<compile_context>
chip_gen: v7x
topology: tpu7x:2x2x1
jax: 0.10.0
libtpu: 0.0.40
codegen_flags: <defaults>
</compile_context>

<pallas_src>
import functools

import jax
import jax.numpy as jnp
from jax.experimental import pallas as pl
from jax.experimental.pallas import tpu as pltpu

VMEM_LIMIT = 40 * 1024 * 1024  # explicit scoped-VMEM budget (fits v5e/v6e/v7x)


def _round_up(x, m):
    return -(-x // m) * m


# ----------------------------------------------------------------------------
# Pallas kernels
# ----------------------------------------------------------------------------

def _conv_mm_kernel(w_ref, b_ref, a_ref, o_ref):
    """out = W @ A + bias  (bf16 operands, f32 accumulate, bias fused)."""
    y = jnp.dot(w_ref[...], a_ref[...], preferred_element_type=jnp.float32)
    o_ref[...] = (y + b_ref[...]).astype(o_ref.dtype)


def _conv_mm_tanh_mul_kernel(w_ref, b_ref, a_ref, m_ref, o_ref):
    """out = m * tanh(W @ A + bias)  (fused epilogue for weight_111)."""
    y = jnp.dot(w_ref[...], a_ref[...], preferred_element_type=jnp.float32)
    y = jnp.tanh(y + b_ref[...])
    o_ref[...] = (m_ref[...].astype(jnp.float32) * y).astype(o_ref.dtype)


def _ln_gate_kernel(*refs, n_in, act):
    """LayerNorm over the last axis of sum(inputs), with fused activation."""
    out_ref = refs[n_in]
    x = refs[0][...].astype(jnp.float32)
    for k in range(1, n_in):
        x = x + refs[k][...].astype(jnp.float32)
    mean = jnp.mean(x, axis=-1, keepdims=True)
    xc = x - mean
    var = jnp.mean(xc * xc, axis=-1, keepdims=True)
    y = xc * jax.lax.rsqrt(var + 1e-5)
    if act == "sigmoid":
        y = jax.nn.sigmoid(y)
    elif act == "tanh":
        y = jnp.tanh(y)
    out_ref[...] = y.astype(out_ref.dtype)


def _c_update_kernel(cl_ref, rc_ref, i_ref, g_ref, o_ref, *, inv_n):
    """c = i*g + LayerNorm_{(C,T,H,W)}(c_hist[-1] + recall), all fused."""
    x = cl_ref[...] + rc_ref[...]
    mean = jnp.sum(jnp.sum(x, axis=-1, keepdims=True), axis=0, keepdims=True) * inv_n
    xc = x - mean
    var = jnp.sum(jnp.sum(xc * xc, axis=-1, keepdims=True), axis=0,
                  keepdims=True) * inv_n
    y = xc * jax.lax.rsqrt(var + 1e-5)
    o_ref[...] = i_ref[...] * g_ref[...] + y


# ----------------------------------------------------------------------------
# Conv3d / ConvDeconv3d built on the Pallas matmul
# ----------------------------------------------------------------------------

def conv3d_cm(x, w, b=None, *, fuse_tanh_mul=None, out_dtype=jnp.bfloat16):
    """nn.Conv3d, stride 1, no padding, channel-major layout.

    x: (B, Cin, T, H, W); w: (Cout, Cin, kt, kh, kw); b: (Cout,) or None.
    Returns (B, Cout, To, Ho, Wo).  If fuse_tanh_mul (shape (B, Cout, To*Ho*Wo))
    is given, returns fuse_tanh_mul * tanh(conv + bias) instead.
    """
    B, Cin, T, H, W = x.shape
    Cout, Cin2, kt, kh, kw = w.shape
    assert Cin == Cin2
    To, Ho, Wo = T - kt + 1, H - kh + 1, W - kw + 1
    M = To * Ho * Wo
    K = Cin * kt * kh * kw
    Kp = _round_up(K, 128)

    xb = x.astype(jnp.bfloat16)
    if (kt, kh, kw) == (1, 1, 1):
        a = xb.reshape(B, K, M)
    else:
        # TODO(synk): im2col still materialized by XLA (single fused bf16 pass);
        # an in-kernel strided patch gather is not robustly expressible today.
        slabs = [xb[:, :, a0:a0 + To, b0:b0 + Ho, c0:c0 + Wo]
                 for a0 in range(kt) for b0 in range(kh) for c0 in range(kw)]
        a = jnp.stack(slabs, axis=2).reshape(B, K, M)
    wmat = w.reshape(Cout, K).astype(jnp.bfloat16)
    if Kp != K:  # keep the MXU contraction lane-aligned; padding is real zeros
        a = jnp.pad(a, ((0, 0), (0, Kp - K), (0, 0)))
        wmat = jnp.pad(wmat, ((0, 0), (0, Kp - K)))
    bias = jnp.zeros((Cout,), jnp.float32) if b is None else b.astype(jnp.float32)
    bias = bias.reshape(Cout, 1)

    if M % 128 == 0 and M > 512:
        mt = max(t for t in (512, 384, 256, 128) if M % t == 0)
    else:
        mt = M
    grid = (B, M // mt)

    in_specs = [
        pl.BlockSpec((Cout, Kp), lambda bi, mi: (0, 0)),   # resident weights
        pl.BlockSpec((Cout, 1), lambda bi, mi: (0, 0)),    # resident bias
        pl.BlockSpec((None, Kp, mt), lambda bi, mi: (bi, 0, mi)),
    ]
    args = [wmat, bias, a]
    if fuse_tanh_mul is not None:
        in_specs.append(pl.BlockSpec((None, Cout, mt), lambda bi, mi: (bi, 0, mi)))
        args.append(fuse_tanh_mul)
        kernel = _conv_mm_tanh_mul_kernel
    else:
        kernel = _conv_mm_kernel

    out = pl.pallas_call(
        kernel,
        out_shape=jax.ShapeDtypeStruct((B, Cout, M), out_dtype),
        grid_spec=pltpu.PrefetchScalarGridSpec(
            num_scalar_prefetch=0,
            grid=grid,
            in_specs=in_specs,
            out_specs=pl.BlockSpec((None, Cout, mt), lambda bi, mi: (bi, 0, mi))),
        compiler_params=pltpu.CompilerParams(
            dimension_semantics=("parallel", "parallel"),
            vmem_limit_bytes=VMEM_LIMIT),
    )(*args)
    return out.reshape(B, Cout, To, Ho, Wo)


def nearest_resize_cm(y, size):
    """F.interpolate(mode='nearest') over the last 3 dims: src = floor(dst*in/out)."""
    To, Ho, Wo = y.shape[-3:]
    T, H, W = size
    ti = (jnp.arange(T) * To) // T
    hi = (jnp.arange(H) * Ho) // H
    wi = (jnp.arange(W) * Wo) // W
    return y[:, :, ti[:, None, None], hi[None, :, None], wi[None, None, :]]


def conv_deconv_cm(x, w, b=None):
    """ConvDeconv3d: valid Conv3d then nearest upsample back to input (T,H,W)."""
    return nearest_resize_cm(conv3d_cm(x, w, b), x.shape[-3:])


# ----------------------------------------------------------------------------
# Fused LayerNorm wrappers
# ----------------------------------------------------------------------------

def _chan_block_map(block_off):
    return lambda bi: (bi, block_off, 0)


def pallas_ln_gate(inputs, offsets, hidden, act):
    """LN over (T,H,W) per (b, channel) of sum_k inputs[k][:, off_k:off_k+hidden]
    with fused activation.  inputs[k]: (B, C_k, S).  No XLA slices/adds needed:
    the channel offset is applied by the BlockSpec index_map."""
    B, _, S = inputs[0].shape
    assert hidden % 8 == 0
    in_specs = [pl.BlockSpec((None, hidden, S), _chan_block_map(off // hidden))
                for off in offsets]
    return pl.pallas_call(
        functools.partial(_ln_gate_kernel, n_in=len(inputs), act=act),
        out_shape=jax.ShapeDtypeStruct((B, hidden, S), jnp.float32),
        grid_spec=pltpu.PrefetchScalarGridSpec(
            num_scalar_prefetch=0,
            grid=(B,),
            in_specs=in_specs,
            out_specs=pl.BlockSpec((None, hidden, S), lambda bi: (bi, 0, 0))),
        compiler_params=pltpu.CompilerParams(
            dimension_semantics=("parallel",),
            vmem_limit_bytes=VMEM_LIMIT),
    )(*inputs)


def pallas_c_update(c_last, recall, i, g):
    """c = i*g + LayerNorm_{(C,T,H,W)}(c_last + recall) in one fused kernel."""
    B, hid, S = c_last.shape
    spec = pl.BlockSpec((None, hid, S), lambda bi: (bi, 0, 0))
    return pl.pallas_call(
        functools.partial(_c_update_kernel, inv_n=1.0 / float(hid * S)),
        out_shape=jax.ShapeDtypeStruct((B, hid, S), jnp.float32),
        grid_spec=pltpu.PrefetchScalarGridSpec(
            num_scalar_prefetch=0,
            grid=(B,),
            in_specs=[spec, spec, spec, spec],
            out_specs=spec),
        compiler_params=pltpu.CompilerParams(
            dimension_semantics=("parallel",),
            vmem_limit_bytes=VMEM_LIMIT),
    )(c_last, recall, i, g)


# ----------------------------------------------------------------------------
# E3D-LSTM cell / stack / trainer forward (faithful to the PyTorch reference)
# ----------------------------------------------------------------------------

def e3dlstm_cell_forward(p, x5, c_history, m, h, spatial):
    T, H, W = spatial
    B, hid, S = m.shape
    h5 = h.reshape(B, hid, T, H, W)
    m5 = m.reshape(B, hid, T, H, W)

    # batched equivalents of the 7 x-convs, 4 h-convs, 3 m-convs
    cx = conv_deconv_cm(x5, p["wx"], p["bx"]).reshape(B, 7 * hid, S)
    ch = conv_deconv_cm(h5, p["wh"]).reshape(B, 4 * hid, S)
    cm = conv_deconv_cm(m5, p["wm"]).reshape(B, 3 * hid, S)

    r = pallas_ln_gate([cx, ch], [0, 0], hid, "sigmoid")
    i = pallas_ln_gate([cx, ch], [hid, hid], hid, "sigmoid")
    g = pallas_ln_gate([cx, ch], [2 * hid, 2 * hid], hid, "tanh")

    # self_attention_fast — faithful to reference, including softmax over dim=0.
    scale = 1.0 / float(S) ** 0.5
    scores = jnp.einsum("bcs,lbcs->bl", r, c_history) * scale
    attention = jax.nn.softmax(scores, axis=0)
    recall = jnp.einsum("bl,lbcs->bcs", attention, c_history)

    c = pallas_c_update(c_history[-1], recall, i, g)

    ip = pallas_ln_gate([cx, cm], [3 * hid, 0], hid, "sigmoid")
    gp = pallas_ln_gate([cx, cm], [4 * hid, hid], hid, "tanh")
    fp = pallas_ln_gate([cx, cm], [5 * hid, 2 * hid], hid, "sigmoid")
    m_new = ip * gp + fp * m

    cco = conv_deconv_cm(c.reshape(B, hid, T, H, W), p["wco"]).reshape(B, hid, S)
    cmo = conv_deconv_cm(m_new.reshape(B, hid, T, H, W), p["wmo"]).reshape(B, hid, S)
    o = pallas_ln_gate([cx, ch, cco, cmo], [6 * hid, 3 * hid, 0, 0], hid, "sigmoid")

    cm_cat = jnp.concatenate([c, m_new], axis=1).reshape(B, 2 * hid, T, H, W)
    h_new = conv3d_cm(cm_cat, p["w111"], p["b111"],
                      fuse_tanh_mul=o, out_dtype=jnp.float32).reshape(B, hid, S)

    c_history_new = jnp.concatenate([c_history[1:], c[None]], axis=0)
    return c_history_new, m_new, h_new


def e3dlstm_forward(params, input_seq, hidden, tau):
    steps, B, Cin, T, H, W = input_seq.shape
    S = T * H * W
    cells = params["cells"]
    c_hist = [None] * len(cells)
    h_states = [None] * len(cells)
    m = None
    outputs = []
    for step in range(steps):
        x5 = input_seq[step]
        for li, p in enumerate(cells):
            if step == 0:
                # Faithful to the reference: init_hidden() runs per layer at step 0,
                # so every layer starts from a zero `m` at the first step.
                c_hist[li] = jnp.zeros((tau, B, hidden, S), jnp.float32)
                m = jnp.zeros((B, hidden, S), jnp.float32)
                h_states[li] = jnp.zeros((B, hidden, S), jnp.float32)
            c_hist[li], m, h_states[li] = e3dlstm_cell_forward(
                p, x5, c_hist[li], m, h_states[li], (T, H, W))
            x5 = h_states[li].reshape(B, hidden, T, H, W)
        outputs.append(h_states[-1])
    return jnp.concatenate(outputs, axis=1)       # (B, hidden*steps, T*H*W)


def taxibj_forward(params, input_seq, hidden, tau):
    steps, B, Cin, T, H, W = input_seq.shape
    enc = e3dlstm_forward(params, input_seq, hidden, tau)
    enc5 = enc.reshape(B, hidden * steps, T, H, W)
    encp = jnp.pad(enc5, ((0, 0), (0, 0), (0, 0), (2, 2), (2, 2)))
    # decoder: nn.Conv3d(hidden*time_steps, 2, (2,5,5), padding=(0,2,2))
    return conv3d_cm(encp, params["dec_w"], params["dec_b"], out_dtype=jnp.float32)


# ----------------------------------------------------------------------------
# Deterministic parameter init (weights ~ N(0, 0.02), biases = 0, like
# weights_init('gaussian'); LayerNorm affine is identity so it is omitted).
# ----------------------------------------------------------------------------

def init_params(key, in_channels, hidden, num_layers, time_steps, out_channels,
                kernel=(2, 5, 5)):
    kt, kh, kw = kernel
    params = {"cells": []}
    cin = in_channels
    for _ in range(num_layers):
        key, *ks = jax.random.split(key, 8)
        cell = {
            # [xr, xi, xg, xi', xg', xf', xo] concatenated along Cout (with bias)
            "wx":   0.02 * jax.random.normal(ks[0], (7 * hidden, cin, kt, kh, kw), jnp.float32),
            "bx":   jnp.zeros((7 * hidden,), jnp.float32),
            # [hr, hi, hg, ho] (bias=False)
            "wh":   0.02 * jax.random.normal(ks[1], (4 * hidden, hidden, kt, kh, kw), jnp.float32),
            # [mi', mg', mf'] (bias=False)
            "wm":   0.02 * jax.random.normal(ks[2], (3 * hidden, hidden, kt, kh, kw), jnp.float32),
            "wco":  0.02 * jax.random.normal(ks[3], (hidden, hidden, kt, kh, kw), jnp.float32),
            "wmo":  0.02 * jax.random.normal(ks[4], (hidden, hidden, kt, kh, kw), jnp.float32),
            "w111": 0.02 * jax.random.normal(ks[5], (hidden, 2 * hidden, 1, 1, 1), jnp.float32),
            "b111": jnp.zeros((hidden,), jnp.float32),
        }
        params["cells"].append(cell)
        cin = hidden
    key, kd = jax.random.split(key)
    params["dec_w"] = 0.02 * jax.random.normal(
        kd, (out_channels, hidden * time_steps, kt, kh, kw), jnp.float32)
    params["dec_b"] = jnp.zeros((out_channels,), jnp.float32)
    return params


# ----------------------------------------------------------------------------
# Main
# ----------------------------------------------------------------------------

if __name__ == "__main__":
    # Small config consistent with TaxiBJTrainer (original: batch=32, H=W=32,
    # hidden=64, 4 LSTM layers; scaled down here for a quick run).
    B = 2
    in_channels = 2
    temporal_frames = 2          # T
    H = W = 16
    hidden = 16
    num_layers = 2
    tau = 2
    input_time_window = 4
    time_steps = (input_time_window - temporal_frames + 1) // 1   # = 3

    key = jax.random.PRNGKey(0)
    kp, kx = jax.random.split(key)
    params = init_params(kp, in_channels, hidden, num_layers, time_steps,
                         out_channels=2)

    # input_seq layout (matches torch.stack(frames_seq, dim=0)):
    # (time_steps, batch, channels=2, temporal_frames, H, W)
    input_seq = jax.random.uniform(
        kx, (time_steps, B, in_channels, temporal_frames, H, W),
        dtype=jnp.float32)

    fwd = jax.jit(functools.partial(taxibj_forward, hidden=hidden, tau=tau))
    out = fwd(params, input_seq)
    out = jax.block_until_ready(out)
    assert out.shape == (B, 2, 1, H, W), out.shape
    assert bool(jnp.all(jnp.isfinite(out)))
    print("KERNEL_OK")
</pallas_src>

<mosaic_0001>
module attributes {stable_mosaic.version = 11 : i64} {
  func.func @_conv_mm_kernel(%arg0: i32, %arg1: i32, %arg2: memref<112x128xbf16, #tpu.memory_space<vmem>>, %arg3: memref<112x1xf32, #tpu.memory_space<vmem>>, %arg4: memref<1x128x144xbf16, #tpu.memory_space<vmem>>, %arg5: memref<1x112x144xbf16, #tpu.memory_space<vmem>>) attributes {dimension_semantics = [#tpu.dimension_semantics<parallel>, #tpu.dimension_semantics<parallel>], iteration_bounds = array<i64: 2, 1>, scalar_prefetch = 0 : i64, scratch_operands = 0 : i64, tpu.core_type = #tpu.core_type<tc>, window_params = [{pipeline_mode = #tpu.pipeline_mode<synchronous>, transform_indices = @transform_0, window_bounds = array<i64: 112, 128>}, {pipeline_mode = #tpu.pipeline_mode<synchronous>, transform_indices = @transform_1, window_bounds = array<i64: 112, 1>}, {transform_indices = @transform_2, window_bounds = array<i64: 1, 128, 144>}, {transform_indices = @transform_3, window_bounds = array<i64: 1, 112, 144>}]} {
    %c0 = arith.constant 0 : index
    %c0_0 = arith.constant 0 : index
    %0 = vector.load %arg2[%c0, %c0_0] : memref<112x128xbf16, #tpu.memory_space<vmem>>, vector<112x128xbf16>
    %c0_1 = arith.constant 0 : index
    %c0_2 = arith.constant 0 : index
    %c0_3 = arith.constant 0 : index
    %1 = vector.load %arg4[%c0_1, %c0_2, %c0_3] : memref<1x128x144xbf16, #tpu.memory_space<vmem>>, vector<1x128x144xbf16>
    %2 = vector.shape_cast %1 : vector<1x128x144xbf16> to vector<128x144xbf16>
    %cst = arith.constant dense<0.000000e+00> : vector<112x144xf32>
    %3 = tpu.matmul %0, %2, %cst {dimension_numbers = #tpu.dot_dimension_numbers<[1], [0], [0], [1], [0, 0, 1, 1], [], []>} : vector<112x128xbf16>, vector<128x144xbf16>, vector<112x144xf32> -> vector<112x144xf32>
    %c0_4 = arith.constant 0 : index
    %c0_5 = arith.constant 0 : index
    %4 = vector.load %arg3[%c0_4, %c0_5] : memref<112x1xf32, #tpu.memory_space<vmem>>, vector<112x1xf32>
    %5 = vector.broadcast %4 : vector<112x1xf32> to vector<112x144xf32>
    %6 = arith.addf %3, %5 : vector<112x144xf32>
    %7 = arith.truncf %6 : vector<112x144xf32> to vector<112x144xbf16>
    %c0_6 = arith.constant 0 : index
    %c0_7 = arith.constant 0 : index
    %c0_8 = arith.constant 0 : index
    %8 = vector.load %arg5[%c0_6, %c0_7, %c0_8] : memref<1x112x144xbf16, #tpu.memory_space<vmem>>, vector<1x112x144xbf16>
    %9 = vector.shape_cast %8 : vector<1x112x144xbf16> to vector<112x144xbf16>
    %10 = vector.shape_cast %7 : vector<112x144xbf16> to vector<1x112x144xbf16>
    tpu.vector_store %arg5[%c0_6, %c0_7, %c0_8], %10 {strides = array<i32>} : memref<1x112x144xbf16, #tpu.memory_space<vmem>>, vector<1x112x144xbf16>,
    return
  }
  func.func @transform_0(%arg0: i32, %arg1: i32) -> (i32, i32) {
    %c0_i32 = arith.constant 0 : i32
    %c0_i32_0 = arith.constant 0 : i32
    %c0_i32_1 = arith.constant 0 : i32
    return %c0_i32, %c0_i32_0 : i32, i32
  }
  func.func @transform_1(%arg0: i32, %arg1: i32) -> (i32, i32) {
    %c0_i32 = arith.constant 0 : i32
    %c0_i32_0 = arith.constant 0 : i32
    %c0_i32_1 = arith.constant 0 : i32
    return %c0_i32, %c0_i32_0 : i32, i32
  }
  func.func @transform_2(%arg0: i32, %arg1: i32) -> (i32, i32, i32) {
    %c0_i32 = arith.constant 0 : i32
    %c0_i32_0 = arith.constant 0 : i32
    return %arg0, %c0_i32, %arg1 : i32, i32, i32
  }
  func.func @transform_3(%arg0: i32, %arg1: i32) -> (i32, i32, i32) {
    %c0_i32 = arith.constant 0 : i32
    %c0_i32_0 = arith.constant 0 : i32
    return %arg0, %c0_i32, %arg1 : i32, i32, i32
  }
}

module attributes {stable_mosaic.version = 11 : i64} {
  func.func @_conv_mm_kernel(%arg0: i32, %arg1: i32, %arg2: memref<48x896xbf16, #tpu.memory_space<vmem>>, %arg3: memref<48x1xf32, #tpu.memory_space<vmem>>, %arg4: memref<1x896x144xbf16, #tpu.memory_space<vmem>>, %arg5: memref<1x48x144xbf16, #tpu.memory_space<vmem>>) attributes {dimension_semantics = [#tpu.dimension_semantics<parallel>, #tpu.dimension_semantics<parallel>], iteration_bounds = array<i64: 2, 1>, scalar_prefetch = 0 : i64, scratch_operands = 0 : i64, tpu.core_type = #tpu.core_type<tc>, window_params = [{pipeline_mode = #tpu.pipeline_mode<synchronous>, transform_indices = @transform_0, window_bounds = array<i64: 48, 896>}, {pipeline_mode = #tpu.pipeline_mode<synchronous>, transform_indices = @transform_1, window_bounds = array<i64: 48, 1>}, {transform_indices = @transform_2, window_bounds = array<i64: 1, 896, 144>}, {transform_indices = @transform_3, window_bounds = array<i64: 1, 48, 144>}]} {
    %c0 = arith.constant 0 : index
    %c0_0 = arith.constant 0 : index
    %0 = vector.load %arg2[%c0, %c0_0] : memref<48x896xbf16, #tpu.memory_space<vmem>>, vector<48x896xbf16>
    %c0_1 = arith.constant 0 : index
    %c0_2 = arith.constant 0 : index
    %c0_3 = arith.constant 0 : index
    %1 = vector.load %arg4[%c0_1, %c0_2, %c0_3] : memref<1x896x144xbf16, #tpu.memory_space<vmem>>, vector<1x896x144xbf16>
    %2 = vector.shape_cast %1 : vector<1x896x144xbf16> to vector<896x144xbf16>
    %cst = arith.constant dense<0.000000e+00> : vector<48x144xf32>
    %3 = tpu.matmul %0, %2, %cst {dimension_numbers = #tpu.dot_dimension_numbers<[1], [0], [0], [1], [0, 0, 1, 1], [], []>} : vector<48x896xbf16>, vector<896x144xbf16>, vector<48x144xf32> -> vector<48x144xf32>
    %c0_4 = arith.constant 0 : index
    %c0_5 = arith.constant 0 : index
    %4 = vector.load %arg3[%c0_4, %c0_5] : memref<48x1xf32, #tpu.memory_space<vmem>>, vector<48x1xf32>
    %5 = vector.broadcast %4 : vector<48x1xf32> to vector<48x144xf32>
    %6 = arith.addf %3, %5 : vector<48x144xf32>
    %7 = arith.truncf %6 : vector<48x144xf32> to vector<48x144xbf16>
    %c0_6 = arith.constant 0 : index
    %c0_7 = arith.constant 0 : index
    %c0_8 = arith.constant 0 : index
    %8 = vector.load %arg5[%c0_6, %c0_7, %c0_8] : memref<1x48x144xbf16, #tpu.memory_space<vmem>>, vector<1x48x144xbf16>
    %9 = vector.shape_cast %8 : vector<1x48x144xbf16> to vector<48x144xbf16>
    %10 = vector.shape_cast %7 : vector<48x144xbf16> to vector<1x48x144xbf16>
    tpu.vector_store %arg5[%c0_6, %c0_7, %c0_8], %10 {strides = array<i32>} : memref<1x48x144xbf16, #tpu.memory_space<vmem>>, vector<1x48x144xbf16>,
    return
  }
  func.func @transform_0(%arg0: i32, %arg1: i32) -> (i32, i32) {
    %c0_i32 = arith.constant 0 : i32
    %c0_i32_0 = arith.constant 0 : i32
    %c0_i32_1 = arith.constant 0 : i32
    return %c0_i32, %c0_i32_0 : i32, i32
  }
  func.func @transform_1(%arg0: i32, %arg1: i32) -> (i32, i32) {
    %c0_i32 = arith.constant 0 : i32
    %c0_i32_0 = arith.constant 0 : i32
    %c0_i32_1 = arith.constant 0 : i32
    return %c0_i32, %c0_i32_0 : i32, i32
  }
  func.func @transform_2(%arg0: i32, %arg1: i32) -> (i32, i32, i32) {
    %c0_i32 = arith.constant 0 : i32
    %c0_i32_0 = arith.constant 0 : i32
    return %arg0, %c0_i32, %arg1 : i32, i32, i32
  }
  func.func @transform_3(%arg0: i32, %arg1: i32) -> (i32, i32, i32) {
    %c0_i32 = arith.constant 0 : i32
    %c0_i32_0 = arith.constant 0 : i32
    return %arg0, %c0_i32, %arg1 : i32, i32, i32
  }
}

module attributes {stable_mosaic.version = 11 : i64} {
  func.func @_ln_gate_kernel(%arg0: i32, %arg1: memref<1x16x512xbf16, #tpu.memory_space<vmem>>, %arg2: memref<1x16x512xbf16, #tpu.memory_space<vmem>>, %arg3: memref<1x16x512xf32, #tpu.memory_space<vmem>>) attributes {dimension_semantics = [#tpu.dimension_semantics<parallel>], iteration_bounds = array<i64: 2>, scalar_prefetch = 0 : i64, scratch_operands = 0 : i64, tpu.core_type = #tpu.core_type<tc>, window_params = [{transform_indices = @transform_0, window_bounds = array<i64: 1, 16, 512>}, {transform_indices = @transform_1, window_bounds = array<i64: 1, 16, 512>}, {transform_indices = @transform_2, window_bounds = array<i64: 1, 16, 512>}]} {
    %c0 = arith.constant 0 : index
    %c0_0 = arith.constant 0 : index
    %c0_1 = arith.constant 0 : index
    %0 = vector.load %arg1[%c0, %c0_0, %c0_1] : memref<1x16x512xbf16, #tpu.memory_space<vmem>>, vector<1x16x512xbf16>
    %1 = vector.shape_cast %0 : vector<1x16x512xbf16> to vector<16x512xbf16>
    %2 = arith.extf %1 : vector<16x512xbf16> to vector<16x512xf32>
    %c0_2 = arith.constant 0 : index
    %c0_3 = arith.constant 0 : index
    %c0_4 = arith.constant 0 : index
    %3 = vector.load %arg2[%c0_2, %c0_3, %c0_4] : memref<1x16x512xbf16, #tpu.memory_space<vmem>>, vector<1x16x512xbf16>
    %4 = vector.shape_cast %3 : vector<1x16x512xbf16> to vector<16x512xbf16>
    %5 = arith.extf %4 : vector<16x512xbf16> to vector<16x512xf32>
    %6 = arith.addf %2, %5 : vector<16x512xf32>
    %cst = arith.constant dense<0.000000e+00> : vector<16xf32>
    %7 = vector.multi_reduction <add>, %6, %cst [1] : vector<16x512xf32> to vector<16xf32>
    %8 = vector.shape_cast %7 : vector<16xf32> to vector<16x1xf32>
    %cst_5 = arith.constant 5.120000e+02 : f32
    %9 = vector.broadcast %cst_5 : f32 to vector<16x1xf32>
    %10 = arith.divf %8, %9 : vector<16x1xf32>
    %11 = vector.broadcast %10 : vector<16x1xf32> to vector<16x512xf32>
    %12 = arith.subf %6, %11 : vector<16x512xf32>
    %13 = arith.mulf %12, %12 : vector<16x512xf32>
    %cst_6 = arith.constant dense<0.000000e+00> : vector<16xf32>
    %14 = vector.multi_reduction <add>, %13, %cst_6 [1] : vector<16x512xf32> to vector<16xf32>
    %15 = vector.shape_cast %14 : vector<16xf32> to vector<16x1xf32>
    %cst_7 = arith.constant 5.120000e+02 : f32
    %16 = vector.broadcast %cst_7 : f32 to vector<16x1xf32>
    %17 = arith.divf %15, %16 : vector<16x1xf32>
    %cst_8 = arith.constant 9.99999974E-6 : f32
    %18 = vector.broadcast %cst_8 : f32 to vector<16x1xf32>
    %19 = arith.addf %17, %18 : vector<16x1xf32>
    %20 = math.rsqrt %19 : vector<16x1xf32>
    %21 = vector.broadcast %20 : vector<16x1xf32> to vector<16x512xf32>
    %22 = arith.mulf %12, %21 : vector<16x512xf32>
    %23 = arith.negf %22 : vector<16x512xf32>
    %24 = math.exp %23 : vector<16x512xf32>
    %cst_9 = arith.constant 1.000000e+00 : f32
    %25 = vector.broadcast %cst_9 : f32 to vector<16x512xf32>
    %26 = arith.addf %25, %24 : vector<16x512xf32>
    %27 = arith.divf %25, %26 : vector<16x512xf32>
    %c0_10 = arith.constant 0 : index
    %c0_11 = arith.constant 0 : index
    %c0_12 = arith.constant 0 : index
    %28 = vector.load %arg3[%c0_10, %c0_11, %c0_12] : memref<1x16x512xf32, #tpu.memory_space<vmem>>, vector<1x16x512xf32>
    %29 = vector.shape_cast %28 : vector<1x16x512xf32> to vector<16x512xf32>
    %30 = vector.shape_cast %27 : vector<16x512xf32> to vector<1x16x512xf32>
    tpu.vector_store %arg3[%c0_10, %c0_11, %c0_12], %30 {strides = array<i32>} : memref<1x16x512xf32, #tpu.memory_space<vmem>>, vector<1x16x512xf32>,
    return
  }
  func.func @transform_0(%arg0: i32) -> (i32, i32, i32) {
    %c5_i32 = arith.constant 5 : i32
    %c0_i32 = arith.constant 0 : i32
    %c0_i32_0 = arith.constant 0 : i32
    return %arg0, %c5_i32, %c0_i32 : i32, i32, i32
  }
  func.func @transform_1(%arg0: i32) -> (i32, i32, i32) {
    %c2_i32 = arith.constant 2 : i32
    %c0_i32 = arith.constant 0 : i32
    %c0_i32_0 = arith.constant 0 : i32
    return %arg0, %c2_i32, %c0_i32 : i32, i32, i32
  }
  func.func @transform_2(%arg0: i32) -> (i32, i32, i32) {
    %c0_i32 = arith.constant 0 : i32
    %c0_i32_0 = arith.constant 0 : i32
    %c0_i32_1 = arith.constant 0 : i32
    return %arg0, %c0_i32, %c0_i32_0 : i32, i32, i32
  }
}

module attributes {stable_mosaic.version = 11 : i64} {
  func.func @_ln_gate_kernel(%arg0: i32, %arg1: memref<1x16x512xbf16, #tpu.memory_space<vmem>>, %arg2: memref<1x16x512xbf16, #tpu.memory_space<vmem>>, %arg3: memref<1x16x512xf32, #tpu.memory_space<vmem>>) attributes {dimension_semantics = [#tpu.dimension_semantics<parallel>], iteration_bounds = array<i64: 2>, scalar_prefetch = 0 : i64, scratch_operands = 0 : i64, tpu.core_type = #tpu.core_type<tc>, window_params = [{transform_indices = @transform_0, window_bounds = array<i64: 1, 16, 512>}, {transform_indices = @transform_1, window_bounds = array<i64: 1, 16, 512>}, {transform_indices = @transform_2, window_bounds = array<i64: 1, 16, 512>}]} {
    %c0 = arith.constant 0 : index
    %c0_0 = arith.constant 0 : index
    %c0_1 = arith.constant 0 : index
    %0 = vector.load %arg1[%c0, %c0_0, %c0_1] : memref<1x16x512xbf16, #tpu.memory_space<vmem>>, vector<1x16x512xbf16>
    %1 = vector.shape_cast %0 : vector<1x16x512xbf16> to vector<16x512xbf16>
    %2 = arith.extf %1 : vector<16x512xbf16> to vector<16x512xf32>
    %c0_2 = arith.constant 0 : index
    %c0_3 = arith.constant 0 : index
    %c0_4 = arith.constant 0 : index
    %3 = vector.load %arg2[%c0_2, %c0_3, %c0_4] : memref<1x16x512xbf16, #tpu.memory_space<vmem>>, vector<1x16x512xbf16>
    %4 = vector.shape_cast %3 : vector<1x16x512xbf16> to vector<16x512xbf16>
    %5 = arith.extf %4 : vector<16x512xbf16> to vector<16x512xf32>
    %6 = arith.addf %2, %5 : vector<16x512xf32>
    %cst = arith.constant dense<0.000000e+00> : vector<16xf32>
    %7 = vector.multi_reduction <add>, %6, %cst [1] : vector<16x512xf32> to vector<16xf32>
    %8 = vector.shape_cast %7 : vector<16xf32> to vector<16x1xf32>
    %cst_5 = arith.constant 5.120000e+02 : f32
    %9 = vector.broadcast %cst_5 : f32 to vector<16x1xf32>
    %10 = arith.divf %8, %9 : vector<16x1xf32>
    %11 = vector.broadcast %10 : vector<16x1xf32> to vector<16x512xf32>
    %12 = arith.subf %6, %11 : vector<16x512xf32>
    %13 = arith.mulf %12, %12 : vector<16x512xf32>
    %cst_6 = arith.constant dense<0.000000e+00> : vector<16xf32>
    %14 = vector.multi_reduction <add>, %13, %cst_6 [1] : vector<16x512xf32> to vector<16xf32>
    %15 = vector.shape_cast %14 : vector<16xf32> to vector<16x1xf32>
    %cst_7 = arith.constant 5.120000e+02 : f32
    %16 = vector.broadcast %cst_7 : f32 to vector<16x1xf32>
    %17 = arith.divf %15, %16 : vector<16x1xf32>
    %cst_8 = arith.constant 9.99999974E-6 : f32
    %18 = vector.broadcast %cst_8 : f32 to vector<16x1xf32>
    %19 = arith.addf %17, %18 : vector<16x1xf32>
    %20 = math.rsqrt %19 : vector<16x1xf32>
    %21 = vector.broadcast %20 : vector<16x1xf32> to vector<16x512xf32>
    %22 = arith.mulf %12, %21 : vector<16x512xf32>
    %23 = arith.negf %22 : vector<16x512xf32>
    %24 = math.exp %23 : vector<16x512xf32>
    %cst_9 = arith.constant 1.000000e+00 : f32
    %25 = vector.broadcast %cst_9 : f32 to vector<16x512xf32>
    %26 = arith.addf %25, %24 : vector<16x512xf32>
    %27 = arith.divf %25, %26 : vector<16x512xf32>
    %c0_10 = arith.constant 0 : index
    %c0_11 = arith.constant 0 : index
    %c0_12 = arith.constant 0 : index
    %28 = vector.load %arg3[%c0_10, %c0_11, %c0_12] : memref<1x16x512xf32, #tpu.memory_space<vmem>>, vector<1x16x512xf32>
    %29 = vector.shape_cast %28 : vector<1x16x512xf32> to vector<16x512xf32>
    %30 = vector.shape_cast %27 : vector<16x512xf32> to vector<1x16x512xf32>
    tpu.vector_store %arg3[%c0_10, %c0_11, %c0_12], %30 {strides = array<i32>} : memref<1x16x512xf32, #tpu.memory_space<vmem>>, vector<1x16x512xf32>,
    return
  }
  func.func @transform_0(%arg0: i32) -> (i32, i32, i32) {
    %c3_i32 = arith.constant 3 : i32
    %c0_i32 = arith.constant 0 : i32
    %c0_i32_0 = arith.constant 0 : i32
    return %arg0, %c3_i32, %c0_i32 : i32, i32, i32
  }
  func.func @transform_1(%arg0: i32) -> (i32, i32, i32) {
    %c0_i32 = arith.constant 0 : i32
    %c0_i32_0 = arith.constant 0 : i32
    %c0_i32_1 = arith.constant 0 : i32
    return %arg0, %c0_i32, %c0_i32_0 : i32, i32, i32
  }
  func.func @transform_2(%arg0: i32) -> (i32, i32, i32) {
    %c0_i32 = arith.constant 0 : i32
    %c0_i32_0 = arith.constant 0 : i32
    %c0_i32_1 = arith.constant 0 : i32
    return %arg0, %c0_i32, %c0_i32_0 : i32, i32, i32
  }
}

module attributes {stable_mosaic.version = 11 : i64} {
  func.func @_ln_gate_kernel(%arg0: i32, %arg1: memref<1x16x512xbf16, #tpu.memory_space<vmem>>, %arg2: memref<1x16x512xbf16, #tpu.memory_space<vmem>>, %arg3: memref<1x16x512xf32, #tpu.memory_space<vmem>>) attributes {dimension_semantics = [#tpu.dimension_semantics<parallel>], iteration_bounds = array<i64: 2>, scalar_prefetch = 0 : i64, scratch_operands = 0 : i64, tpu.core_type = #tpu.core_type<tc>, window_params = [{transform_indices = @transform_0, window_bounds = array<i64: 1, 16, 512>}, {transform_indices = @transform_1, window_bounds = array<i64: 1, 16, 512>}, {transform_indices = @transform_2, window_bounds = array<i64: 1, 16, 512>}]} {
    %c0 = arith.constant 0 : index
    %c0_0 = arith.constant 0 : index
    %c0_1 = arith.constant 0 : index
    %0 = vector.load %arg1[%c0, %c0_0, %c0_1] : memref<1x16x512xbf16, #tpu.memory_space<vmem>>, vector<1x16x512xbf16>
    %1 = vector.shape_cast %0 : vector<1x16x512xbf16> to vector<16x512xbf16>
    %2 = arith.extf %1 : vector<16x512xbf16> to vector<16x512xf32>
    %c0_2 = arith.constant 0 : index
    %c0_3 = arith.constant 0 : index
    %c0_4 = arith.constant 0 : index
    %3 = vector.load %arg2[%c0_2, %c0_3, %c0_4] : memref<1x16x512xbf16, #tpu.memory_space<vmem>>, vector<1x16x512xbf16>
    %4 = vector.shape_cast %3 : vector<1x16x512xbf16> to vector<16x512xbf16>
    %5 = arith.extf %4 : vector<16x512xbf16> to vector<16x512xf32>
    %6 = arith.addf %2, %5 : vector<16x512xf32>
    %cst = arith.constant dense<0.000000e+00> : vector<16xf32>
    %7 = vector.multi_reduction <add>, %6, %cst [1] : vector<16x512xf32> to vector<16xf32>
    %8 = vector.shape_cast %7 : vector<16xf32> to vector<16x1xf32>
    %cst_5 = arith.constant 5.120000e+02 : f32
    %9 = vector.broadcast %cst_5 : f32 to vector<16x1xf32>
    %10 = arith.divf %8, %9 : vector<16x1xf32>
    %11 = vector.broadcast %10 : vector<16x1xf32> to vector<16x512xf32>
    %12 = arith.subf %6, %11 : vector<16x512xf32>
    %13 = arith.mulf %12, %12 : vector<16x512xf32>
    %cst_6 = arith.constant dense<0.000000e+00> : vector<16xf32>
    %14 = vector.multi_reduction <add>, %13, %cst_6 [1] : vector<16x512xf32> to vector<16xf32>
    %15 = vector.shape_cast %14 : vector<16xf32> to vector<16x1xf32>
    %cst_7 = arith.constant 5.120000e+02 : f32
    %16 = vector.broadcast %cst_7 : f32 to vector<16x1xf32>
    %17 = arith.divf %15, %16 : vector<16x1xf32>
    %cst_8 = arith.constant 9.99999974E-6 : f32
    %18 = vector.broadcast %cst_8 : f32 to vector<16x1xf32>
    %19 = arith.addf %17, %18 : vector<16x1xf32>
    %20 = math.rsqrt %19 : vector<16x1xf32>
    %21 = vector.broadcast %20 : vector<16x1xf32> to vector<16x512xf32>
    %22 = arith.mulf %12, %21 : vector<16x512xf32>
    %23 = math.tanh %22 : vector<16x512xf32>
    %c0_9 = arith.constant 0 : index
    %c0_10 = arith.constant 0 : index
    %c0_11 = arith.constant 0 : index
    %24 = vector.load %arg3[%c0_9, %c0_10, %c0_11] : memref<1x16x512xf32, #tpu.memory_space<vmem>>, vector<1x16x512xf32>
    %25 = vector.shape_cast %24 : vector<1x16x512xf32> to vector<16x512xf32>
    %26 = vector.shape_cast %23 : vector<16x512xf32> to vector<1x16x512xf32>
    tpu.vector_store %arg3[%c0_9, %c0_10, %c0_11], %26 {strides = array<i32>} : memref<1x16x512xf32, #tpu.memory_space<vmem>>, vector<1x16x512xf32>,
    return
  }
  func.func @transform_0(%arg0: i32) -> (i32, i32, i32) {
    %c4_i32 = arith.constant 4 : i32
    %c0_i32 = arith.constant 0 : i32
    %c0_i32_0 = arith.constant 0 : i32
    return %arg0, %c4_i32, %c0_i32 : i32, i32, i32
  }
  func.func @transform_1(%arg0: i32) -> (i32, i32, i32) {
    %c1_i32 = arith.constant 1 : i32
    %c0_i32 = arith.constant 0 : i32
    %c0_i32_0 = arith.constant 0 : i32
    return %arg0, %c1_i32, %c0_i32 : i32, i32, i32
  }
  func.func @transform_2(%arg0: i32) -> (i32, i32, i32) {
    %c0_i32 = arith.constant 0 : i32
    %c0_i32_0 = arith.constant 0 : i32
    %c0_i32_1 = arith.constant 0 : i32
    return %arg0, %c0_i32, %c0_i32_0 : i32, i32, i32
  }
}

module attributes {stable_mosaic.version = 11 : i64} {
  func.func @_conv_mm_kernel(%arg0: i32, %arg1: i32, %arg2: memref<64x896xbf16, #tpu.memory_space<vmem>>, %arg3: memref<64x1xf32, #tpu.memory_space<vmem>>, %arg4: memref<1x896x144xbf16, #tpu.memory_space<vmem>>, %arg5: memref<1x64x144xbf16, #tpu.memory_space<vmem>>) attributes {dimension_semantics = [#tpu.dimension_semantics<parallel>, #tpu.dimension_semantics<parallel>], iteration_bounds = array<i64: 2, 1>, scalar_prefetch = 0 : i64, scratch_operands = 0 : i64, tpu.core_type = #tpu.core_type<tc>, window_params = [{pipeline_mode = #tpu.pipeline_mode<synchronous>, transform_indices = @transform_0, window_bounds = array<i64: 64, 896>}, {pipeline_mode = #tpu.pipeline_mode<synchronous>, transform_indices = @transform_1, window_bounds = array<i64: 64, 1>}, {transform_indices = @transform_2, window_bounds = array<i64: 1, 896, 144>}, {transform_indices = @transform_3, window_bounds = array<i64: 1, 64, 144>}]} {
    %c0 = arith.constant 0 : index
    %c0_0 = arith.constant 0 : index
    %0 = vector.load %arg2[%c0, %c0_0] : memref<64x896xbf16, #tpu.memory_space<vmem>>, vector<64x896xbf16>
    %c0_1 = arith.constant 0 : index
    %c0_2 = arith.constant 0 : index
    %c0_3 = arith.constant 0 : index
    %1 = vector.load %arg4[%c0_1, %c0_2, %c0_3] : memref<1x896x144xbf16, #tpu.memory_space<vmem>>, vector<1x896x144xbf16>
    %2 = vector.shape_cast %1 : vector<1x896x144xbf16> to vector<896x144xbf16>
    %cst = arith.constant dense<0.000000e+00> : vector<64x144xf32>
    %3 = tpu.matmul %0, %2, %cst {dimension_numbers = #tpu.dot_dimension_numbers<[1], [0], [0], [1], [0, 0, 1, 1], [], []>} : vector<64x896xbf16>, vector<896x144xbf16>, vector<64x144xf32> -> vector<64x144xf32>
    %c0_4 = arith.constant 0 : index
    %c0_5 = arith.constant 0 : index
    %4 = vector.load %arg3[%c0_4, %c0_5] : memref<64x1xf32, #tpu.memory_space<vmem>>, vector<64x1xf32>
    %5 = vector.broadcast %4 : vector<64x1xf32> to vector<64x144xf32>
    %6 = arith.addf %3, %5 : vector<64x144xf32>
    %7 = arith.truncf %6 : vector<64x144xf32> to vector<64x144xbf16>
    %c0_6 = arith.constant 0 : index
    %c0_7 = arith.constant 0 : index
    %c0_8 = arith.constant 0 : index
    %8 = vector.load %arg5[%c0_6, %c0_7, %c0_8] : memref<1x64x144xbf16, #tpu.memory_space<vmem>>, vector<1x64x144xbf16>
    %9 = vector.shape_cast %8 : vector<1x64x144xbf16> to vector<64x144xbf16>
    %10 = vector.shape_cast %7 : vector<64x144xbf16> to vector<1x64x144xbf16>
    tpu.vector_store %arg5[%c0_6, %c0_7, %c0_8], %10 {strides = array<i32>} : memref<1x64x144xbf16, #tpu.memory_space<vmem>>, vector<1x64x144xbf16>,
    return
  }
  func.func @transform_0(%arg0: i32, %arg1: i32) -> (i32, i32) {
    %c0_i32 = arith.constant 0 : i32
    %c0_i32_0 = arith.constant 0 : i32
    %c0_i32_1 = arith.constant 0 : i32
    return %c0_i32, %c0_i32_0 : i32, i32
  }
  func.func @transform_1(%arg0: i32, %arg1: i32) -> (i32, i32) {
    %c0_i32 = arith.constant 0 : i32
    %c0_i32_0 = arith.constant 0 : i32
    %c0_i32_1 = arith.constant 0 : i32
    return %c0_i32, %c0_i32_0 : i32, i32
  }
  func.func @transform_2(%arg0: i32, %arg1: i32) -> (i32, i32, i32) {
    %c0_i32 = arith.constant 0 : i32
    %c0_i32_0 = arith.constant 0 : i32
    return %arg0, %c0_i32, %arg1 : i32, i32, i32
  }
  func.func @transform_3(%arg0: i32, %arg1: i32) -> (i32, i32, i32) {
    %c0_i32 = arith.constant 0 : i32
    %c0_i32_0 = arith.constant 0 : i32
    return %arg0, %c0_i32, %arg1 : i32, i32, i32
  }
}

module attributes {stable_mosaic.version = 11 : i64} {
  func.func @_ln_gate_kernel(%arg0: i32, %arg1: memref<1x16x512xbf16, #tpu.memory_space<vmem>>, %arg2: memref<1x16x512xbf16, #tpu.memory_space<vmem>>, %arg3: memref<1x16x512xf32, #tpu.memory_space<vmem>>) attributes {dimension_semantics = [#tpu.dimension_semantics<parallel>], iteration_bounds = array<i64: 2>, scalar_prefetch = 0 : i64, scratch_operands = 0 : i64, tpu.core_type = #tpu.core_type<tc>, window_params = [{transform_indices = @transform_0, window_bounds = array<i64: 1, 16, 512>}, {transform_indices = @transform_1, window_bounds = array<i64: 1, 16, 512>}, {transform_indices = @transform_2, window_bounds = array<i64: 1, 16, 512>}]} {
    %c0 = arith.constant 0 : index
    %c0_0 = arith.constant 0 : index
    %c0_1 = arith.constant 0 : index
    %0 = vector.load %arg1[%c0, %c0_0, %c0_1] : memref<1x16x512xbf16, #tpu.memory_space<vmem>>, vector<1x16x512xbf16>
    %1 = vector.shape_cast %0 : vector<1x16x512xbf16> to vector<16x512xbf16>
    %2 = arith.extf %1 : vector<16x512xbf16> to vector<16x512xf32>
    %c0_2 = arith.constant 0 : index
    %c0_3 = arith.constant 0 : index
    %c0_4 = arith.constant 0 : index
    %3 = vector.load %arg2[%c0_2, %c0_3, %c0_4] : memref<1x16x512xbf16, #tpu.memory_space<vmem>>, vector<1x16x512xbf16>
    %4 = vector.shape_cast %3 : vector<1x16x512xbf16> to vector<16x512xbf16>
    %5 = arith.extf %4 : vector<16x512xbf16> to vector<16x512xf32>
    %6 = arith.addf %2, %5 : vector<16x512xf32>
    %cst = arith.constant dense<0.000000e+00> : vector<16xf32>
    %7 = vector.multi_reduction <add>, %6, %cst [1] : vector<16x512xf32> to vector<16xf32>
    %8 = vector.shape_cast %7 : vector<16xf32> to vector<16x1xf32>
    %cst_5 = arith.constant 5.120000e+02 : f32
    %9 = vector.broadcast %cst_5 : f32 to vector<16x1xf32>
    %10 = arith.divf %8, %9 : vector<16x1xf32>
    %11 = vector.broadcast %10 : vector<16x1xf32> to vector<16x512xf32>
    %12 = arith.subf %6, %11 : vector<16x512xf32>
    %13 = arith.mulf %12, %12 : vector<16x512xf32>
    %cst_6 = arith.constant dense<0.000000e+00> : vector<16xf32>
    %14 = vector.multi_reduction <add>, %13, %cst_6 [1] : vector<16x512xf32> to vector<16xf32>
    %15 = vector.shape_cast %14 : vector<16xf32> to vector<16x1xf32>
    %cst_7 = arith.constant 5.120000e+02 : f32
    %16 = vector.broadcast %cst_7 : f32 to vector<16x1xf32>
    %17 = arith.divf %15, %16 : vector<16x1xf32>
    %cst_8 = arith.constant 9.99999974E-6 : f32
    %18 = vector.broadcast %cst_8 : f32 to vector<16x1xf32>
    %19 = arith.addf %17, %18 : vector<16x1xf32>
    %20 = math.rsqrt %19 : vector<16x1xf32>
    %21 = vector.broadcast %20 : vector<16x1xf32> to vector<16x512xf32>
    %22 = arith.mulf %12, %21 : vector<16x512xf32>
    %23 = arith.negf %22 : vector<16x512xf32>
    %24 = math.exp %23 : vector<16x512xf32>
    %cst_9 = arith.constant 1.000000e+00 : f32
    %25 = vector.broadcast %cst_9 : f32 to vector<16x512xf32>
    %26 = arith.addf %25, %24 : vector<16x512xf32>
    %27 = arith.divf %25, %26 : vector<16x512xf32>
    %c0_10 = arith.constant 0 : index
    %c0_11 = arith.constant 0 : index
    %c0_12 = arith.constant 0 : index
    %28 = vector.load %arg3[%c0_10, %c0_11, %c0_12] : memref<1x16x512xf32, #tpu.memory_space<vmem>>, vector<1x16x512xf32>
    %29 = vector.shape_cast %28 : vector<1x16x512xf32> to vector<16x512xf32>
    %30 = vector.shape_cast %27 : vector<16x512xf32> to vector<1x16x512xf32>
    tpu.vector_store %arg3[%c0_10, %c0_11, %c0_12], %30 {strides = array<i32>} : memref<1x16x512xf32, #tpu.memory_space<vmem>>, vector<1x16x512xf32>,
    return
  }
  func.func @transform_0(%arg0: i32) -> (i32, i32, i32) {
    %c0_i32 = arith.constant 0 : i32
    %c0_i32_0 = arith.constant 0 : i32
    %c0_i32_1 = arith.constant 0 : i32
    return %arg0, %c0_i32, %c0_i32_0 : i32, i32, i32
  }
  func.func @transform_1(%arg0: i32) -> (i32, i32, i32) {
    %c0_i32 = arith.constant 0 : i32
    %c0_i32_0 = arith.constant 0 : i32
    %c0_i32_1 = arith.constant 0 : i32
    return %arg0, %c0_i32, %c0_i32_0 : i32, i32, i32
  }
  func.func @transform_2(%arg0: i32) -> (i32, i32, i32) {
    %c0_i32 = arith.constant 0 : i32
    %c0_i32_0 = arith.constant 0 : i32
    %c0_i32_1 = arith.constant 0 : i32
    return %arg0, %c0_i32, %c0_i32_0 : i32, i32, i32
  }
}

module attributes {stable_mosaic.version = 11 : i64} {
  func.func @_ln_gate_kernel(%arg0: i32, %arg1: memref<1x16x512xbf16, #tpu.memory_space<vmem>>, %arg2: memref<1x16x512xbf16, #tpu.memory_space<vmem>>, %arg3: memref<1x16x512xf32, #tpu.memory_space<vmem>>) attributes {dimension_semantics = [#tpu.dimension_semantics<parallel>], iteration_bounds = array<i64: 2>, scalar_prefetch = 0 : i64, scratch_operands = 0 : i64, tpu.core_type = #tpu.core_type<tc>, window_params = [{transform_indices = @transform_0, window_bounds = array<i64: 1, 16, 512>}, {transform_indices = @transform_1, window_bounds = array<i64: 1, 16, 512>}, {transform_indices = @transform_2, window_bounds = array<i64: 1, 16, 512>}]} {
    %c0 = arith.constant 0 : index
    %c0_0 = arith.constant 0 : index
    %c0_1 = arith.constant 0 : index
    %0 = vector.load %arg1[%c0, %c0_0, %c0_1] : memref<1x16x512xbf16, #tpu.memory_space<vmem>>, vector<1x16x512xbf16>
    %1 = vector.shape_cast %0 : vector<1x16x512xbf16> to vector<16x512xbf16>
    %2 = arith.extf %1 : vector<16x512xbf16> to vector<16x512xf32>
    %c0_2 = arith.constant 0 : index
    %c0_3 = arith.constant 0 : index
    %c0_4 = arith.constant 0 : index
    %3 = vector.load %arg2[%c0_2, %c0_3, %c0_4] : memref<1x16x512xbf16, #tpu.memory_space<vmem>>, vector<1x16x512xbf16>
    %4 = vector.shape_cast %3 : vector<1x16x512xbf16> to vector<16x512xbf16>
    %5 = arith.extf %4 : vector<16x512xbf16> to vector<16x512xf32>
    %6 = arith.addf %2, %5 : vector<16x512xf32>
    %cst = arith.constant dense<0.000000e+00> : vector<16xf32>
    %7 = vector.multi_reduction <add>, %6, %cst [1] : vector<16x512xf32> to vector<16xf32>
    %8 = vector.shape_cast %7 : vector<16xf32> to vector<16x1xf32>
    %cst_5 = arith.constant 5.120000e+02 : f32
    %9 = vector.broadcast %cst_5 : f32 to vector<16x1xf32>
    %10 = arith.divf %8, %9 : vector<16x1xf32>
    %11 = vector.broadcast %10 : vector<16x1xf32> to vector<16x512xf32>
    %12 = arith.subf %6, %11 : vector<16x512xf32>
    %13 = arith.mulf %12, %12 : vector<16x512xf32>
    %cst_6 = arith.constant dense<0.000000e+00> : vector<16xf32>
    %14 = vector.multi_reduction <add>, %13, %cst_6 [1] : vector<16x512xf32> to vector<16xf32>
    %15 = vector.shape_cast %14 : vector<16xf32> to vector<16x1xf32>
    %cst_7 = arith.constant 5.120000e+02 : f32
    %16 = vector.broadcast %cst_7 : f32 to vector<16x1xf32>
    %17 = arith.divf %15, %16 : vector<16x1xf32>
    %cst_8 = arith.constant 9.99999974E-6 : f32
    %18 = vector.broadcast %cst_8 : f32 to vector<16x1xf32>
    %19 = arith.addf %17, %18 : vector<16x1xf32>
    %20 = math.rsqrt %19 : vector<16x1xf32>
    %21 = vector.broadcast %20 : vector<16x1xf32> to vector<16x512xf32>
    %22 = arith.mulf %12, %21 : vector<16x512xf32>
    %23 = math.tanh %22 : vector<16x512xf32>
    %c0_9 = arith.constant 0 : index
    %c0_10 = arith.constant 0 : index
    %c0_11 = arith.constant 0 : index
    %24 = vector.load %arg3[%c0_9, %c0_10, %c0_11] : memref<1x16x512xf32, #tpu.memory_space<vmem>>, vector<1x16x512xf32>
    %25 = vector.shape_cast %24 : vector<1x16x512xf32> to vector<16x512xf32>
    %26 = vector.shape_cast %23 : vector<16x512xf32> to vector<1x16x512xf32>
    tpu.vector_store %arg3[%c0_9, %c0_10, %c0_11], %26 {strides = array<i32>} : memref<1x16x512xf32, #tpu.memory_space<vmem>>, vector<1x16x512xf32>,
    return
  }
  func.func @transform_0(%arg0: i32) -> (i32, i32, i32) {
    %c2_i32 = arith.constant 2 : i32
    %c0_i32 = arith.constant 0 : i32
    %c0_i32_0 = arith.constant 0 : i32
    return %arg0, %c2_i32, %c0_i32 : i32, i32, i32
  }
  func.func @transform_1(%arg0: i32) -> (i32, i32, i32) {
    %c2_i32 = arith.constant 2 : i32
    %c0_i32 = arith.constant 0 : i32
    %c0_i32_0 = arith.constant 0 : i32
    return %arg0, %c2_i32, %c0_i32 : i32, i32, i32
  }
  func.func @transform_2(%arg0: i32) -> (i32, i32, i32) {
    %c0_i32 = arith.constant 0 : i32
    %c0_i32_0 = arith.constant 0 : i32
    %c0_i32_1 = arith.constant 0 : i32
    return %arg0, %c0_i32, %c0_i32_0 : i32, i32, i32
  }
}

module attributes {stable_mosaic.version = 11 : i64} {
  func.func @_ln_gate_kernel(%arg0: i32, %arg1: memref<1x16x512xbf16, #tpu.memory_space<vmem>>, %arg2: memref<1x16x512xbf16, #tpu.memory_space<vmem>>, %arg3: memref<1x16x512xf32, #tpu.memory_space<vmem>>) attributes {dimension_semantics = [#tpu.dimension_semantics<parallel>], iteration_bounds = array<i64: 2>, scalar_prefetch = 0 : i64, scratch_operands = 0 : i64, tpu.core_type = #tpu.core_type<tc>, window_params = [{transform_indices = @transform_0, window_bounds = array<i64: 1, 16, 512>}, {transform_indices = @transform_1, window_bounds = array<i64: 1, 16, 512>}, {transform_indices = @transform_2, window_bounds = array<i64: 1, 16, 512>}]} {
    %c0 = arith.constant 0 : index
    %c0_0 = arith.constant 0 : index
    %c0_1 = arith.constant 0 : index
    %0 = vector.load %arg1[%c0, %c0_0, %c0_1] : memref<1x16x512xbf16, #tpu.memory_space<vmem>>, vector<1x16x512xbf16>
    %1 = vector.shape_cast %0 : vector<1x16x512xbf16> to vector<16x512xbf16>
    %2 = arith.extf %1 : vector<16x512xbf16> to vector<16x512xf32>
    %c0_2 = arith.constant 0 : index
    %c0_3 = arith.constant 0 : index
    %c0_4 = arith.constant 0 : index
    %3 = vector.load %arg2[%c0_2, %c0_3, %c0_4] : memref<1x16x512xbf16, #tpu.memory_space<vmem>>, vector<1x16x512xbf16>
    %4 = vector.shape_cast %3 : vector<1x16x512xbf16> to vector<16x512xbf16>
    %5 = arith.extf %4 : vector<16x512xbf16> to vector<16x512xf32>
    %6 = arith.addf %2, %5 : vector<16x512xf32>
    %cst = arith.constant dense<0.000000e+00> : vector<16xf32>
    %7 = vector.multi_reduction <add>, %6, %cst [1] : vector<16x512xf32> to vector<16xf32>
    %8 = vector.shape_cast %7 : vector<16xf32> to vector<16x1xf32>
    %cst_5 = arith.constant 5.120000e+02 : f32
    %9 = vector.broadcast %cst_5 : f32 to vector<16x1xf32>
    %10 = arith.divf %8, %9 : vector<16x1xf32>
    %11 = vector.broadcast %10 : vector<16x1xf32> to vector<16x512xf32>
    %12 = arith.subf %6, %11 : vector<16x512xf32>
    %13 = arith.mulf %12, %12 : vector<16x512xf32>
    %cst_6 = arith.constant dense<0.000000e+00> : vector<16xf32>
    %14 = vector.multi_reduction <add>, %13, %cst_6 [1] : vector<16x512xf32> to vector<16xf32>
    %15 = vector.shape_cast %14 : vector<16xf32> to vector<16x1xf32>
    %cst_7 = arith.constant 5.120000e+02 : f32
    %16 = vector.broadcast %cst_7 : f32 to vector<16x1xf32>
    %17 = arith.divf %15, %16 : vector<16x1xf32>
    %cst_8 = arith.constant 9.99999974E-6 : f32
    %18 = vector.broadcast %cst_8 : f32 to vector<16x1xf32>
    %19 = arith.addf %17, %18 : vector<16x1xf32>
    %20 = math.rsqrt %19 : vector<16x1xf32>
    %21 = vector.broadcast %20 : vector<16x1xf32> to vector<16x512xf32>
    %22 = arith.mulf %12, %21 : vector<16x512xf32>
    %23 = arith.negf %22 : vector<16x512xf32>
    %24 = math.exp %23 : vector<16x512xf32>
    %cst_9 = arith.constant 1.000000e+00 : f32
    %25 = vector.broadcast %cst_9 : f32 to vector<16x512xf32>
    %26 = arith.addf %25, %24 : vector<16x512xf32>
    %27 = arith.divf %25, %26 : vector<16x512xf32>
    %c0_10 = arith.constant 0 : index
    %c0_11 = arith.constant 0 : index
    %c0_12 = arith.constant 0 : index
    %28 = vector.load %arg3[%c0_10, %c0_11, %c0_12] : memref<1x16x512xf32, #tpu.memory_space<vmem>>, vector<1x16x512xf32>
    %29 = vector.shape_cast %28 : vector<1x16x512xf32> to vector<16x512xf32>
    %30 = vector.shape_cast %27 : vector<16x512xf32> to vector<1x16x512xf32>
    tpu.vector_store %arg3[%c0_10, %c0_11, %c0_12], %30 {strides = array<i32>} : memref<1x16x512xf32, #tpu.memory_space<vmem>>, vector<1x16x512xf32>,
    return
  }
  func.func @transform_0(%arg0: i32) -> (i32, i32, i32) {
    %c1_i32 = arith.constant 1 : i32
    %c0_i32 = arith.constant 0 : i32
    %c0_i32_0 = arith.constant 0 : i32
    return %arg0, %c1_i32, %c0_i32 : i32, i32, i32
  }
  func.func @transform_1(%arg0: i32) -> (i32, i32, i32) {
    %c1_i32 = arith.constant 1 : i32
    %c0_i32 = arith.constant 0 : i32
    %c0_i32_0 = arith.constant 0 : i32
    return %arg0, %c1_i32, %c0_i32 : i32, i32, i32
  }
  func.func @transform_2(%arg0: i32) -> (i32, i32, i32) {
    %c0_i32 = arith.constant 0 : i32
    %c0_i32_0 = arith.constant 0 : i32
    %c0_i32_1 = arith.constant 0 : i32
    return %arg0, %c0_i32, %c0_i32_0 : i32, i32, i32
  }
}

module attributes {stable_mosaic.version = 11 : i64} {
  func.func @_c_update_kernel(%arg0: i32, %arg1: memref<1x16x512xf32, #tpu.memory_space<vmem>>, %arg2: memref<1x16x512xf32, #tpu.memory_space<vmem>>, %arg3: memref<1x16x512xf32, #tpu.memory_space<vmem>>, %arg4: memref<1x16x512xf32, #tpu.memory_space<vmem>>, %arg5: memref<1x16x512xf32, #tpu.memory_space<vmem>>) attributes {dimension_semantics = [#tpu.dimension_semantics<parallel>], iteration_bounds = array<i64: 2>, scalar_prefetch = 0 : i64, scratch_operands = 0 : i64, tpu.core_type = #tpu.core_type<tc>, window_params = [{transform_indices = @transform_0, window_bounds = array<i64: 1, 16, 512>}, {transform_indices = @transform_1, window_bounds = array<i64: 1, 16, 512>}, {transform_indices = @transform_2, window_bounds = array<i64: 1, 16, 512>}, {transform_indices = @transform_3, window_bounds = array<i64: 1, 16, 512>}, {transform_indices = @transform_4, window_bounds = array<i64: 1, 16, 512>}]} {
    %c0 = arith.constant 0 : index
    %c0_0 = arith.constant 0 : index
    %c0_1 = arith.constant 0 : index
    %0 = vector.load %arg1[%c0, %c0_0, %c0_1] : memref<1x16x512xf32, #tpu.memory_space<vmem>>, vector<1x16x512xf32>
    %1 = vector.shape_cast %0 : vector<1x16x512xf32> to vector<16x512xf32>
    %c0_2 = arith.constant 0 : index
    %c0_3 = arith.constant 0 : index
    %c0_4 = arith.constant 0 : index
    %2 = vector.load %arg2[%c0_2, %c0_3, %c0_4] : memref<1x16x512xf32, #tpu.memory_space<vmem>>, vector<1x16x512xf32>
    %3 = vector.shape_cast %2 : vector<1x16x512xf32> to vector<16x512xf32>
    %4 = arith.addf %1, %3 : vector<16x512xf32>
    %cst = arith.constant dense<0.000000e+00> : vector<16xf32>
    %5 = vector.multi_reduction <add>, %4, %cst [1] : vector<16x512xf32> to vector<16xf32>
    %6 = vector.shape_cast %5 : vector<16xf32> to vector<16x1xf32>
    %cst_5 = arith.constant dense<0.000000e+00> : vector<1xf32>
    %7 = vector.multi_reduction <add>, %6, %cst_5 [0] : vector<16x1xf32> to vector<1xf32>
    %8 = vector.shape_cast %7 : vector<1xf32> to vector<1x1xf32>
    %cst_6 = arith.constant 1.22070313E-4 : f32
    %9 = vector.broadcast %cst_6 : f32 to vector<1x1xf32>
    %10 = arith.mulf %8, %9 : vector<1x1xf32>
    %11 = vector.broadcast %10 : vector<1x1xf32> to vector<16x512xf32>
    %12 = arith.subf %4, %11 : vector<16x512xf32>
    %13 = arith.mulf %12, %12 : vector<16x512xf32>
    %cst_7 = arith.constant dense<0.000000e+00> : vector<16xf32>
    %14 = vector.multi_reduction <add>, %13, %cst_7 [1] : vector<16x512xf32> to vector<16xf32>
    %15 = vector.shape_cast %14 : vector<16xf32> to vector<16x1xf32>
    %cst_8 = arith.constant dense<0.000000e+00> : vector<1xf32>
    %16 = vector.multi_reduction <add>, %15, %cst_8 [0] : vector<16x1xf32> to vector<1xf32>
    %17 = vector.shape_cast %16 : vector<1xf32> to vector<1x1xf32>
    %cst_9 = arith.constant 1.22070313E-4 : f32
    %18 = vector.broadcast %cst_9 : f32 to vector<1x1xf32>
    %19 = arith.mulf %17, %18 : vector<1x1xf32>
    %cst_10 = arith.constant 9.99999974E-6 : f32
    %20 = vector.broadcast %cst_10 : f32 to vector<1x1xf32>
    %21 = arith.addf %19, %20 : vector<1x1xf32>
    %22 = math.rsqrt %21 : vector<1x1xf32>
    %23 = vector.broadcast %22 : vector<1x1xf32> to vector<16x512xf32>
    %24 = arith.mulf %12, %23 : vector<16x512xf32>
    %c0_11 = arith.constant 0 : index
    %c0_12 = arith.constant 0 : index
    %c0_13 = arith.constant 0 : index
    %25 = vector.load %arg3[%c0_11, %c0_12, %c0_13] : memref<1x16x512xf32, #tpu.memory_space<vmem>>, vector<1x16x512xf32>
    %26 = vector.shape_cast %25 : vector<1x16x512xf32> to vector<16x512xf32>
    %c0_14 = arith.constant 0 : index
    %c0_15 = arith.constant 0 : index
    %c0_16 = arith.constant 0 : index
    %27 = vector.load %arg4[%c0_14, %c0_15, %c0_16] : memref<1x16x512xf32, #tpu.memory_space<vmem>>, vector<1x16x512xf32>
    %28 = vector.shape_cast %27 : vector<1x16x512xf32> to vector<16x512xf32>
    %29 = arith.mulf %26, %28 : vector<16x512xf32>
    %30 = arith.addf %29, %24 : vector<16x512xf32>
    %c0_17 = arith.constant 0 : index
    %c0_18 = arith.constant 0 : index
    %c0_19 = arith.constant 0 : index
    %31 = vector.load %arg5[%c0_17, %c0_18, %c0_19] : memref<1x16x512xf32, #tpu.memory_space<vmem>>, vector<1x16x512xf32>
    %32 = vector.shape_cast %31 : vector<1x16x512xf32> to vector<16x512xf32>
    %33 = vector.shape_cast %30 : vector<16x512xf32> to vector<1x16x512xf32>
    tpu.vector_store %arg5[%c0_17, %c0_18, %c0_19], %33 {strides = array<i32>} : memref<1x16x512xf32, #tpu.memory_space<vmem>>, vector<1x16x512xf32>,
    return
  }
  func.func @transform_0(%arg0: i32) -> (i32, i32, i32) {
    %c0_i32 = arith.constant 0 : i32
    %c0_i32_0 = arith.constant 0 : i32
    %c0_i32_1 = arith.constant 0 : i32
    return %arg0, %c0_i32, %c0_i32_0 : i32, i32, i32
  }
  func.func @transform_1(%arg0: i32) -> (i32, i32, i32) {
    %c0_i32 = arith.constant 0 : i32
    %c0_i32_0 = arith.constant 0 : i32
    %c0_i32_1 = arith.constant 0 : i32
    return %arg0, %c0_i32, %c0_i32_0 : i32, i32, i32
  }
  func.func @transform_2(%arg0: i32) -> (i32, i32, i32) {
    %c0_i32 = arith.constant 0 : i32
    %c0_i32_0 = arith.constant 0 : i32
    %c0_i32_1 = arith.constant 0 : i32
    return %arg0, %c0_i32, %c0_i32_0 : i32, i32, i32
  }
  func.func @transform_3(%arg0: i32) -> (i32, i32, i32) {
    %c0_i32 = arith.constant 0 : i32
    %c0_i32_0 = arith.constant 0 : i32
    %c0_i32_1 = arith.constant 0 : i32
    return %arg0, %c0_i32, %c0_i32_0 : i32, i32, i32
  }
  func.func @transform_4(%arg0: i32) -> (i32, i32, i32) {
    %c0_i32 = arith.constant 0 : i32
    %c0_i32_0 = arith.constant 0 : i32
    %c0_i32_1 = arith.constant 0 : i32
    return %arg0, %c0_i32, %c0_i32_0 : i32, i32, i32
  }
}

module attributes {stable_mosaic.version = 11 : i64} {
  func.func @_conv_mm_kernel(%arg0: i32, %arg1: i32, %arg2: memref<16x896xbf16, #tpu.memory_space<vmem>>, %arg3: memref<16x1xf32, #tpu.memory_space<vmem>>, %arg4: memref<1x896x144xbf16, #tpu.memory_space<vmem>>, %arg5: memref<1x16x144xbf16, #tpu.memory_space<vmem>>) attributes {dimension_semantics = [#tpu.dimension_semantics<parallel>, #tpu.dimension_semantics<parallel>], iteration_bounds = array<i64: 2, 1>, scalar_prefetch = 0 : i64, scratch_operands = 0 : i64, tpu.core_type = #tpu.core_type<tc>, window_params = [{pipeline_mode = #tpu.pipeline_mode<synchronous>, transform_indices = @transform_0, window_bounds = array<i64: 16, 896>}, {pipeline_mode = #tpu.pipeline_mode<synchronous>, transform_indices = @transform_1, window_bounds = array<i64: 16, 1>}, {transform_indices = @transform_2, window_bounds = array<i64: 1, 896, 144>}, {transform_indices = @transform_3, window_bounds = array<i64: 1, 16, 144>}]} {
    %c0 = arith.constant 0 : index
    %c0_0 = arith.constant 0 : index
    %0 = vector.load %arg2[%c0, %c0_0] : memref<16x896xbf16, #tpu.memory_space<vmem>>, vector<16x896xbf16>
    %c0_1 = arith.constant 0 : index
    %c0_2 = arith.constant 0 : index
    %c0_3 = arith.constant 0 : index
    %1 = vector.load %arg4[%c0_1, %c0_2, %c0_3] : memref<1x896x144xbf16, #tpu.memory_space<vmem>>, vector<1x896x144xbf16>
    %2 = vector.shape_cast %1 : vector<1x896x144xbf16> to vector<896x144xbf16>
    %cst = arith.constant dense<0.000000e+00> : vector<16x144xf32>
    %3 = tpu.matmul %0, %2, %cst {dimension_numbers = #tpu.dot_dimension_numbers<[1], [0], [0], [1], [0, 0, 1, 1], [], []>} : vector<16x896xbf16>, vector<896x144xbf16>, vector<16x144xf32> -> vector<16x144xf32>
    %c0_4 = arith.constant 0 : index
    %c0_5 = arith.constant 0 : index
    %4 = vector.load %arg3[%c0_4, %c0_5] : memref<16x1xf32, #tpu.memory_space<vmem>>, vector<16x1xf32>
    %5 = vector.broadcast %4 : vector<16x1xf32> to vector<16x144xf32>
    %6 = arith.addf %3, %5 : vector<16x144xf32>
    %7 = arith.truncf %6 : vector<16x144xf32> to vector<16x144xbf16>
    %c0_6 = arith.constant 0 : index
    %c0_7 = arith.constant 0 : index
    %c0_8 = arith.constant 0 : index
    %8 = vector.load %arg5[%c0_6, %c0_7, %c0_8] : memref<1x16x144xbf16, #tpu.memory_space<vmem>>, vector<1x16x144xbf16>
    %9 = vector.shape_cast %8 : vector<1x16x144xbf16> to vector<16x144xbf16>
    %10 = vector.shape_cast %7 : vector<16x144xbf16> to vector<1x16x144xbf16>
    tpu.vector_store %arg5[%c0_6, %c0_7, %c0_8], %10 {strides = array<i32>} : memref<1x16x144xbf16, #tpu.memory_space<vmem>>, vector<1x16x144xbf16>,
    return
  }
  func.func @transform_0(%arg0: i32, %arg1: i32) -> (i32, i32) {
    %c0_i32 = arith.constant 0 : i32
    %c0_i32_0 = arith.constant 0 : i32
    %c0_i32_1 = arith.constant 0 : i32
    return %c0_i32, %c0_i32_0 : i32, i32
  }
  func.func @transform_1(%arg0: i32, %arg1: i32) -> (i32, i32) {
    %c0_i32 = arith.constant 0 : i32
    %c0_i32_0 = arith.constant 0 : i32
    %c0_i32_1 = arith.constant 0 : i32
    return %c0_i32, %c0_i32_0 : i32, i32
  }
  func.func @transform_2(%arg0: i32, %arg1: i32) -> (i32, i32, i32) {
    %c0_i32 = arith.constant 0 : i32
    %c0_i32_0 = arith.constant 0 : i32
    return %arg0, %c0_i32, %arg1 : i32, i32, i32
  }
  func.func @transform_3(%arg0: i32, %arg1: i32) -> (i32, i32, i32) {
    %c0_i32 = arith.constant 0 : i32
    %c0_i32_0 = arith.constant 0 : i32
    return %arg0, %c0_i32, %arg1 : i32, i32, i32
  }
}

module attributes {stable_mosaic.version = 11 : i64} {
  func.func @_ln_gate_kernel(%arg0: i32, %arg1: memref<1x16x512xbf16, #tpu.memory_space<vmem>>, %arg2: memref<1x16x512xbf16, #tpu.memory_space<vmem>>, %arg3: memref<1x16x512xbf16, #tpu.memory_space<vmem>>, %arg4: memref<1x16x512xbf16, #tpu.memory_space<vmem>>, %arg5: memref<1x16x512xf32, #tpu.memory_space<vmem>>) attributes {dimension_semantics = [#tpu.dimension_semantics<parallel>], iteration_bounds = array<i64: 2>, scalar_prefetch = 0 : i64, scratch_operands = 0 : i64, tpu.core_type = #tpu.core_type<tc>, window_params = [{transform_indices = @transform_0, window_bounds = array<i64: 1, 16, 512>}, {transform_indices = @transform_1, window_bounds = array<i64: 1, 16, 512>}, {transform_indices = @transform_2, window_bounds = array<i64: 1, 16, 512>}, {transform_indices = @transform_3, window_bounds = array<i64: 1, 16, 512>}, {transform_indices = @transform_4, window_bounds = array<i64: 1, 16, 512>}]} {
    %c0 = arith.constant 0 : index
    %c0_0 = arith.constant 0 : index
    %c0_1 = arith.constant 0 : index
    %0 = vector.load %arg1[%c0, %c0_0, %c0_1] : memref<1x16x512xbf16, #tpu.memory_space<vmem>>, vector<1x16x512xbf16>
    %1 = vector.shape_cast %0 : vector<1x16x512xbf16> to vector<16x512xbf16>
    %2 = arith.extf %1 : vector<16x512xbf16> to vector<16x512xf32>
    %c0_2 = arith.constant 0 : index
    %c0_3 = arith.constant 0 : index
    %c0_4 = arith.constant 0 : index
    %3 = vector.load %arg2[%c0_2, %c0_3, %c0_4] : memref<1x16x512xbf16, #tpu.memory_space<vmem>>, vector<1x16x512xbf16>
    %4 = vector.shape_cast %3 : vector<1x16x512xbf16> to vector<16x512xbf16>
    %5 = arith.extf %4 : vector<16x512xbf16> to vector<16x512xf32>
    %6 = arith.addf %2, %5 : vector<16x512xf32>
    %c0_5 = arith.constant 0 : index
    %c0_6 = arith.constant 0 : index
    %c0_7 = arith.constant 0 : index
    %7 = vector.load %arg3[%c0_5, %c0_6, %c0_7] : memref<1x16x512xbf16, #tpu.memory_space<vmem>>, vector<1x16x512xbf16>
    %8 = vector.shape_cast %7 : vector<1x16x512xbf16> to vector<16x512xbf16>
    %9 = arith.extf %8 : vector<16x512xbf16> to vector<16x512xf32>
    %10 = arith.addf %6, %9 : vector<16x512xf32>
    %c0_8 = arith.constant 0 : index
    %c0_9 = arith.constant 0 : index
    %c0_10 = arith.constant 0 : index
    %11 = vector.load %arg4[%c0_8, %c0_9, %c0_10] : memref<1x16x512xbf16, #tpu.memory_space<vmem>>, vector<1x16x512xbf16>
    %12 = vector.shape_cast %11 : vector<1x16x512xbf16> to vector<16x512xbf16>
    %13 = arith.extf %12 : vector<16x512xbf16> to vector<16x512xf32>
    %14 = arith.addf %10, %13 : vector<16x512xf32>
    %cst = arith.constant dense<0.000000e+00> : vector<16xf32>
    %15 = vector.multi_reduction <add>, %14, %cst [1] : vector<16x512xf32> to vector<16xf32>
    %16 = vector.shape_cast %15 : vector<16xf32> to vector<16x1xf32>
    %cst_11 = arith.constant 5.120000e+02 : f32
    %17 = vector.broadcast %cst_11 : f32 to vector<16x1xf32>
    %18 = arith.divf %16, %17 : vector<16x1xf32>
    %19 = vector.broadcast %18 : vector<16x1xf32> to vector<16x512xf32>
    %20 = arith.subf %14, %19 : vector<16x512xf32>
    %21 = arith.mulf %20, %20 : vector<16x512xf32>
    %cst_12 = arith.constant dense<0.000000e+00> : vector<16xf32>
    %22 = vector.multi_reduction <add>, %21, %cst_12 [1] : vector<16x512xf32> to vector<16xf32>
    %23 = vector.shape_cast %22 : vector<16xf32> to vector<16x1xf32>
    %cst_13 = arith.constant 5.120000e+02 : f32
    %24 = vector.broadcast %cst_13 : f32 to vector<16x1xf32>
    %25 = arith.divf %23, %24 : vector<16x1xf32>
    %cst_14 = arith.constant 9.99999974E-6 : f32
    %26 = vector.broadcast %cst_14 : f32 to vector<16x1xf32>
    %27 = arith.addf %25, %26 : vector<16x1xf32>
    %28 = math.rsqrt %27 : vector<16x1xf32>
    %29 = vector.broadcast %28 : vector<16x1xf32> to vector<16x512xf32>
    %30 = arith.mulf %20, %29 : vector<16x512xf32>
    %31 = arith.negf %30 : vector<16x512xf32>
    %32 = math.exp %31 : vector<16x512xf32>
    %cst_15 = arith.constant 1.000000e+00 : f32
    %33 = vector.broadcast %cst_15 : f32 to vector<16x512xf32>
    %34 = arith.addf %33, %32 : vector<16x512xf32>
    %35 = arith.divf %33, %34 : vector<16x512xf32>
    %c0_16 = arith.constant 0 : index
    %c0_17 = arith.constant 0 : index
    %c0_18 = arith.constant 0 : index
    %36 = vector.load %arg5[%c0_16, %c0_17, %c0_18] : memref<1x16x512xf32, #tpu.memory_space<vmem>>, vector<1x16x512xf32>
    %37 = vector.shape_cast %36 : vector<1x16x512xf32> to vector<16x512xf32>
    %38 = vector.shape_cast %35 : vector<16x512xf32> to vector<1x16x512xf32>
    tpu.vector_store %arg5[%c0_16, %c0_17, %c0_18], %38 {strides = array<i32>} : memref<1x16x512xf32, #tpu.memory_space<vmem>>, vector<1x16x512xf32>,
    return
  }
  func.func @transform_0(%arg0: i32) -> (i32, i32, i32) {
    %c6_i32 = arith.constant 6 : i32
    %c0_i32 = arith.constant 0 : i32
    %c0_i32_0 = arith.constant 0 : i32
    return %arg0, %c6_i32, %c0_i32 : i32, i32, i32
  }
  func.func @transform_1(%arg0: i32) -> (i32, i32, i32) {
    %c3_i32 = arith.constant 3 : i32
    %c0_i32 = arith.constant 0 : i32
    %c0_i32_0 = arith.constant 0 : i32
    return %arg0, %c3_i32, %c0_i32 : i32, i32, i32
  }
  func.func @transform_2(%arg0: i32) -> (i32, i32, i32) {
    %c0_i32 = arith.constant 0 : i32
    %c0_i32_0 = arith.constant 0 : i32
    %c0_i32_1 = arith.constant 0 : i32
    return %arg0, %c0_i32, %c0_i32_0 : i32, i32, i32
  }
  func.func @transform_3(%arg0: i32) -> (i32, i32, i32) {
    %c0_i32 = arith.constant 0 : i32
    %c0_i32_0 = arith.constant 0 : i32
    %c0_i32_1 = arith.constant 0 : i32
    return %arg0, %c0_i32, %c0_i32_0 : i32, i32, i32
  }
  func.func @transform_4(%arg0: i32) -> (i32, i32, i32) {
    %c0_i32 = arith.constant 0 : i32
    %c0_i32_0 = arith.constant 0 : i32
    %c0_i32_1 = arith.constant 0 : i32
    return %arg0, %c0_i32, %c0_i32_0 : i32, i32, i32
  }
}

module attributes {stable_mosaic.version = 11 : i64} {
  func.func @_conv_mm_tanh_mul_kernel(%arg0: i32, %arg1: i32, %arg2: memref<16x128xbf16, #tpu.memory_space<vmem>>, %arg3: memref<16x1xf32, #tpu.memory_space<vmem>>, %arg4: memref<1x128x512xbf16, #tpu.memory_space<vmem>>, %arg5: memref<1x16x512xf32, #tpu.memory_space<vmem>>, %arg6: memref<1x16x512xf32, #tpu.memory_space<vmem>>) attributes {dimension_semantics = [#tpu.dimension_semantics<parallel>, #tpu.dimension_semantics<parallel>], iteration_bounds = array<i64: 2, 1>, scalar_prefetch = 0 : i64, scratch_operands = 0 : i64, tpu.core_type = #tpu.core_type<tc>, window_params = [{pipeline_mode = #tpu.pipeline_mode<synchronous>, transform_indices = @transform_0, window_bounds = array<i64: 16, 128>}, {pipeline_mode = #tpu.pipeline_mode<synchronous>, transform_indices = @transform_1, window_bounds = array<i64: 16, 1>}, {transform_indices = @transform_2, window_bounds = array<i64: 1, 128, 512>}, {transform_indices = @transform_3, window_bounds = array<i64: 1, 16, 512>}, {transform_indices = @transform_4, window_bounds = array<i64: 1, 16, 512>}]} {
    %c0 = arith.constant 0 : index
    %c0_0 = arith.constant 0 : index
    %0 = vector.load %arg2[%c0, %c0_0] : memref<16x128xbf16, #tpu.memory_space<vmem>>, vector<16x128xbf16>
    %c0_1 = arith.constant 0 : index
    %c0_2 = arith.constant 0 : index
    %c0_3 = arith.constant 0 : index
    %1 = vector.load %arg4[%c0_1, %c0_2, %c0_3] : memref<1x128x512xbf16, #tpu.memory_space<vmem>>, vector<1x128x512xbf16>
    %2 = vector.shape_cast %1 : vector<1x128x512xbf16> to vector<128x512xbf16>
    %cst = arith.constant dense<0.000000e+00> : vector<16x512xf32>
    %3 = tpu.matmul %0, %2, %cst {dimension_numbers = #tpu.dot_dimension_numbers<[1], [0], [0], [1], [0, 0, 1, 1], [], []>} : vector<16x128xbf16>, vector<128x512xbf16>, vector<16x512xf32> -> vector<16x512xf32>
    %c0_4 = arith.constant 0 : index
    %c0_5 = arith.constant 0 : index
    %4 = vector.load %arg3[%c0_4, %c0_5] : memref<16x1xf32, #tpu.memory_space<vmem>>, vector<16x1xf32>
    %5 = vector.broadcast %4 : vector<16x1xf32> to vector<16x512xf32>
    %6 = arith.addf %3, %5 : vector<16x512xf32>
    %7 = math.tanh %6 : vector<16x512xf32>
    %c0_6 = arith.constant 0 : index
    %c0_7 = arith.constant 0 : index
    %c0_8 = arith.constant 0 : index
    %8 = vector.load %arg5[%c0_6, %c0_7, %c0_8] : memref<1x16x512xf32, #tpu.memory_space<vmem>>, vector<1x16x512xf32>
    %9 = vector.shape_cast %8 : vector<1x16x512xf32> to vector<16x512xf32>
    %10 = arith.mulf %9, %7 : vector<16x512xf32>
    %c0_9 = arith.constant 0 : index
    %c0_10 = arith.constant 0 : index
    %c0_11 = arith.constant 0 : index
    %11 = vector.load %arg6[%c0_9, %c0_10, %c0_11] : memref<1x16x512xf32, #tpu.memory_space<vmem>>, vector<1x16x512xf32>
    %12 = vector.shape_cast %11 : vector<1x16x512xf32> to vector<16x512xf32>
    %13 = vector.shape_cast %10 : vector<16x512xf32> to vector<1x16x512xf32>
    tpu.vector_store %arg6[%c0_9, %c0_10, %c0_11], %13 {strides = array<i32>} : memref<1x16x512xf32, #tpu.memory_space<vmem>>, vector<1x16x512xf32>,
    return
  }
  func.func @transform_0(%arg0: i32, %arg1: i32) -> (i32, i32) {
    %c0_i32 = arith.constant 0 : i32
    %c0_i32_0 = arith.constant 0 : i32
    %c0_i32_1 = arith.constant 0 : i32
    return %c0_i32, %c0_i32_0 : i32, i32
  }
  func.func @transform_1(%arg0: i32, %arg1: i32) -> (i32, i32) {
    %c0_i32 = arith.constant 0 : i32
    %c0_i32_0 = arith.constant 0 : i32
    %c0_i32_1 = arith.constant 0 : i32
    return %c0_i32, %c0_i32_0 : i32, i32
  }
  func.func @transform_2(%arg0: i32, %arg1: i32) -> (i32, i32, i32) {
    %c0_i32 = arith.constant 0 : i32
    %c0_i32_0 = arith.constant 0 : i32
    return %arg0, %c0_i32, %arg1 : i32, i32, i32
  }
  func.func @transform_3(%arg0: i32, %arg1: i32) -> (i32, i32, i32) {
    %c0_i32 = arith.constant 0 : i32
    %c0_i32_0 = arith.constant 0 : i32
    return %arg0, %c0_i32, %arg1 : i32, i32, i32
  }
  func.func @transform_4(%arg0: i32, %arg1: i32) -> (i32, i32, i32) {
    %c0_i32 = arith.constant 0 : i32
    %c0_i32_0 = arith.constant 0 : i32
    return %arg0, %c0_i32, %arg1 : i32, i32, i32
  }
}

module attributes {stable_mosaic.version = 11 : i64} {
  func.func @_conv_mm_kernel(%arg0: i32, %arg1: i32, %arg2: memref<112x896xbf16, #tpu.memory_space<vmem>>, %arg3: memref<112x1xf32, #tpu.memory_space<vmem>>, %arg4: memref<1x896x144xbf16, #tpu.memory_space<vmem>>, %arg5: memref<1x112x144xbf16, #tpu.memory_space<vmem>>) attributes {dimension_semantics = [#tpu.dimension_semantics<parallel>, #tpu.dimension_semantics<parallel>], iteration_bounds = array<i64: 2, 1>, scalar_prefetch = 0 : i64, scratch_operands = 0 : i64, tpu.core_type = #tpu.core_type<tc>, window_params = [{pipeline_mode = #tpu.pipeline_mode<synchronous>, transform_indices = @transform_0, window_bounds = array<i64: 112, 896>}, {pipeline_mode = #tpu.pipeline_mode<synchronous>, transform_indices = @transform_1, window_bounds = array<i64: 112, 1>}, {transform_indices = @transform_2, window_bounds = array<i64: 1, 896, 144>}, {transform_indices = @transform_3, window_bounds = array<i64: 1, 112, 144>}]} {
    %c0 = arith.constant 0 : index
    %c0_0 = arith.constant 0 : index
    %0 = vector.load %arg2[%c0, %c0_0] : memref<112x896xbf16, #tpu.memory_space<vmem>>, vector<112x896xbf16>
    %c0_1 = arith.constant 0 : index
    %c0_2 = arith.constant 0 : index
    %c0_3 = arith.constant 0 : index
    %1 = vector.load %arg4[%c0_1, %c0_2, %c0_3] : memref<1x896x144xbf16, #tpu.memory_space<vmem>>, vector<1x896x144xbf16>
    %2 = vector.shape_cast %1 : vector<1x896x144xbf16> to vector<896x144xbf16>
    %cst = arith.constant dense<0.000000e+00> : vector<112x144xf32>
    %3 = tpu.matmul %0, %2, %cst {dimension_numbers = #tpu.dot_dimension_numbers<[1], [0], [0], [1], [0, 0, 1, 1], [], []>} : vector<112x896xbf16>, vector<896x144xbf16>, vector<112x144xf32> -> vector<112x144xf32>
    %c0_4 = arith.constant 0 : index
    %c0_5 = arith.constant 0 : index
    %4 = vector.load %arg3[%c0_4, %c0_5] : memref<112x1xf32, #tpu.memory_space<vmem>>, vector<112x1xf32>
    %5 = vector.broadcast %4 : vector<112x1xf32> to vector<112x144xf32>
    %6 = arith.addf %3, %5 : vector<112x144xf32>
    %7 = arith.truncf %6 : vector<112x144xf32> to vector<112x144xbf16>
    %c0_6 = arith.constant 0 : index
    %c0_7 = arith.constant 0 : index
    %c0_8 = arith.constant 0 : index
    %8 = vector.load %arg5[%c0_6, %c0_7, %c0_8] : memref<1x112x144xbf16, #tpu.memory_space<vmem>>, vector<1x112x144xbf16>
    %9 = vector.shape_cast %8 : vector<1x112x144xbf16> to vector<112x144xbf16>
    %10 = vector.shape_cast %7 : vector<112x144xbf16> to vector<1x112x144xbf16>
    tpu.vector_store %arg5[%c0_6, %c0_7, %c0_8], %10 {strides = array<i32>} : memref<1x112x144xbf16, #tpu.memory_space<vmem>>, vector<1x112x144xbf16>,
    return
  }
  func.func @transform_0(%arg0: i32, %arg1: i32) -> (i32, i32) {
    %c0_i32 = arith.constant 0 : i32
    %c0_i32_0 = arith.constant 0 : i32
    %c0_i32_1 = arith.constant 0 : i32
    return %c0_i32, %c0_i32_0 : i32, i32
  }
  func.func @transform_1(%arg0: i32, %arg1: i32) -> (i32, i32) {
    %c0_i32 = arith.constant 0 : i32
    %c0_i32_0 = arith.constant 0 : i32
    %c0_i32_1 = arith.constant 0 : i32
    return %c0_i32, %c0_i32_0 : i32, i32
  }
  func.func @transform_2(%arg0: i32, %arg1: i32) -> (i32, i32, i32) {
    %c0_i32 = arith.constant 0 : i32
    %c0_i32_0 = arith.constant 0 : i32
    return %arg0, %c0_i32, %arg1 : i32, i32, i32
  }
  func.func @transform_3(%arg0: i32, %arg1: i32) -> (i32, i32, i32) {
    %c0_i32 = arith.constant 0 : i32
    %c0_i32_0 = arith.constant 0 : i32
    return %arg0, %c0_i32, %arg1 : i32, i32, i32
  }
}

module attributes {stable_mosaic.version = 11 : i64} {
  func.func @_conv_mm_kernel(%arg0: i32, %arg1: i32, %arg2: memref<2x2432xbf16, #tpu.memory_space<vmem>>, %arg3: memref<2x1xf32, #tpu.memory_space<vmem>>, %arg4: memref<1x2432x256xbf16, #tpu.memory_space<vmem>>, %arg5: memref<1x2x256xf32, #tpu.memory_space<vmem>>) attributes {dimension_semantics = [#tpu.dimension_semantics<parallel>, #tpu.dimension_semantics<parallel>], iteration_bounds = array<i64: 2, 1>, scalar_prefetch = 0 : i64, scratch_operands = 0 : i64, tpu.core_type = #tpu.core_type<tc>, window_params = [{pipeline_mode = #tpu.pipeline_mode<synchronous>, transform_indices = @transform_0, window_bounds = array<i64: 2, 2432>}, {pipeline_mode = #tpu.pipeline_mode<synchronous>, transform_indices = @transform_1, window_bounds = array<i64: 2, 1>}, {transform_indices = @transform_2, window_bounds = array<i64: 1, 2432, 256>}, {transform_indices = @transform_3, window_bounds = array<i64: 1, 2, 256>}]} {
    %c0 = arith.constant 0 : index
    %c0_0 = arith.constant 0 : index
    %0 = vector.load %arg2[%c0, %c0_0] : memref<2x2432xbf16, #tpu.memory_space<vmem>>, vector<2x2432xbf16>
    %c0_1 = arith.constant 0 : index
    %c0_2 = arith.constant 0 : index
    %c0_3 = arith.constant 0 : index
    %1 = vector.load %arg4[%c0_1, %c0_2, %c0_3] : memref<1x2432x256xbf16, #tpu.memory_space<vmem>>, vector<1x2432x256xbf16>
    %2 = vector.shape_cast %1 : vector<1x2432x256xbf16> to vector<2432x256xbf16>
    %cst = arith.constant dense<0.000000e+00> : vector<2x256xf32>
    %3 = tpu.matmul %0, %2, %cst {dimension_numbers = #tpu.dot_dimension_numbers<[1], [0], [0], [1], [0, 0, 1, 1], [], []>} : vector<2x2432xbf16>, vector<2432x256xbf16>, vector<2x256xf32> -> vector<2x256xf32>
    %c0_4 = arith.constant 0 : index
    %c0_5 = arith.constant 0 : index
    %4 = vector.load %arg3[%c0_4, %c0_5] : memref<2x1xf32, #tpu.memory_space<vmem>>, vector<2x1xf32>
    %5 = vector.broadcast %4 : vector<2x1xf32> to vector<2x256xf32>
    %6 = arith.addf %3, %5 : vector<2x256xf32>
    %c0_6 = arith.constant 0 : index
    %c0_7 = arith.constant 0 : index
    %c0_8 = arith.constant 0 : index
    %7 = vector.load %arg5[%c0_6, %c0_7, %c0_8] : memref<1x2x256xf32, #tpu.memory_space<vmem>>, vector<1x2x256xf32>
    %8 = vector.shape_cast %7 : vector<1x2x256xf32> to vector<2x256xf32>
    %9 = vector.shape_cast %6 : vector<2x256xf32> to vector<1x2x256xf32>
    tpu.vector_store %arg5[%c0_6, %c0_7, %c0_8], %9 {strides = array<i32>} : memref<1x2x256xf32, #tpu.memory_space<vmem>>, vector<1x2x256xf32>,
    return
  }
  func.func @transform_0(%arg0: i32, %arg1: i32) -> (i32, i32) {
    %c0_i32 = arith.constant 0 : i32
    %c0_i32_0 = arith.constant 0 : i32
    %c0_i32_1 = arith.constant 0 : i32
    return %c0_i32, %c0_i32_0 : i32, i32
  }
  func.func @transform_1(%arg0: i32, %arg1: i32) -> (i32, i32) {
    %c0_i32 = arith.constant 0 : i32
    %c0_i32_0 = arith.constant 0 : i32
    %c0_i32_1 = arith.constant 0 : i32
    return %c0_i32, %c0_i32_0 : i32, i32
  }
  func.func @transform_2(%arg0: i32, %arg1: i32) -> (i32, i32, i32) {
    %c0_i32 = arith.constant 0 : i32
    %c0_i32_0 = arith.constant 0 : i32
    return %arg0, %c0_i32, %arg1 : i32, i32, i32
  }
  func.func @transform_3(%arg0: i32, %arg1: i32) -> (i32, i32, i32) {
    %c0_i32 = arith.constant 0 : i32
    %c0_i32_0 = arith.constant 0 : i32
    return %arg0, %c0_i32, %arg1 : i32, i32, i32
  }
}

</mosaic_0001>

<bundles_post_ra>
// kernel: taxibj_forward.141
= control target key start
LH: loop header
LB: loop body
LE: loop exit
PB: predicated region body
PF: predicated region fallthrough
CT: control target
= control target key end

     0   :  { %s920_s12 = smov 0   ;;  %s922_s13 = smov 0   ;;  %s1111_s0 = inlined_call_operand.vmem [shape: bf16[112,128], index: 0, kind: input, shape index: {}]   ;;  %s1112_s1 = inlined_call_operand.vmem [shape: f32[112,1], index: 1, kind: input, shape index: {}]   ;;  %s1113_s2 = inlined_call_operand.vmem [shape: bf16[2,128,144], index: 2, kind: input, shape index: {}]   ;;  %s1114_s3 = inlined_call_operand.vmem [shape: bf16[2,112,144], index: 3, kind: output, shape index: {}]  }
   0x1   :  { %s924_s14 = smov 0  }
   0x2 LB: > { %s25_s15 = sadd.s32 1, %s893_s13  ;;  %p742_p0 = scmp.ge.s32.totalorder %s897_s14, 1  ;;  %s897_s14 = sphi %s924_s14, %s13_s14   ;;  %s893_s13 = sphi %s922_s13, %s1118_s13   ;;  %s889_s12 = sphi %s920_s12, %s1117_s12  }
   0x3   : > { %p27_p1 = scmp.ge.s32.totalorder %s25_s15, 2  ;;  %p158_p2 = scmp.lt.s32.totalorder %s897_s14, 3 }
   0x5   : > { %s1120_s15 = smov (%p27_p1, %s25_s15), 0  ;;  %p159_p3 = pnand %p742_p0, %p158_p2 }
   0x6   : > { %p191_p4 = scmp.lt.s32.totalorder (!%p159_p3), %s889_s12, 1  ;;  %v899_v0 = vmov (!%p159_p3), 0   ;;  %v243_v10 = vld [vmem:[%s1112_s1 + $0x10] sm:$0xff] (!%p159_p3)  ;;  %v241_v11 = vld [vmem:[%s1112_s1] sm:$0xff] (!%p159_p3)  ;;  %v244_v12 = vld [vmem:[%s1112_s1 + $0x18] sm:$0xff] (!%p159_p3)  ;;  %vm634_vm0 = vcmask (!%p159_p3), 1043456  }
   0x7   : > { %162 = sbr.rel (%p159_p3) target bundleno = 294 (0x126), region = 32  ;;  %479 = vmatprep.mubr.bf16.mxu0 (!%p159_p3), %v899_v0  ;;  %519 = vmatprep.mubr.bf16.mxu1 (!%p159_p3), %v899_v0  ;;  %v242_v13 = vld [vmem:[%s1112_s1 + $0x8] sm:$0xff] (!%p159_p3)  ;;  %v245_v17 = vld [vmem:[%s1112_s1 + $0x20] sm:$0xff] (!%p159_p3)  ;;  %v248_v20 = vld [vmem:[%s1112_s1 + $0x38] sm:$0xff] (!%p159_p3)  ;;  %vm635_vm1 = vcmask (!%p159_p3), 130052  }
   0x8   : > { %843 = vset.pattern.permute.xlu1 (!%p159_p3), %v899_v0  ;;  %842 = vset.pattern.permute.xlu0 (!%p159_p3), %v899_v0  ;;  %v246_v16 = vld [vmem:[%s1112_s1 + $0x28] sm:$0xff] (!%p159_p3)  ;;  %v247_v21 = vld [vmem:[%s1112_s1 + $0x30] sm:$0xff] (!%p159_p3)  ;;  %v249_v25 = vld [vmem:[%s1112_s1 + $0x40] sm:$0xff] (!%p159_p3) }
   0x9   : > { %267 = vperm.xlu1 (!%p159_p3), %843, %v243_v10   ;;  %257 = vperm.xlu0 (!%p159_p3), %842, %v241_v11   ;;  %v250_v24 = vld [vmem:[%s1112_s1 + $0x48] sm:$0xff] (!%p159_p3)  ;;  %v868_v27 = vld [vmem:[%s1111_s0] sm:$0xff] (!%p159_p3)   ;;  %v252_v29 = vld [vmem:[%s1112_s1 + $0x58] sm:$0xff] (!%p159_p3) }
   0xa   : > { %v869_v28 = vld [vmem:[%s1111_s0 + $0x20] sm:$0xff] (!%p159_p3)   ;;  %v251_v30 = vld [vmem:[%s1112_s1 + $0x50] sm:$0xff] (!%p159_p3)  ;;  %v254_v31 = vld [vmem:[%s1112_s1 + $0x68] sm:$0xff] (!%p159_p3) }
   0xb   : > { %v253_v32 = vld [vmem:[%s1112_s1 + $0x60] sm:$0xff] (!%p159_p3)  ;;  %v870_v33 = vld [vmem:[%s1111_s0 + $0x8] sm:$0xff] (!%p159_p3)   ;;  %v872_v35 = vld [vmem:[%s1111_s0 + $0x10] sm:$0xff] (!%p159_p3)  }
   0xc   : > { %v871_v34 = vld [vmem:[%s1111_s0 + $0x28] sm:$0xff] (!%p159_p3)   ;;  %v873_v36 = vld [vmem:[%s1111_s0 + $0x30] sm:$0xff] (!%p159_p3)   ;;  %v874_v37 = vld [vmem:[%s1111_s0 + $0x18] sm:$0xff] (!%p159_p3)  }
   0xd   : > { %272 = vperm.xlu1 (!%p159_p3), %843, %v244_v12   ;;  %262 = vperm.xlu0 (!%p159_p3), %842, %v242_v13   ;;  %vm1048_vm2 = vmor (!%p159_p3), %vm635_vm1, %vm634_vm0 }
   0xe   : > { %s1122_s12 = smov (!%p191_p4, %s889_s12), 1 }
   0xf   : > { %s785_s16 = sshll.u32 %s1122_s12, 7 }
  0x10   : > { %s948_s19 = scalar_lea.vmem %s1113_s2, %s785_s16  ;;  %s816_s16 = smul.u32 112, %s1122_s12 }
  0x11   : > { %v844_v1 = vld [vmem:[%s948_s19 + $0x4] ss:$8 sps:$4 sm:$0xff]   ;;  %v846_v2 = vld [vmem:[%s948_s19] ss:$8 sps:$4 sm:$0xff]   ;;  %v847_v3 = vld [vmem:[%s948_s19 + $0x14] ss:$8 sps:$4 sm:$0xff]   ;;  %282 = vperm.xlu1 %843, %v246_v16   ;;  %277 = vperm.xlu0 %842, %v245_v17  }
  0x12   : > { %447 = vmatprep.subr.bf16.mxu0 %v844_v1  ;;  %800 = vmatprep.subr.bf16.mxu1 %v844_v1  ;;  %v849_v4 = vld [vmem:[%s948_s19 + $0x10] ss:$8 sps:$4 sm:$0xff]   ;;  %v850_v5 = vld [vmem:[%s948_s19 + $0x24] ss:$8 sps:$4 sm:$0xff]   ;;  %v852_v6 = vld [vmem:[%s948_s19 + $0x20] ss:$8 sps:$4 sm:$0xff]   ;;  %s1046_s20 = scalar_lea.vmem %s1114_s3, %s816_s16 }
  0x13   : > { %448 = vmatpush1.bf16.msra.mxu0 %v846_v2  ;;  %808 = vmatpush1.bf16.msra.mxu1 %v846_v2  ;;  %v853_v7 = vld [vmem:[%s948_s19 + $0x34] ss:$8 sps:$4 sm:$0xff]   ;;  %v855_v8 = vld [vmem:[%s948_s19 + $0x30] ss:$8 sps:$4 sm:$0xff]   ;;  %v856_v9 = vld [vmem:[%s948_s19 + $0x44] ss:$8 sps:$4 sm:$0xff]  }
  0x14   : > { %449 = vmatprep.subr.bf16.mxu0 %v847_v3  ;;  %801 = vmatprep.subr.bf16.mxu1 %v847_v3  ;;  %v858_v14 = vld [vmem:[%s948_s19 + $0x40] ss:$8 sps:$4 sm:$0xff]   ;;  %v859_v15 = vld [vmem:[%s948_s19 + $0x54] ss:$8 sps:$4 sm:$0xff]   ;;  %v861_v18 = vld [vmem:[%s948_s19 + $0x50] ss:$8 sps:$4 sm:$0xff]  }
  0x15   : > { %v862_v19 = vld [vmem:[%s948_s19 + $0x64] ss:$8 sps:$4 sm:$0xff]   ;;  %v864_v22 = vld [vmem:[%s948_s19 + $0x60] ss:$8 sps:$4 sm:$0xff]   ;;  %v865_v23 = vld [vmem:[%s948_s19 + $0x74] ss:$8 sps:$4 sm:$0xff]   ;;  %292 = vperm.xlu1 %843, %v248_v20   ;;  %287 = vperm.xlu0 %842, %v247_v21  }
  0x16   : > { %v867_v26 = vld [vmem:[%s948_s19 + $0x70] ss:$8 sps:$4 sm:$0xff]  }
  0x17   : > { %450 = vmatpush1.bf16.msra.mxu0 %v849_v4  ;;  %809 = vmatpush1.bf16.msra.mxu1 %v849_v4 }
  0x18   : > { %451 = vmatprep.subr.bf16.mxu0 %v850_v5  ;;  %802 = vmatprep.subr.bf16.mxu1 %v850_v5 }
  0x19   : > { %302 = vperm.xlu1 %843, %v250_v24   ;;  %297 = vperm.xlu0 %842, %v249_v25  }
  0x1b   : > { %452 = vmatpush1.bf16.msra.mxu0 %v852_v6  ;;  %810 = vmatpush1.bf16.msra.mxu1 %v852_v6 }
  0x1c   : > { %453 = vmatprep.subr.bf16.mxu0 %v853_v7  ;;  %803 = vmatprep.subr.bf16.mxu1 %v853_v7 }
  0x1d   : > { %312 = vperm.xlu1 %843, %v252_v29   ;;  %307 = vperm.xlu0 %842, %v251_v30  }
  0x1f   : > { %454 = vmatpush1.bf16.msra.mxu0 %v855_v8  ;;  %811 = vmatpush1.bf16.msra.mxu1 %v855_v8 }
  0x20   : > { %455 = vmatprep.subr.bf16.mxu0 %v856_v9  ;;  %804 = vmatprep.subr.bf16.mxu1 %v856_v9 }
  0x21   : > { %322 = vperm.xlu1 %843, %v254_v31   ;;  %317 = vperm.xlu0 %842, %v253_v32  }
  0x23   : > { %456 = vmatpush1.bf16.msra.mxu0 %v858_v14  ;;  %812 = vmatpush1.bf16.msra.mxu1 %v858_v14 }
  0x24   : > { %457 = vmatprep.subr.bf16.mxu0 %v859_v15  ;;  %805 = vmatprep.subr.bf16.mxu1 %v859_v15 }
  0x27   : > { %458 = vmatpush1.bf16.msra.mxu0 %v861_v18  ;;  %813 = vmatpush1.bf16.msra.mxu1 %v861_v18 }
  0x28   : > { %459 = vmatprep.subr.bf16.mxu0 %v862_v19  ;;  %806 = vmatprep.subr.bf16.mxu1 %v862_v19 }
  0x2b   : > { %460 = vmatpush1.bf16.msra.mxu0 %v864_v22  ;;  %814 = vmatpush1.bf16.msra.mxu1 %v864_v22 }
  0x2c   : > { %461 = vmatprep.subr.bf16.mxu0 %v865_v23  ;;  %807 = vmatprep.subr.bf16.mxu1 %v865_v23 }
  0x2f   : > { %462 = vmatpush1.bf16.msra.mxu0 %v867_v26  ;;  %815 = vmatpush1.bf16.msra.mxu1 %v867_v26 }
  0x32   : > { %480 = vmatmul.mubr.bf16.vlgmr.msra.gmra.mrb[0].mxu0 %v868_v27  ;;  %520 = vmatmul.mubr.bf16.vlgmr.msra.gmra.mrb[0].mxu1 %v869_v28 }
  0x33   : > { %489 = vmatprep.mubr.bf16.mxu0 %v899_v0  ;;  %529 = vmatprep.mubr.bf16.mxu1 %v899_v0 }
  0x3a   : > { %490 = vmatmul.mubr.bf16.gmra.mrb[4].mxu0 %v870_v33  ;;  %530 = vmatmul.mubr.bf16.gmra.mrb[4].mxu1 %v871_v34 }
  0x3b   : > { %499 = vmatprep.mubr.bf16.mxu0 %v899_v0  ;;  %539 = vmatprep.mubr.bf16.mxu1 %v899_v0 }
  0x42   : > { %500 = vmatmul.mubr.bf16.gmra.mrb[8].mxu0 %v872_v35  ;;  %540 = vmatmul.mubr.bf16.gmra.mrb[8].mxu1 %v873_v36 }
  0x43   : > { %509 = vmatprep.mubr.bf16.mxu0 %v899_v0 }
  0x4a   : > { %510 = vmatmul.mubr.bf16.gmra.mrb[12].mxu0 %v874_v37 }
  0x88   : > { %v268_v38 = vpop.permute.xlu1 %267  ;;  %v258_v39 = vpop.permute.xlu0 %257 }
  0x8c   : > { %v273_v40 = vpop.permute.xlu1 %272  ;;  %v263_v41 = vpop.permute.xlu0 %262 }
  0x90   : > { %v1034_v42 = vpop.permute.xlu1 %282  ;;  %v1036_v43 = vpop.permute.xlu0 %277 }
  0x94   : > { %v1038_v44 = vpop.permute.xlu1 %292  ;;  %v1040_v45 = vpop.permute.xlu0 %287 }
  0x98   : > { %v303_v46 = vpop.permute.xlu1 %302  ;;  %v298_v47 = vpop.permute.xlu0 %297 }
  0x9c   : > { %v313_v5 = vpop.permute.xlu1 %312  ;;  %v308_v6 = vpop.permute.xlu0 %307 }
  0xa0   : > { %v323_v27 = vpop.permute.xlu1 %322  ;;  %v318_v28 = vpop.permute.xlu0 %317 }
 0x105   : > { %v481_v48 = vpop.f32.mrb[0].mxu0  ;;  %v521_v49 = vpop.f32.mrb[0].mxu1 }
 0x106   : > { %v482_v50 = vadd.f32 %v481_v48, %v258_v39  ;;  %v522_v51 = vadd.f32 %v521_v49, %v298_v47  ;;  %v483_v52 = vpop.f32.mrb[1].mxu0  ;;  %v523_v53 = vpop.f32.mrb[1].mxu1 }
 0x107   : > { %v484_v54 = vadd.f32 %v483_v52, %v258_v39  ;;  %v524_v55 = vadd.f32 %v523_v53, %v298_v47  ;;  %v485_v56 = vpop.f32.mrb[2].mxu0  ;;  %v525_v57 = vpop.f32.mrb[2].mxu1 }
 0x108   : > { %v486_v59 = vadd.f32 %v485_v56, %v263_v41  ;;  %v526_v60 = vadd.f32 %v525_v57, %v303_v46  ;;  %v487_v61 = vpop.f32.mrb[3].mxu0  ;;  %v527_v62 = vpop.f32.mrb[3].mxu1 }
 0x109   : > { %v786_v63 = vpack.c.bf16 %v484_v54, %v482_v50  ;;  %v794_v0 = vpack.c.bf16 %v524_v55, %v522_v51  ;;  %v488_v1 = vadd.f32 %v487_v61, %v263_v41  ;;  %v528_v2 = vadd.f32 %v527_v62, %v303_v46 }
 0x10b   : > { %637 = vst.msk [vmem:[%s1046_s20] sm:$0xff] %vm1048_vm2, %v786_v63  ;;  %645 = vst.msk [vmem:[%s1046_s20 + $0x40] sm:$0xff] %vm1048_vm2, %v794_v0  ;;  %v787_v3 = vpack.c.bf16 %v488_v1, %v486_v59  ;;  %v795_v4 = vpack.c.bf16 %v528_v2, %v526_v60 }
 0x10d   : > { %638 = vst.msk [vmem:[%s1046_s20 + $0x8] sm:$0xff] %vm1048_vm2, %v787_v3  ;;  %646 = vst.msk [vmem:[%s1046_s20 + $0x48] sm:$0xff] %vm1048_vm2, %v795_v4  ;;  %v491_v7 = vpop.f32.mrb[4].mxu0  ;;  %v531_v8 = vpop.f32.mrb[4].mxu1 }
 0x10e   : > { %v492_v9 = vadd.f32 %v491_v7, %v268_v38  ;;  %v532_v10 = vadd.f32 %v531_v8, %v308_v6  ;;  %v493_v11 = vpop.f32.mrb[5].mxu0  ;;  %v533_v12 = vpop.f32.mrb[5].mxu1 }
 0x10f   : > { %v494_v13 = vadd.f32 %v493_v11, %v268_v38  ;;  %v534_v14 = vadd.f32 %v533_v12, %v308_v6  ;;  %v495_v15 = vpop.f32.mrb[6].mxu0  ;;  %v535_v16 = vpop.f32.mrb[6].mxu1 }
 0x110   : > { %v496_v17 = vadd.f32 %v495_v15, %v273_v40  ;;  %v536_v18 = vadd.f32 %v535_v16, %v313_v5  ;;  %v497_v19 = vpop.f32.mrb[7].mxu0  ;;  %v537_v20 = vpop.f32.mrb[7].mxu1 }
 0x111   : > { %v788_v21 = vpack.c.bf16 %v494_v13, %v492_v9  ;;  %v796_v22 = vpack.c.bf16 %v534_v14, %v532_v10  ;;  %v498_v23 = vadd.f32 %v497_v19, %v273_v40  ;;  %v538_v24 = vadd.f32 %v537_v20, %v313_v5 }
 0x113   : > { %639 = vst.msk [vmem:[%s1046_s20 + $0x10] sm:$0xff] %vm1048_vm2, %v788_v21  ;;  %647 = vst.msk [vmem:[%s1046_s20 + $0x50] sm:$0xff] %vm1048_vm2, %v796_v22  ;;  %v789_v25 = vpack.c.bf16 %v498_v23, %v496_v17  ;;  %v797_v26 = vpack.c.bf16 %v538_v24, %v536_v18 }
 0x115   : > { %640 = vst.msk [vmem:[%s1046_s20 + $0x18] sm:$0xff] %vm1048_vm2, %v789_v25  ;;  %648 = vst.msk [vmem:[%s1046_s20 + $0x58] sm:$0xff] %vm1048_vm2, %v797_v26  ;;  %v501_v29 = vpop.f32.mrb[8].mxu0  ;;  %v541_v30 = vpop.f32.mrb[8].mxu1 }
 0x116   : > { %v502_v31 = vadd.f32 %v501_v29, %v1036_v43  ;;  %v542_v32 = vadd.f32 %v541_v30, %v318_v28  ;;  %v503_v33 = vpop.f32.mrb[9].mxu0  ;;  %v543_v34 = vpop.f32.mrb[9].mxu1 }
 0x117   : > { %v504_v35 = vadd.f32 %v503_v33, %v1036_v43  ;;  %v544_v36 = vadd.f32 %v543_v34, %v318_v28  ;;  %v505_v37 = vpop.f32.mrb[10].mxu0  ;;  %v545_v38 = vpop.f32.mrb[10].mxu1 }
 0x118   : > { %v506_v39 = vadd.f32 %v505_v37, %v1034_v42  ;;  %v546_v40 = vadd.f32 %v545_v38, %v323_v27  ;;  %v507_v41 = vpop.f32.mrb[11].mxu0  ;;  %v547_v46 = vpop.f32.mrb[11].mxu1 }
 0x119   : > { %v790_v47 = vpack.c.bf16 %v504_v35, %v502_v31  ;;  %v798_v48 = vpack.c.bf16 %v544_v36, %v542_v32  ;;  %v508_v49 = vadd.f32 %v507_v41, %v1034_v42  ;;  %v548_v50 = vadd.f32 %v547_v46, %v323_v27 }
 0x11b   : > { %641 = vst.msk [vmem:[%s1046_s20 + $0x20] sm:$0xff] %vm1048_vm2, %v790_v47  ;;  %649 = vst.msk [vmem:[%s1046_s20 + $0x60] sm:$0xff] %vm1048_vm2, %v798_v48  ;;  %v791_v43 = vpack.c.bf16 %v508_v49, %v506_v39  ;;  %v799_v51 = vpack.c.bf16 %v548_v50, %v546_v40 }
 0x11d   : > { %642 = vst.msk [vmem:[%s1046_s20 + $0x28] sm:$0xff] %vm1048_vm2, %v791_v43  ;;  %650 = vst.msk [vmem:[%s1046_s20 + $0x68] sm:$0xff] %vm1048_vm2, %v799_v51  ;;  %v511_v52 = vpop.f32.mrb[12].mxu0 }
 0x11e   : > { %v512_v42 = vadd.f32 %v511_v52, %v1040_v45  ;;  %v513_v53 = vpop.f32.mrb[13].mxu0 }
 0x11f   : > { %v514_v54 = vadd.f32 %v513_v53, %v1040_v45  ;;  %v515_v55 = vpop.f32.mrb[14].mxu0 }
 0x120   : > { %v516_v56 = vadd.f32 %v515_v55, %v1038_v44  ;;  %v517_v57 = vpop.f32.mrb[15].mxu0 }
 0x121   : > { %v792_v59 = vpack.c.bf16 %v514_v54, %v512_v42  ;;  %v518_v60 = vadd.f32 %v517_v57, %v1038_v44 }
 0x123   : > { %643 = vst.msk [vmem:[%s1046_s20 + $0x30] sm:$0xff] %vm1048_vm2, %v792_v59  ;;  %v793_v61 = vpack.c.bf16 %v518_v60, %v516_v56 }
 0x125   : > { %644 = vst.msk [vmem:[%s1046_s20 + $0x38] sm:$0xff] %vm1048_vm2, %v793_v61 }
 0x126 PF: > { %s13_s14 = sadd.s32 1, %s897_s14   ;;  %s1117_s12 = smov %s893_s13 }
 0x127   : > { %p10_p5 = scmp.ge.s32.totalorder %s13_s14, 4   ;;  %s1118_s13 = smov %s1120_s15 }
 0x129   :  { %12 = sbr.rel (!%p10_p5) target bundleno = 2 (0x2), region = 62 }

// kernel: taxibj_forward.87
= control target key start
LH: loop header
LB: loop body
LE: loop exit
PB: predicated region body
PF: predicated region fallthrough
CT: control target
= control target key end

     0   :  { %s1909_s12 = smov 0   ;;  %s1911_s13 = smov 0   ;;  %s2170_s0 = inlined_call_operand.vmem [shape: bf16[48,896], index: 0, kind: input, shape index: {}]   ;;  %s2171_s1 = inlined_call_operand.vmem [shape: f32[48,1], index: 1, kind: input, shape index: {}]   ;;  %s2172_s2 = inlined_call_operand.vmem [shape: bf16[2,896,144], index: 2, kind: input, shape index: {}]   ;;  %s2173_s3 = inlined_call_operand.vmem [shape: bf16[2,48,144], index: 3, kind: output, shape index: {}]  }
   0x1   :  { %s1913_s14 = smov 0  }
   0x2 LB: > { %s25_s15 = sadd.s32 1, %s1882_s13  ;;  %p1439_p0 = scmp.ge.s32.totalorder %s1886_s14, 1  ;;  %s1886_s14 = sphi %s1913_s14, %s13_s14   ;;  %s1882_s13 = sphi %s1911_s13, %s2177_s13   ;;  %s1878_s12 = sphi %s1909_s12, %s2176_s12  }
   0x3   : > { %p27_p1 = scmp.ge.s32.totalorder %s25_s15, 2  ;;  %p158_p2 = scmp.lt.s32.totalorder %s1886_s14, 3 }
   0x5   : > { %s2179_s15 = smov (%p27_p1, %s25_s15), 0  ;;  %p159_p3 = pnand %p1439_p0, %p158_p2 }
   0x6   : > { %p191_p4 = scmp.lt.s32.totalorder (!%p159_p3), %s1878_s12, 1  ;;  %v1764_v0 = vld [vmem:[%s2170_s0 + $0x4] ss:$28 sps:$4 sm:$0xff] (!%p159_p3)   ;;  %v1888_v1 = vmov (!%p159_p3), 0   ;;  %v1770_v2 = vld [vmem:[%s2170_s0 + $0x14] ss:$28 sps:$4 sm:$0xff] (!%p159_p3)  }
   0x7   : > { %162 = sbr.rel (%p159_p3) target bundleno = 385 (0x181), region = 32  ;;  %1664 = vset.pattern.permute.xlu0 (!%p159_p3), %v1888_v1  ;;  %1665 = vset.pattern.permute.xlu1 (!%p159_p3), %v1888_v1  ;;  %vm1339_vm0 = vcmask (!%p159_p3), 1043456   ;;  %vm1340_vm1 = vcmask (!%p159_p3), 130052  }
   0x8   : > { %1083 = vmatprep.mubr.bf16.mxu1 (!%p159_p3), %v1764_v0  ;;  %1209 = vmatprep.mubr.bf16.mxu0 (!%p159_p3), %v1770_v2  ;;  %vm2139_vm2 = vmor (!%p159_p3), %vm1340_vm1, %vm1339_vm0 }
   0xe   : > { %s2181_s12 = smov (!%p191_p4, %s1878_s12), 1 }
   0xf   : > { %s1637_s20 = smul.u32 896, %s2181_s12 }
  0x10   : > { %s1638_s29 = smul.u32 48, %s2181_s12 }
  0x11   : > { %s1941_s23 = scalar_lea.vmem %s2172_s2, %s1637_s20 }
  0x12   : > { %v1666_v3 = vld [vmem:[%s1941_s23 + $0x4] ss:$8 sps:$4 sm:$0xff]   ;;  %v1670_v5 = vld [vmem:[%s1941_s23] ss:$8 sps:$4 sm:$0xff]   ;;  %v1672_v7 = vld [vmem:[%s1941_s23 + $0x14] ss:$8 sps:$4 sm:$0xff]   ;;  %s2137_s5 = scalar_lea.vmem %s2173_s3, %s1638_s29 }
  0x13   : > { %v1668_v4 = vld [vmem:[%s1941_s23 + $0x204] ss:$8 sps:$4 sm:$0xff]   ;;  %1051 = vmatprep.subr.bf16.mxu1 %v1666_v3  ;;  %v1671_v6 = vld [vmem:[%s1941_s23 + $0x200] ss:$8 sps:$4 sm:$0xff]   ;;  %v1674_v8 = vld [vmem:[%s1941_s23 + $0x214] ss:$8 sps:$4 sm:$0xff]  }
  0x14   : > { %1177 = vmatprep.subr.bf16.mxu0 %v1668_v4  ;;  %1052 = vmatpush1.bf16.msra.mxu1 %v1670_v5  ;;  %v1676_v9 = vld [vmem:[%s1941_s23 + $0x10] ss:$8 sps:$4 sm:$0xff]   ;;  %v1678_v11 = vld [vmem:[%s1941_s23 + $0x24] ss:$8 sps:$4 sm:$0xff]   ;;  %v1682_v13 = vld [vmem:[%s1941_s23 + $0x20] ss:$8 sps:$4 sm:$0xff]  }
  0x15   : > { %1178 = vmatpush1.bf16.msra.mxu0 %v1671_v6  ;;  %1053 = vmatprep.subr.bf16.mxu1 %v1672_v7  ;;  %v1677_v10 = vld [vmem:[%s1941_s23 + $0x210] ss:$8 sps:$4 sm:$0xff]   ;;  %v1680_v12 = vld [vmem:[%s1941_s23 + $0x224] ss:$8 sps:$4 sm:$0xff]   ;;  %v1683_v14 = vld [vmem:[%s1941_s23 + $0x220] ss:$8 sps:$4 sm:$0xff]  }
  0x16   : > { %1179 = vmatprep.subr.bf16.mxu0 %v1674_v8  ;;  %v1684_v15 = vld [vmem:[%s1941_s23 + $0x34] ss:$8 sps:$4 sm:$0xff]   ;;  %v1688_v17 = vld [vmem:[%s1941_s23 + $0x30] ss:$8 sps:$4 sm:$0xff]   ;;  %v1690_v19 = vld [vmem:[%s1941_s23 + $0x44] ss:$8 sps:$4 sm:$0xff]  }
  0x17   : > { %v1686_v16 = vld [vmem:[%s1941_s23 + $0x234] ss:$8 sps:$4 sm:$0xff]   ;;  %v1689_v18 = vld [vmem:[%s1941_s23 + $0x230] ss:$8 sps:$4 sm:$0xff]   ;;  %v1692_v20 = vld [vmem:[%s1941_s23 + $0x244] ss:$8 sps:$4 sm:$0xff]  }
  0x18   : > { %1054 = vmatpush1.bf16.msra.mxu1 %v1676_v9  ;;  %v1694_v21 = vld [vmem:[%s1941_s23 + $0x40] ss:$8 sps:$4 sm:$0xff]   ;;  %v1696_v23 = vld [vmem:[%s1941_s23 + $0x54] ss:$8 sps:$4 sm:$0xff]   ;;  %v1700_v25 = vld [vmem:[%s1941_s23 + $0x50] ss:$8 sps:$4 sm:$0xff]  }
  0x19   : > { %1180 = vmatpush1.bf16.msra.mxu0 %v1677_v10  ;;  %1055 = vmatprep.subr.bf16.mxu1 %v1678_v11  ;;  %v1695_v22 = vld [vmem:[%s1941_s23 + $0x240] ss:$8 sps:$4 sm:$0xff]   ;;  %v1698_v24 = vld [vmem:[%s1941_s23 + $0x254] ss:$8 sps:$4 sm:$0xff]   ;;  %v1701_v26 = vld [vmem:[%s1941_s23 + $0x250] ss:$8 sps:$4 sm:$0xff]  }
  0x1a   : > { %1181 = vmatprep.subr.bf16.mxu0 %v1680_v12  ;;  %v1702_v27 = vld [vmem:[%s1941_s23 + $0x64] ss:$8 sps:$4 sm:$0xff]   ;;  %v1706_v29 = vld [vmem:[%s1941_s23 + $0x60] ss:$8 sps:$4 sm:$0xff]   ;;  %v1708_v31 = vld [vmem:[%s1941_s23 + $0x74] ss:$8 sps:$4 sm:$0xff]  }
  0x1b   : > { %v1704_v28 = vld [vmem:[%s1941_s23 + $0x264] ss:$8 sps:$4 sm:$0xff]   ;;  %v1707_v30 = vld [vmem:[%s1941_s23 + $0x260] ss:$8 sps:$4 sm:$0xff]   ;;  %v1710_v32 = vld [vmem:[%s1941_s23 + $0x274] ss:$8 sps:$4 sm:$0xff]  }
  0x1c   : > { %1056 = vmatpush1.bf16.msra.mxu1 %v1682_v13  ;;  %v1712_v33 = vld [vmem:[%s1941_s23 + $0x70] ss:$8 sps:$4 sm:$0xff]   ;;  %v1714_v35 = vld [vmem:[%s1941_s23 + $0x84] ss:$8 sps:$4 sm:$0xff]   ;;  %v1718_v37 = vld [vmem:[%s1941_s23 + $0x80] ss:$8 sps:$4 sm:$0xff]  }
  0x1d   : > { %1182 = vmatpush1.bf16.msra.mxu0 %v1683_v14  ;;  %1057 = vmatprep.subr.bf16.mxu1 %v1684_v15  ;;  %v1713_v34 = vld [vmem:[%s1941_s23 + $0x270] ss:$8 sps:$4 sm:$0xff]   ;;  %v1716_v36 = vld [vmem:[%s1941_s23 + $0x284] ss:$8 sps:$4 sm:$0xff]   ;;  %v1719_v38 = vld [vmem:[%s1941_s23 + $0x280] ss:$8 sps:$4 sm:$0xff]  }
  0x1e   : > { %1183 = vmatprep.subr.bf16.mxu0 %v1686_v16  ;;  %v1720_v39 = vld [vmem:[%s1941_s23 + $0x94] ss:$8 sps:$4 sm:$0xff]   ;;  %v1724_v41 = vld [vmem:[%s1941_s23 + $0x90] ss:$8 sps:$4 sm:$0xff]   ;;  %v1726_v43 = vld [vmem:[%s1941_s23 + $0xa4] ss:$8 sps:$4 sm:$0xff]  }
  0x1f   : > { %v1722_v40 = vld [vmem:[%s1941_s23 + $0x294] ss:$8 sps:$4 sm:$0xff]   ;;  %v1725_v42 = vld [vmem:[%s1941_s23 + $0x290] ss:$8 sps:$4 sm:$0xff]   ;;  %v1728_v44 = vld [vmem:[%s1941_s23 + $0x2a4] ss:$8 sps:$4 sm:$0xff]  }
  0x20   : > { %1058 = vmatpush1.bf16.msra.mxu1 %v1688_v17  ;;  %v1730_v45 = vld [vmem:[%s1941_s23 + $0xa0] ss:$8 sps:$4 sm:$0xff]   ;;  %v1732_v47 = vld [vmem:[%s1941_s23 + $0xb4] ss:$8 sps:$4 sm:$0xff]   ;;  %v1736_v49 = vld [vmem:[%s1941_s23 + $0xb0] ss:$8 sps:$4 sm:$0xff]  }
  0x21   : > { %1184 = vmatpush1.bf16.msra.mxu0 %v1689_v18  ;;  %1059 = vmatprep.subr.bf16.mxu1 %v1690_v19  ;;  %v1731_v46 = vld [vmem:[%s1941_s23 + $0x2a0] ss:$8 sps:$4 sm:$0xff]   ;;  %v1734_v48 = vld [vmem:[%s1941_s23 + $0x2b4] ss:$8 sps:$4 sm:$0xff]   ;;  %v1737_v50 = vld [vmem:[%s1941_s23 + $0x2b0] ss:$8 sps:$4 sm:$0xff]  }
  0x22   : > { %1185 = vmatprep.subr.bf16.mxu0 %v1692_v20  ;;  %v1738_v51 = vld [vmem:[%s1941_s23 + $0xc4] ss:$8 sps:$4 sm:$0xff]   ;;  %v1742_v53 = vld [vmem:[%s1941_s23 + $0xc0] ss:$8 sps:$4 sm:$0xff]   ;;  %v1744_v55 = vld [vmem:[%s1941_s23 + $0xd4] ss:$8 sps:$4 sm:$0xff]  }
  0x23   : > { %v1740_v52 = vld [vmem:[%s1941_s23 + $0x2c4] ss:$8 sps:$4 sm:$0xff]   ;;  %v1743_v54 = vld [vmem:[%s1941_s23 + $0x2c0] ss:$8 sps:$4 sm:$0xff]   ;;  %v1746_v56 = vld [vmem:[%s1941_s23 + $0x2d4] ss:$8 sps:$4 sm:$0xff]  }
  0x24   : > { %1060 = vmatpush1.bf16.msra.mxu1 %v1694_v21  ;;  %v1748_v57 = vld [vmem:[%s1941_s23 + $0xd0] ss:$8 sps:$4 sm:$0xff]   ;;  %v1750_v59 = vld [vmem:[%s1941_s23 + $0xe4] ss:$8 sps:$4 sm:$0xff]   ;;  %v1754_v61 = vld [vmem:[%s1941_s23 + $0xe0] ss:$8 sps:$4 sm:$0xff]  }
  0x25   : > { %1186 = vmatpush1.bf16.msra.mxu0 %v1695_v22  ;;  %1061 = vmatprep.subr.bf16.mxu1 %v1696_v23  ;;  %v1749_v58 = vld [vmem:[%s1941_s23 + $0x2d0] ss:$8 sps:$4 sm:$0xff]   ;;  %v1752_v60 = vld [vmem:[%s1941_s23 + $0x2e4] ss:$8 sps:$4 sm:$0xff]   ;;  %v1755_v62 = vld [vmem:[%s1941_s23 + $0x2e0] ss:$8 sps:$4 sm:$0xff]  }
  0x26   : > { %1187 = vmatprep.subr.bf16.mxu0 %v1698_v24  ;;  %v1756_v63 = vld [vmem:[%s1941_s23 + $0xf4] ss:$8 sps:$4 sm:$0xff]   ;;  %v1760_v2 = vld [vmem:[%s1941_s23 + $0xf0] ss:$8 sps:$4 sm:$0xff]   ;;  %v1767_v4 = vld [vmem:[%s1941_s23 + $0x104] ss:$8 sps:$4 sm:$0xff]  }
  0x27   : > { %v1758_v0 = vld [vmem:[%s1941_s23 + $0x2f4] ss:$8 sps:$4 sm:$0xff]   ;;  %v1761_v3 = vld [vmem:[%s1941_s23 + $0x2f0] ss:$8 sps:$4 sm:$0xff]   ;;  %v1773_v5 = vld [vmem:[%s1941_s23 + $0x304] ss:$8 sps:$4 sm:$0xff]  }
  0x28   : > { %1062 = vmatpush1.bf16.msra.mxu1 %v1700_v25  ;;  %v1762_v6 = vld [vmem:[%s2170_s0] ss:$28 sps:$4 sm:$0xff]   ;;  %v1768_v7 = vld [vmem:[%s2170_s0 + $0x10] ss:$28 sps:$4 sm:$0xff]   ;;  %v1797_v19 = vld [vmem:[%s2170_s0 + $0x48] ss:$28 sps:$4 sm:$0xff]  }
  0x29   : > { %1188 = vmatpush1.bf16.msra.mxu0 %v1701_v26  ;;  %1063 = vmatprep.subr.bf16.mxu1 %v1702_v27  ;;  %v1765_v8 = vld [vmem:[%s1941_s23 + $0x100] ss:$8 sps:$4 sm:$0xff]   ;;  %v1776_v10 = vld [vmem:[%s1941_s23 + $0x114] ss:$8 sps:$4 sm:$0xff]   ;;  %v1774_v13 = vld [vmem:[%s1941_s23 + $0x110] ss:$8 sps:$4 sm:$0xff]  }
  0x2a   : > { %1189 = vmatprep.subr.bf16.mxu0 %v1704_v28  ;;  %v1771_v9 = vld [vmem:[%s1941_s23 + $0x300] ss:$8 sps:$4 sm:$0xff]   ;;  %v1779_v11 = vld [vmem:[%s1941_s23 + $0x314] ss:$8 sps:$4 sm:$0xff]   ;;  %v1777_v14 = vld [vmem:[%s1941_s23 + $0x310] ss:$8 sps:$4 sm:$0xff]  }
  0x2b   : > { %v1792_v12 = vld [vmem:[%s2170_s0 + $0x4c] ss:$28 sps:$4 sm:$0xff]   ;;  %v1835_v17 = vld [vmem:[%s2170_s0 + $0x3c] ss:$28 sps:$4 sm:$0xff]   ;;  %v1807_v22 = vld [vmem:[%s2170_s0 + $0x84] ss:$28 sps:$4 sm:$0xff]  }
  0x2c   : > { %1064 = vmatpush1.bf16.msra.mxu1 %v1706_v29  ;;  %v1782_v15 = vld [vmem:[%s1941_s23 + $0x124] ss:$8 sps:$4 sm:$0xff]   ;;  %v1780_v18 = vld [vmem:[%s1941_s23 + $0x120] ss:$8 sps:$4 sm:$0xff]   ;;  %v1838_v20 = vld [vmem:[%s2170_s0 + $0x38] ss:$28 sps:$4 sm:$0xff]  }
  0x2d   : > { %1190 = vmatpush1.bf16.msra.mxu0 %v1707_v30  ;;  %1065 = vmatprep.subr.bf16.mxu1 %v1708_v31  ;;  %v1785_v16 = vld [vmem:[%s1941_s23 + $0x324] ss:$8 sps:$4 sm:$0xff]   ;;  %v1783_v21 = vld [vmem:[%s1941_s23 + $0x320] ss:$8 sps:$4 sm:$0xff]   ;;  %v1788_v23 = vld [vmem:[%s1941_s23 + $0x134] ss:$8 sps:$4 sm:$0xff]  }
  0x2e   : > { %1191 = vmatprep.subr.bf16.mxu0 %v1710_v32  ;;  %v1791_v24 = vld [vmem:[%s1941_s23 + $0x334] ss:$8 sps:$4 sm:$0xff]   ;;  %v1786_v26 = vld [vmem:[%s1941_s23 + $0x130] ss:$8 sps:$4 sm:$0xff]   ;;  %v1796_v28 = vld [vmem:[%s1941_s23 + $0x144] ss:$8 sps:$4 sm:$0xff]  }
  0x2f   : > { %v1845_v25 = vld [vmem:[%s2170_s0 + $0x74] ss:$28 sps:$4 sm:$0xff]   ;;  %v1800_v29 = vld [vmem:[%s1941_s23 + $0x344] ss:$8 sps:$4 sm:$0xff]   ;;  %v1794_v30 = vld [vmem:[%s1941_s23 + $0x140] ss:$8 sps:$4 sm:$0xff]  }
  0x30   : > { %1066 = vmatpush1.bf16.msra.mxu1 %v1712_v33  ;;  %v1789_v27 = vld [vmem:[%s1941_s23 + $0x330] ss:$8 sps:$4 sm:$0xff]   ;;  %v1812_v31 = vld [vmem:[%s2170_s0 + $0x80] ss:$28 sps:$4 sm:$0xff]  }
  0x31   : > { %1192 = vmatpush1.bf16.msra.mxu0 %v1713_v34  ;;  %1067 = vmatprep.subr.bf16.mxu1 %v1714_v35  ;;  %v1798_v32 = vld [vmem:[%s1941_s23 + $0x340] ss:$8 sps:$4 sm:$0xff]   ;;  %v1848_v33 = vld [vmem:[%s2170_s0 + $0x70] ss:$28 sps:$4 sm:$0xff]   ;;  %v1803_v34 = vld [vmem:[%s1941_s23 + $0x154] ss:$8 sps:$4 sm:$0xff]  }
  0x32   : > { %1193 = vmatprep.subr.bf16.mxu0 %v1716_v36  ;;  %v1806_v35 = vld [vmem:[%s1941_s23 + $0x354] ss:$8 sps:$4 sm:$0xff]   ;;  %v1857_v36 = vld [vmem:[%s2170_s0 + $0xc] ss:$28 sps:$4 sm:$0xff]  }
  0x34   : > { %1068 = vmatpush1.bf16.msra.mxu1 %v1718_v37  ;;  %v1801_v37 = vld [vmem:[%s1941_s23 + $0x150] ss:$8 sps:$4 sm:$0xff]  }
  0x35   : > { %1194 = vmatpush1.bf16.msra.mxu0 %v1719_v38  ;;  %1069 = vmatprep.subr.bf16.mxu1 %v1720_v39  ;;  %v1804_v38 = vld [vmem:[%s1941_s23 + $0x350] ss:$8 sps:$4 sm:$0xff]   ;;  %v347_v39 = vld [vmem:[%s2171_s1] sm:$0xff] }
  0x36   : > { %1195 = vmatprep.subr.bf16.mxu0 %v1722_v40  ;;  %v349_v40 = vld [vmem:[%s2171_s1 + $0x10] sm:$0xff]  ;;  %355 = vperm.xlu0 %1664, %v347_v39  }
  0x37   : > { %365 = vperm.xlu1 %1665, %v349_v40  }
  0x38   : > { %1070 = vmatpush1.bf16.msra.mxu1 %v1724_v41  ;;  %v1811_v41 = vld [vmem:[%s1941_s23 + $0x164] ss:$8 sps:$4 sm:$0xff]  }
  0x39   : > { %1196 = vmatpush1.bf16.msra.mxu0 %v1725_v42  ;;  %1071 = vmatprep.subr.bf16.mxu1 %v1726_v43  ;;  %v1815_v42 = vld [vmem:[%s1941_s23 + $0x364] ss:$8 sps:$4 sm:$0xff]   ;;  %v1809_v43 = vld [vmem:[%s1941_s23 + $0x160] ss:$8 sps:$4 sm:$0xff]  }
  0x3a   : > { %1197 = vmatprep.subr.bf16.mxu0 %v1728_v44  ;;  %v1813_v44 = vld [vmem:[%s1941_s23 + $0x360] ss:$8 sps:$4 sm:$0xff]  }
  0x3c   : > { %1072 = vmatpush1.bf16.msra.mxu1 %v1730_v45  ;;  %v348_v45 = vld [vmem:[%s2171_s1 + $0x8] sm:$0xff] }
  0x3d   : > { %1198 = vmatpush1.bf16.msra.mxu0 %v1731_v46  ;;  %1073 = vmatprep.subr.bf16.mxu1 %v1732_v47  ;;  %v350_v46 = vld [vmem:[%s2171_s1 + $0x18] sm:$0xff] }
  0x3e   : > { %1199 = vmatprep.subr.bf16.mxu0 %v1734_v48  ;;  %v1818_v47 = vld [vmem:[%s1941_s23 + $0x174] ss:$8 sps:$4 sm:$0xff]   ;;  %360 = vperm.xlu0 %1664, %v348_v45  }
  0x3f   : > { %v1821_v48 = vld [vmem:[%s1941_s23 + $0x374] ss:$8 sps:$4 sm:$0xff]   ;;  %370 = vperm.xlu1 %1665, %v350_v46  }
  0x40   : > { %1074 = vmatpush1.bf16.msra.mxu1 %v1736_v49  ;;  %v1816_v49 = vld [vmem:[%s1941_s23 + $0x170] ss:$8 sps:$4 sm:$0xff]  }
  0x41   : > { %1200 = vmatpush1.bf16.msra.mxu0 %v1737_v50  ;;  %1075 = vmatprep.subr.bf16.mxu1 %v1738_v51  ;;  %v1819_v50 = vld [vmem:[%s1941_s23 + $0x370] ss:$8 sps:$4 sm:$0xff]   ;;  %v352_v51 = vld [vmem:[%s2171_s1 + $0x28] sm:$0xff] }
  0x42   : > { %1201 = vmatprep.subr.bf16.mxu0 %v1740_v52  ;;  %v351_v52 = vld [vmem:[%s2171_s1 + $0x20] sm:$0xff] }
  0x43   : > { %380 = vperm.xlu1 %1665, %v352_v51   ;;  %375 = vperm.xlu0 %1664, %v351_v52  }
  0x44   : > { %1076 = vmatpush1.bf16.msra.mxu1 %v1742_v53  ;;  %v1824_v53 = vld [vmem:[%s1941_s23 + $0x184] ss:$8 sps:$4 sm:$0xff]  }
  0x45   : > { %1202 = vmatpush1.bf16.msra.mxu0 %v1743_v54  ;;  %1077 = vmatprep.subr.bf16.mxu1 %v1744_v55  ;;  %v1825_v54 = vld [vmem:[%s2170_s0 + $0x18] ss:$28 sps:$4 sm:$0xff]   ;;  %v1822_v55 = vld [vmem:[%s1941_s23 + $0x180] ss:$8 sps:$4 sm:$0xff]  }
  0x46   : > { %1203 = vmatprep.subr.bf16.mxu0 %v1746_v56  ;;  %v1828_v56 = vld [vmem:[%s1941_s23 + $0x194] ss:$8 sps:$4 sm:$0xff]  }
  0x48   : > { %1078 = vmatpush1.bf16.msra.mxu1 %v1748_v57  ;;  %v1826_v57 = vld [vmem:[%s1941_s23 + $0x190] ss:$8 sps:$4 sm:$0xff]  }
  0x49   : > { %1204 = vmatpush1.bf16.msra.mxu0 %v1749_v58  ;;  %1079 = vmatprep.subr.bf16.mxu1 %v1750_v59  ;;  %v1831_v58 = vld [vmem:[%s1941_s23 + $0x1a4] ss:$8 sps:$4 sm:$0xff]  }
  0x4a   : > { %1205 = vmatprep.subr.bf16.mxu0 %v1752_v60  ;;  %v1837_v59 = vld [vmem:[%s2170_s0 + $0x50] ss:$28 sps:$4 sm:$0xff]   ;;  %v1829_v60 = vld [vmem:[%s1941_s23 + $0x1a0] ss:$8 sps:$4 sm:$0xff]  }
  0x4c   : > { %1080 = vmatpush1.bf16.msra.mxu1 %v1754_v61  ;;  %v1834_v61 = vld [vmem:[%s1941_s23 + $0x1b4] ss:$8 sps:$4 sm:$0xff]  }
  0x4d   : > { %1206 = vmatpush1.bf16.msra.mxu0 %v1755_v62  ;;  %1081 = vmatprep.subr.bf16.mxu1 %v1756_v63  ;;  %v1832_v62 = vld [vmem:[%s1941_s23 + $0x1b0] ss:$8 sps:$4 sm:$0xff]   ;;  %v1841_v63 = vld [vmem:[%s1941_s23 + $0x1c4] ss:$8 sps:$4 sm:$0xff]  }
  0x4e   : > { %1207 = vmatprep.subr.bf16.mxu0 %v1758_v0  ;;  %v1847_v0 = vld [vmem:[%s2170_s0 + $0x88] ss:$28 sps:$4 sm:$0xff]  }
  0x50   : > { %1082 = vmatpush1.bf16.msra.mxu1 %v1760_v2  ;;  %v1839_v2 = vld [vmem:[%s1941_s23 + $0x1c0] ss:$8 sps:$4 sm:$0xff]  }
  0x51   : > { %1208 = vmatpush1.bf16.msra.mxu0 %v1761_v3  ;;  %1114 = vmatprep.subr.bf16.mxu1 %v1767_v4  ;;  %v1844_v3 = vld [vmem:[%s1941_s23 + $0x1d4] ss:$8 sps:$4 sm:$0xff]   ;;  %v1842_v4 = vld [vmem:[%s1941_s23 + $0x1d0] ss:$8 sps:$4 sm:$0xff]  }
  0x52   : > { %1240 = vmatprep.subr.bf16.mxu0 %v1773_v5  ;;  %v1851_v5 = vld [vmem:[%s1941_s23 + $0x1e4] ss:$8 sps:$4 sm:$0xff]  }
  0x53   : > { %1084 = vmatmul.mubr.bf16.vlgmr.msra.gmra.mrb[0].mxu1 %v1762_v6  ;;  %v1849_v6 = vld [vmem:[%s1941_s23 + $0x1e0] ss:$8 sps:$4 sm:$0xff]  }
  0x54   : > { %1210 = vmatmul.mubr.bf16.vlgmr.msra.gmra.mrb[0].mxu0 %v1768_v7  ;;  %1115 = vmatpush1.bf16.msra.mxu1 %v1765_v8  ;;  %v1852_v7 = vld [vmem:[%s1941_s23 + $0x1f0] ss:$8 sps:$4 sm:$0xff]   ;;  %v1855_v8 = vld [vmem:[%s2170_s0 + $0x8] ss:$28 sps:$4 sm:$0xff]  }
  0x55   : > { %1241 = vmatpush1.bf16.msra.mxu0 %v1771_v9  ;;  %1116 = vmatprep.subr.bf16.mxu1 %v1776_v10  ;;  %v1858_v9 = vld [vmem:[%s2170_s0 + $0x44] ss:$28 sps:$4 sm:$0xff]  }
  0x56   : > { %1242 = vmatprep.subr.bf16.mxu0 %v1779_v11  ;;  %1219 = vmatprep.mubr.bf16.mxu0 %v1792_v12  ;;  %v1860_v10 = vld [vmem:[%s2170_s0 + $0x40] ss:$28 sps:$4 sm:$0xff]   ;;  %v1863_v12 = vld [vmem:[%s2170_s0 + $0x78] ss:$28 sps:$4 sm:$0xff]  }
  0x57   : > { %1093 = vmatprep.mubr.bf16.mxu1 %v1835_v17  ;;  %v1861_v11 = vld [vmem:[%s2170_s0 + $0x7c] ss:$28 sps:$4 sm:$0xff]  }
  0x58   : > { %1117 = vmatpush1.bf16.msra.mxu1 %v1774_v13 }
  0x59   : > { %1243 = vmatpush1.bf16.msra.mxu0 %v1777_v14  ;;  %1118 = vmatprep.subr.bf16.mxu1 %v1782_v15 }
  0x5a   : > { %1244 = vmatprep.subr.bf16.mxu0 %v1785_v16 }
  0x5b   : > { %1094 = vmatmul.mubr.bf16.gmra.mrb[4].mxu1 %v1838_v20 }
  0x5c   : > { %1220 = vmatmul.mubr.bf16.gmra.mrb[4].mxu0 %v1797_v19  ;;  %1119 = vmatpush1.bf16.msra.mxu1 %v1780_v18 }
  0x5d   : > { %1245 = vmatpush1.bf16.msra.mxu0 %v1783_v21  ;;  %1120 = vmatprep.subr.bf16.mxu1 %v1788_v23 }
  0x5e   : > { %1246 = vmatprep.subr.bf16.mxu0 %v1791_v24  ;;  %1229 = vmatprep.mubr.bf16.mxu0 %v1807_v22 }
  0x5f   : > { %1103 = vmatprep.mubr.bf16.mxu1 %v1845_v25 }
  0x60   : > { %1121 = vmatpush1.bf16.msra.mxu1 %v1786_v26 }
  0x61   : > { %1247 = vmatpush1.bf16.msra.mxu0 %v1789_v27  ;;  %1122 = vmatprep.subr.bf16.mxu1 %v1796_v28 }
  0x62   : > { %1248 = vmatprep.subr.bf16.mxu0 %v1800_v29 }
  0x63   : > { %1104 = vmatmul.mubr.bf16.gmra.mrb[8].mxu1 %v1848_v33 }
  0x64   : > { %1230 = vmatmul.mubr.bf16.gmra.mrb[8].mxu0 %v1812_v31  ;;  %1123 = vmatpush1.bf16.msra.mxu1 %v1794_v30 }
  0x65   : > { %1249 = vmatpush1.bf16.msra.mxu0 %v1798_v32  ;;  %1124 = vmatprep.subr.bf16.mxu1 %v1803_v34 }
  0x66   : > { %1250 = vmatprep.subr.bf16.mxu0 %v1806_v35  ;;  %1272 = vmatprep.mubr.bf16.mxu0 %v1888_v1 }
  0x67   : > { %1146 = vmatprep.mubr.bf16.mxu1 %v1857_v36 }
  0x68   : > { %1125 = vmatpush1.bf16.msra.mxu1 %v1801_v37 }
  0x69   : > { %1251 = vmatpush1.bf16.msra.mxu0 %v1804_v38  ;;  %1126 = vmatprep.subr.bf16.mxu1 %v1811_v41 }
  0x6a   : > { %1252 = vmatprep.subr.bf16.mxu0 %v1815_v42 }
  0x6c   : > { %1127 = vmatpush1.bf16.msra.mxu1 %v1809_v43 }
  0x6d   : > { %1253 = vmatpush1.bf16.msra.mxu0 %v1813_v44  ;;  %1128 = vmatprep.subr.bf16.mxu1 %v1818_v47 }
  0x6e   : > { %1254 = vmatprep.subr.bf16.mxu0 %v1821_v48 }
  0x70   : > { %1129 = vmatpush1.bf16.msra.mxu1 %v1816_v49 }
  0x71   : > { %1255 = vmatpush1.bf16.msra.mxu0 %v1819_v50  ;;  %1130 = vmatprep.subr.bf16.mxu1 %v1824_v53 }
  0x74   : > { %1273 = vmatmul.mubr.bf16.vlgmr.msra.gmra.mrb[0].mxu0 %v1825_v54  ;;  %1131 = vmatpush1.bf16.msra.mxu1 %v1822_v55 }
  0x75   : > { %1282 = vmatprep.mubr.bf16.mxu0 %v1888_v1  ;;  %1132 = vmatprep.subr.bf16.mxu1 %v1828_v56 }
  0x78   : > { %1133 = vmatpush1.bf16.msra.mxu1 %v1826_v57 }
  0x79   : > { %1134 = vmatprep.subr.bf16.mxu1 %v1831_v58 }
  0x7c   : > { %1283 = vmatmul.mubr.bf16.gmra.mrb[4].mxu0 %v1837_v59  ;;  %1135 = vmatpush1.bf16.msra.mxu1 %v1829_v60 }
  0x7d   : > { %1292 = vmatprep.mubr.bf16.mxu0 %v1888_v1  ;;  %1136 = vmatprep.subr.bf16.mxu1 %v1834_v61  ;;  %v1854_v1 = vld [vmem:[%s1941_s23 + $0x1f4] ss:$8 sps:$4 sm:$0xff]  }
  0x80   : > { %1137 = vmatpush1.bf16.msra.mxu1 %v1832_v62 }
  0x81   : > { %1138 = vmatprep.subr.bf16.mxu1 %v1841_v63 }
  0x84   : > { %1293 = vmatmul.mubr.bf16.gmra.mrb[8].mxu0 %v1847_v0  ;;  %1139 = vmatpush1.bf16.msra.mxu1 %v1839_v2 }
  0x85   : > { %1140 = vmatprep.subr.bf16.mxu1 %v1844_v3 }
  0x88   : > { %1141 = vmatpush1.bf16.msra.mxu1 %v1842_v4 }
  0x89   : > { %1142 = vmatprep.subr.bf16.mxu1 %v1851_v5 }
  0x8c   : > { %1143 = vmatpush1.bf16.msra.mxu1 %v1849_v6 }
  0x8d   : > { %1144 = vmatprep.subr.bf16.mxu1 %v1854_v1 }
  0x90   : > { %1145 = vmatpush1.bf16.msra.mxu1 %v1852_v7 }
  0x93   : > { %1147 = vmatmul.mubr.bf16.vlgmr.msra.gmra.mrb[0].mxu1 %v1855_v8 }
  0x94   : > { %1156 = vmatprep.mubr.bf16.mxu1 %v1858_v9 }
  0x9b   : > { %1157 = vmatmul.mubr.bf16.gmra.mrb[4].mxu1 %v1860_v10 }
  0x9c   : > { %1166 = vmatprep.mubr.bf16.mxu1 %v1861_v11 }
  0xa3   : > { %1167 = vmatmul.mubr.bf16.gmra.mrb[8].mxu1 %v1863_v12 }
  0xb5   : > { %v356_v25 = vpop.permute.xlu0 %355 }
  0xb6   : > { %v366_v36 = vpop.permute.xlu1 %365 }
  0xbd   : > { %v361_v27 = vpop.permute.xlu0 %360 }
  0xbe   : > { %v371_v46 = vpop.permute.xlu1 %370 }
  0xc2   : > { %v376_v57 = vpop.permute.xlu0 %375  ;;  %v381_v62 = vpop.permute.xlu1 %380 }
 0x147   : > { %v1274_v13 = vpop.f32.mrb[0].mxu0 }
 0x148   : > { %v1276_v14 = vpop.f32.mrb[1].mxu0 }
 0x149   : > { %v1278_v15 = vpop.f32.mrb[2].mxu0 }
 0x14a   : > { %v1280_v16 = vpop.f32.mrb[3].mxu0 }
 0x14f   : > { %v1284_v17 = vpop.f32.mrb[4].mxu0 }
 0x150   : > { %v1286_v18 = vpop.f32.mrb[5].mxu0 }
 0x151   : > { %v1288_v19 = vpop.f32.mrb[6].mxu0 }
 0x152   : > { %v1290_v20 = vpop.f32.mrb[7].mxu0 }
 0x157   : > { %v1294_v21 = vpop.f32.mrb[8].mxu0 }
 0x158   : > { %v1296_v22 = vpop.f32.mrb[9].mxu0 }
 0x159   : > { %v1298_v23 = vpop.f32.mrb[10].mxu0 }
 0x15a   : > { %v1300_v24 = vpop.f32.mrb[11].mxu0 }
 0x166   : > { %v1148_v26 = vpop.f32.mrb[0].mxu1 }
 0x167   : > { %v1589_v28 = vadd.f32 %v1148_v26, %v356_v25  ;;  %v1150_v29 = vpop.f32.mrb[1].mxu1 }
 0x168   : > { %v1591_v30 = vadd.f32 %v1150_v29, %v356_v25  ;;  %v1152_v31 = vpop.f32.mrb[2].mxu1 }
 0x169   : > { %v1590_v32 = vadd.f32 %v1589_v28, %v1274_v13  ;;  %v1593_v33 = vadd.f32 %v1152_v31, %v361_v27  ;;  %v1154_v34 = vpop.f32.mrb[3].mxu1 }
 0x16a   : > { %v1592_v35 = vadd.f32 %v1591_v30, %v1276_v14  ;;  %v1595_v37 = vadd.f32 %v1154_v34, %v361_v27 }
 0x16b   : > { %v1594_v39 = vadd.f32 %v1593_v33, %v1278_v15 }
 0x16c   : > { %v1583_v40 = vpack.c.bf16 %v1592_v35, %v1590_v32  ;;  %v1596_v41 = vadd.f32 %v1595_v37, %v1280_v16 }
 0x16e   : > { %1342 = vst.msk [vmem:[%s2137_s5] sm:$0xff] %vm2139_vm2, %v1583_v40  ;;  %v1584_v42 = vpack.c.bf16 %v1596_v41, %v1594_v39  ;;  %v1158_v43 = vpop.f32.mrb[4].mxu1 }
 0x16f   : > { %v1597_v44 = vadd.f32 %v1158_v43, %v366_v36  ;;  %v1160_v45 = vpop.f32.mrb[5].mxu1 }
 0x170   : > { %1343 = vst.msk [vmem:[%s2137_s5 + $0x8] sm:$0xff] %vm2139_vm2, %v1584_v42  ;;  %v1599_v47 = vadd.f32 %v1160_v45, %v366_v36  ;;  %v1162_v48 = vpop.f32.mrb[6].mxu1 }
 0x171   : > { %v1598_v49 = vadd.f32 %v1597_v44, %v1284_v17  ;;  %v1601_v50 = vadd.f32 %v1162_v48, %v371_v46  ;;  %v1164_v51 = vpop.f32.mrb[7].mxu1 }
 0x172   : > { %v1600_v52 = vadd.f32 %v1599_v47, %v1286_v18  ;;  %v1603_v53 = vadd.f32 %v1164_v51, %v371_v46 }
 0x173   : > { %v1602_v54 = vadd.f32 %v1601_v50, %v1288_v19 }
 0x174   : > { %v1585_v55 = vpack.c.bf16 %v1600_v52, %v1598_v49  ;;  %v1604_v56 = vadd.f32 %v1603_v53, %v1290_v20 }
 0x176   : > { %1344 = vst.msk [vmem:[%s2137_s5 + $0x10] sm:$0xff] %vm2139_vm2, %v1585_v55  ;;  %v1586_v58 = vpack.c.bf16 %v1604_v56, %v1602_v54  ;;  %v1168_v59 = vpop.f32.mrb[8].mxu1 }
 0x177   : > { %v1605_v60 = vadd.f32 %v1168_v59, %v376_v57  ;;  %v1170_v61 = vpop.f32.mrb[9].mxu1 }
 0x178   : > { %1345 = vst.msk [vmem:[%s2137_s5 + $0x18] sm:$0xff] %vm2139_vm2, %v1586_v58  ;;  %v1607_v63 = vadd.f32 %v1170_v61, %v376_v57  ;;  %v1172_v0 = vpop.f32.mrb[10].mxu1 }
 0x179   : > { %v1606_v2 = vadd.f32 %v1605_v60, %v1294_v21  ;;  %v1609_v3 = vadd.f32 %v1172_v0, %v381_v62  ;;  %v1174_v4 = vpop.f32.mrb[11].mxu1 }
 0x17a   : > { %v1608_v5 = vadd.f32 %v1607_v63, %v1296_v22  ;;  %v1611_v6 = vadd.f32 %v1174_v4, %v381_v62 }
 0x17b   : > { %v1610_v1 = vadd.f32 %v1609_v3, %v1298_v23 }
 0x17c   : > { %v1587_v7 = vpack.c.bf16 %v1608_v5, %v1606_v2  ;;  %v1612_v8 = vadd.f32 %v1611_v6, %v1300_v24 }
 0x17e   : > { %1346 = vst.msk [vmem:[%s2137_s5 + $0x20] sm:$0xff] %vm2139_vm2, %v1587_v7  ;;  %v1588_v9 = vpack.c.bf16 %v1612_v8, %v1610_v1 }
 0x180   : > { %1347 = vst.msk [vmem:[%s2137_s5 + $0x28] sm:$0xff] %vm2139_vm2, %v1588_v9 }
 0x181 PF: > { %s13_s14 = sadd.s32 1, %s1886_s14   ;;  %s2176_s12 = smov %s1882_s13 }
 0x182   : > { %p10_p5 = scmp.ge.s32.totalorder %s13_s14, 4   ;;  %s2177_s13 = smov %s2179_s15 }
 0x184   :  { %12 = sbr.rel (!%p10_p5) target bundleno = 2 (0x2), region = 62 }

// kernel: taxibj_forward.94
= control target key start
LH: loop header
LB: loop body
LE: loop exit
PB: predicated region body
PF: predicated region fallthrough
CT: control target
= control target key end

     0   :  { %s485_s9 = smov 0   ;;  %s510_s0 = inlined_call_operand.vmem [shape: bf16[2,112,512], index: 0, kind: input, shape index: {}]   ;;  %s511_s1 = inlined_call_operand.vmem [shape: bf16[2,48,512], index: 1, kind: input, shape index: {}]   ;;  %s512_s2 = inlined_call_operand.vmem [shape: f32[2,16,512], index: 2, kind: output, shape index: {}]  }
   0x1 LB: > { %s390_s10 = sadd.s32 4294967295, %s468_s9   ;;  %p394_p0 = scmp.ge.s32.totalorder %s468_s9, 1  ;;  %s468_s9 = sphi %s485_s9, %s12_s9  }
   0x2   : > { %p124_p1 = scmp.lt.s32.totalorder %s468_s9, 3 }
   0x4   : > { %p125_p2 = pnand %p394_p0, %p124_p1 }
   0x5   : > { %p153_p3 = scmp.lt.s32.totalorder (!%p125_p2), %s390_s10, 1 }
   0x6   : > { %128 = sbr.rel (%p125_p2) target bundleno = 376 (0x178), region = 28 }
   0xd   : > { %s514_s10 = smov (!%p153_p3, %s390_s10), 1 }
   0xe   : > { %s395_s11 = smul.u32 224, %s514_s10  ;;  %s417_s19 = sshll.u32 %s514_s10, 6 }
   0xf   : > { %s396_s12 = smul.u32 96, %s514_s10  ;;  %s169_s22 = scalar_lea.vmem %s512_s2, %s417_s19 }
  0x10   : > { %s352_s15 = scalar_lea.vmem %s510_s0, %s395_s11 }
  0x11   : > { %s356_s18 = scalar_lea.vmem %s511_s1, %s396_s12  ;;  %v399_v0 = vld [vmem:[%s352_s15 + $0xa0] sm:$0xff]  ;;  %v400_v1 = vld [vmem:[%s352_s15 + $0xa8] sm:$0xff]  ;;  %v401_v2 = vld [vmem:[%s352_s15 + $0xb0] sm:$0xff] }
  0x12   : > { %v174_v3 = vunpack.c.l.bf16 %v399_v0  ;;  %v175_v4 = vunpack.c.h.bf16 %v399_v0  ;;  %v176_v5 = vunpack.c.l.bf16 %v400_v1  ;;  %v177_v6 = vunpack.c.h.bf16 %v400_v1  ;;  %v403_v7 = vld [vmem:[%s356_s18 + $0x40] sm:$0xff]  ;;  %v404_v8 = vld [vmem:[%s356_s18 + $0x48] sm:$0xff]  ;;  %v402_v9 = vld [vmem:[%s352_s15 + $0xb8] sm:$0xff] }
  0x13   : > { %v186_v10 = vunpack.c.l.bf16 %v403_v7  ;;  %v187_v11 = vunpack.c.h.bf16 %v403_v7  ;;  %v188_v12 = vunpack.c.l.bf16 %v404_v8  ;;  %v189_v13 = vunpack.c.h.bf16 %v404_v8  ;;  %v405_v14 = vld [vmem:[%s356_s18 + $0x50] sm:$0xff]  ;;  %v406_v15 = vld [vmem:[%s356_s18 + $0x58] sm:$0xff] }
  0x14   : > { %v178_v16 = vunpack.c.l.bf16 %v401_v2  ;;  %v179_v17 = vunpack.c.h.bf16 %v401_v2  ;;  %v180_v18 = vunpack.c.l.bf16 %v402_v9  ;;  %v181_v22 = vunpack.c.h.bf16 %v402_v9 }
  0x15   : > { %v194_v19 = vadd.f32 %v186_v10, %v174_v3  ;;  %v195_v20 = vadd.f32 %v187_v11, %v175_v4  ;;  %v196_v21 = vadd.f32 %v188_v12, %v176_v5  ;;  %v190_v23 = vunpack.c.l.bf16 %v405_v14 }
  0x16   : > { %v191_v24 = vunpack.c.h.bf16 %v405_v14  ;;  %v192_v25 = vunpack.c.l.bf16 %v406_v15  ;;  %v193_v26 = vunpack.c.h.bf16 %v406_v15  ;;  %v197_v27 = vadd.f32 %v189_v13, %v177_v6 }
  0x17   : > { %v202_v28 = vadd.f32 %v195_v20, %v194_v19  ;;  %v198_v29 = vadd.f32 %v190_v23, %v178_v16 }
  0x18   : > { %v199_v30 = vadd.f32 %v191_v24, %v179_v17  ;;  %v200_v31 = vadd.f32 %v192_v25, %v180_v18  ;;  %v201_v33 = vadd.f32 %v193_v26, %v181_v22 }
  0x19   : > { %v203_v32 = vadd.f32 %v202_v28, %v196_v21 }
  0x1a   : > { %v207_v34 = vadd.f32 %v199_v30, %v198_v29 }
  0x1b   : > { %v204_v35 = vadd.f32 %v203_v32, %v197_v27 }
  0x1c   : > { %v208_v36 = vadd.f32 %v207_v34, %v200_v31 }
  0x1d   : > { %205 = vadd.xlane.f32.xlu0 %v204_v35 }
  0x1e   : > { %v209_v37 = vadd.f32 %v208_v36, %v201_v33 }
  0x21   : > { %210 = vadd.xlane.f32.xlu0 %v209_v37 }
  0xaa   : > { %v206_v38 = vpop.xlane.xlu0 %205 }
  0xab   : > { %v213_v39 = vmul.f32 0.001953125, %v206_v38 }
  0xad   : > { %v215_v40 = vsub.f32 %v194_v19, %v213_v39  ;;  %v216_v41 = vsub.f32 %v195_v20, %v213_v39  ;;  %v217_v42 = vsub.f32 %v196_v21, %v213_v39  ;;  %v218_v44 = vsub.f32 %v197_v27, %v213_v39 }
  0xae   : > { %v211_v43 = vpop.xlane.xlu0 %210 }
  0xaf   : > { %v214_v45 = vmul.f32 0.001953125, %v211_v43  ;;  %v223_v46 = vmul.f32 %v215_v40, %v215_v40  ;;  %v224_v47 = vmul.f32 %v216_v41, %v216_v41  ;;  %v225_v48 = vmul.f32 %v217_v42, %v217_v42 }
  0xb0   : > { %v226_v53 = vmul.f32 %v218_v44, %v218_v44 }
  0xb1   : > { %v219_v49 = vsub.f32 %v198_v29, %v214_v45  ;;  %v220_v50 = vsub.f32 %v199_v30, %v214_v45  ;;  %v231_v51 = vadd.f32 %v224_v47, %v223_v46  ;;  %v221_v52 = vsub.f32 %v200_v31, %v214_v45 }
  0xb2   : > { %v222_v55 = vsub.f32 %v201_v33, %v214_v45 }
  0xb3   : > { %v232_v54 = vadd.f32 %v231_v51, %v225_v48  ;;  %v227_v56 = vmul.f32 %v219_v49, %v219_v49  ;;  %v228_v57 = vmul.f32 %v220_v50, %v220_v50  ;;  %v229_v59 = vmul.f32 %v221_v52, %v221_v52 }
  0xb4   : > { %v230_v61 = vmul.f32 %v222_v55, %v222_v55 }
  0xb5   : > { %v233_v58 = vadd.f32 %v232_v54, %v226_v53  ;;  %v236_v60 = vadd.f32 %v228_v57, %v227_v56 }
  0xb7   : > { %234 = vadd.xlane.f32.xlu1 %v233_v58  ;;  %v237_v62 = vadd.f32 %v236_v60, %v229_v59 }
  0xb9   : > { %v238_v63 = vadd.f32 %v237_v62, %v230_v61 }
  0xbb   : > { %239 = vadd.xlane.f32.xlu1 %v238_v63 }
 0x144   : > { %v235_v0 = vpop.xlane.xlu1 %234 }
 0x145   : > { %v241_v1 = vmul.f32 0.001953125, %v235_v0 }
 0x147   : > { %v243_v2 = vadd.f32 1e-05, %v241_v1 }
 0x148   : > { %v240_v3 = vpop.xlane.xlu1 %239 }
 0x149   : > { %426 = vrsqrt.f32 %v243_v2  ;;  %v242_v4 = vmul.f32 0.001953125, %v240_v3 }
 0x14b   : > { %v244_v5 = vadd.f32 1e-05, %v242_v4 }
 0x14d   : > { %428 = vrsqrt.f32 %v244_v5 }
 0x153   : > { %v427_v6 = vpop.eup %426 }
 0x154   : > { %v247_v7 = vmul.f32 %v427_v6, %v215_v40  ;;  %v248_v8 = vmul.f32 %v427_v6, %v216_v41  ;;  %v249_v9 = vmul.f32 %v427_v6, %v217_v42  ;;  %v250_v10 = vmul.f32 %v427_v6, %v218_v44 }
 0x156   : > { %v407_v11 = vmul.f32 -1.442695, %v247_v7  ;;  %v408_v12 = vmul.f32 -1.442695, %v248_v8  ;;  %v409_v13 = vmul.f32 -1.442695, %v249_v9 }
 0x157   : > { %v429_v14 = vpop.eup %428  ;;  %v410_v15 = vmul.f32 -1.442695, %v250_v10 }
 0x158   : > { %430 = vpow2.f32 %v407_v11  ;;  %v251_v16 = vmul.f32 %v429_v14, %v219_v49  ;;  %v252_v17 = vmul.f32 %v429_v14, %v220_v50  ;;  %v253_v18 = vmul.f32 %v429_v14, %v221_v52 }
 0x159   : > { %432 = vpow2.f32 %v408_v12  ;;  %v254_v19 = vmul.f32 %v429_v14, %v222_v55 }
 0x15a   : > { %434 = vpow2.f32 %v409_v13  ;;  %v411_v20 = vmul.f32 -1.442695, %v251_v16  ;;  %v412_v21 = vmul.f32 -1.442695, %v252_v17  ;;  %v413_v22 = vmul.f32 -1.442695, %v253_v18 }
 0x15b   : > { %436 = vpow2.f32 %v410_v15  ;;  %v414_v23 = vmul.f32 -1.442695, %v254_v19 }
 0x15c   : > { %438 = vpow2.f32 %v411_v20 }
 0x15d   : > { %440 = vpow2.f32 %v412_v21 }
 0x15e   : > { %442 = vpow2.f32 %v413_v22 }
 0x15f   : > { %444 = vpow2.f32 %v414_v23 }
 0x162   : > { %v431_v24 = vpop.eup %430 }
 0x163   : > { %v433_v25 = vpop.eup %432  ;;  %v279_v26 = vadd.f32 1.0, %v431_v24 }
 0x164   : > { %v435_v27 = vpop.eup %434  ;;  %v280_v28 = vadd.f32 1.0, %v433_v25 }
 0x165   : > { %v437_v29 = vpop.eup %436  ;;  %v281_v30 = vadd.f32 1.0, %v435_v27  ;;  %446 = vrcp.f32 %v279_v26 }
 0x166   : > { %v439_v31 = vpop.eup %438  ;;  %v282_v32 = vadd.f32 1.0, %v437_v29  ;;  %448 = vrcp.f32 %v280_v28 }
 0x167   : > { %v441_v33 = vpop.eup %440  ;;  %450 = vrcp.f32 %v281_v30  ;;  %v283_v34 = vadd.f32 1.0, %v439_v31 }
 0x168   : > { %v443_v35 = vpop.eup %442  ;;  %452 = vrcp.f32 %v282_v32  ;;  %v284_v36 = vadd.f32 1.0, %v441_v33 }
 0x169   : > { %v445_v37 = vpop.eup %444  ;;  %v285_v38 = vadd.f32 1.0, %v443_v35  ;;  %454 = vrcp.f32 %v283_v34 }
 0x16a   : > { %v286_v39 = vadd.f32 1.0, %v445_v37  ;;  %456 = vrcp.f32 %v284_v36 }
 0x16b   : > { %458 = vrcp.f32 %v285_v38 }
 0x16c   : > { %460 = vrcp.f32 %v286_v39 }
 0x16f   : > { %v447_v40 = vpop.eup %446 }
 0x170   : > { %v449_v41 = vpop.eup %448  ;;  %303 = vst [vmem:[%s169_s22] sm:$0xff] %v447_v40 }
 0x171   : > { %v451_v42 = vpop.eup %450  ;;  %304 = vst [vmem:[%s169_s22 + $0x8] sm:$0xff] %v449_v41 }
 0x172   : > { %v453_v43 = vpop.eup %452  ;;  %305 = vst [vmem:[%s169_s22 + $0x10] sm:$0xff] %v451_v42 }
 0x173   : > { %v455_v44 = vpop.eup %454  ;;  %306 = vst [vmem:[%s169_s22 + $0x18] sm:$0xff] %v453_v43 }
 0x174   : > { %v457_v45 = vpop.eup %456  ;;  %307 = vst [vmem:[%s169_s22 + $0x20] sm:$0xff] %v455_v44 }
 0x175   : > { %v459_v46 = vpop.eup %458  ;;  %308 = vst [vmem:[%s169_s22 + $0x28] sm:$0xff] %v457_v45 }
 0x176   : > { %v461_v47 = vpop.eup %460  ;;  %309 = vst [vmem:[%s169_s22 + $0x30] sm:$0xff] %v459_v46 }
 0x177   : > { %310 = vst [vmem:[%s169_s22 + $0x38] sm:$0xff] %v461_v47 }
 0x178 PF: > { %s12_s9 = sadd.s32 1, %s468_s9  }
 0x179   : > { %p9_p4 = scmp.ge.s32.totalorder %s12_s9, 4  }
 0x17b   :  { %11 = sbr.rel (!%p9_p4) target bundleno = 1 (0x1), region = 61 }

// kernel: taxibj_forward.92
= control target key start
LH: loop header
LB: loop body
LE: loop exit
PB: predicated region body
PF: predicated region fallthrough
CT: control target
= control target key end

     0   :  { %s473_s9 = smov 0   ;;  %s498_s0 = inlined_call_operand.vmem [shape: bf16[2,112,512], index: 0, kind: input, shape index: {}]   ;;  %s499_s1 = inlined_call_operand.vmem [shape: bf16[2,48,512], index: 1, kind: input, shape index: {}]   ;;  %s500_s2 = inlined_call_operand.vmem [shape: f32[2,16,512], index: 2, kind: output, shape index: {}]  }
   0x1 LB: > { %s381_s10 = sadd.s32 4294967295, %s456_s9   ;;  %p385_p0 = scmp.ge.s32.totalorder %s456_s9, 1  ;;  %s456_s9 = sphi %s473_s9, %s12_s9  }
   0x2   : > { %p123_p1 = scmp.lt.s32.totalorder %s456_s9, 3 }
   0x4   : > { %p124_p2 = pnand %p385_p0, %p123_p1 }
   0x5   : > { %p151_p3 = scmp.lt.s32.totalorder (!%p124_p2), %s381_s10, 1 }
   0x6   : > { %127 = sbr.rel (%p124_p2) target bundleno = 376 (0x178), region = 28 }
   0xd   : > { %s502_s10 = smov (!%p151_p3, %s381_s10), 1 }
   0xe   : > { %s386_s11 = smul.u32 224, %s502_s10  ;;  %s404_s19 = sshll.u32 %s502_s10, 6 }
   0xf   : > { %s405_s12 = smul.u32 96, %s502_s10  ;;  %s166_s22 = scalar_lea.vmem %s500_s2, %s404_s19 }
  0x10   : > { %s345_s15 = scalar_lea.vmem %s498_s0, %s386_s11 }
  0x11   : > { %s161_s18 = scalar_lea.vmem %s499_s1, %s405_s12  ;;  %v390_v0 = vld [vmem:[%s345_s15 + $0x60] sm:$0xff]  ;;  %v391_v1 = vld [vmem:[%s345_s15 + $0x68] sm:$0xff]  ;;  %v392_v2 = vld [vmem:[%s345_s15 + $0x70] sm:$0xff] }
  0x12   : > { %v171_v3 = vunpack.c.l.bf16 %v390_v0  ;;  %v172_v4 = vunpack.c.h.bf16 %v390_v0  ;;  %v173_v5 = vunpack.c.l.bf16 %v391_v1  ;;  %v174_v6 = vunpack.c.h.bf16 %v391_v1  ;;  %v179_v7 = vld [vmem:[%s161_s18] sm:$0xff]  ;;  %v180_v8 = vld [vmem:[%s161_s18 + $0x8] sm:$0xff]  ;;  %v393_v9 = vld [vmem:[%s345_s15 + $0x78] sm:$0xff] }
  0x13   : > { %v183_v10 = vunpack.c.l.bf16 %v179_v7  ;;  %v184_v11 = vunpack.c.h.bf16 %v179_v7  ;;  %v185_v12 = vunpack.c.l.bf16 %v180_v8  ;;  %v186_v13 = vunpack.c.h.bf16 %v180_v8  ;;  %v181_v14 = vld [vmem:[%s161_s18 + $0x10] sm:$0xff]  ;;  %v182_v15 = vld [vmem:[%s161_s18 + $0x18] sm:$0xff] }
  0x14   : > { %v175_v16 = vunpack.c.l.bf16 %v392_v2  ;;  %v176_v17 = vunpack.c.h.bf16 %v392_v2  ;;  %v177_v18 = vunpack.c.l.bf16 %v393_v9  ;;  %v178_v22 = vunpack.c.h.bf16 %v393_v9 }
  0x15   : > { %v191_v19 = vadd.f32 %v183_v10, %v171_v3  ;;  %v192_v20 = vadd.f32 %v184_v11, %v172_v4  ;;  %v193_v21 = vadd.f32 %v185_v12, %v173_v5  ;;  %v187_v23 = vunpack.c.l.bf16 %v181_v14 }
  0x16   : > { %v188_v24 = vunpack.c.h.bf16 %v181_v14  ;;  %v189_v25 = vunpack.c.l.bf16 %v182_v15  ;;  %v190_v26 = vunpack.c.h.bf16 %v182_v15  ;;  %v194_v27 = vadd.f32 %v186_v13, %v174_v6 }
  0x17   : > { %v199_v28 = vadd.f32 %v192_v20, %v191_v19  ;;  %v195_v29 = vadd.f32 %v187_v23, %v175_v16 }
  0x18   : > { %v196_v30 = vadd.f32 %v188_v24, %v176_v17  ;;  %v197_v31 = vadd.f32 %v189_v25, %v177_v18  ;;  %v198_v33 = vadd.f32 %v190_v26, %v178_v22 }
  0x19   : > { %v200_v32 = vadd.f32 %v199_v28, %v193_v21 }
  0x1a   : > { %v204_v34 = vadd.f32 %v196_v30, %v195_v29 }
  0x1b   : > { %v201_v35 = vadd.f32 %v200_v32, %v194_v27 }
  0x1c   : > { %v205_v36 = vadd.f32 %v204_v34, %v197_v31 }
  0x1d   : > { %202 = vadd.xlane.f32.xlu0 %v201_v35 }
  0x1e   : > { %v206_v37 = vadd.f32 %v205_v36, %v198_v33 }
  0x21   : > { %207 = vadd.xlane.f32.xlu0 %v206_v37 }
  0xaa   : > { %v203_v38 = vpop.xlane.xlu0 %202 }
  0xab   : > { %v210_v39 = vmul.f32 0.001953125, %v203_v38 }
  0xad   : > { %v212_v40 = vsub.f32 %v191_v19, %v210_v39  ;;  %v213_v41 = vsub.f32 %v192_v20, %v210_v39  ;;  %v214_v42 = vsub.f32 %v193_v21, %v210_v39  ;;  %v215_v44 = vsub.f32 %v194_v27, %v210_v39 }
  0xae   : > { %v208_v43 = vpop.xlane.xlu0 %207 }
  0xaf   : > { %v211_v45 = vmul.f32 0.001953125, %v208_v43  ;;  %v220_v46 = vmul.f32 %v212_v40, %v212_v40  ;;  %v221_v47 = vmul.f32 %v213_v41, %v213_v41  ;;  %v222_v48 = vmul.f32 %v214_v42, %v214_v42 }
  0xb0   : > { %v223_v53 = vmul.f32 %v215_v44, %v215_v44 }
  0xb1   : > { %v216_v49 = vsub.f32 %v195_v29, %v211_v45  ;;  %v217_v50 = vsub.f32 %v196_v30, %v211_v45  ;;  %v228_v51 = vadd.f32 %v221_v47, %v220_v46  ;;  %v218_v52 = vsub.f32 %v197_v31, %v211_v45 }
  0xb2   : > { %v219_v55 = vsub.f32 %v198_v33, %v211_v45 }
  0xb3   : > { %v229_v54 = vadd.f32 %v228_v51, %v222_v48  ;;  %v224_v56 = vmul.f32 %v216_v49, %v216_v49  ;;  %v225_v57 = vmul.f32 %v217_v50, %v217_v50  ;;  %v226_v59 = vmul.f32 %v218_v52, %v218_v52 }
  0xb4   : > { %v227_v61 = vmul.f32 %v219_v55, %v219_v55 }
  0xb5   : > { %v230_v58 = vadd.f32 %v229_v54, %v223_v53  ;;  %v233_v60 = vadd.f32 %v225_v57, %v224_v56 }
  0xb7   : > { %231 = vadd.xlane.f32.xlu1 %v230_v58  ;;  %v234_v62 = vadd.f32 %v233_v60, %v226_v59 }
  0xb9   : > { %v235_v63 = vadd.f32 %v234_v62, %v227_v61 }
  0xbb   : > { %236 = vadd.xlane.f32.xlu1 %v235_v63 }
 0x144   : > { %v232_v0 = vpop.xlane.xlu1 %231 }
 0x145   : > { %v238_v1 = vmul.f32 0.001953125, %v232_v0 }
 0x147   : > { %v240_v2 = vadd.f32 1e-05, %v238_v1 }
 0x148   : > { %v237_v3 = vpop.xlane.xlu1 %236 }
 0x149   : > { %414 = vrsqrt.f32 %v240_v2  ;;  %v239_v4 = vmul.f32 0.001953125, %v237_v3 }
 0x14b   : > { %v241_v5 = vadd.f32 1e-05, %v239_v4 }
 0x14d   : > { %416 = vrsqrt.f32 %v241_v5 }
 0x153   : > { %v415_v6 = vpop.eup %414 }
 0x154   : > { %v244_v7 = vmul.f32 %v415_v6, %v212_v40  ;;  %v245_v8 = vmul.f32 %v415_v6, %v213_v41  ;;  %v246_v9 = vmul.f32 %v415_v6, %v214_v42  ;;  %v247_v10 = vmul.f32 %v415_v6, %v215_v44 }
 0x156   : > { %v394_v11 = vmul.f32 -1.442695, %v244_v7  ;;  %v395_v12 = vmul.f32 -1.442695, %v245_v8  ;;  %v396_v13 = vmul.f32 -1.442695, %v246_v9 }
 0x157   : > { %v417_v14 = vpop.eup %416  ;;  %v397_v15 = vmul.f32 -1.442695, %v247_v10 }
 0x158   : > { %418 = vpow2.f32 %v394_v11  ;;  %v248_v16 = vmul.f32 %v417_v14, %v216_v49  ;;  %v249_v17 = vmul.f32 %v417_v14, %v217_v50  ;;  %v250_v18 = vmul.f32 %v417_v14, %v218_v52 }
 0x159   : > { %420 = vpow2.f32 %v395_v12  ;;  %v251_v19 = vmul.f32 %v417_v14, %v219_v55 }
 0x15a   : > { %422 = vpow2.f32 %v396_v13  ;;  %v398_v20 = vmul.f32 -1.442695, %v248_v16  ;;  %v399_v21 = vmul.f32 -1.442695, %v249_v17  ;;  %v400_v22 = vmul.f32 -1.442695, %v250_v18 }
 0x15b   : > { %424 = vpow2.f32 %v397_v15  ;;  %v401_v23 = vmul.f32 -1.442695, %v251_v19 }
 0x15c   : > { %426 = vpow2.f32 %v398_v20 }
 0x15d   : > { %428 = vpow2.f32 %v399_v21 }
 0x15e   : > { %430 = vpow2.f32 %v400_v22 }
 0x15f   : > { %432 = vpow2.f32 %v401_v23 }
 0x162   : > { %v419_v24 = vpop.eup %418 }
 0x163   : > { %v421_v25 = vpop.eup %420  ;;  %v276_v26 = vadd.f32 1.0, %v419_v24 }
 0x164   : > { %v423_v27 = vpop.eup %422  ;;  %v277_v28 = vadd.f32 1.0, %v421_v25 }
 0x165   : > { %v425_v29 = vpop.eup %424  ;;  %v278_v30 = vadd.f32 1.0, %v423_v27  ;;  %434 = vrcp.f32 %v276_v26 }
 0x166   : > { %v427_v31 = vpop.eup %426  ;;  %v279_v32 = vadd.f32 1.0, %v425_v29  ;;  %436 = vrcp.f32 %v277_v28 }
 0x167   : > { %v429_v33 = vpop.eup %428  ;;  %438 = vrcp.f32 %v278_v30  ;;  %v280_v34 = vadd.f32 1.0, %v427_v31 }
 0x168   : > { %v431_v35 = vpop.eup %430  ;;  %440 = vrcp.f32 %v279_v32  ;;  %v281_v36 = vadd.f32 1.0, %v429_v33 }
 0x169   : > { %v433_v37 = vpop.eup %432  ;;  %v282_v38 = vadd.f32 1.0, %v431_v35  ;;  %442 = vrcp.f32 %v280_v34 }
 0x16a   : > { %v283_v39 = vadd.f32 1.0, %v433_v37  ;;  %444 = vrcp.f32 %v281_v36 }
 0x16b   : > { %446 = vrcp.f32 %v282_v38 }
 0x16c   : > { %448 = vrcp.f32 %v283_v39 }
 0x16f   : > { %v435_v40 = vpop.eup %434 }
 0x170   : > { %v437_v41 = vpop.eup %436  ;;  %300 = vst [vmem:[%s166_s22] sm:$0xff] %v435_v40 }
 0x171   : > { %v439_v42 = vpop.eup %438  ;;  %301 = vst [vmem:[%s166_s22 + $0x8] sm:$0xff] %v437_v41 }
 0x172   : > { %v441_v43 = vpop.eup %440  ;;  %302 = vst [vmem:[%s166_s22 + $0x10] sm:$0xff] %v439_v42 }
 0x173   : > { %v443_v44 = vpop.eup %442  ;;  %303 = vst [vmem:[%s166_s22 + $0x18] sm:$0xff] %v441_v43 }
 0x174   : > { %v445_v45 = vpop.eup %444  ;;  %304 = vst [vmem:[%s166_s22 + $0x20] sm:$0xff] %v443_v44 }
 0x175   : > { %v447_v46 = vpop.eup %446  ;;  %305 = vst [vmem:[%s166_s22 + $0x28] sm:$0xff] %v445_v45 }
 0x176   : > { %v449_v47 = vpop.eup %448  ;;  %306 = vst [vmem:[%s166_s22 + $0x30] sm:$0xff] %v447_v46 }
 0x177   : > { %307 = vst [vmem:[%s166_s22 + $0x38] sm:$0xff] %v449_v47 }
 0x178 PF: > { %s12_s9 = sadd.s32 1, %s456_s9  }
 0x179   : > { %p9_p4 = scmp.ge.s32.totalorder %s12_s9, 4  }
 0x17b   :  { %11 = sbr.rel (!%p9_p4) target bundleno = 1 (0x1), region = 61 }

// kernel: taxibj_forward.93
= control target key start
LH: loop header
LB: loop body
LE: loop exit
PB: predicated region body
PF: predicated region fallthrough
CT: control target
= control target key end

     0   :  { %s421_s9 = smov 0   ;;  %s446_s0 = inlined_call_operand.vmem [shape: bf16[2,112,512], index: 0, kind: input, shape index: {}]   ;;  %s447_s1 = inlined_call_operand.vmem [shape: bf16[2,48,512], index: 1, kind: input, shape index: {}]   ;;  %s448_s2 = inlined_call_operand.vmem [shape: f32[2,16,512], index: 2, kind: output, shape index: {}]  }
   0x1 LB: > { %s350_s10 = sadd.s32 4294967295, %s404_s9   ;;  %p354_p0 = scmp.ge.s32.totalorder %s404_s9, 1  ;;  %s404_s9 = sphi %s421_s9, %s12_s9  }
   0x2   : > { %p124_p1 = scmp.lt.s32.totalorder %s404_s9, 3 }
   0x4   : > { %p125_p2 = pnand %p354_p0, %p124_p1 }
   0x5   : > { %p153_p3 = scmp.lt.s32.totalorder (!%p125_p2), %s350_s10, 1 }
   0x6   : > { %128 = sbr.rel (%p125_p2) target bundleno = 361 (0x169), region = 28 }
   0xd   : > { %s450_s10 = smov (!%p153_p3, %s350_s10), 1 }
   0xe   : > { %s355_s11 = smul.u32 224, %s450_s10  ;;  %s369_s19 = sshll.u32 %s450_s10, 6 }
   0xf   : > { %s356_s12 = smul.u32 96, %s450_s10  ;;  %s169_s22 = scalar_lea.vmem %s448_s2, %s369_s19 }
  0x10   : > { %s312_s15 = scalar_lea.vmem %s446_s0, %s355_s11 }
  0x11   : > { %s316_s18 = scalar_lea.vmem %s447_s1, %s356_s12  ;;  %v359_v0 = vld [vmem:[%s312_s15 + $0x80] sm:$0xff]  ;;  %v360_v1 = vld [vmem:[%s312_s15 + $0x88] sm:$0xff]  ;;  %v361_v2 = vld [vmem:[%s312_s15 + $0x90] sm:$0xff] }
  0x12   : > { %v174_v3 = vunpack.c.l.bf16 %v359_v0  ;;  %v175_v4 = vunpack.c.h.bf16 %v359_v0  ;;  %v176_v5 = vunpack.c.l.bf16 %v360_v1  ;;  %v177_v6 = vunpack.c.h.bf16 %v360_v1  ;;  %v363_v7 = vld [vmem:[%s316_s18 + $0x20] sm:$0xff]  ;;  %v364_v8 = vld [vmem:[%s316_s18 + $0x28] sm:$0xff]  ;;  %v362_v9 = vld [vmem:[%s312_s15 + $0x98] sm:$0xff] }
  0x13   : > { %v186_v10 = vunpack.c.l.bf16 %v363_v7  ;;  %v187_v11 = vunpack.c.h.bf16 %v363_v7  ;;  %v188_v12 = vunpack.c.l.bf16 %v364_v8  ;;  %v189_v13 = vunpack.c.h.bf16 %v364_v8  ;;  %v365_v14 = vld [vmem:[%s316_s18 + $0x30] sm:$0xff]  ;;  %v366_v15 = vld [vmem:[%s316_s18 + $0x38] sm:$0xff] }
  0x14   : > { %v178_v16 = vunpack.c.l.bf16 %v361_v2  ;;  %v179_v17 = vunpack.c.h.bf16 %v361_v2  ;;  %v180_v18 = vunpack.c.l.bf16 %v362_v9  ;;  %v181_v22 = vunpack.c.h.bf16 %v362_v9 }
  0x15   : > { %v194_v19 = vadd.f32 %v186_v10, %v174_v3  ;;  %v195_v20 = vadd.f32 %v187_v11, %v175_v4  ;;  %v196_v21 = vadd.f32 %v188_v12, %v176_v5  ;;  %v190_v23 = vunpack.c.l.bf16 %v365_v14 }
  0x16   : > { %v191_v24 = vunpack.c.h.bf16 %v365_v14  ;;  %v192_v25 = vunpack.c.l.bf16 %v366_v15  ;;  %v193_v26 = vunpack.c.h.bf16 %v366_v15  ;;  %v197_v27 = vadd.f32 %v189_v13, %v177_v6 }
  0x17   : > { %v202_v28 = vadd.f32 %v195_v20, %v194_v19  ;;  %v198_v29 = vadd.f32 %v190_v23, %v178_v16 }
  0x18   : > { %v199_v30 = vadd.f32 %v191_v24, %v179_v17  ;;  %v200_v31 = vadd.f32 %v192_v25, %v180_v18  ;;  %v201_v33 = vadd.f32 %v193_v26, %v181_v22 }
  0x19   : > { %v203_v32 = vadd.f32 %v202_v28, %v196_v21 }
  0x1a   : > { %v207_v34 = vadd.f32 %v199_v30, %v198_v29 }
  0x1b   : > { %v204_v35 = vadd.f32 %v203_v32, %v197_v27 }
  0x1c   : > { %v208_v36 = vadd.f32 %v207_v34, %v200_v31 }
  0x1d   : > { %205 = vadd.xlane.f32.xlu0 %v204_v35 }
  0x1e   : > { %v209_v37 = vadd.f32 %v208_v36, %v201_v33 }
  0x21   : > { %210 = vadd.xlane.f32.xlu0 %v209_v37 }
  0xaa   : > { %v206_v38 = vpop.xlane.xlu0 %205 }
  0xab   : > { %v213_v39 = vmul.f32 0.001953125, %v206_v38 }
  0xad   : > { %v215_v40 = vsub.f32 %v194_v19, %v213_v39  ;;  %v216_v41 = vsub.f32 %v195_v20, %v213_v39  ;;  %v217_v42 = vsub.f32 %v196_v21, %v213_v39  ;;  %v218_v44 = vsub.f32 %v197_v27, %v213_v39 }
  0xae   : > { %v211_v43 = vpop.xlane.xlu0 %210 }
  0xaf   : > { %v214_v45 = vmul.f32 0.001953125, %v211_v43  ;;  %v223_v46 = vmul.f32 %v215_v40, %v215_v40  ;;  %v224_v47 = vmul.f32 %v216_v41, %v216_v41  ;;  %v225_v48 = vmul.f32 %v217_v42, %v217_v42 }
  0xb0   : > { %v226_v53 = vmul.f32 %v218_v44, %v218_v44 }
  0xb1   : > { %v219_v49 = vsub.f32 %v198_v29, %v214_v45  ;;  %v220_v50 = vsub.f32 %v199_v30, %v214_v45  ;;  %v231_v51 = vadd.f32 %v224_v47, %v223_v46  ;;  %v221_v52 = vsub.f32 %v200_v31, %v214_v45 }
  0xb2   : > { %v222_v55 = vsub.f32 %v201_v33, %v214_v45 }
  0xb3   : > { %v232_v54 = vadd.f32 %v231_v51, %v225_v48  ;;  %v227_v56 = vmul.f32 %v219_v49, %v219_v49  ;;  %v228_v57 = vmul.f32 %v220_v50, %v220_v50  ;;  %v229_v59 = vmul.f32 %v221_v52, %v221_v52 }
  0xb4   : > { %v230_v61 = vmul.f32 %v222_v55, %v222_v55 }
  0xb5   : > { %v233_v58 = vadd.f32 %v232_v54, %v226_v53  ;;  %v236_v60 = vadd.f32 %v228_v57, %v227_v56 }
  0xb7   : > { %234 = vadd.xlane.f32.xlu1 %v233_v58  ;;  %v237_v62 = vadd.f32 %v236_v60, %v229_v59 }
  0xb9   : > { %v238_v63 = vadd.f32 %v237_v62, %v230_v61 }
  0xbb   : > { %239 = vadd.xlane.f32.xlu1 %v238_v63 }
 0x144   : > { %v235_v0 = vpop.xlane.xlu1 %234 }
 0x145   : > { %v241_v1 = vmul.f32 0.001953125, %v235_v0 }
 0x147   : > { %v243_v2 = vadd.f32 1e-05, %v241_v1 }
 0x148   : > { %v240_v3 = vpop.xlane.xlu1 %239 }
 0x149   : > { %378 = vrsqrt.f32 %v243_v2  ;;  %v242_v4 = vmul.f32 0.001953125, %v240_v3 }
 0x14b   : > { %v244_v5 = vadd.f32 1e-05, %v242_v4 }
 0x14d   : > { %380 = vrsqrt.f32 %v244_v5 }
 0x153   : > { %v379_v6 = vpop.eup %378 }
 0x154   : > { %v247_v7 = vmul.f32 %v379_v6, %v215_v40  ;;  %v248_v8 = vmul.f32 %v379_v6, %v216_v41  ;;  %v249_v9 = vmul.f32 %v379_v6, %v217_v42  ;;  %v250_v10 = vmul.f32 %v379_v6, %v218_v44 }
 0x156   : > { %382 = vtanh.f32 %v247_v7 }
 0x157   : > { %v381_v11 = vpop.eup %380  ;;  %384 = vtanh.f32 %v248_v8 }
 0x158   : > { %386 = vtanh.f32 %v249_v9  ;;  %v251_v12 = vmul.f32 %v381_v11, %v219_v49  ;;  %v252_v13 = vmul.f32 %v381_v11, %v220_v50  ;;  %v253_v14 = vmul.f32 %v381_v11, %v221_v52 }
 0x159   : > { %388 = vtanh.f32 %v250_v10  ;;  %v254_v15 = vmul.f32 %v381_v11, %v222_v55 }
 0x15a   : > { %390 = vtanh.f32 %v251_v12 }
 0x15b   : > { %392 = vtanh.f32 %v252_v13 }
 0x15c   : > { %394 = vtanh.f32 %v253_v14 }
 0x15d   : > { %396 = vtanh.f32 %v254_v15 }
 0x160   : > { %v383_v16 = vpop.eup %382 }
 0x161   : > { %v385_v17 = vpop.eup %384  ;;  %263 = vst [vmem:[%s169_s22] sm:$0xff] %v383_v16 }
 0x162   : > { %v387_v18 = vpop.eup %386  ;;  %264 = vst [vmem:[%s169_s22 + $0x8] sm:$0xff] %v385_v17 }
 0x163   : > { %v389_v19 = vpop.eup %388  ;;  %265 = vst [vmem:[%s169_s22 + $0x10] sm:$0xff] %v387_v18 }
 0x164   : > { %v391_v20 = vpop.eup %390  ;;  %266 = vst [vmem:[%s169_s22 + $0x18] sm:$0xff] %v389_v19 }
 0x165   : > { %v393_v21 = vpop.eup %392  ;;  %267 = vst [vmem:[%s169_s22 + $0x20] sm:$0xff] %v391_v20 }
 0x166   : > { %v395_v22 = vpop.eup %394  ;;  %268 = vst [vmem:[%s169_s22 + $0x28] sm:$0xff] %v393_v21 }
 0x167   : > { %v397_v23 = vpop.eup %396  ;;  %269 = vst [vmem:[%s169_s22 + $0x30] sm:$0xff] %v395_v22 }
 0x168   : > { %270 = vst [vmem:[%s169_s22 + $0x38] sm:$0xff] %v397_v23 }
 0x169 PF: > { %s12_s9 = sadd.s32 1, %s404_s9  }
 0x16a   : > { %p9_p4 = scmp.ge.s32.totalorder %s12_s9, 4  }
 0x16c   :  { %11 = sbr.rel (!%p9_p4) target bundleno = 1 (0x1), region = 61 }

// kernel: taxibj_forward.88
= control target key start
LH: loop header
LB: loop body
LE: loop exit
PB: predicated region body
PF: predicated region fallthrough
CT: control target
= control target key end

     0   :  { %s462_s9 = smov 0   ;;  %s487_s0 = inlined_call_operand.vmem [shape: bf16[2,112,512], index: 0, kind: input, shape index: {}]   ;;  %s488_s1 = inlined_call_operand.vmem [shape: bf16[2,64,512], index: 1, kind: input, shape index: {}]   ;;  %s489_s2 = inlined_call_operand.vmem [shape: f32[2,16,512], index: 2, kind: output, shape index: {}]  }
   0x1 LB: > { %s372_s10 = sadd.s32 4294967295, %s445_s9   ;;  %p376_p0 = scmp.ge.s32.totalorder %s445_s9, 1  ;;  %s445_s9 = sphi %s462_s9, %s12_s9  }
   0x2   : > { %p122_p1 = scmp.lt.s32.totalorder %s445_s9, 3 }
   0x4   : > { %p123_p2 = pnand %p376_p0, %p122_p1 }
   0x5   : > { %p149_p3 = scmp.lt.s32.totalorder (!%p123_p2), %s372_s10, 1 }
   0x6   : > { %126 = sbr.rel (%p123_p2) target bundleno = 375 (0x177), region = 28 }
   0xd   : > { %s491_s10 = smov (!%p149_p3, %s372_s10), 1 }
   0xe   : > { %s394_s11 = smul.u32 224, %s491_s10  ;;  %s392_s12 = sshll.u32 %s491_s10, 7 }
   0xf   : > { %s158_s15 = scalar_lea.vmem %s488_s1, %s392_s12  ;;  %s393_s19 = sshll.u32 %s491_s10, 6 }
  0x10   : > { %s153_s18 = scalar_lea.vmem %s487_s0, %s394_s11  ;;  %v176_v0 = vld [vmem:[%s158_s15] sm:$0xff]  ;;  %v177_v1 = vld [vmem:[%s158_s15 + $0x8] sm:$0xff]  ;;  %v178_v14 = vld [vmem:[%s158_s15 + $0x10] sm:$0xff]  ;;  %s163_s22 = scalar_lea.vmem %s489_s2, %s393_s19 }
  0x11   : > { %v164_v2 = vld [vmem:[%s153_s18] sm:$0xff]  ;;  %v165_v3 = vld [vmem:[%s153_s18 + $0x8] sm:$0xff]  ;;  %v180_v4 = vunpack.c.l.bf16 %v176_v0  ;;  %v181_v5 = vunpack.c.h.bf16 %v176_v0  ;;  %v182_v6 = vunpack.c.l.bf16 %v177_v1  ;;  %v183_v7 = vunpack.c.h.bf16 %v177_v1  ;;  %v166_v8 = vld [vmem:[%s153_s18 + $0x10] sm:$0xff] }
  0x12   : > { %v168_v9 = vunpack.c.l.bf16 %v164_v2  ;;  %v169_v10 = vunpack.c.h.bf16 %v164_v2  ;;  %v170_v11 = vunpack.c.l.bf16 %v165_v3  ;;  %v171_v12 = vunpack.c.h.bf16 %v165_v3  ;;  %v167_v13 = vld [vmem:[%s153_s18 + $0x18] sm:$0xff] }
  0x13   : > { %v179_v15 = vld [vmem:[%s158_s15 + $0x18] sm:$0xff]  ;;  %v172_v16 = vunpack.c.l.bf16 %v166_v8  ;;  %v173_v17 = vunpack.c.h.bf16 %v166_v8  ;;  %v174_v18 = vunpack.c.l.bf16 %v167_v13  ;;  %v175_v22 = vunpack.c.h.bf16 %v167_v13 }
  0x14   : > { %v188_v19 = vadd.f32 %v180_v4, %v168_v9  ;;  %v189_v20 = vadd.f32 %v181_v5, %v169_v10  ;;  %v190_v21 = vadd.f32 %v182_v6, %v170_v11  ;;  %v184_v23 = vunpack.c.l.bf16 %v178_v14 }
  0x15   : > { %v185_v24 = vunpack.c.h.bf16 %v178_v14  ;;  %v186_v25 = vunpack.c.l.bf16 %v179_v15  ;;  %v187_v26 = vunpack.c.h.bf16 %v179_v15  ;;  %v191_v27 = vadd.f32 %v183_v7, %v171_v12 }
  0x16   : > { %v196_v28 = vadd.f32 %v189_v20, %v188_v19  ;;  %v192_v29 = vadd.f32 %v184_v23, %v172_v16 }
  0x17   : > { %v193_v30 = vadd.f32 %v185_v24, %v173_v17  ;;  %v194_v31 = vadd.f32 %v186_v25, %v174_v18  ;;  %v195_v33 = vadd.f32 %v187_v26, %v175_v22 }
  0x18   : > { %v197_v32 = vadd.f32 %v196_v28, %v190_v21 }
  0x19   : > { %v201_v34 = vadd.f32 %v193_v30, %v192_v29 }
  0x1a   : > { %v198_v35 = vadd.f32 %v197_v32, %v191_v27 }
  0x1b   : > { %v202_v36 = vadd.f32 %v201_v34, %v194_v31 }
  0x1c   : > { %199 = vadd.xlane.f32.xlu0 %v198_v35 }
  0x1d   : > { %v203_v37 = vadd.f32 %v202_v36, %v195_v33 }
  0x20   : > { %204 = vadd.xlane.f32.xlu0 %v203_v37 }
  0xa9   : > { %v200_v38 = vpop.xlane.xlu0 %199 }
  0xaa   : > { %v207_v39 = vmul.f32 0.001953125, %v200_v38 }
  0xac   : > { %v209_v40 = vsub.f32 %v188_v19, %v207_v39  ;;  %v210_v41 = vsub.f32 %v189_v20, %v207_v39  ;;  %v211_v42 = vsub.f32 %v190_v21, %v207_v39  ;;  %v212_v44 = vsub.f32 %v191_v27, %v207_v39 }
  0xad   : > { %v205_v43 = vpop.xlane.xlu0 %204 }
  0xae   : > { %v208_v45 = vmul.f32 0.001953125, %v205_v43  ;;  %v217_v46 = vmul.f32 %v209_v40, %v209_v40  ;;  %v218_v47 = vmul.f32 %v210_v41, %v210_v41  ;;  %v219_v48 = vmul.f32 %v211_v42, %v211_v42 }
  0xaf   : > { %v220_v53 = vmul.f32 %v212_v44, %v212_v44 }
  0xb0   : > { %v213_v49 = vsub.f32 %v192_v29, %v208_v45  ;;  %v214_v50 = vsub.f32 %v193_v30, %v208_v45  ;;  %v225_v51 = vadd.f32 %v218_v47, %v217_v46  ;;  %v215_v52 = vsub.f32 %v194_v31, %v208_v45 }
  0xb1   : > { %v216_v55 = vsub.f32 %v195_v33, %v208_v45 }
  0xb2   : > { %v226_v54 = vadd.f32 %v225_v51, %v219_v48  ;;  %v221_v56 = vmul.f32 %v213_v49, %v213_v49  ;;  %v222_v57 = vmul.f32 %v214_v50, %v214_v50  ;;  %v223_v59 = vmul.f32 %v215_v52, %v215_v52 }
  0xb3   : > { %v224_v61 = vmul.f32 %v216_v55, %v216_v55 }
  0xb4   : > { %v227_v58 = vadd.f32 %v226_v54, %v220_v53  ;;  %v230_v60 = vadd.f32 %v222_v57, %v221_v56 }
  0xb6   : > { %228 = vadd.xlane.f32.xlu1 %v227_v58  ;;  %v231_v62 = vadd.f32 %v230_v60, %v223_v59 }
  0xb8   : > { %v232_v63 = vadd.f32 %v231_v62, %v224_v61 }
  0xba   : > { %233 = vadd.xlane.f32.xlu1 %v232_v63 }
 0x143   : > { %v229_v0 = vpop.xlane.xlu1 %228 }
 0x144   : > { %v235_v1 = vmul.f32 0.001953125, %v229_v0 }
 0x146   : > { %v237_v2 = vadd.f32 1e-05, %v235_v1 }
 0x147   : > { %v234_v3 = vpop.xlane.xlu1 %233 }
 0x148   : > { %403 = vrsqrt.f32 %v237_v2  ;;  %v236_v4 = vmul.f32 0.001953125, %v234_v3 }
 0x14a   : > { %v238_v5 = vadd.f32 1e-05, %v236_v4 }
 0x14c   : > { %405 = vrsqrt.f32 %v238_v5 }
 0x152   : > { %v404_v6 = vpop.eup %403 }
 0x153   : > { %v241_v7 = vmul.f32 %v404_v6, %v209_v40  ;;  %v242_v8 = vmul.f32 %v404_v6, %v210_v41  ;;  %v243_v9 = vmul.f32 %v404_v6, %v211_v42  ;;  %v244_v10 = vmul.f32 %v404_v6, %v212_v44 }
 0x155   : > { %v382_v11 = vmul.f32 -1.442695, %v241_v7  ;;  %v383_v12 = vmul.f32 -1.442695, %v242_v8  ;;  %v384_v13 = vmul.f32 -1.442695, %v243_v9 }
 0x156   : > { %v406_v14 = vpop.eup %405  ;;  %v385_v15 = vmul.f32 -1.442695, %v244_v10 }
 0x157   : > { %407 = vpow2.f32 %v382_v11  ;;  %v245_v16 = vmul.f32 %v406_v14, %v213_v49  ;;  %v246_v17 = vmul.f32 %v406_v14, %v214_v50  ;;  %v247_v18 = vmul.f32 %v406_v14, %v215_v52 }
 0x158   : > { %409 = vpow2.f32 %v383_v12  ;;  %v248_v19 = vmul.f32 %v406_v14, %v216_v55 }
 0x159   : > { %411 = vpow2.f32 %v384_v13  ;;  %v386_v20 = vmul.f32 -1.442695, %v245_v16  ;;  %v387_v21 = vmul.f32 -1.442695, %v246_v17  ;;  %v388_v22 = vmul.f32 -1.442695, %v247_v18 }
 0x15a   : > { %413 = vpow2.f32 %v385_v15  ;;  %v389_v23 = vmul.f32 -1.442695, %v248_v19 }
 0x15b   : > { %415 = vpow2.f32 %v386_v20 }
 0x15c   : > { %417 = vpow2.f32 %v387_v21 }
 0x15d   : > { %419 = vpow2.f32 %v388_v22 }
 0x15e   : > { %421 = vpow2.f32 %v389_v23 }
 0x161   : > { %v408_v24 = vpop.eup %407 }
 0x162   : > { %v410_v25 = vpop.eup %409  ;;  %v273_v26 = vadd.f32 1.0, %v408_v24 }
 0x163   : > { %v412_v27 = vpop.eup %411  ;;  %v274_v28 = vadd.f32 1.0, %v410_v25 }
 0x164   : > { %v414_v29 = vpop.eup %413  ;;  %v275_v30 = vadd.f32 1.0, %v412_v27  ;;  %423 = vrcp.f32 %v273_v26 }
 0x165   : > { %v416_v31 = vpop.eup %415  ;;  %v276_v32 = vadd.f32 1.0, %v414_v29  ;;  %425 = vrcp.f32 %v274_v28 }
 0x166   : > { %v418_v33 = vpop.eup %417  ;;  %427 = vrcp.f32 %v275_v30  ;;  %v277_v34 = vadd.f32 1.0, %v416_v31 }
 0x167   : > { %v420_v35 = vpop.eup %419  ;;  %429 = vrcp.f32 %v276_v32  ;;  %v278_v36 = vadd.f32 1.0, %v418_v33 }
 0x168   : > { %v422_v37 = vpop.eup %421  ;;  %v279_v38 = vadd.f32 1.0, %v420_v35  ;;  %431 = vrcp.f32 %v277_v34 }
 0x169   : > { %v280_v39 = vadd.f32 1.0, %v422_v37  ;;  %433 = vrcp.f32 %v278_v36 }
 0x16a   : > { %435 = vrcp.f32 %v279_v38 }
 0x16b   : > { %437 = vrcp.f32 %v280_v39 }
 0x16e   : > { %v424_v40 = vpop.eup %423 }
 0x16f   : > { %v426_v41 = vpop.eup %425  ;;  %297 = vst [vmem:[%s163_s22] sm:$0xff] %v424_v40 }
 0x170   : > { %v428_v42 = vpop.eup %427  ;;  %298 = vst [vmem:[%s163_s22 + $0x8] sm:$0xff] %v426_v41 }
 0x171   : > { %v430_v43 = vpop.eup %429  ;;  %299 = vst [vmem:[%s163_s22 + $0x10] sm:$0xff] %v428_v42 }
 0x172   : > { %v432_v44 = vpop.eup %431  ;;  %300 = vst [vmem:[%s163_s22 + $0x18] sm:$0xff] %v430_v43 }
 0x173   : > { %v434_v45 = vpop.eup %433  ;;  %301 = vst [vmem:[%s163_s22 + $0x20] sm:$0xff] %v432_v44 }
 0x174   : > { %v436_v46 = vpop.eup %435  ;;  %302 = vst [vmem:[%s163_s22 + $0x28] sm:$0xff] %v434_v45 }
 0x175   : > { %v438_v47 = vpop.eup %437  ;;  %303 = vst [vmem:[%s163_s22 + $0x30] sm:$0xff] %v436_v46 }
 0x176   : > { %304 = vst [vmem:[%s163_s22 + $0x38] sm:$0xff] %v438_v47 }
 0x177 PF: > { %s12_s9 = sadd.s32 1, %s445_s9  }
 0x178   : > { %p9_p4 = scmp.ge.s32.totalorder %s12_s9, 4  }
 0x17a   :  { %11 = sbr.rel (!%p9_p4) target bundleno = 1 (0x1), region = 61 }

// kernel: taxibj_forward.86
= control target key start
LH: loop header
LB: loop body
LE: loop exit
PB: predicated region body
PF: predicated region fallthrough
CT: control target
= control target key end

     0   :  { %s2057_s12 = smov 0   ;;  %s2059_s13 = smov 0   ;;  %s2364_s0 = inlined_call_operand.vmem [shape: bf16[64,896], index: 0, kind: input, shape index: {}]   ;;  %s2365_s1 = inlined_call_operand.vmem [shape: f32[64,1], index: 1, kind: input, shape index: {}]   ;;  %s2366_s2 = inlined_call_operand.vmem [shape: bf16[2,896,144], index: 2, kind: input, shape index: {}]   ;;  %s2367_s3 = inlined_call_operand.vmem [shape: bf16[2,64,144], index: 3, kind: output, shape index: {}]  }
   0x1   :  { %s2061_s14 = smov 0  }
   0x2 LB: > { %s25_s15 = sadd.s32 1, %s2030_s13  ;;  %p1549_p0 = scmp.ge.s32.totalorder %s2034_s14, 1  ;;  %s2034_s14 = sphi %s2061_s14, %s13_s14   ;;  %s2030_s13 = sphi %s2059_s13, %s2371_s13   ;;  %s2026_s12 = sphi %s2057_s12, %s2370_s12  }
   0x3   : > { %p27_p1 = scmp.ge.s32.totalorder %s25_s15, 2  ;;  %p158_p2 = scmp.lt.s32.totalorder %s2034_s14, 3 }
   0x5   : > { %s2373_s15 = smov (%p27_p1, %s25_s15), 0  ;;  %p159_p3 = pnand %p1549_p0, %p158_p2 }
   0x6   : > { %p191_p4 = scmp.lt.s32.totalorder (!%p159_p3), %s2026_s12, 1  ;;  %v1902_v0 = vld [vmem:[%s2364_s0 + $0x14] ss:$28 sps:$4 sm:$0xff] (!%p159_p3)   ;;  %v2036_v1 = vmov (!%p159_p3), 0   ;;  %v1905_v2 = vld [vmem:[%s2364_s0 + $0x4] ss:$28 sps:$4 sm:$0xff] (!%p159_p3)  }
   0x7   : > { %162 = sbr.rel (%p159_p3) target bundleno = 393 (0x189), region = 32  ;;  %1802 = vset.pattern.permute.xlu0 (!%p159_p3), %v2036_v1  ;;  %1803 = vset.pattern.permute.xlu1 (!%p159_p3), %v2036_v1  ;;  %vm1447_vm0 = vcmask (!%p159_p3), 1043456   ;;  %vm1448_vm1 = vcmask (!%p159_p3), 130052  }
   0x8   : > { %1285 = vmatprep.mubr.bf16.mxu0 (!%p159_p3), %v1902_v0  ;;  %1139 = vmatprep.mubr.bf16.mxu1 (!%p159_p3), %v1905_v2  ;;  %vm2323_vm2 = vmor (!%p159_p3), %vm1448_vm1, %vm1447_vm0 }
   0xe   : > { %s2375_s12 = smov (!%p191_p4, %s2026_s12), 1 }
   0xf   : > { %s1776_s20 = smul.u32 896, %s2375_s12  ;;  %s1703_s25 = sshll.u32 %s2375_s12, 6 }
  0x10   : > { %s2321_s28 = scalar_lea.vmem %s2367_s3, %s1703_s25 }
  0x11   : > { %s2089_s23 = scalar_lea.vmem %s2366_s2, %s1776_s20 }
  0x12   : > { %v1804_v3 = vld [vmem:[%s2089_s23 + $0x4] ss:$8 sps:$4 sm:$0xff]   ;;  %v1808_v5 = vld [vmem:[%s2089_s23] ss:$8 sps:$4 sm:$0xff]   ;;  %v1810_v7 = vld [vmem:[%s2089_s23 + $0x14] ss:$8 sps:$4 sm:$0xff]  }
  0x13   : > { %v1806_v4 = vld [vmem:[%s2089_s23 + $0x204] ss:$8 sps:$4 sm:$0xff]   ;;  %1107 = vmatprep.subr.bf16.mxu1 %v1804_v3  ;;  %v1809_v6 = vld [vmem:[%s2089_s23 + $0x200] ss:$8 sps:$4 sm:$0xff]   ;;  %v1812_v8 = vld [vmem:[%s2089_s23 + $0x214] ss:$8 sps:$4 sm:$0xff]  }
  0x14   : > { %1253 = vmatprep.subr.bf16.mxu0 %v1806_v4  ;;  %1108 = vmatpush1.bf16.msra.mxu1 %v1808_v5  ;;  %v1814_v9 = vld [vmem:[%s2089_s23 + $0x10] ss:$8 sps:$4 sm:$0xff]   ;;  %v1816_v11 = vld [vmem:[%s2089_s23 + $0x24] ss:$8 sps:$4 sm:$0xff]   ;;  %v1820_v13 = vld [vmem:[%s2089_s23 + $0x20] ss:$8 sps:$4 sm:$0xff]  }
  0x15   : > { %1254 = vmatpush1.bf16.msra.mxu0 %v1809_v6  ;;  %1109 = vmatprep.subr.bf16.mxu1 %v1810_v7  ;;  %v1815_v10 = vld [vmem:[%s2089_s23 + $0x210] ss:$8 sps:$4 sm:$0xff]   ;;  %v1818_v12 = vld [vmem:[%s2089_s23 + $0x224] ss:$8 sps:$4 sm:$0xff]   ;;  %v1821_v14 = vld [vmem:[%s2089_s23 + $0x220] ss:$8 sps:$4 sm:$0xff]  }
  0x16   : > { %1255 = vmatprep.subr.bf16.mxu0 %v1812_v8  ;;  %v1822_v15 = vld [vmem:[%s2089_s23 + $0x34] ss:$8 sps:$4 sm:$0xff]   ;;  %v1826_v17 = vld [vmem:[%s2089_s23 + $0x30] ss:$8 sps:$4 sm:$0xff]   ;;  %v1828_v19 = vld [vmem:[%s2089_s23 + $0x44] ss:$8 sps:$4 sm:$0xff]  }
  0x17   : > { %v1824_v16 = vld [vmem:[%s2089_s23 + $0x234] ss:$8 sps:$4 sm:$0xff]   ;;  %v1827_v18 = vld [vmem:[%s2089_s23 + $0x230] ss:$8 sps:$4 sm:$0xff]   ;;  %v1830_v20 = vld [vmem:[%s2089_s23 + $0x244] ss:$8 sps:$4 sm:$0xff]  }
  0x18   : > { %1110 = vmatpush1.bf16.msra.mxu1 %v1814_v9  ;;  %v1832_v21 = vld [vmem:[%s2089_s23 + $0x40] ss:$8 sps:$4 sm:$0xff]   ;;  %v1834_v23 = vld [vmem:[%s2089_s23 + $0x54] ss:$8 sps:$4 sm:$0xff]   ;;  %v1838_v25 = vld [vmem:[%s2089_s23 + $0x50] ss:$8 sps:$4 sm:$0xff]  }
  0x19   : > { %1256 = vmatpush1.bf16.msra.mxu0 %v1815_v10  ;;  %1111 = vmatprep.subr.bf16.mxu1 %v1816_v11  ;;  %v1833_v22 = vld [vmem:[%s2089_s23 + $0x240] ss:$8 sps:$4 sm:$0xff]   ;;  %v1836_v24 = vld [vmem:[%s2089_s23 + $0x254] ss:$8 sps:$4 sm:$0xff]   ;;  %v1839_v26 = vld [vmem:[%s2089_s23 + $0x250] ss:$8 sps:$4 sm:$0xff]  }
  0x1a   : > { %1257 = vmatprep.subr.bf16.mxu0 %v1818_v12  ;;  %v1840_v27 = vld [vmem:[%s2089_s23 + $0x64] ss:$8 sps:$4 sm:$0xff]   ;;  %v1844_v29 = vld [vmem:[%s2089_s23 + $0x60] ss:$8 sps:$4 sm:$0xff]   ;;  %v1846_v31 = vld [vmem:[%s2089_s23 + $0x74] ss:$8 sps:$4 sm:$0xff]  }
  0x1b   : > { %v1842_v28 = vld [vmem:[%s2089_s23 + $0x264] ss:$8 sps:$4 sm:$0xff]   ;;  %v1845_v30 = vld [vmem:[%s2089_s23 + $0x260] ss:$8 sps:$4 sm:$0xff]   ;;  %v1848_v32 = vld [vmem:[%s2089_s23 + $0x274] ss:$8 sps:$4 sm:$0xff]  }
  0x1c   : > { %1112 = vmatpush1.bf16.msra.mxu1 %v1820_v13  ;;  %v1850_v33 = vld [vmem:[%s2089_s23 + $0x70] ss:$8 sps:$4 sm:$0xff]   ;;  %v1852_v35 = vld [vmem:[%s2089_s23 + $0x84] ss:$8 sps:$4 sm:$0xff]   ;;  %v1856_v37 = vld [vmem:[%s2089_s23 + $0x80] ss:$8 sps:$4 sm:$0xff]  }
  0x1d   : > { %1258 = vmatpush1.bf16.msra.mxu0 %v1821_v14  ;;  %1113 = vmatprep.subr.bf16.mxu1 %v1822_v15  ;;  %v1851_v34 = vld [vmem:[%s2089_s23 + $0x270] ss:$8 sps:$4 sm:$0xff]   ;;  %v1854_v36 = vld [vmem:[%s2089_s23 + $0x284] ss:$8 sps:$4 sm:$0xff]   ;;  %v1857_v38 = vld [vmem:[%s2089_s23 + $0x280] ss:$8 sps:$4 sm:$0xff]  }
  0x1e   : > { %1259 = vmatprep.subr.bf16.mxu0 %v1824_v16  ;;  %v1858_v39 = vld [vmem:[%s2089_s23 + $0x94] ss:$8 sps:$4 sm:$0xff]   ;;  %v1862_v41 = vld [vmem:[%s2089_s23 + $0x90] ss:$8 sps:$4 sm:$0xff]   ;;  %v1864_v43 = vld [vmem:[%s2089_s23 + $0xa4] ss:$8 sps:$4 sm:$0xff]  }
  0x1f   : > { %v1860_v40 = vld [vmem:[%s2089_s23 + $0x294] ss:$8 sps:$4 sm:$0xff]   ;;  %v1863_v42 = vld [vmem:[%s2089_s23 + $0x290] ss:$8 sps:$4 sm:$0xff]   ;;  %v1866_v44 = vld [vmem:[%s2089_s23 + $0x2a4] ss:$8 sps:$4 sm:$0xff]  }
  0x20   : > { %1114 = vmatpush1.bf16.msra.mxu1 %v1826_v17  ;;  %v1868_v45 = vld [vmem:[%s2089_s23 + $0xa0] ss:$8 sps:$4 sm:$0xff]   ;;  %v1870_v47 = vld [vmem:[%s2089_s23 + $0xb4] ss:$8 sps:$4 sm:$0xff]   ;;  %v1874_v49 = vld [vmem:[%s2089_s23 + $0xb0] ss:$8 sps:$4 sm:$0xff]  }
  0x21   : > { %1260 = vmatpush1.bf16.msra.mxu0 %v1827_v18  ;;  %1115 = vmatprep.subr.bf16.mxu1 %v1828_v19  ;;  %v1869_v46 = vld [vmem:[%s2089_s23 + $0x2a0] ss:$8 sps:$4 sm:$0xff]   ;;  %v1872_v48 = vld [vmem:[%s2089_s23 + $0x2b4] ss:$8 sps:$4 sm:$0xff]   ;;  %v1875_v50 = vld [vmem:[%s2089_s23 + $0x2b0] ss:$8 sps:$4 sm:$0xff]  }
  0x22   : > { %1261 = vmatprep.subr.bf16.mxu0 %v1830_v20  ;;  %v1876_v51 = vld [vmem:[%s2089_s23 + $0xc4] ss:$8 sps:$4 sm:$0xff]   ;;  %v1880_v53 = vld [vmem:[%s2089_s23 + $0xc0] ss:$8 sps:$4 sm:$0xff]   ;;  %v1882_v55 = vld [vmem:[%s2089_s23 + $0xd4] ss:$8 sps:$4 sm:$0xff]  }
  0x23   : > { %v1878_v52 = vld [vmem:[%s2089_s23 + $0x2c4] ss:$8 sps:$4 sm:$0xff]   ;;  %v1881_v54 = vld [vmem:[%s2089_s23 + $0x2c0] ss:$8 sps:$4 sm:$0xff]   ;;  %v1884_v56 = vld [vmem:[%s2089_s23 + $0x2d4] ss:$8 sps:$4 sm:$0xff]  }
  0x24   : > { %1116 = vmatpush1.bf16.msra.mxu1 %v1832_v21  ;;  %v1886_v57 = vld [vmem:[%s2089_s23 + $0xd0] ss:$8 sps:$4 sm:$0xff]   ;;  %v1888_v59 = vld [vmem:[%s2089_s23 + $0xe4] ss:$8 sps:$4 sm:$0xff]   ;;  %v1892_v61 = vld [vmem:[%s2089_s23 + $0xe0] ss:$8 sps:$4 sm:$0xff]  }
  0x25   : > { %1262 = vmatpush1.bf16.msra.mxu0 %v1833_v22  ;;  %1117 = vmatprep.subr.bf16.mxu1 %v1834_v23  ;;  %v1887_v58 = vld [vmem:[%s2089_s23 + $0x2d0] ss:$8 sps:$4 sm:$0xff]   ;;  %v1890_v60 = vld [vmem:[%s2089_s23 + $0x2e4] ss:$8 sps:$4 sm:$0xff]   ;;  %v1893_v62 = vld [vmem:[%s2089_s23 + $0x2e0] ss:$8 sps:$4 sm:$0xff]  }
  0x26   : > { %1263 = vmatprep.subr.bf16.mxu0 %v1836_v24  ;;  %v1894_v63 = vld [vmem:[%s2089_s23 + $0xf4] ss:$8 sps:$4 sm:$0xff]   ;;  %v1898_v2 = vld [vmem:[%s2089_s23 + $0xf0] ss:$8 sps:$4 sm:$0xff]   ;;  %v1908_v4 = vld [vmem:[%s2089_s23 + $0x104] ss:$8 sps:$4 sm:$0xff]  }
  0x27   : > { %v1896_v0 = vld [vmem:[%s2089_s23 + $0x2f4] ss:$8 sps:$4 sm:$0xff]   ;;  %v1899_v3 = vld [vmem:[%s2089_s23 + $0x2f0] ss:$8 sps:$4 sm:$0xff]   ;;  %v1911_v5 = vld [vmem:[%s2089_s23 + $0x304] ss:$8 sps:$4 sm:$0xff]  }
  0x28   : > { %1118 = vmatpush1.bf16.msra.mxu1 %v1838_v25  ;;  %v1900_v6 = vld [vmem:[%s2364_s0 + $0x10] ss:$28 sps:$4 sm:$0xff]   ;;  %v1903_v7 = vld [vmem:[%s2364_s0] ss:$28 sps:$4 sm:$0xff]   ;;  %v1923_v17 = vld [vmem:[%s2364_s0 + $0x48] ss:$28 sps:$4 sm:$0xff]  }
  0x29   : > { %1264 = vmatpush1.bf16.msra.mxu0 %v1839_v26  ;;  %1119 = vmatprep.subr.bf16.mxu1 %v1840_v27  ;;  %v1906_v8 = vld [vmem:[%s2089_s23 + $0x100] ss:$8 sps:$4 sm:$0xff]   ;;  %v1914_v10 = vld [vmem:[%s2089_s23 + $0x114] ss:$8 sps:$4 sm:$0xff]   ;;  %v1912_v13 = vld [vmem:[%s2089_s23 + $0x110] ss:$8 sps:$4 sm:$0xff]  }
  0x2a   : > { %1265 = vmatprep.subr.bf16.mxu0 %v1842_v28  ;;  %v1909_v9 = vld [vmem:[%s2089_s23 + $0x300] ss:$8 sps:$4 sm:$0xff]   ;;  %v1917_v11 = vld [vmem:[%s2089_s23 + $0x314] ss:$8 sps:$4 sm:$0xff]   ;;  %v1915_v14 = vld [vmem:[%s2089_s23 + $0x310] ss:$8 sps:$4 sm:$0xff]  }
  0x2b   : > { %v1918_v12 = vld [vmem:[%s2364_s0 + $0x4c] ss:$28 sps:$4 sm:$0xff]   ;;  %v1970_v15 = vld [vmem:[%s2364_s0 + $0x3c] ss:$28 sps:$4 sm:$0xff]   ;;  %v1933_v22 = vld [vmem:[%s2364_s0 + $0x84] ss:$28 sps:$4 sm:$0xff]  }
  0x2c   : > { %1120 = vmatpush1.bf16.msra.mxu1 %v1844_v29  ;;  %v1922_v16 = vld [vmem:[%s2089_s23 + $0x124] ss:$8 sps:$4 sm:$0xff]   ;;  %v1920_v19 = vld [vmem:[%s2089_s23 + $0x120] ss:$8 sps:$4 sm:$0xff]   ;;  %v1972_v20 = vld [vmem:[%s2364_s0 + $0x38] ss:$28 sps:$4 sm:$0xff]  }
  0x2d   : > { %1266 = vmatpush1.bf16.msra.mxu0 %v1845_v30  ;;  %1121 = vmatprep.subr.bf16.mxu1 %v1846_v31  ;;  %v1926_v18 = vld [vmem:[%s2089_s23 + $0x324] ss:$8 sps:$4 sm:$0xff]   ;;  %v1924_v21 = vld [vmem:[%s2089_s23 + $0x320] ss:$8 sps:$4 sm:$0xff]   ;;  %v1929_v23 = vld [vmem:[%s2089_s23 + $0x134] ss:$8 sps:$4 sm:$0xff]  }
  0x2e   : > { %1267 = vmatprep.subr.bf16.mxu0 %v1848_v32  ;;  %v1932_v24 = vld [vmem:[%s2089_s23 + $0x334] ss:$8 sps:$4 sm:$0xff]   ;;  %v1927_v25 = vld [vmem:[%s2089_s23 + $0x130] ss:$8 sps:$4 sm:$0xff]   ;;  %v1937_v28 = vld [vmem:[%s2089_s23 + $0x144] ss:$8 sps:$4 sm:$0xff]  }
  0x2f   : > { %v1980_v26 = vld [vmem:[%s2364_s0 + $0x74] ss:$28 sps:$4 sm:$0xff]   ;;  %v1941_v29 = vld [vmem:[%s2089_s23 + $0x344] ss:$8 sps:$4 sm:$0xff]   ;;  %v1935_v30 = vld [vmem:[%s2089_s23 + $0x140] ss:$8 sps:$4 sm:$0xff]  }
  0x30   : > { %1122 = vmatpush1.bf16.msra.mxu1 %v1850_v33  ;;  %v1930_v27 = vld [vmem:[%s2089_s23 + $0x330] ss:$8 sps:$4 sm:$0xff]   ;;  %v1938_v31 = vld [vmem:[%s2364_s0 + $0x80] ss:$28 sps:$4 sm:$0xff]  }
  0x31   : > { %1268 = vmatpush1.bf16.msra.mxu0 %v1851_v34  ;;  %1123 = vmatprep.subr.bf16.mxu1 %v1852_v35  ;;  %v1939_v32 = vld [vmem:[%s2089_s23 + $0x340] ss:$8 sps:$4 sm:$0xff]   ;;  %v1982_v33 = vld [vmem:[%s2364_s0 + $0x70] ss:$28 sps:$4 sm:$0xff]   ;;  %v1944_v34 = vld [vmem:[%s2089_s23 + $0x154] ss:$8 sps:$4 sm:$0xff]  }
  0x32   : > { %1269 = vmatprep.subr.bf16.mxu0 %v1854_v36  ;;  %v1948_v35 = vld [vmem:[%s2364_s0 + $0xbc] ss:$28 sps:$4 sm:$0xff]  }
  0x33   : > { %v1947_v36 = vld [vmem:[%s2089_s23 + $0x354] ss:$8 sps:$4 sm:$0xff]  }
  0x34   : > { %1124 = vmatpush1.bf16.msra.mxu1 %v1856_v37  ;;  %v1990_v37 = vld [vmem:[%s2364_s0 + $0xac] ss:$28 sps:$4 sm:$0xff]  }
  0x35   : > { %1270 = vmatpush1.bf16.msra.mxu0 %v1857_v38  ;;  %1125 = vmatprep.subr.bf16.mxu1 %v1858_v39  ;;  %v1942_v38 = vld [vmem:[%s2089_s23 + $0x150] ss:$8 sps:$4 sm:$0xff]  }
  0x36   : > { %1271 = vmatprep.subr.bf16.mxu0 %v1860_v40  ;;  %v1945_v39 = vld [vmem:[%s2089_s23 + $0x350] ss:$8 sps:$4 sm:$0xff]   ;;  %v1952_v40 = vld [vmem:[%s2089_s23 + $0x164] ss:$8 sps:$4 sm:$0xff]  }
  0x38   : > { %1126 = vmatpush1.bf16.msra.mxu1 %v1862_v41  ;;  %v1956_v41 = vld [vmem:[%s2089_s23 + $0x364] ss:$8 sps:$4 sm:$0xff]  }
  0x39   : > { %1272 = vmatpush1.bf16.msra.mxu0 %v1863_v42  ;;  %1127 = vmatprep.subr.bf16.mxu1 %v1864_v43  ;;  %v1953_v42 = vld [vmem:[%s2364_s0 + $0xb8] ss:$28 sps:$4 sm:$0xff]   ;;  %v1992_v43 = vld [vmem:[%s2364_s0 + $0xa8] ss:$28 sps:$4 sm:$0xff]  }
  0x3a   : > { %1273 = vmatprep.subr.bf16.mxu0 %v1866_v44  ;;  %v355_v44 = vld [vmem:[%s2365_s1] sm:$0xff] }
  0x3b   : > { %365 = vperm.xlu0 %1802, %v355_v44  }
  0x3c   : > { %1128 = vmatpush1.bf16.msra.mxu1 %v1868_v45  ;;  %v1950_v45 = vld [vmem:[%s2089_s23 + $0x160] ss:$8 sps:$4 sm:$0xff]  }
  0x3d   : > { %1274 = vmatpush1.bf16.msra.mxu0 %v1869_v46  ;;  %1129 = vmatprep.subr.bf16.mxu1 %v1870_v47  ;;  %v1954_v46 = vld [vmem:[%s2089_s23 + $0x360] ss:$8 sps:$4 sm:$0xff]   ;;  %v357_v47 = vld [vmem:[%s2365_s1 + $0x10] sm:$0xff] }
  0x3e   : > { %1275 = vmatprep.subr.bf16.mxu0 %v1872_v48  ;;  %v1959_v48 = vld [vmem:[%s2089_s23 + $0x174] ss:$8 sps:$4 sm:$0xff]   ;;  %375 = vperm.xlu1 %1803, %v357_v47  }
  0x40   : > { %1130 = vmatpush1.bf16.msra.mxu1 %v1874_v49  ;;  %v1962_v49 = vld [vmem:[%s2089_s23 + $0x374] ss:$8 sps:$4 sm:$0xff]  }
  0x41   : > { %1276 = vmatpush1.bf16.msra.mxu0 %v1875_v50  ;;  %1131 = vmatprep.subr.bf16.mxu1 %v1876_v51  ;;  %v2002_v50 = vld [vmem:[%s2364_s0 + $0xc] ss:$28 sps:$4 sm:$0xff]   ;;  %v1957_v51 = vld [vmem:[%s2089_s23 + $0x170] ss:$8 sps:$4 sm:$0xff]  }
  0x42   : > { %1277 = vmatprep.subr.bf16.mxu0 %v1878_v52  ;;  %v1960_v52 = vld [vmem:[%s2089_s23 + $0x370] ss:$8 sps:$4 sm:$0xff]  }
  0x44   : > { %1132 = vmatpush1.bf16.msra.mxu1 %v1880_v53  ;;  %v356_v53 = vld [vmem:[%s2365_s1 + $0x8] sm:$0xff] }
  0x45   : > { %1278 = vmatpush1.bf16.msra.mxu0 %v1881_v54  ;;  %1133 = vmatprep.subr.bf16.mxu1 %v1882_v55  ;;  %v358_v54 = vld [vmem:[%s2365_s1 + $0x18] sm:$0xff]  ;;  %v1965_v55 = vld [vmem:[%s2089_s23 + $0x184] ss:$8 sps:$4 sm:$0xff]  }
  0x46   : > { %1279 = vmatprep.subr.bf16.mxu0 %v1884_v56  ;;  %v1966_v56 = vld [vmem:[%s2364_s0 + $0x18] ss:$28 sps:$4 sm:$0xff]   ;;  %370 = vperm.xlu0 %1802, %v356_v53  }
  0x47   : > { %380 = vperm.xlu1 %1803, %v358_v54  }
  0x48   : > { %1134 = vmatpush1.bf16.msra.mxu1 %v1886_v57  ;;  %v1963_v57 = vld [vmem:[%s2089_s23 + $0x180] ss:$8 sps:$4 sm:$0xff]  }
  0x49   : > { %1280 = vmatpush1.bf16.msra.mxu0 %v1887_v58  ;;  %1135 = vmatprep.subr.bf16.mxu1 %v1888_v59  ;;  %v360_v58 = vld [vmem:[%s2365_s1 + $0x28] sm:$0xff]  ;;  %v1969_v59 = vld [vmem:[%s2089_s23 + $0x194] ss:$8 sps:$4 sm:$0xff]  }
  0x4a   : > { %1281 = vmatprep.subr.bf16.mxu0 %v1890_v60  ;;  %v359_v60 = vld [vmem:[%s2365_s1 + $0x20] sm:$0xff] }
  0x4b   : > { %390 = vperm.xlu1 %1803, %v360_v58   ;;  %385 = vperm.xlu0 %1802, %v359_v60  }
  0x4c   : > { %1136 = vmatpush1.bf16.msra.mxu1 %v1892_v61  ;;  %v1967_v61 = vld [vmem:[%s2089_s23 + $0x190] ss:$8 sps:$4 sm:$0xff]  }
  0x4d   : > { %1282 = vmatpush1.bf16.msra.mxu0 %v1893_v62  ;;  %1137 = vmatprep.subr.bf16.mxu1 %v1894_v63  ;;  %v362_v62 = vld [vmem:[%s2365_s1 + $0x38] sm:$0xff]  ;;  %v1975_v63 = vld [vmem:[%s2089_s23 + $0x1a4] ss:$8 sps:$4 sm:$0xff]  }
  0x4e   : > { %1283 = vmatprep.subr.bf16.mxu0 %v1896_v0  ;;  %v361_v0 = vld [vmem:[%s2365_s1 + $0x30] sm:$0xff] }
  0x4f   : > { %400 = vperm.xlu1 %1803, %v362_v62   ;;  %395 = vperm.xlu0 %1802, %v361_v0  }
  0x50   : > { %1138 = vmatpush1.bf16.msra.mxu1 %v1898_v2  ;;  %v1976_v2 = vld [vmem:[%s2364_s0 + $0x50] ss:$28 sps:$4 sm:$0xff]  }
  0x51   : > { %1284 = vmatpush1.bf16.msra.mxu0 %v1899_v3  ;;  %1180 = vmatprep.subr.bf16.mxu1 %v1908_v4  ;;  %v1973_v3 = vld [vmem:[%s2089_s23 + $0x1a0] ss:$8 sps:$4 sm:$0xff]   ;;  %v1979_v4 = vld [vmem:[%s2089_s23 + $0x1b4] ss:$8 sps:$4 sm:$0xff]  }
  0x52   : > { %1326 = vmatprep.subr.bf16.mxu0 %v1911_v5  ;;  %v1977_v5 = vld [vmem:[%s2089_s23 + $0x1b0] ss:$8 sps:$4 sm:$0xff]  }
  0x53   : > { %1140 = vmatmul.mubr.bf16.vlgmr.msra.gmra.mrb[0].mxu1 %v1903_v7  ;;  %v1986_v7 = vld [vmem:[%s2364_s0 + $0x88] ss:$28 sps:$4 sm:$0xff]  }
  0x54   : > { %1286 = vmatmul.mubr.bf16.vlgmr.msra.gmra.mrb[0].mxu0 %v1900_v6  ;;  %1181 = vmatpush1.bf16.msra.mxu1 %v1906_v8  ;;  %v1985_v6 = vld [vmem:[%s2089_s23 + $0x1c4] ss:$8 sps:$4 sm:$0xff]   ;;  %v1983_v8 = vld [vmem:[%s2089_s23 + $0x1c0] ss:$8 sps:$4 sm:$0xff]  }
  0x55   : > { %1327 = vmatpush1.bf16.msra.mxu0 %v1909_v9  ;;  %1182 = vmatprep.subr.bf16.mxu1 %v1914_v10  ;;  %v1989_v9 = vld [vmem:[%s2089_s23 + $0x1d4] ss:$8 sps:$4 sm:$0xff]   ;;  %v1987_v10 = vld [vmem:[%s2089_s23 + $0x1d0] ss:$8 sps:$4 sm:$0xff]  }
  0x56   : > { %1328 = vmatprep.subr.bf16.mxu0 %v1917_v11  ;;  %1295 = vmatprep.mubr.bf16.mxu0 %v1918_v12  ;;  %v1995_v11 = vld [vmem:[%s2089_s23 + $0x1e4] ss:$8 sps:$4 sm:$0xff]   ;;  %v1996_v12 = vld [vmem:[%s2364_s0 + $0xc0] ss:$28 sps:$4 sm:$0xff]  }
  0x57   : > { %1149 = vmatprep.mubr.bf16.mxu1 %v1970_v15  ;;  %v1997_v15 = vld [vmem:[%s2089_s23 + $0x1f0] ss:$8 sps:$4 sm:$0xff]  }
  0x58   : > { %1183 = vmatpush1.bf16.msra.mxu1 %v1912_v13  ;;  %v1993_v13 = vld [vmem:[%s2089_s23 + $0x1e0] ss:$8 sps:$4 sm:$0xff]  }
  0x59   : > { %1329 = vmatpush1.bf16.msra.mxu0 %v1915_v14  ;;  %1184 = vmatprep.subr.bf16.mxu1 %v1922_v16  ;;  %v1999_v14 = vld [vmem:[%s2089_s23 + $0x1f4] ss:$8 sps:$4 sm:$0xff]   ;;  %v2000_v16 = vld [vmem:[%s2364_s0 + $0x8] ss:$28 sps:$4 sm:$0xff]  }
  0x5a   : > { %1330 = vmatprep.subr.bf16.mxu0 %v1926_v18  ;;  %v2006_v18 = vld [vmem:[%s2364_s0 + $0x7c] ss:$28 sps:$4 sm:$0xff]  }
  0x5b   : > { %1150 = vmatmul.mubr.bf16.gmra.mrb[4].mxu1 %v1972_v20  ;;  %v2009_v20 = vld [vmem:[%s2364_s0 + $0xb4] ss:$28 sps:$4 sm:$0xff]  }
  0x5c   : > { %1296 = vmatmul.mubr.bf16.gmra.mrb[4].mxu0 %v1923_v17  ;;  %1185 = vmatpush1.bf16.msra.mxu1 %v1920_v19  ;;  %v2005_v17 = vld [vmem:[%s2364_s0 + $0x40] ss:$28 sps:$4 sm:$0xff]   ;;  %v2008_v19 = vld [vmem:[%s2364_s0 + $0x78] ss:$28 sps:$4 sm:$0xff]  }
  0x5d   : > { %1331 = vmatpush1.bf16.msra.mxu0 %v1924_v21  ;;  %1186 = vmatprep.subr.bf16.mxu1 %v1929_v23  ;;  %v2011_v21 = vld [vmem:[%s2364_s0 + $0xb0] ss:$28 sps:$4 sm:$0xff]  }
  0x5e   : > { %1332 = vmatprep.subr.bf16.mxu0 %v1932_v24  ;;  %1305 = vmatprep.mubr.bf16.mxu0 %v1933_v22 }
  0x5f   : > { %1159 = vmatprep.mubr.bf16.mxu1 %v1980_v26 }
  0x60   : > { %1187 = vmatpush1.bf16.msra.mxu1 %v1927_v25 }
  0x61   : > { %1333 = vmatpush1.bf16.msra.mxu0 %v1930_v27  ;;  %1188 = vmatprep.subr.bf16.mxu1 %v1937_v28 }
  0x62   : > { %1334 = vmatprep.subr.bf16.mxu0 %v1941_v29 }
  0x63   : > { %1160 = vmatmul.mubr.bf16.gmra.mrb[8].mxu1 %v1982_v33 }
  0x64   : > { %1306 = vmatmul.mubr.bf16.gmra.mrb[8].mxu0 %v1938_v31  ;;  %1189 = vmatpush1.bf16.msra.mxu1 %v1935_v30 }
  0x65   : > { %1335 = vmatpush1.bf16.msra.mxu0 %v1939_v32  ;;  %1190 = vmatprep.subr.bf16.mxu1 %v1944_v34 }
  0x66   : > { %1336 = vmatprep.subr.bf16.mxu0 %v1947_v36  ;;  %1315 = vmatprep.mubr.bf16.mxu0 %v1948_v35 }
  0x67   : > { %1169 = vmatprep.mubr.bf16.mxu1 %v1990_v37 }
  0x68   : > { %1191 = vmatpush1.bf16.msra.mxu1 %v1942_v38 }
  0x69   : > { %1337 = vmatpush1.bf16.msra.mxu0 %v1945_v39  ;;  %1192 = vmatprep.subr.bf16.mxu1 %v1952_v40 }
  0x6a   : > { %1338 = vmatprep.subr.bf16.mxu0 %v1956_v41 }
  0x6b   : > { %1170 = vmatmul.mubr.bf16.gmra.mrb[12].mxu1 %v1992_v43 }
  0x6c   : > { %1316 = vmatmul.mubr.bf16.gmra.mrb[12].mxu0 %v1953_v42  ;;  %1193 = vmatpush1.bf16.msra.mxu1 %v1950_v45 }
  0x6d   : > { %1339 = vmatpush1.bf16.msra.mxu0 %v1954_v46  ;;  %1194 = vmatprep.subr.bf16.mxu1 %v1959_v48 }
  0x6e   : > { %1340 = vmatprep.subr.bf16.mxu0 %v1962_v49  ;;  %1358 = vmatprep.mubr.bf16.mxu0 %v2036_v1 }
  0x6f   : > { %1212 = vmatprep.mubr.bf16.mxu1 %v2002_v50 }
  0x70   : > { %1195 = vmatpush1.bf16.msra.mxu1 %v1957_v51 }
  0x71   : > { %1341 = vmatpush1.bf16.msra.mxu0 %v1960_v52  ;;  %1196 = vmatprep.subr.bf16.mxu1 %v1965_v55 }
  0x74   : > { %1359 = vmatmul.mubr.bf16.vlgmr.msra.gmra.mrb[0].mxu0 %v1966_v56  ;;  %1197 = vmatpush1.bf16.msra.mxu1 %v1963_v57 }
  0x75   : > { %1368 = vmatprep.mubr.bf16.mxu0 %v2036_v1  ;;  %1198 = vmatprep.subr.bf16.mxu1 %v1969_v59 }
  0x78   : > { %1199 = vmatpush1.bf16.msra.mxu1 %v1967_v61 }
  0x79   : > { %1200 = vmatprep.subr.bf16.mxu1 %v1975_v63 }
  0x7c   : > { %1369 = vmatmul.mubr.bf16.gmra.mrb[4].mxu0 %v1976_v2  ;;  %1201 = vmatpush1.bf16.msra.mxu1 %v1973_v3 }
  0x7d   : > { %1378 = vmatprep.mubr.bf16.mxu0 %v2036_v1  ;;  %1202 = vmatprep.subr.bf16.mxu1 %v1979_v4 }
  0x80   : > { %1203 = vmatpush1.bf16.msra.mxu1 %v1977_v5 }
  0x81   : > { %1204 = vmatprep.subr.bf16.mxu1 %v1985_v6 }
  0x84   : > { %1379 = vmatmul.mubr.bf16.gmra.mrb[8].mxu0 %v1986_v7  ;;  %1205 = vmatpush1.bf16.msra.mxu1 %v1983_v8 }
  0x85   : > { %1388 = vmatprep.mubr.bf16.mxu0 %v2036_v1  ;;  %1206 = vmatprep.subr.bf16.mxu1 %v1989_v9  ;;  %v2003_v1 = vld [vmem:[%s2364_s0 + $0x44] ss:$28 sps:$4 sm:$0xff]  }
  0x88   : > { %1207 = vmatpush1.bf16.msra.mxu1 %v1987_v10 }
  0x89   : > { %1208 = vmatprep.subr.bf16.mxu1 %v1995_v11 }
  0x8c   : > { %1389 = vmatmul.mubr.bf16.gmra.mrb[12].mxu0 %v1996_v12  ;;  %1209 = vmatpush1.bf16.msra.mxu1 %v1993_v13 }
  0x8d   : > { %1210 = vmatprep.subr.bf16.mxu1 %v1999_v14 }
  0x90   : > { %1211 = vmatpush1.bf16.msra.mxu1 %v1997_v15 }
  0x93   : > { %1213 = vmatmul.mubr.bf16.vlgmr.msra.gmra.mrb[0].mxu1 %v2000_v16 }
  0x94   : > { %1222 = vmatprep.mubr.bf16.mxu1 %v2003_v1 }
  0x9b   : > { %1223 = vmatmul.mubr.bf16.gmra.mrb[4].mxu1 %v2005_v17 }
  0x9c   : > { %1232 = vmatprep.mubr.bf16.mxu1 %v2006_v18 }
  0xa3   : > { %1233 = vmatmul.mubr.bf16.gmra.mrb[8].mxu1 %v2008_v19 }
  0xa4   : > { %1242 = vmatprep.mubr.bf16.mxu1 %v2009_v20 }
  0xab   : > { %1243 = vmatmul.mubr.bf16.gmra.mrb[12].mxu1 %v2011_v21 }
  0xba   : > { %v366_v37 = vpop.permute.xlu0 %365 }
  0xbd   : > { %v376_v49 = vpop.permute.xlu1 %375 }
  0xc5   : > { %v371_v40 = vpop.permute.xlu0 %370 }
  0xc6   : > { %v381_v59 = vpop.permute.xlu1 %380 }
  0xca   : > { %v386_v7 = vpop.permute.xlu0 %385  ;;  %v391_v12 = vpop.permute.xlu1 %390 }
 0x147   : > { %v1360_v22 = vpop.f32.mrb[0].mxu0 }
 0x148   : > { %v1362_v23 = vpop.f32.mrb[1].mxu0 }
 0x149   : > { %v1364_v24 = vpop.f32.mrb[2].mxu0 }
 0x14a   : > { %v1366_v25 = vpop.f32.mrb[3].mxu0 }
 0x14f   : > { %v1370_v26 = vpop.f32.mrb[4].mxu0 }
 0x150   : > { %v1372_v27 = vpop.f32.mrb[5].mxu0 }
 0x151   : > { %v1374_v28 = vpop.f32.mrb[6].mxu0 }
 0x152   : > { %v1376_v29 = vpop.f32.mrb[7].mxu0 }
 0x157   : > { %v1380_v30 = vpop.f32.mrb[8].mxu0 }
 0x158   : > { %v1382_v31 = vpop.f32.mrb[9].mxu0 }
 0x159   : > { %v1384_v32 = vpop.f32.mrb[10].mxu0 }
 0x15a   : > { %v1386_v33 = vpop.f32.mrb[11].mxu0 }
 0x15f   : > { %v2309_v34 = vpop.f32.mrb[12].mxu0 }
 0x160   : > { %v2311_v35 = vpop.f32.mrb[13].mxu0 }
 0x161   : > { %v2313_v36 = vpop.f32.mrb[14].mxu0 }
 0x162   : > { %v2315_v38 = vpop.f32.mrb[15].mxu0 }
 0x166   : > { %v1214_v39 = vpop.f32.mrb[0].mxu1 }
 0x167   : > { %v1712_v41 = vadd.f32 %v1214_v39, %v366_v37  ;;  %v1216_v42 = vpop.f32.mrb[1].mxu1 }
 0x168   : > { %v1714_v43 = vadd.f32 %v1216_v42, %v366_v37  ;;  %v1218_v44 = vpop.f32.mrb[2].mxu1 }
 0x169   : > { %v1713_v45 = vadd.f32 %v1712_v41, %v1360_v22  ;;  %v1716_v46 = vadd.f32 %v1218_v44, %v371_v40  ;;  %v1220_v47 = vpop.f32.mrb[3].mxu1  ;;  %v396_v22 = vpop.permute.xlu0 %395 }
 0x16a   : > { %v1715_v48 = vadd.f32 %v1714_v43, %v1362_v23  ;;  %v1718_v50 = vadd.f32 %v1220_v47, %v371_v40 }
 0x16b   : > { %v1717_v52 = vadd.f32 %v1716_v46, %v1364_v24 }
 0x16c   : > { %v1704_v53 = vpack.c.bf16 %v1715_v48, %v1713_v45  ;;  %v1719_v54 = vadd.f32 %v1718_v50, %v1366_v25 }
 0x16e   : > { %1450 = vst.msk [vmem:[%s2321_s28] sm:$0xff] %vm2323_vm2, %v1704_v53  ;;  %v1705_v55 = vpack.c.bf16 %v1719_v54, %v1717_v52  ;;  %v1224_v56 = vpop.f32.mrb[4].mxu1 }
 0x16f   : > { %v1720_v57 = vadd.f32 %v1224_v56, %v376_v49  ;;  %v1226_v58 = vpop.f32.mrb[5].mxu1 }
 0x170   : > { %1451 = vst.msk [vmem:[%s2321_s28 + $0x8] sm:$0xff] %vm2323_vm2, %v1705_v55  ;;  %v1722_v60 = vadd.f32 %v1226_v58, %v376_v49  ;;  %v1228_v61 = vpop.f32.mrb[6].mxu1 }
 0x171   : > { %v1721_v62 = vadd.f32 %v1720_v57, %v1370_v26  ;;  %v1724_v63 = vadd.f32 %v1228_v61, %v381_v59  ;;  %v1230_v0 = vpop.f32.mrb[7].mxu1 }
 0x172   : > { %v1723_v2 = vadd.f32 %v1722_v60, %v1372_v27  ;;  %v1726_v3 = vadd.f32 %v1230_v0, %v381_v59  ;;  %v401_v27 = vpop.permute.xlu1 %400 }
 0x173   : > { %v1725_v4 = vadd.f32 %v1724_v63, %v1374_v28 }
 0x174   : > { %v1706_v5 = vpack.c.bf16 %v1723_v2, %v1721_v62  ;;  %v1727_v6 = vadd.f32 %v1726_v3, %v1376_v29 }
 0x176   : > { %1452 = vst.msk [vmem:[%s2321_s28 + $0x10] sm:$0xff] %vm2323_vm2, %v1706_v5  ;;  %v1707_v8 = vpack.c.bf16 %v1727_v6, %v1725_v4  ;;  %v1234_v9 = vpop.f32.mrb[8].mxu1 }
 0x177   : > { %v1728_v10 = vadd.f32 %v1234_v9, %v386_v7  ;;  %v1236_v11 = vpop.f32.mrb[9].mxu1 }
 0x178   : > { %1453 = vst.msk [vmem:[%s2321_s28 + $0x18] sm:$0xff] %vm2323_vm2, %v1707_v8  ;;  %v1730_v13 = vadd.f32 %v1236_v11, %v386_v7  ;;  %v1238_v14 = vpop.f32.mrb[10].mxu1 }
 0x179   : > { %v1729_v15 = vadd.f32 %v1728_v10, %v1380_v30  ;;  %v1732_v16 = vadd.f32 %v1238_v14, %v391_v12  ;;  %v1240_v1 = vpop.f32.mrb[11].mxu1 }
 0x17a   : > { %v1731_v17 = vadd.f32 %v1730_v13, %v1382_v31  ;;  %v1734_v18 = vadd.f32 %v1240_v1, %v391_v12 }
 0x17b   : > { %v1733_v19 = vadd.f32 %v1732_v16, %v1384_v32 }
 0x17c   : > { %v1708_v20 = vpack.c.bf16 %v1731_v17, %v1729_v15  ;;  %v1735_v21 = vadd.f32 %v1734_v18, %v1386_v33 }
 0x17e   : > { %1454 = vst.msk [vmem:[%s2321_s28 + $0x20] sm:$0xff] %vm2323_vm2, %v1708_v20  ;;  %v1709_v23 = vpack.c.bf16 %v1735_v21, %v1733_v19  ;;  %v1244_v24 = vpop.f32.mrb[12].mxu1 }
 0x17f   : > { %v1736_v25 = vadd.f32 %v1244_v24, %v396_v22  ;;  %v1246_v26 = vpop.f32.mrb[13].mxu1 }
 0x180   : > { %1455 = vst.msk [vmem:[%s2321_s28 + $0x28] sm:$0xff] %vm2323_vm2, %v1709_v23  ;;  %v1738_v28 = vadd.f32 %v1246_v26, %v396_v22  ;;  %v1248_v29 = vpop.f32.mrb[14].mxu1 }
 0x181   : > { %v1737_v30 = vadd.f32 %v1736_v25, %v2309_v34  ;;  %v1740_v31 = vadd.f32 %v1248_v29, %v401_v27  ;;  %v1250_v32 = vpop.f32.mrb[15].mxu1 }
 0x182   : > { %v1739_v33 = vadd.f32 %v1738_v28, %v2311_v35  ;;  %v1742_v37 = vadd.f32 %v1250_v32, %v401_v27 }
 0x183   : > { %v1741_v39 = vadd.f32 %v1740_v31, %v2313_v36 }
 0x184   : > { %v1710_v40 = vpack.c.bf16 %v1739_v33, %v1737_v30  ;;  %v1743_v41 = vadd.f32 %v1742_v37, %v2315_v38 }
 0x186   : > { %1456 = vst.msk [vmem:[%s2321_s28 + $0x30] sm:$0xff] %vm2323_vm2, %v1710_v40  ;;  %v1711_v42 = vpack.c.bf16 %v1743_v41, %v1741_v39 }
 0x188   : > { %1457 = vst.msk [vmem:[%s2321_s28 + $0x38] sm:$0xff] %vm2323_vm2, %v1711_v42 }
 0x189 PF: > { %s13_s14 = sadd.s32 1, %s2034_s14   ;;  %s2370_s12 = smov %s2030_s13 }
 0x18a   : > { %p10_p5 = scmp.ge.s32.totalorder %s13_s14, 4   ;;  %s2371_s13 = smov %s2373_s15 }
 0x18c   :  { %12 = sbr.rel (!%p10_p5) target bundleno = 2 (0x2), region = 62 }

// kernel: taxibj_forward.90
= control target key start
LH: loop header
LB: loop body
LE: loop exit
PB: predicated region body
PF: predicated region fallthrough
CT: control target
= control target key end

     0   :  { %s423_s9 = smov 0   ;;  %s448_s0 = inlined_call_operand.vmem [shape: bf16[2,112,512], index: 0, kind: input, shape index: {}]   ;;  %s449_s1 = inlined_call_operand.vmem [shape: bf16[2,64,512], index: 1, kind: input, shape index: {}]   ;;  %s450_s2 = inlined_call_operand.vmem [shape: f32[2,16,512], index: 2, kind: output, shape index: {}]  }
   0x1 LB: > { %s350_s10 = sadd.s32 4294967295, %s406_s9   ;;  %p354_p0 = scmp.ge.s32.totalorder %s406_s9, 1  ;;  %s406_s9 = sphi %s423_s9, %s12_s9  }
   0x2   : > { %p124_p1 = scmp.lt.s32.totalorder %s406_s9, 3 }
   0x4   : > { %p125_p2 = pnand %p354_p0, %p124_p1 }
   0x5   : > { %p153_p3 = scmp.lt.s32.totalorder (!%p125_p2), %s350_s10, 1 }
   0x6   : > { %128 = sbr.rel (%p125_p2) target bundleno = 360 (0x168), region = 28 }
   0xd   : > { %s452_s10 = smov (!%p153_p3, %s350_s10), 1 }
   0xe   : > { %s355_s11 = smul.u32 224, %s452_s10  ;;  %s370_s12 = sshll.u32 %s452_s10, 7 }
   0xf   : > { %s316_s15 = scalar_lea.vmem %s449_s1, %s370_s12  ;;  %s371_s19 = sshll.u32 %s452_s10, 6 }
  0x10   : > { %s312_s18 = scalar_lea.vmem %s448_s0, %s355_s11  ;;  %v364_v0 = vld [vmem:[%s316_s15 + $0x40] sm:$0xff]  ;;  %v365_v1 = vld [vmem:[%s316_s15 + $0x48] sm:$0xff]  ;;  %v366_v14 = vld [vmem:[%s316_s15 + $0x50] sm:$0xff]  ;;  %s169_s22 = scalar_lea.vmem %s450_s2, %s371_s19 }
  0x11   : > { %v360_v2 = vld [vmem:[%s312_s18 + $0x40] sm:$0xff]  ;;  %v361_v3 = vld [vmem:[%s312_s18 + $0x48] sm:$0xff]  ;;  %v186_v4 = vunpack.c.l.bf16 %v364_v0  ;;  %v187_v5 = vunpack.c.h.bf16 %v364_v0  ;;  %v188_v6 = vunpack.c.l.bf16 %v365_v1  ;;  %v189_v7 = vunpack.c.h.bf16 %v365_v1  ;;  %v362_v8 = vld [vmem:[%s312_s18 + $0x50] sm:$0xff] }
  0x12   : > { %v174_v9 = vunpack.c.l.bf16 %v360_v2  ;;  %v175_v10 = vunpack.c.h.bf16 %v360_v2  ;;  %v176_v11 = vunpack.c.l.bf16 %v361_v3  ;;  %v177_v12 = vunpack.c.h.bf16 %v361_v3  ;;  %v363_v13 = vld [vmem:[%s312_s18 + $0x58] sm:$0xff] }
  0x13   : > { %v367_v15 = vld [vmem:[%s316_s15 + $0x58] sm:$0xff]  ;;  %v178_v16 = vunpack.c.l.bf16 %v362_v8  ;;  %v179_v17 = vunpack.c.h.bf16 %v362_v8  ;;  %v180_v18 = vunpack.c.l.bf16 %v363_v13  ;;  %v181_v22 = vunpack.c.h.bf16 %v363_v13 }
  0x14   : > { %v194_v19 = vadd.f32 %v186_v4, %v174_v9  ;;  %v195_v20 = vadd.f32 %v187_v5, %v175_v10  ;;  %v196_v21 = vadd.f32 %v188_v6, %v176_v11  ;;  %v190_v23 = vunpack.c.l.bf16 %v366_v14 }
  0x15   : > { %v191_v24 = vunpack.c.h.bf16 %v366_v14  ;;  %v192_v25 = vunpack.c.l.bf16 %v367_v15  ;;  %v193_v26 = vunpack.c.h.bf16 %v367_v15  ;;  %v197_v27 = vadd.f32 %v189_v7, %v177_v12 }
  0x16   : > { %v202_v28 = vadd.f32 %v195_v20, %v194_v19  ;;  %v198_v29 = vadd.f32 %v190_v23, %v178_v16 }
  0x17   : > { %v199_v30 = vadd.f32 %v191_v24, %v179_v17  ;;  %v200_v31 = vadd.f32 %v192_v25, %v180_v18  ;;  %v201_v33 = vadd.f32 %v193_v26, %v181_v22 }
  0x18   : > { %v203_v32 = vadd.f32 %v202_v28, %v196_v21 }
  0x19   : > { %v207_v34 = vadd.f32 %v199_v30, %v198_v29 }
  0x1a   : > { %v204_v35 = vadd.f32 %v203_v32, %v197_v27 }
  0x1b   : > { %v208_v36 = vadd.f32 %v207_v34, %v200_v31 }
  0x1c   : > { %205 = vadd.xlane.f32.xlu0 %v204_v35 }
  0x1d   : > { %v209_v37 = vadd.f32 %v208_v36, %v201_v33 }
  0x20   : > { %210 = vadd.xlane.f32.xlu0 %v209_v37 }
  0xa9   : > { %v206_v38 = vpop.xlane.xlu0 %205 }
  0xaa   : > { %v213_v39 = vmul.f32 0.001953125, %v206_v38 }
  0xac   : > { %v215_v40 = vsub.f32 %v194_v19, %v213_v39  ;;  %v216_v41 = vsub.f32 %v195_v20, %v213_v39  ;;  %v217_v42 = vsub.f32 %v196_v21, %v213_v39  ;;  %v218_v44 = vsub.f32 %v197_v27, %v213_v39 }
  0xad   : > { %v211_v43 = vpop.xlane.xlu0 %210 }
  0xae   : > { %v214_v45 = vmul.f32 0.001953125, %v211_v43  ;;  %v223_v46 = vmul.f32 %v215_v40, %v215_v40  ;;  %v224_v47 = vmul.f32 %v216_v41, %v216_v41  ;;  %v225_v48 = vmul.f32 %v217_v42, %v217_v42 }
  0xaf   : > { %v226_v53 = vmul.f32 %v218_v44, %v218_v44 }
  0xb0   : > { %v219_v49 = vsub.f32 %v198_v29, %v214_v45  ;;  %v220_v50 = vsub.f32 %v199_v30, %v214_v45  ;;  %v231_v51 = vadd.f32 %v224_v47, %v223_v46  ;;  %v221_v52 = vsub.f32 %v200_v31, %v214_v45 }
  0xb1   : > { %v222_v55 = vsub.f32 %v201_v33, %v214_v45 }
  0xb2   : > { %v232_v54 = vadd.f32 %v231_v51, %v225_v48  ;;  %v227_v56 = vmul.f32 %v219_v49, %v219_v49  ;;  %v228_v57 = vmul.f32 %v220_v50, %v220_v50  ;;  %v229_v59 = vmul.f32 %v221_v52, %v221_v52 }
  0xb3   : > { %v230_v61 = vmul.f32 %v222_v55, %v222_v55 }
  0xb4   : > { %v233_v58 = vadd.f32 %v232_v54, %v226_v53  ;;  %v236_v60 = vadd.f32 %v228_v57, %v227_v56 }
  0xb6   : > { %234 = vadd.xlane.f32.xlu1 %v233_v58  ;;  %v237_v62 = vadd.f32 %v236_v60, %v229_v59 }
  0xb8   : > { %v238_v63 = vadd.f32 %v237_v62, %v230_v61 }
  0xba   : > { %239 = vadd.xlane.f32.xlu1 %v238_v63 }
 0x143   : > { %v235_v0 = vpop.xlane.xlu1 %234 }
 0x144   : > { %v241_v1 = vmul.f32 0.001953125, %v235_v0 }
 0x146   : > { %v243_v2 = vadd.f32 1e-05, %v241_v1 }
 0x147   : > { %v240_v3 = vpop.xlane.xlu1 %239 }
 0x148   : > { %380 = vrsqrt.f32 %v243_v2  ;;  %v242_v4 = vmul.f32 0.001953125, %v240_v3 }
 0x14a   : > { %v244_v5 = vadd.f32 1e-05, %v242_v4 }
 0x14c   : > { %382 = vrsqrt.f32 %v244_v5 }
 0x152   : > { %v381_v6 = vpop.eup %380 }
 0x153   : > { %v247_v7 = vmul.f32 %v381_v6, %v215_v40  ;;  %v248_v8 = vmul.f32 %v381_v6, %v216_v41  ;;  %v249_v9 = vmul.f32 %v381_v6, %v217_v42  ;;  %v250_v10 = vmul.f32 %v381_v6, %v218_v44 }
 0x155   : > { %384 = vtanh.f32 %v247_v7 }
 0x156   : > { %v383_v11 = vpop.eup %382  ;;  %386 = vtanh.f32 %v248_v8 }
 0x157   : > { %388 = vtanh.f32 %v249_v9  ;;  %v251_v12 = vmul.f32 %v383_v11, %v219_v49  ;;  %v252_v13 = vmul.f32 %v383_v11, %v220_v50  ;;  %v253_v14 = vmul.f32 %v383_v11, %v221_v52 }
 0x158   : > { %390 = vtanh.f32 %v250_v10  ;;  %v254_v15 = vmul.f32 %v383_v11, %v222_v55 }
 0x159   : > { %392 = vtanh.f32 %v251_v12 }
 0x15a   : > { %394 = vtanh.f32 %v252_v13 }
 0x15b   : > { %396 = vtanh.f32 %v253_v14 }
 0x15c   : > { %398 = vtanh.f32 %v254_v15 }
 0x15f   : > { %v385_v16 = vpop.eup %384 }
 0x160   : > { %v387_v17 = vpop.eup %386  ;;  %263 = vst [vmem:[%s169_s22] sm:$0xff] %v385_v16 }
 0x161   : > { %v389_v18 = vpop.eup %388  ;;  %264 = vst [vmem:[%s169_s22 + $0x8] sm:$0xff] %v387_v17 }
 0x162   : > { %v391_v19 = vpop.eup %390  ;;  %265 = vst [vmem:[%s169_s22 + $0x10] sm:$0xff] %v389_v18 }
 0x163   : > { %v393_v20 = vpop.eup %392  ;;  %266 = vst [vmem:[%s169_s22 + $0x18] sm:$0xff] %v391_v19 }
 0x164   : > { %v395_v21 = vpop.eup %394  ;;  %267 = vst [vmem:[%s169_s22 + $0x20] sm:$0xff] %v393_v20 }
 0x165   : > { %v397_v22 = vpop.eup %396  ;;  %268 = vst [vmem:[%s169_s22 + $0x28] sm:$0xff] %v395_v21 }
 0x166   : > { %v399_v23 = vpop.eup %398  ;;  %269 = vst [vmem:[%s169_s22 + $0x30] sm:$0xff] %v397_v22 }
 0x167   : > { %270 = vst [vmem:[%s169_s22 + $0x38] sm:$0xff] %v399_v23 }
 0x168 PF: > { %s12_s9 = sadd.s32 1, %s406_s9  }
 0x169   : > { %p9_p4 = scmp.ge.s32.totalorder %s12_s9, 4  }
 0x16b   :  { %11 = sbr.rel (!%p9_p4) target bundleno = 1 (0x1), region = 61 }

// kernel: taxibj_forward.89
= control target key start
LH: loop header
LB: loop body
LE: loop exit
PB: predicated region body
PF: predicated region fallthrough
CT: control target
= control target key end

     0   :  { %s487_s9 = smov 0   ;;  %s512_s0 = inlined_call_operand.vmem [shape: bf16[2,112,512], index: 0, kind: input, shape index: {}]   ;;  %s513_s1 = inlined_call_operand.vmem [shape: bf16[2,64,512], index: 1, kind: input, shape index: {}]   ;;  %s514_s2 = inlined_call_operand.vmem [shape: f32[2,16,512], index: 2, kind: output, shape index: {}]  }
   0x1 LB: > { %s390_s10 = sadd.s32 4294967295, %s470_s9   ;;  %p394_p0 = scmp.ge.s32.totalorder %s470_s9, 1  ;;  %s470_s9 = sphi %s487_s9, %s12_s9  }
   0x2   : > { %p124_p1 = scmp.lt.s32.totalorder %s470_s9, 3 }
   0x4   : > { %p125_p2 = pnand %p394_p0, %p124_p1 }
   0x5   : > { %p153_p3 = scmp.lt.s32.totalorder (!%p125_p2), %s390_s10, 1 }
   0x6   : > { %128 = sbr.rel (%p125_p2) target bundleno = 375 (0x177), region = 28 }
   0xd   : > { %s516_s10 = smov (!%p153_p3, %s390_s10), 1 }
   0xe   : > { %s395_s11 = smul.u32 224, %s516_s10  ;;  %s418_s12 = sshll.u32 %s516_s10, 7 }
   0xf   : > { %s356_s15 = scalar_lea.vmem %s513_s1, %s418_s12  ;;  %s419_s19 = sshll.u32 %s516_s10, 6 }
  0x10   : > { %s352_s18 = scalar_lea.vmem %s512_s0, %s395_s11  ;;  %v404_v0 = vld [vmem:[%s356_s15 + $0x20] sm:$0xff]  ;;  %v405_v1 = vld [vmem:[%s356_s15 + $0x28] sm:$0xff]  ;;  %v406_v14 = vld [vmem:[%s356_s15 + $0x30] sm:$0xff]  ;;  %s169_s22 = scalar_lea.vmem %s514_s2, %s419_s19 }
  0x11   : > { %v400_v2 = vld [vmem:[%s352_s18 + $0x20] sm:$0xff]  ;;  %v401_v3 = vld [vmem:[%s352_s18 + $0x28] sm:$0xff]  ;;  %v186_v4 = vunpack.c.l.bf16 %v404_v0  ;;  %v187_v5 = vunpack.c.h.bf16 %v404_v0  ;;  %v188_v6 = vunpack.c.l.bf16 %v405_v1  ;;  %v189_v7 = vunpack.c.h.bf16 %v405_v1  ;;  %v402_v8 = vld [vmem:[%s352_s18 + $0x30] sm:$0xff] }
  0x12   : > { %v174_v9 = vunpack.c.l.bf16 %v400_v2  ;;  %v175_v10 = vunpack.c.h.bf16 %v400_v2  ;;  %v176_v11 = vunpack.c.l.bf16 %v401_v3  ;;  %v177_v12 = vunpack.c.h.bf16 %v401_v3  ;;  %v403_v13 = vld [vmem:[%s352_s18 + $0x38] sm:$0xff] }
  0x13   : > { %v407_v15 = vld [vmem:[%s356_s15 + $0x38] sm:$0xff]  ;;  %v178_v16 = vunpack.c.l.bf16 %v402_v8  ;;  %v179_v17 = vunpack.c.h.bf16 %v402_v8  ;;  %v180_v18 = vunpack.c.l.bf16 %v403_v13  ;;  %v181_v22 = vunpack.c.h.bf16 %v403_v13 }
  0x14   : > { %v194_v19 = vadd.f32 %v186_v4, %v174_v9  ;;  %v195_v20 = vadd.f32 %v187_v5, %v175_v10  ;;  %v196_v21 = vadd.f32 %v188_v6, %v176_v11  ;;  %v190_v23 = vunpack.c.l.bf16 %v406_v14 }
  0x15   : > { %v191_v24 = vunpack.c.h.bf16 %v406_v14  ;;  %v192_v25 = vunpack.c.l.bf16 %v407_v15  ;;  %v193_v26 = vunpack.c.h.bf16 %v407_v15  ;;  %v197_v27 = vadd.f32 %v189_v7, %v177_v12 }
  0x16   : > { %v202_v28 = vadd.f32 %v195_v20, %v194_v19  ;;  %v198_v29 = vadd.f32 %v190_v23, %v178_v16 }
  0x17   : > { %v199_v30 = vadd.f32 %v191_v24, %v179_v17  ;;  %v200_v31 = vadd.f32 %v192_v25, %v180_v18  ;;  %v201_v33 = vadd.f32 %v193_v26, %v181_v22 }
  0x18   : > { %v203_v32 = vadd.f32 %v202_v28, %v196_v21 }
  0x19   : > { %v207_v34 = vadd.f32 %v199_v30, %v198_v29 }
  0x1a   : > { %v204_v35 = vadd.f32 %v203_v32, %v197_v27 }
  0x1b   : > { %v208_v36 = vadd.f32 %v207_v34, %v200_v31 }
  0x1c   : > { %205 = vadd.xlane.f32.xlu0 %v204_v35 }
  0x1d   : > { %v209_v37 = vadd.f32 %v208_v36, %v201_v33 }
  0x20   : > { %210 = vadd.xlane.f32.xlu0 %v209_v37 }
  0xa9   : > { %v206_v38 = vpop.xlane.xlu0 %205 }
  0xaa   : > { %v213_v39 = vmul.f32 0.001953125, %v206_v38 }
  0xac   : > { %v215_v40 = vsub.f32 %v194_v19, %v213_v39  ;;  %v216_v41 = vsub.f32 %v195_v20, %v213_v39  ;;  %v217_v42 = vsub.f32 %v196_v21, %v213_v39  ;;  %v218_v44 = vsub.f32 %v197_v27, %v213_v39 }
  0xad   : > { %v211_v43 = vpop.xlane.xlu0 %210 }
  0xae   : > { %v214_v45 = vmul.f32 0.001953125, %v211_v43  ;;  %v223_v46 = vmul.f32 %v215_v40, %v215_v40  ;;  %v224_v47 = vmul.f32 %v216_v41, %v216_v41  ;;  %v225_v48 = vmul.f32 %v217_v42, %v217_v42 }
  0xaf   : > { %v226_v53 = vmul.f32 %v218_v44, %v218_v44 }
  0xb0   : > { %v219_v49 = vsub.f32 %v198_v29, %v214_v45  ;;  %v220_v50 = vsub.f32 %v199_v30, %v214_v45  ;;  %v231_v51 = vadd.f32 %v224_v47, %v223_v46  ;;  %v221_v52 = vsub.f32 %v200_v31, %v214_v45 }
  0xb1   : > { %v222_v55 = vsub.f32 %v201_v33, %v214_v45 }
  0xb2   : > { %v232_v54 = vadd.f32 %v231_v51, %v225_v48  ;;  %v227_v56 = vmul.f32 %v219_v49, %v219_v49  ;;  %v228_v57 = vmul.f32 %v220_v50, %v220_v50  ;;  %v229_v59 = vmul.f32 %v221_v52, %v221_v52 }
  0xb3   : > { %v230_v61 = vmul.f32 %v222_v55, %v222_v55 }
  0xb4   : > { %v233_v58 = vadd.f32 %v232_v54, %v226_v53  ;;  %v236_v60 = vadd.f32 %v228_v57, %v227_v56 }
  0xb6   : > { %234 = vadd.xlane.f32.xlu1 %v233_v58  ;;  %v237_v62 = vadd.f32 %v236_v60, %v229_v59 }
  0xb8   : > { %v238_v63 = vadd.f32 %v237_v62, %v230_v61 }
  0xba   : > { %239 = vadd.xlane.f32.xlu1 %v238_v63 }
 0x143   : > { %v235_v0 = vpop.xlane.xlu1 %234 }
 0x144   : > { %v241_v1 = vmul.f32 0.001953125, %v235_v0 }
 0x146   : > { %v243_v2 = vadd.f32 1e-05, %v241_v1 }
 0x147   : > { %v240_v3 = vpop.xlane.xlu1 %239 }
 0x148   : > { %428 = vrsqrt.f32 %v243_v2  ;;  %v242_v4 = vmul.f32 0.001953125, %v240_v3 }
 0x14a   : > { %v244_v5 = vadd.f32 1e-05, %v242_v4 }
 0x14c   : > { %430 = vrsqrt.f32 %v244_v5 }
 0x152   : > { %v429_v6 = vpop.eup %428 }
 0x153   : > { %v247_v7 = vmul.f32 %v429_v6, %v215_v40  ;;  %v248_v8 = vmul.f32 %v429_v6, %v216_v41  ;;  %v249_v9 = vmul.f32 %v429_v6, %v217_v42  ;;  %v250_v10 = vmul.f32 %v429_v6, %v218_v44 }
 0x155   : > { %v408_v11 = vmul.f32 -1.442695, %v247_v7  ;;  %v409_v12 = vmul.f32 -1.442695, %v248_v8  ;;  %v410_v13 = vmul.f32 -1.442695, %v249_v9 }
 0x156   : > { %v431_v14 = vpop.eup %430  ;;  %v411_v15 = vmul.f32 -1.442695, %v250_v10 }
 0x157   : > { %432 = vpow2.f32 %v408_v11  ;;  %v251_v16 = vmul.f32 %v431_v14, %v219_v49  ;;  %v252_v17 = vmul.f32 %v431_v14, %v220_v50  ;;  %v253_v18 = vmul.f32 %v431_v14, %v221_v52 }
 0x158   : > { %434 = vpow2.f32 %v409_v12  ;;  %v254_v19 = vmul.f32 %v431_v14, %v222_v55 }
 0x159   : > { %436 = vpow2.f32 %v410_v13  ;;  %v412_v20 = vmul.f32 -1.442695, %v251_v16  ;;  %v413_v21 = vmul.f32 -1.442695, %v252_v17  ;;  %v414_v22 = vmul.f32 -1.442695, %v253_v18 }
 0x15a   : > { %438 = vpow2.f32 %v411_v15  ;;  %v415_v23 = vmul.f32 -1.442695, %v254_v19 }
 0x15b   : > { %440 = vpow2.f32 %v412_v20 }
 0x15c   : > { %442 = vpow2.f32 %v413_v21 }
 0x15d   : > { %444 = vpow2.f32 %v414_v22 }
 0x15e   : > { %446 = vpow2.f32 %v415_v23 }
 0x161   : > { %v433_v24 = vpop.eup %432 }
 0x162   : > { %v435_v25 = vpop.eup %434  ;;  %v279_v26 = vadd.f32 1.0, %v433_v24 }
 0x163   : > { %v437_v27 = vpop.eup %436  ;;  %v280_v28 = vadd.f32 1.0, %v435_v25 }
 0x164   : > { %v439_v29 = vpop.eup %438  ;;  %v281_v30 = vadd.f32 1.0, %v437_v27  ;;  %448 = vrcp.f32 %v279_v26 }
 0x165   : > { %v441_v31 = vpop.eup %440  ;;  %v282_v32 = vadd.f32 1.0, %v439_v29  ;;  %450 = vrcp.f32 %v280_v28 }
 0x166   : > { %v443_v33 = vpop.eup %442  ;;  %452 = vrcp.f32 %v281_v30  ;;  %v283_v34 = vadd.f32 1.0, %v441_v31 }
 0x167   : > { %v445_v35 = vpop.eup %444  ;;  %454 = vrcp.f32 %v282_v32  ;;  %v284_v36 = vadd.f32 1.0, %v443_v33 }
 0x168   : > { %v447_v37 = vpop.eup %446  ;;  %v285_v38 = vadd.f32 1.0, %v445_v35  ;;  %456 = vrcp.f32 %v283_v34 }
 0x169   : > { %v286_v39 = vadd.f32 1.0, %v447_v37  ;;  %458 = vrcp.f32 %v284_v36 }
 0x16a   : > { %460 = vrcp.f32 %v285_v38 }
 0x16b   : > { %462 = vrcp.f32 %v286_v39 }
 0x16e   : > { %v449_v40 = vpop.eup %448 }
 0x16f   : > { %v451_v41 = vpop.eup %450  ;;  %303 = vst [vmem:[%s169_s22] sm:$0xff] %v449_v40 }
 0x170   : > { %v453_v42 = vpop.eup %452  ;;  %304 = vst [vmem:[%s169_s22 + $0x8] sm:$0xff] %v451_v41 }
 0x171   : > { %v455_v43 = vpop.eup %454  ;;  %305 = vst [vmem:[%s169_s22 + $0x10] sm:$0xff] %v453_v42 }
 0x172   : > { %v457_v44 = vpop.eup %456  ;;  %306 = vst [vmem:[%s169_s22 + $0x18] sm:$0xff] %v455_v43 }
 0x173   : > { %v459_v45 = vpop.eup %458  ;;  %307 = vst [vmem:[%s169_s22 + $0x20] sm:$0xff] %v457_v44 }
 0x174   : > { %v461_v46 = vpop.eup %460  ;;  %308 = vst [vmem:[%s169_s22 + $0x28] sm:$0xff] %v459_v45 }
 0x175   : > { %v463_v47 = vpop.eup %462  ;;  %309 = vst [vmem:[%s169_s22 + $0x30] sm:$0xff] %v461_v46 }
 0x176   : > { %310 = vst [vmem:[%s169_s22 + $0x38] sm:$0xff] %v463_v47 }
 0x177 PF: > { %s12_s9 = sadd.s32 1, %s470_s9  }
 0x178   : > { %p9_p4 = scmp.ge.s32.totalorder %s12_s9, 4  }
 0x17a   :  { %11 = sbr.rel (!%p9_p4) target bundleno = 1 (0x1), region = 61 }

// kernel: taxibj_forward.91
= control target key start
LH: loop header
LB: loop body
LE: loop exit
PB: predicated region body
PF: predicated region fallthrough
CT: control target
= control target key end

     0   :  { %s540_s15 = smov 0   ;;  %s598_s0 = inlined_call_operand.vmem [shape: f32[2,16,512], index: 0, kind: input, shape index: {}]   ;;  %s599_s1 = inlined_call_operand.vmem [shape: f32[2,16,512], index: 1, kind: input, shape index: {}]   ;;  %s600_s2 = inlined_call_operand.vmem [shape: f32[2,16,512], index: 2, kind: input, shape index: {}]   ;;  %s601_s3 = inlined_call_operand.vmem [shape: f32[2,16,512], index: 3, kind: input, shape index: {}]   ;;  %s602_s4 = inlined_call_operand.vmem [shape: f32[2,16,512], index: 4, kind: output, shape index: {}]  }
   0x1 LB: > { %s475_s16 = sadd.s32 4294967295, %s513_s15   ;;  %p479_p0 = scmp.ge.s32.totalorder %s513_s15, 1  ;;  %s513_s15 = sphi %s540_s15, %s14_s15  }
   0x2   : > { %p192_p1 = scmp.lt.s32.totalorder %s513_s15, 3 }
   0x4   : > { %p193_p2 = pnand %p479_p0, %p192_p1 }
   0x5   : > { %p233_p3 = scmp.lt.s32.totalorder (!%p193_p2), %s475_s16, 1 }
   0x6   : > { %196 = sbr.rel (%p193_p2) target bundleno = 381 (0x17d), region = 36 }
   0xd   : > { %s604_s16 = smov (!%p233_p3, %s475_s16), 1 }
   0xe   : > { %s548_s17 = sshll.u32 %s604_s16, 6 }
   0xf   : > { %s237_s20 = scalar_lea.vmem %s598_s0, %s548_s17  ;;  %s242_s23 = scalar_lea.vmem %s599_s1, %s548_s17 }
  0x10   : > { %v258_v0 = vld [vmem:[%s237_s20] sm:$0xff]  ;;  %v259_v1 = vld [vmem:[%s237_s20 + $0x8] sm:$0xff]  ;;  %v260_v2 = vld [vmem:[%s237_s20 + $0x10] sm:$0xff]  ;;  %s247_s26 = scalar_lea.vmem %s600_s2, %s548_s17  ;;  %s252_s29 = scalar_lea.vmem %s601_s3, %s548_s17 }
  0x11   : > { %v261_v3 = vld [vmem:[%s237_s20 + $0x18] sm:$0xff]  ;;  %v266_v4 = vld [vmem:[%s242_s23] sm:$0xff]  ;;  %v267_v5 = vld [vmem:[%s242_s23 + $0x8] sm:$0xff]  ;;  %s257_s6 = scalar_lea.vmem %s602_s4, %s548_s17 }
  0x12   : > { %v268_v6 = vld [vmem:[%s242_s23 + $0x10] sm:$0xff]  ;;  %v269_v7 = vld [vmem:[%s242_s23 + $0x18] sm:$0xff]  ;;  %v274_v8 = vadd.f32 %v266_v4, %v258_v0  ;;  %v275_v9 = vadd.f32 %v267_v5, %v259_v1  ;;  %v262_v15 = vld [vmem:[%s237_s20 + $0x20] sm:$0xff] }
  0x13   : > { %v276_v10 = vadd.f32 %v268_v6, %v260_v2  ;;  %v277_v11 = vadd.f32 %v269_v7, %v261_v3  ;;  %v263_v16 = vld [vmem:[%s237_s20 + $0x28] sm:$0xff]  ;;  %v264_v17 = vld [vmem:[%s237_s20 + $0x30] sm:$0xff]  ;;  %v265_v18 = vld [vmem:[%s237_s20 + $0x38] sm:$0xff] }
  0x14   : > { %v282_v12 = vadd.f32 %v275_v9, %v274_v8  ;;  %v270_v19 = vld [vmem:[%s242_s23 + $0x20] sm:$0xff]  ;;  %v271_v20 = vld [vmem:[%s242_s23 + $0x28] sm:$0xff]  ;;  %v272_v21 = vld [vmem:[%s242_s23 + $0x30] sm:$0xff] }
  0x15   : > { %v273_v22 = vld [vmem:[%s242_s23 + $0x38] sm:$0xff]  ;;  %v278_v23 = vadd.f32 %v270_v19, %v262_v15  ;;  %v279_v24 = vadd.f32 %v271_v20, %v263_v16  ;;  %v280_v25 = vadd.f32 %v272_v21, %v264_v17  ;;  %v350_v15 = vld [vmem:[%s247_s26 + $0x30] sm:$0xff]  ;;  %v352_v17 = vld [vmem:[%s252_s29] sm:$0xff] }
  0x16   : > { %v283_v13 = vadd.f32 %v282_v12, %v276_v10  ;;  %v281_v26 = vadd.f32 %v273_v22, %v265_v18  ;;  %v347_v12 = vld [vmem:[%s247_s26 + $0x18] sm:$0xff]  ;;  %v353_v18 = vld [vmem:[%s252_s29 + $0x8] sm:$0xff]  ;;  %v354_v19 = vld [vmem:[%s252_s29 + $0x10] sm:$0xff] }
  0x17   : > { %v287_v27 = vadd.f32 %v279_v24, %v278_v23  ;;  %v351_v16 = vld [vmem:[%s247_s26 + $0x38] sm:$0xff]  ;;  %v356_v21 = vld [vmem:[%s252_s29 + $0x20] sm:$0xff]  ;;  %v357_v22 = vld [vmem:[%s252_s29 + $0x28] sm:$0xff] }
  0x18   : > { %v284_v14 = vadd.f32 %v283_v13, %v277_v11  ;;  %v348_v13 = vld [vmem:[%s247_s26 + $0x20] sm:$0xff]  ;;  %v355_v20 = vld [vmem:[%s252_s29 + $0x18] sm:$0xff] }
  0x19   : > { %v288_v28 = vadd.f32 %v287_v27, %v280_v25 }
  0x1a   : > { %285 = vadd.xlane.f32.xlu0 %v284_v14  ;;  %v349_v14 = vld [vmem:[%s247_s26 + $0x28] sm:$0xff] }
  0x1b   : > { %v289_v29 = vadd.f32 %v288_v28, %v281_v26  ;;  %v363_v28 = vmul.f32 %v355_v20, %v347_v12 }
  0x1e   : > { %290 = vadd.xlane.f32.xlu0 %v289_v29 }
  0xa7   : > { %v286_v30 = vpop.xlane.xlu0 %285 }
  0xab   : > { %v291_v31 = vpop.xlane.xlu0 %290 }
  0xac   : > { %v292_v32 = vadd.f32 %v291_v31, %v286_v30  ;;  %v364_v30 = vmul.f32 %v356_v21, %v348_v13  ;;  %v365_v31 = vmul.f32 %v357_v22, %v349_v14 }
  0xae   : > { %v293_v33 = vrot.slane %v292_v32, 4 }
  0xb0   : > { %v294_v34 = vadd.f32 %v293_v33, %v292_v32 }
  0xb2   : > { %v295_v35 = vrot.slane %v294_v34, 2 }
  0xb4   : > { %v296_v36 = vadd.f32 %v295_v35, %v294_v34 }
  0xb6   : > { %v297_v37 = vrot.slane %v296_v36, 1 }
  0xb8   : > { %v298_v38 = vadd.f32 %v297_v37, %v296_v36 }
  0xba   : > { %v299_v39 = vmul.f32 0.00012207031, %v298_v38 }
  0xbc   : > { %v558_v40 = vsub.f32 %v274_v8, %v299_v39  ;;  %v560_v41 = vsub.f32 %v275_v9, %v299_v39  ;;  %v562_v42 = vsub.f32 %v276_v10, %v299_v39  ;;  %v564_v43 = vsub.f32 %v278_v23, %v299_v39  ;;  %v344_v9 = vld [vmem:[%s247_s26] sm:$0xff]  ;;  %v345_v10 = vld [vmem:[%s247_s26 + $0x8] sm:$0xff]  ;;  %v358_v23 = vld [vmem:[%s252_s29 + $0x30] sm:$0xff] }
  0xbd   : > { %v566_v44 = vsub.f32 %v279_v24, %v299_v39  ;;  %v303_v45 = vsub.f32 %v277_v11, %v299_v39  ;;  %v306_v48 = vsub.f32 %v280_v25, %v299_v39  ;;  %v307_v56 = vsub.f32 %v281_v26, %v299_v39  ;;  %v346_v11 = vld [vmem:[%s247_s26 + $0x10] sm:$0xff]  ;;  %v359_v24 = vld [vmem:[%s252_s29 + $0x38] sm:$0xff] }
  0xbe   : > { %v308_v46 = vmul.f32 %v558_v40, %v558_v40  ;;  %v309_v47 = vmul.f32 %v560_v41, %v560_v41  ;;  %v312_v49 = vmul.f32 %v564_v43, %v564_v43  ;;  %v310_v51 = vmul.f32 %v562_v42, %v562_v42 }
  0xbf   : > { %v313_v50 = vmul.f32 %v566_v44, %v566_v44  ;;  %v311_v54 = vmul.f32 %v303_v45, %v303_v45  ;;  %v314_v57 = vmul.f32 %v306_v48, %v306_v48  ;;  %v315_v60 = vmul.f32 %v307_v56, %v307_v56 }
  0xc0   : > { %v316_v52 = vadd.f32 %v309_v47, %v308_v46  ;;  %v360_v25 = vmul.f32 %v352_v17, %v344_v9  ;;  %v361_v26 = vmul.f32 %v353_v18, %v345_v10  ;;  %v362_v27 = vmul.f32 %v354_v19, %v346_v11 }
  0xc1   : > { %v321_v53 = vadd.f32 %v313_v50, %v312_v49  ;;  %v366_v32 = vmul.f32 %v358_v23, %v350_v15  ;;  %v367_v33 = vmul.f32 %v359_v24, %v351_v16 }
  0xc2   : > { %v317_v55 = vadd.f32 %v316_v52, %v310_v51 }
  0xc3   : > { %v322_v59 = vadd.f32 %v321_v53, %v314_v57 }
  0xc4   : > { %v318_v58 = vadd.f32 %v317_v55, %v311_v54 }
  0xc5   : > { %v323_v61 = vadd.f32 %v322_v59, %v315_v60 }
  0xc6   : > { %319 = vadd.xlane.f32.xlu1 %v318_v58 }
  0xca   : > { %324 = vadd.xlane.f32.xlu1 %v323_v61 }
 0x153   : > { %v320_v62 = vpop.xlane.xlu1 %319 }
 0x157   : > { %v325_v63 = vpop.xlane.xlu1 %324 }
 0x158   : > { %v326_v0 = vadd.f32 %v325_v63, %v320_v62 }
 0x15a   : > { %v327_v1 = vrot.slane %v326_v0, 4 }
 0x15c   : > { %v328_v2 = vadd.f32 %v327_v1, %v326_v0 }
 0x15e   : > { %v329_v3 = vrot.slane %v328_v2, 2 }
 0x160   : > { %v330_v4 = vadd.f32 %v329_v3, %v328_v2 }
 0x162   : > { %v331_v5 = vrot.slane %v330_v4, 1 }
 0x164   : > { %v332_v6 = vadd.f32 %v331_v5, %v330_v4 }
 0x166   : > { %v333_v7 = vmul.f32 0.00012207031, %v332_v6 }
 0x168   : > { %v334_v8 = vadd.f32 1e-05, %v333_v7 }
 0x16a   : > { %505 = vrsqrt.f32 %v334_v8 }
 0x174   : > { %v506_v29 = vpop.eup %505 }
 0x175   : > { %v336_v34 = vmul.f32 %v506_v29, %v558_v40  ;;  %v337_v35 = vmul.f32 %v506_v29, %v560_v41  ;;  %v338_v36 = vmul.f32 %v506_v29, %v562_v42  ;;  %v339_v37 = vmul.f32 %v506_v29, %v303_v45 }
 0x176   : > { %v340_v38 = vmul.f32 %v506_v29, %v564_v43  ;;  %v341_v39 = vmul.f32 %v506_v29, %v566_v44  ;;  %v342_v46 = vmul.f32 %v506_v29, %v306_v48  ;;  %v343_v47 = vmul.f32 %v506_v29, %v307_v56 }
 0x177   : > { %v368_v49 = vadd.f32 %v360_v25, %v336_v34  ;;  %v369_v50 = vadd.f32 %v361_v26, %v337_v35  ;;  %v370_v51 = vadd.f32 %v362_v27, %v338_v36  ;;  %v371_v52 = vadd.f32 %v363_v28, %v339_v37 }
 0x178   : > { %v372_v40 = vadd.f32 %v364_v30, %v340_v38  ;;  %v373_v53 = vadd.f32 %v365_v31, %v341_v39  ;;  %v374_v41 = vadd.f32 %v366_v32, %v342_v46  ;;  %v375_v54 = vadd.f32 %v367_v33, %v343_v47 }
 0x179   : > { %376 = vst [vmem:[%s257_s6] sm:$0xff] %v368_v49  ;;  %377 = vst [vmem:[%s257_s6 + $0x8] sm:$0xff] %v369_v50 }
 0x17a   : > { %378 = vst [vmem:[%s257_s6 + $0x10] sm:$0xff] %v370_v51  ;;  %379 = vst [vmem:[%s257_s6 + $0x18] sm:$0xff] %v371_v52 }
 0x17b   : > { %380 = vst [vmem:[%s257_s6 + $0x20] sm:$0xff] %v372_v40  ;;  %381 = vst [vmem:[%s257_s6 + $0x28] sm:$0xff] %v373_v53 }
 0x17c   : > { %382 = vst [vmem:[%s257_s6 + $0x30] sm:$0xff] %v374_v41  ;;  %383 = vst [vmem:[%s257_s6 + $0x38] sm:$0xff] %v375_v54 }
 0x17d PF: > { %s14_s15 = sadd.s32 1, %s513_s15  }
 0x17e   : > { %p11_p4 = scmp.ge.s32.totalorder %s14_s15, 4  }
 0x180   :  { %13 = sbr.rel (!%p11_p4) target bundleno = 1 (0x1), region = 75 }

// kernel: taxibj_forward.95
= control target key start
LH: loop header
LB: loop body
LE: loop exit
PB: predicated region body
PF: predicated region fallthrough
CT: control target
= control target key end

     0   :  { %s1615_s12 = smov 0   ;;  %s1617_s13 = smov 0   ;;  %s1795_s0 = inlined_call_operand.vmem [shape: bf16[16,896], index: 0, kind: input, shape index: {}]   ;;  %s1796_s1 = inlined_call_operand.vmem [shape: f32[16,1], index: 1, kind: input, shape index: {}]   ;;  %s1797_s2 = inlined_call_operand.vmem [shape: bf16[2,896,144], index: 2, kind: input, shape index: {}]   ;;  %s1798_s3 = inlined_call_operand.vmem [shape: bf16[2,16,144], index: 3, kind: output, shape index: {}]  }
   0x1   :  { %s1619_s14 = smov 0  }
   0x2 LB: > { %s25_s15 = sadd.s32 1, %s1588_s13  ;;  %p1219_p0 = scmp.ge.s32.totalorder %s1592_s14, 1  ;;  %s1592_s14 = sphi %s1619_s14, %s13_s14   ;;  %s1588_s13 = sphi %s1617_s13, %s1800_s13   ;;  %s1584_s12 = sphi %s1615_s12, %s1799_s12  }
   0x3   : > { %p27_p1 = scmp.ge.s32.totalorder %s25_s15, 2  ;;  %p158_p2 = scmp.lt.s32.totalorder %s1592_s14, 3 }
   0x5   : > { %s1802_s15 = smov (%p27_p1, %s25_s15), 0  ;;  %p159_p3 = pnand %p1219_p0, %p158_p2 }
   0x6   : > { %p191_p4 = scmp.lt.s32.totalorder (!%p159_p3), %s1584_s12, 1  ;;  %v1490_v0 = vld [vmem:[%s1795_s0 + $0x4] ss:$28 sps:$4 sm:$0xff] (!%p159_p3)   ;;  %v1594_v1 = vmov (!%p159_p3), 0   ;;  %v1496_v2 = vld [vmem:[%s1795_s0 + $0x14] ss:$28 sps:$4 sm:$0xff] (!%p159_p3)  }
   0x7   : > { %162 = sbr.rel (%p159_p3) target bundleno = 369 (0x171), region = 32  ;;  %1391 = vset.pattern.permute.xlu0 (!%p159_p3), %v1594_v1  ;;  %971 = vmatprep.mubr.bf16.mxu1 (!%p159_p3), %v1490_v0  ;;  %vm1123_vm0 = vcmask (!%p159_p3), 1043456   ;;  %vm1124_vm1 = vcmask (!%p159_p3), 130052  }
   0x8   : > { %1057 = vmatprep.mubr.bf16.mxu0 (!%p159_p3), %v1496_v2  ;;  %vm1125_vm2 = vmor (!%p159_p3), %vm1124_vm1, %vm1123_vm0 }
   0xe   : > { %s1804_s12 = smov (!%p191_p4, %s1584_s12), 1 }
   0xf   : > { %s1365_s20 = smul.u32 896, %s1804_s12  ;;  %s1346_s11 = sshll.u32 %s1804_s12, 4 }
  0x10   : > { %s208_s18 = scalar_lea.vmem %s1798_s3, %s1346_s11 }
  0x11   : > { %s1646_s23 = scalar_lea.vmem %s1797_s2, %s1365_s20 }
  0x12   : > { %v1392_v3 = vld [vmem:[%s1646_s23 + $0x4] ss:$8 sps:$4 sm:$0xff]   ;;  %v1396_v5 = vld [vmem:[%s1646_s23] ss:$8 sps:$4 sm:$0xff]   ;;  %v1398_v7 = vld [vmem:[%s1646_s23 + $0x14] ss:$8 sps:$4 sm:$0xff]  }
  0x13   : > { %v1394_v4 = vld [vmem:[%s1646_s23 + $0x204] ss:$8 sps:$4 sm:$0xff]   ;;  %939 = vmatprep.subr.bf16.mxu1 %v1392_v3  ;;  %v1397_v6 = vld [vmem:[%s1646_s23 + $0x200] ss:$8 sps:$4 sm:$0xff]   ;;  %v1400_v8 = vld [vmem:[%s1646_s23 + $0x214] ss:$8 sps:$4 sm:$0xff]  }
  0x14   : > { %1025 = vmatprep.subr.bf16.mxu0 %v1394_v4  ;;  %940 = vmatpush1.bf16.msra.mxu1 %v1396_v5  ;;  %v1402_v9 = vld [vmem:[%s1646_s23 + $0x10] ss:$8 sps:$4 sm:$0xff]   ;;  %v1404_v11 = vld [vmem:[%s1646_s23 + $0x24] ss:$8 sps:$4 sm:$0xff]   ;;  %v1408_v13 = vld [vmem:[%s1646_s23 + $0x20] ss:$8 sps:$4 sm:$0xff]  }
  0x15   : > { %1026 = vmatpush1.bf16.msra.mxu0 %v1397_v6  ;;  %941 = vmatprep.subr.bf16.mxu1 %v1398_v7  ;;  %v1403_v10 = vld [vmem:[%s1646_s23 + $0x210] ss:$8 sps:$4 sm:$0xff]   ;;  %v1406_v12 = vld [vmem:[%s1646_s23 + $0x224] ss:$8 sps:$4 sm:$0xff]   ;;  %v1409_v14 = vld [vmem:[%s1646_s23 + $0x220] ss:$8 sps:$4 sm:$0xff]  }
  0x16   : > { %1027 = vmatprep.subr.bf16.mxu0 %v1400_v8  ;;  %v1410_v15 = vld [vmem:[%s1646_s23 + $0x34] ss:$8 sps:$4 sm:$0xff]   ;;  %v1414_v17 = vld [vmem:[%s1646_s23 + $0x30] ss:$8 sps:$4 sm:$0xff]   ;;  %v1416_v19 = vld [vmem:[%s1646_s23 + $0x44] ss:$8 sps:$4 sm:$0xff]  }
  0x17   : > { %v1412_v16 = vld [vmem:[%s1646_s23 + $0x234] ss:$8 sps:$4 sm:$0xff]   ;;  %v1415_v18 = vld [vmem:[%s1646_s23 + $0x230] ss:$8 sps:$4 sm:$0xff]   ;;  %v1418_v20 = vld [vmem:[%s1646_s23 + $0x244] ss:$8 sps:$4 sm:$0xff]  }
  0x18   : > { %942 = vmatpush1.bf16.msra.mxu1 %v1402_v9  ;;  %v1420_v21 = vld [vmem:[%s1646_s23 + $0x40] ss:$8 sps:$4 sm:$0xff]   ;;  %v1422_v23 = vld [vmem:[%s1646_s23 + $0x54] ss:$8 sps:$4 sm:$0xff]   ;;  %v1426_v25 = vld [vmem:[%s1646_s23 + $0x50] ss:$8 sps:$4 sm:$0xff]  }
  0x19   : > { %1028 = vmatpush1.bf16.msra.mxu0 %v1403_v10  ;;  %943 = vmatprep.subr.bf16.mxu1 %v1404_v11  ;;  %v1421_v22 = vld [vmem:[%s1646_s23 + $0x240] ss:$8 sps:$4 sm:$0xff]   ;;  %v1424_v24 = vld [vmem:[%s1646_s23 + $0x254] ss:$8 sps:$4 sm:$0xff]   ;;  %v1427_v26 = vld [vmem:[%s1646_s23 + $0x250] ss:$8 sps:$4 sm:$0xff]  }
  0x1a   : > { %1029 = vmatprep.subr.bf16.mxu0 %v1406_v12  ;;  %v1428_v27 = vld [vmem:[%s1646_s23 + $0x64] ss:$8 sps:$4 sm:$0xff]   ;;  %v1432_v29 = vld [vmem:[%s1646_s23 + $0x60] ss:$8 sps:$4 sm:$0xff]   ;;  %v1434_v31 = vld [vmem:[%s1646_s23 + $0x74] ss:$8 sps:$4 sm:$0xff]  }
  0x1b   : > { %v1430_v28 = vld [vmem:[%s1646_s23 + $0x264] ss:$8 sps:$4 sm:$0xff]   ;;  %v1433_v30 = vld [vmem:[%s1646_s23 + $0x260] ss:$8 sps:$4 sm:$0xff]   ;;  %v1436_v32 = vld [vmem:[%s1646_s23 + $0x274] ss:$8 sps:$4 sm:$0xff]  }
  0x1c   : > { %944 = vmatpush1.bf16.msra.mxu1 %v1408_v13  ;;  %v1438_v33 = vld [vmem:[%s1646_s23 + $0x70] ss:$8 sps:$4 sm:$0xff]   ;;  %v1440_v35 = vld [vmem:[%s1646_s23 + $0x84] ss:$8 sps:$4 sm:$0xff]   ;;  %v1444_v37 = vld [vmem:[%s1646_s23 + $0x80] ss:$8 sps:$4 sm:$0xff]  }
  0x1d   : > { %1030 = vmatpush1.bf16.msra.mxu0 %v1409_v14  ;;  %945 = vmatprep.subr.bf16.mxu1 %v1410_v15  ;;  %v1439_v34 = vld [vmem:[%s1646_s23 + $0x270] ss:$8 sps:$4 sm:$0xff]   ;;  %v1442_v36 = vld [vmem:[%s1646_s23 + $0x284] ss:$8 sps:$4 sm:$0xff]   ;;  %v1445_v38 = vld [vmem:[%s1646_s23 + $0x280] ss:$8 sps:$4 sm:$0xff]  }
  0x1e   : > { %1031 = vmatprep.subr.bf16.mxu0 %v1412_v16  ;;  %v1446_v39 = vld [vmem:[%s1646_s23 + $0x94] ss:$8 sps:$4 sm:$0xff]   ;;  %v1450_v41 = vld [vmem:[%s1646_s23 + $0x90] ss:$8 sps:$4 sm:$0xff]   ;;  %v1452_v43 = vld [vmem:[%s1646_s23 + $0xa4] ss:$8 sps:$4 sm:$0xff]  }
  0x1f   : > { %v1448_v40 = vld [vmem:[%s1646_s23 + $0x294] ss:$8 sps:$4 sm:$0xff]   ;;  %v1451_v42 = vld [vmem:[%s1646_s23 + $0x290] ss:$8 sps:$4 sm:$0xff]   ;;  %v1454_v44 = vld [vmem:[%s1646_s23 + $0x2a4] ss:$8 sps:$4 sm:$0xff]  }
  0x20   : > { %946 = vmatpush1.bf16.msra.mxu1 %v1414_v17  ;;  %v1456_v45 = vld [vmem:[%s1646_s23 + $0xa0] ss:$8 sps:$4 sm:$0xff]   ;;  %v1458_v47 = vld [vmem:[%s1646_s23 + $0xb4] ss:$8 sps:$4 sm:$0xff]   ;;  %v1462_v49 = vld [vmem:[%s1646_s23 + $0xb0] ss:$8 sps:$4 sm:$0xff]  }
  0x21   : > { %1032 = vmatpush1.bf16.msra.mxu0 %v1415_v18  ;;  %947 = vmatprep.subr.bf16.mxu1 %v1416_v19  ;;  %v1457_v46 = vld [vmem:[%s1646_s23 + $0x2a0] ss:$8 sps:$4 sm:$0xff]   ;;  %v1460_v48 = vld [vmem:[%s1646_s23 + $0x2b4] ss:$8 sps:$4 sm:$0xff]   ;;  %v1463_v50 = vld [vmem:[%s1646_s23 + $0x2b0] ss:$8 sps:$4 sm:$0xff]  }
  0x22   : > { %1033 = vmatprep.subr.bf16.mxu0 %v1418_v20  ;;  %v1464_v51 = vld [vmem:[%s1646_s23 + $0xc4] ss:$8 sps:$4 sm:$0xff]   ;;  %v1468_v53 = vld [vmem:[%s1646_s23 + $0xc0] ss:$8 sps:$4 sm:$0xff]   ;;  %v1470_v55 = vld [vmem:[%s1646_s23 + $0xd4] ss:$8 sps:$4 sm:$0xff]  }
  0x23   : > { %v1466_v52 = vld [vmem:[%s1646_s23 + $0x2c4] ss:$8 sps:$4 sm:$0xff]   ;;  %v1469_v54 = vld [vmem:[%s1646_s23 + $0x2c0] ss:$8 sps:$4 sm:$0xff]   ;;  %v1472_v56 = vld [vmem:[%s1646_s23 + $0x2d4] ss:$8 sps:$4 sm:$0xff]  }
  0x24   : > { %948 = vmatpush1.bf16.msra.mxu1 %v1420_v21  ;;  %v1474_v57 = vld [vmem:[%s1646_s23 + $0xd0] ss:$8 sps:$4 sm:$0xff]   ;;  %v1476_v59 = vld [vmem:[%s1646_s23 + $0xe4] ss:$8 sps:$4 sm:$0xff]   ;;  %v1480_v61 = vld [vmem:[%s1646_s23 + $0xe0] ss:$8 sps:$4 sm:$0xff]  }
  0x25   : > { %1034 = vmatpush1.bf16.msra.mxu0 %v1421_v22  ;;  %949 = vmatprep.subr.bf16.mxu1 %v1422_v23  ;;  %v1475_v58 = vld [vmem:[%s1646_s23 + $0x2d0] ss:$8 sps:$4 sm:$0xff]   ;;  %v1478_v60 = vld [vmem:[%s1646_s23 + $0x2e4] ss:$8 sps:$4 sm:$0xff]   ;;  %v1481_v62 = vld [vmem:[%s1646_s23 + $0x2e0] ss:$8 sps:$4 sm:$0xff]  }
  0x26   : > { %1035 = vmatprep.subr.bf16.mxu0 %v1424_v24  ;;  %v1482_v63 = vld [vmem:[%s1646_s23 + $0xf4] ss:$8 sps:$4 sm:$0xff]   ;;  %v1486_v2 = vld [vmem:[%s1646_s23 + $0xf0] ss:$8 sps:$4 sm:$0xff]   ;;  %v1493_v4 = vld [vmem:[%s1646_s23 + $0x104] ss:$8 sps:$4 sm:$0xff]  }
  0x27   : > { %v1484_v0 = vld [vmem:[%s1646_s23 + $0x2f4] ss:$8 sps:$4 sm:$0xff]   ;;  %v1487_v3 = vld [vmem:[%s1646_s23 + $0x2f0] ss:$8 sps:$4 sm:$0xff]   ;;  %v1499_v5 = vld [vmem:[%s1646_s23 + $0x304] ss:$8 sps:$4 sm:$0xff]  }
  0x28   : > { %950 = vmatpush1.bf16.msra.mxu1 %v1426_v25  ;;  %v1488_v6 = vld [vmem:[%s1795_s0] ss:$28 sps:$4 sm:$0xff]   ;;  %v1494_v7 = vld [vmem:[%s1795_s0 + $0x10] ss:$28 sps:$4 sm:$0xff]  }
  0x29   : > { %1036 = vmatpush1.bf16.msra.mxu0 %v1427_v26  ;;  %951 = vmatprep.subr.bf16.mxu1 %v1428_v27  ;;  %v1491_v8 = vld [vmem:[%s1646_s23 + $0x100] ss:$8 sps:$4 sm:$0xff]   ;;  %v1502_v10 = vld [vmem:[%s1646_s23 + $0x114] ss:$8 sps:$4 sm:$0xff]   ;;  %v1500_v12 = vld [vmem:[%s1646_s23 + $0x110] ss:$8 sps:$4 sm:$0xff]  }
  0x2a   : > { %1037 = vmatprep.subr.bf16.mxu0 %v1430_v28  ;;  %v1497_v9 = vld [vmem:[%s1646_s23 + $0x300] ss:$8 sps:$4 sm:$0xff]   ;;  %v1505_v11 = vld [vmem:[%s1646_s23 + $0x314] ss:$8 sps:$4 sm:$0xff]   ;;  %v1503_v13 = vld [vmem:[%s1646_s23 + $0x310] ss:$8 sps:$4 sm:$0xff]  }
  0x2b   : > { %v1508_v14 = vld [vmem:[%s1646_s23 + $0x124] ss:$8 sps:$4 sm:$0xff]   ;;  %v1506_v16 = vld [vmem:[%s1646_s23 + $0x120] ss:$8 sps:$4 sm:$0xff]   ;;  %v1514_v18 = vld [vmem:[%s1646_s23 + $0x134] ss:$8 sps:$4 sm:$0xff]  }
  0x2c   : > { %952 = vmatpush1.bf16.msra.mxu1 %v1432_v29  ;;  %v1511_v15 = vld [vmem:[%s1646_s23 + $0x324] ss:$8 sps:$4 sm:$0xff]   ;;  %v1509_v17 = vld [vmem:[%s1646_s23 + $0x320] ss:$8 sps:$4 sm:$0xff]   ;;  %v1517_v19 = vld [vmem:[%s1646_s23 + $0x334] ss:$8 sps:$4 sm:$0xff]  }
  0x2d   : > { %1038 = vmatpush1.bf16.msra.mxu0 %v1433_v30  ;;  %953 = vmatprep.subr.bf16.mxu1 %v1434_v31  ;;  %v1569_v20 = vld [vmem:[%s1795_s0 + $0xc] ss:$28 sps:$4 sm:$0xff]   ;;  %v1512_v21 = vld [vmem:[%s1646_s23 + $0x130] ss:$8 sps:$4 sm:$0xff]   ;;  %v1526_v28 = vld [vmem:[%s1646_s23 + $0x154] ss:$8 sps:$4 sm:$0xff]  }
  0x2e   : > { %1039 = vmatprep.subr.bf16.mxu0 %v1436_v32  ;;  %v1515_v22 = vld [vmem:[%s1646_s23 + $0x330] ss:$8 sps:$4 sm:$0xff]   ;;  %v1520_v23 = vld [vmem:[%s1646_s23 + $0x144] ss:$8 sps:$4 sm:$0xff]   ;;  %v1518_v26 = vld [vmem:[%s1646_s23 + $0x140] ss:$8 sps:$4 sm:$0xff]  }
  0x2f   : > { %v1523_v24 = vld [vmem:[%s1646_s23 + $0x344] ss:$8 sps:$4 sm:$0xff]   ;;  %v1521_v27 = vld [vmem:[%s1646_s23 + $0x340] ss:$8 sps:$4 sm:$0xff]   ;;  %v1529_v29 = vld [vmem:[%s1646_s23 + $0x354] ss:$8 sps:$4 sm:$0xff]  }
  0x30   : > { %954 = vmatpush1.bf16.msra.mxu1 %v1438_v33  ;;  %v332_v25 = vld [vmem:[%s1796_s1 + $0x8] sm:$0xff]  ;;  %v1524_v30 = vld [vmem:[%s1646_s23 + $0x150] ss:$8 sps:$4 sm:$0xff]  }
  0x31   : > { %1040 = vmatpush1.bf16.msra.mxu0 %v1439_v34  ;;  %955 = vmatprep.subr.bf16.mxu1 %v1440_v35  ;;  %v1527_v31 = vld [vmem:[%s1646_s23 + $0x350] ss:$8 sps:$4 sm:$0xff]   ;;  %v1532_v32 = vld [vmem:[%s1646_s23 + $0x164] ss:$8 sps:$4 sm:$0xff]   ;;  %v1530_v34 = vld [vmem:[%s1646_s23 + $0x160] ss:$8 sps:$4 sm:$0xff]  }
  0x32   : > { %1041 = vmatprep.subr.bf16.mxu0 %v1442_v36  ;;  %v1535_v33 = vld [vmem:[%s1646_s23 + $0x364] ss:$8 sps:$4 sm:$0xff]   ;;  %v1533_v35 = vld [vmem:[%s1646_s23 + $0x360] ss:$8 sps:$4 sm:$0xff]   ;;  %v1538_v36 = vld [vmem:[%s1646_s23 + $0x174] ss:$8 sps:$4 sm:$0xff]  }
  0x34   : > { %956 = vmatpush1.bf16.msra.mxu1 %v1444_v37  ;;  %v1541_v37 = vld [vmem:[%s1646_s23 + $0x374] ss:$8 sps:$4 sm:$0xff]  }
  0x35   : > { %1042 = vmatpush1.bf16.msra.mxu0 %v1445_v38  ;;  %957 = vmatprep.subr.bf16.mxu1 %v1446_v39  ;;  %v1536_v38 = vld [vmem:[%s1646_s23 + $0x170] ss:$8 sps:$4 sm:$0xff]  }
  0x36   : > { %1043 = vmatprep.subr.bf16.mxu0 %v1448_v40  ;;  %v1539_v39 = vld [vmem:[%s1646_s23 + $0x370] ss:$8 sps:$4 sm:$0xff]   ;;  %v1544_v40 = vld [vmem:[%s1646_s23 + $0x184] ss:$8 sps:$4 sm:$0xff]  }
  0x38   : > { %958 = vmatpush1.bf16.msra.mxu1 %v1450_v41  ;;  %v1545_v41 = vld [vmem:[%s1795_s0 + $0x18] ss:$28 sps:$4 sm:$0xff]  }
  0x39   : > { %1044 = vmatpush1.bf16.msra.mxu0 %v1451_v42  ;;  %959 = vmatprep.subr.bf16.mxu1 %v1452_v43  ;;  %v1542_v42 = vld [vmem:[%s1646_s23 + $0x180] ss:$8 sps:$4 sm:$0xff]   ;;  %v1548_v43 = vld [vmem:[%s1646_s23 + $0x194] ss:$8 sps:$4 sm:$0xff]  }
  0x3a   : > { %1045 = vmatprep.subr.bf16.mxu0 %v1454_v44  ;;  %v1546_v44 = vld [vmem:[%s1646_s23 + $0x190] ss:$8 sps:$4 sm:$0xff]  }
  0x3c   : > { %960 = vmatpush1.bf16.msra.mxu1 %v1456_v45  ;;  %v1551_v45 = vld [vmem:[%s1646_s23 + $0x1a4] ss:$8 sps:$4 sm:$0xff]  }
  0x3d   : > { %1046 = vmatpush1.bf16.msra.mxu0 %v1457_v46  ;;  %961 = vmatprep.subr.bf16.mxu1 %v1458_v47  ;;  %v1549_v46 = vld [vmem:[%s1646_s23 + $0x1a0] ss:$8 sps:$4 sm:$0xff]   ;;  %v1554_v47 = vld [vmem:[%s1646_s23 + $0x1b4] ss:$8 sps:$4 sm:$0xff]  }
  0x3e   : > { %1047 = vmatprep.subr.bf16.mxu0 %v1460_v48  ;;  %v1552_v48 = vld [vmem:[%s1646_s23 + $0x1b0] ss:$8 sps:$4 sm:$0xff]  }
  0x40   : > { %962 = vmatpush1.bf16.msra.mxu1 %v1462_v49  ;;  %v1557_v49 = vld [vmem:[%s1646_s23 + $0x1c4] ss:$8 sps:$4 sm:$0xff]  }
  0x41   : > { %1048 = vmatpush1.bf16.msra.mxu0 %v1463_v50  ;;  %963 = vmatprep.subr.bf16.mxu1 %v1464_v51  ;;  %v1555_v50 = vld [vmem:[%s1646_s23 + $0x1c0] ss:$8 sps:$4 sm:$0xff]   ;;  %v1560_v51 = vld [vmem:[%s1646_s23 + $0x1d4] ss:$8 sps:$4 sm:$0xff]  }
  0x42   : > { %1049 = vmatprep.subr.bf16.mxu0 %v1466_v52  ;;  %v1558_v52 = vld [vmem:[%s1646_s23 + $0x1d0] ss:$8 sps:$4 sm:$0xff]  }
  0x44   : > { %964 = vmatpush1.bf16.msra.mxu1 %v1468_v53  ;;  %v1563_v53 = vld [vmem:[%s1646_s23 + $0x1e4] ss:$8 sps:$4 sm:$0xff]  }
  0x45   : > { %1050 = vmatpush1.bf16.msra.mxu0 %v1469_v54  ;;  %965 = vmatprep.subr.bf16.mxu1 %v1470_v55  ;;  %v1561_v54 = vld [vmem:[%s1646_s23 + $0x1e0] ss:$8 sps:$4 sm:$0xff]   ;;  %v1566_v55 = vld [vmem:[%s1646_s23 + $0x1f4] ss:$8 sps:$4 sm:$0xff]  }
  0x46   : > { %1051 = vmatprep.subr.bf16.mxu0 %v1472_v56  ;;  %v1564_v56 = vld [vmem:[%s1646_s23 + $0x1f0] ss:$8 sps:$4 sm:$0xff]  }
  0x48   : > { %966 = vmatpush1.bf16.msra.mxu1 %v1474_v57  ;;  %v1567_v57 = vld [vmem:[%s1795_s0 + $0x8] ss:$28 sps:$4 sm:$0xff]  }
  0x49   : > { %1052 = vmatpush1.bf16.msra.mxu0 %v1475_v58  ;;  %967 = vmatprep.subr.bf16.mxu1 %v1476_v59 }
  0x4a   : > { %1053 = vmatprep.subr.bf16.mxu0 %v1478_v60 }
  0x4c   : > { %968 = vmatpush1.bf16.msra.mxu1 %v1480_v61 }
  0x4d   : > { %1054 = vmatpush1.bf16.msra.mxu0 %v1481_v62  ;;  %969 = vmatprep.subr.bf16.mxu1 %v1482_v63 }
  0x4e   : > { %1055 = vmatprep.subr.bf16.mxu0 %v1484_v0 }
  0x50   : > { %970 = vmatpush1.bf16.msra.mxu1 %v1486_v2 }
  0x51   : > { %1056 = vmatpush1.bf16.msra.mxu0 %v1487_v3  ;;  %982 = vmatprep.subr.bf16.mxu1 %v1493_v4 }
  0x52   : > { %1068 = vmatprep.subr.bf16.mxu0 %v1499_v5 }
  0x53   : > { %972 = vmatmul.mubr.bf16.vlgmr.msra.gmra.mrb[0].mxu1 %v1488_v6 }
  0x54   : > { %1058 = vmatmul.mubr.bf16.vlgmr.msra.gmra.mrb[0].mxu0 %v1494_v7  ;;  %983 = vmatpush1.bf16.msra.mxu1 %v1491_v8 }
  0x55   : > { %1069 = vmatpush1.bf16.msra.mxu0 %v1497_v9  ;;  %984 = vmatprep.subr.bf16.mxu1 %v1502_v10 }
  0x56   : > { %1070 = vmatprep.subr.bf16.mxu0 %v1505_v11  ;;  %1100 = vmatprep.mubr.bf16.mxu0 %v1594_v1  ;;  %v331_v1 = vld [vmem:[%s1796_s1] sm:$0xff] }
  0x57   : > { %1014 = vmatprep.mubr.bf16.mxu1 %v1569_v20  ;;  %335 = vperm.xlu0 %1391, %v331_v1  }
  0x58   : > { %985 = vmatpush1.bf16.msra.mxu1 %v1500_v12 }
  0x59   : > { %1071 = vmatpush1.bf16.msra.mxu0 %v1503_v13  ;;  %986 = vmatprep.subr.bf16.mxu1 %v1508_v14 }
  0x5a   : > { %1072 = vmatprep.subr.bf16.mxu0 %v1511_v15 }
  0x5b   : > { %340 = vperm.xlu0 %1391, %v332_v25  }
  0x5c   : > { %987 = vmatpush1.bf16.msra.mxu1 %v1506_v16 }
  0x5d   : > { %1073 = vmatpush1.bf16.msra.mxu0 %v1509_v17  ;;  %988 = vmatprep.subr.bf16.mxu1 %v1514_v18 }
  0x5e   : > { %1074 = vmatprep.subr.bf16.mxu0 %v1517_v19 }
  0x60   : > { %989 = vmatpush1.bf16.msra.mxu1 %v1512_v21 }
  0x61   : > { %1075 = vmatpush1.bf16.msra.mxu0 %v1515_v22  ;;  %990 = vmatprep.subr.bf16.mxu1 %v1520_v23 }
  0x62   : > { %1076 = vmatprep.subr.bf16.mxu0 %v1523_v24 }
  0x64   : > { %991 = vmatpush1.bf16.msra.mxu1 %v1518_v26 }
  0x65   : > { %1077 = vmatpush1.bf16.msra.mxu0 %v1521_v27  ;;  %992 = vmatprep.subr.bf16.mxu1 %v1526_v28 }
  0x66   : > { %1078 = vmatprep.subr.bf16.mxu0 %v1529_v29 }
  0x68   : > { %993 = vmatpush1.bf16.msra.mxu1 %v1524_v30 }
  0x69   : > { %1079 = vmatpush1.bf16.msra.mxu0 %v1527_v31  ;;  %994 = vmatprep.subr.bf16.mxu1 %v1532_v32 }
  0x6a   : > { %1080 = vmatprep.subr.bf16.mxu0 %v1535_v33 }
  0x6c   : > { %995 = vmatpush1.bf16.msra.mxu1 %v1530_v34 }
  0x6d   : > { %1081 = vmatpush1.bf16.msra.mxu0 %v1533_v35  ;;  %996 = vmatprep.subr.bf16.mxu1 %v1538_v36 }
  0x6e   : > { %1082 = vmatprep.subr.bf16.mxu0 %v1541_v37 }
  0x70   : > { %997 = vmatpush1.bf16.msra.mxu1 %v1536_v38 }
  0x71   : > { %1083 = vmatpush1.bf16.msra.mxu0 %v1539_v39  ;;  %998 = vmatprep.subr.bf16.mxu1 %v1544_v40 }
  0x74   : > { %1101 = vmatmul.mubr.bf16.vlgmr.msra.gmra.mrb[0].mxu0 %v1545_v41  ;;  %999 = vmatpush1.bf16.msra.mxu1 %v1542_v42 }
  0x75   : > { %1000 = vmatprep.subr.bf16.mxu1 %v1548_v43 }
  0x78   : > { %1001 = vmatpush1.bf16.msra.mxu1 %v1546_v44 }
  0x79   : > { %1002 = vmatprep.subr.bf16.mxu1 %v1551_v45 }
  0x7c   : > { %1003 = vmatpush1.bf16.msra.mxu1 %v1549_v46 }
  0x7d   : > { %1004 = vmatprep.subr.bf16.mxu1 %v1554_v47 }
  0x80   : > { %1005 = vmatpush1.bf16.msra.mxu1 %v1552_v48 }
  0x81   : > { %1006 = vmatprep.subr.bf16.mxu1 %v1557_v49 }
  0x84   : > { %1007 = vmatpush1.bf16.msra.mxu1 %v1555_v50 }
  0x85   : > { %1008 = vmatprep.subr.bf16.mxu1 %v1560_v51 }
  0x88   : > { %1009 = vmatpush1.bf16.msra.mxu1 %v1558_v52 }
  0x89   : > { %1010 = vmatprep.subr.bf16.mxu1 %v1563_v53 }
  0x8c   : > { %1011 = vmatpush1.bf16.msra.mxu1 %v1561_v54 }
  0x8d   : > { %1012 = vmatprep.subr.bf16.mxu1 %v1566_v55 }
  0x90   : > { %1013 = vmatpush1.bf16.msra.mxu1 %v1564_v56 }
  0x93   : > { %1015 = vmatmul.mubr.bf16.vlgmr.msra.gmra.mrb[0].mxu1 %v1567_v57 }
  0xd6   : > { %v336_v62 = vpop.permute.xlu0 %335 }
  0xda   : > { %v341_v3 = vpop.permute.xlu0 %340 }
 0x147   : > { %v1102_v58 = vpop.f32.mrb[0].mxu0 }
 0x148   : > { %v1104_v59 = vpop.f32.mrb[1].mxu0 }
 0x149   : > { %v1106_v60 = vpop.f32.mrb[2].mxu0 }
 0x14a   : > { %v1108_v61 = vpop.f32.mrb[3].mxu0 }
 0x166   : > { %v1016_v63 = vpop.f32.mrb[0].mxu1 }
 0x167   : > { %v1349_v0 = vadd.f32 %v1016_v63, %v336_v62  ;;  %v1018_v2 = vpop.f32.mrb[1].mxu1 }
 0x168   : > { %v1351_v4 = vadd.f32 %v1018_v2, %v336_v62  ;;  %v1020_v5 = vpop.f32.mrb[2].mxu1 }
 0x169   : > { %v1350_v6 = vadd.f32 %v1349_v0, %v1102_v58  ;;  %v1353_v7 = vadd.f32 %v1020_v5, %v341_v3  ;;  %v1022_v8 = vpop.f32.mrb[3].mxu1 }
 0x16a   : > { %v1352_v9 = vadd.f32 %v1351_v4, %v1104_v59  ;;  %v1355_v10 = vadd.f32 %v1022_v8, %v341_v3 }
 0x16b   : > { %v1354_v11 = vadd.f32 %v1353_v7, %v1106_v60 }
 0x16c   : > { %v1347_v12 = vpack.c.bf16 %v1352_v9, %v1350_v6  ;;  %v1356_v13 = vadd.f32 %v1355_v10, %v1108_v61 }
 0x16e   : > { %1126 = vst.msk [vmem:[%s208_s18] sm:$0xff] %vm1125_vm2, %v1347_v12  ;;  %v1348_v14 = vpack.c.bf16 %v1356_v13, %v1354_v11 }
 0x170   : > { %1127 = vst.msk [vmem:[%s208_s18 + $0x8] sm:$0xff] %vm1125_vm2, %v1348_v14 }
 0x171 PF: > { %s13_s14 = sadd.s32 1, %s1592_s14   ;;  %s1799_s12 = smov %s1588_s13 }
 0x172   : > { %p10_p5 = scmp.ge.s32.totalorder %s13_s14, 4   ;;  %s1800_s13 = smov %s1802_s15 }
 0x174   :  { %12 = sbr.rel (!%p10_p5) target bundleno = 2 (0x2), region = 62 }

// kernel: taxibj_forward.98
= control target key start
LH: loop header
LB: loop body
LE: loop exit
PB: predicated region body
PF: predicated region fallthrough
CT: control target
= control target key end

     0   :  { %s899_s15 = smov 0   ;;  %s901_s16 = smov 0   ;;  %s982_s0 = inlined_call_operand.vmem [shape: bf16[16,128], index: 0, kind: input, shape index: {}]   ;;  %s983_s1 = inlined_call_operand.vmem [shape: f32[16,1], index: 1, kind: input, shape index: {}]   ;;  %s984_s2 = inlined_call_operand.vmem [shape: bf16[2,128,512], index: 2, kind: input, shape index: {}]   ;;  %s985_s3 = inlined_call_operand.vmem [shape: f32[2,16,512], index: 3, kind: input, shape index: {}]   ;;  %s986_s4 = inlined_call_operand.vmem [shape: f32[2,16,512], index: 4, kind: output, shape index: {}]  }
   0x1   :  { %s903_s17 = smov 0  }
   0x2 LB: > { %s26_s18 = sadd.s32 1, %s867_s16  ;;  %p713_p0 = scmp.ge.s32.totalorder %s871_s17, 1  ;;  %s871_s17 = sphi %s903_s17, %s14_s17   ;;  %s867_s16 = sphi %s901_s16, %s988_s16   ;;  %s863_s15 = sphi %s899_s15, %s987_s15  }
   0x3   : > { %p28_p1 = scmp.ge.s32.totalorder %s26_s18, 2  ;;  %p200_p2 = scmp.lt.s32.totalorder %s871_s17, 3 }
   0x5   : > { %s990_s18 = smov (%p28_p1, %s26_s18), 0  ;;  %p201_p3 = pnand %p713_p0, %p200_p2 }
   0x6   : > { %p244_p4 = scmp.lt.s32.totalorder (!%p201_p3), %s863_s15, 1  ;;  %v873_v0 = vmov (!%p201_p3), 0   ;;  %v308_v1 = vld [vmem:[%s983_s1] sm:$0xff] (!%p201_p3)  ;;  %v309_v2 = vld [vmem:[%s983_s1 + $0x8] sm:$0xff] (!%p201_p3) }
   0x7   : > { %204 = sbr.rel (%p201_p3) target bundleno = 285 (0x11d), region = 36  ;;  %518 = vmatprep.mubr.bf16.mxu0 (!%p201_p3), %v873_v0  ;;  %561 = vmatprep.mubr.bf16.mxu1 (!%p201_p3), %v873_v0  ;;  %v832_v35 = vld [vmem:[%s982_s0] sm:$0xff] (!%p201_p3)  }
   0x8   : > { %783 = vset.pattern.permute.xlu0 (!%p201_p3), %v873_v0 }
   0x9   : > { %312 = vperm.xlu0 (!%p201_p3), %783, %v308_v1  }
   0xd   : > { %317 = vperm.xlu0 (!%p201_p3), %783, %v309_v2  }
   0xe   : > { %s992_s15 = smov (!%p244_p4, %s863_s15), 1 }
   0xf   : > { %s755_s21 = sshll.u32 %s992_s15, 8  ;;  %s756_s29 = sshll.u32 %s992_s15, 6 }
  0x10   : > { %s929_s26 = scalar_lea.vmem %s984_s2, %s755_s21  ;;  %s261_s6 = scalar_lea.vmem %s985_s3, %s756_s29 }
  0x11   : > { %v784_v3 = vld [vmem:[%s929_s26 + $0x4] ss:$16 sps:$4 sm:$0xff]   ;;  %v786_v4 = vld [vmem:[%s929_s26 + $0xc] ss:$16 sps:$4 sm:$0xff]   ;;  %v788_v5 = vld [vmem:[%s929_s26] ss:$16 sps:$4 sm:$0xff]   ;;  %s271_s9 = scalar_lea.vmem %s986_s4, %s756_s29 }
  0x12   : > { %486 = vmatprep.subr.bf16.mxu0 %v784_v3  ;;  %v789_v6 = vld [vmem:[%s929_s26 + $0x8] ss:$16 sps:$4 sm:$0xff]   ;;  %529 = vmatprep.subr.bf16.mxu1 %v786_v4  ;;  %v790_v7 = vld [vmem:[%s929_s26 + $0x24] ss:$16 sps:$4 sm:$0xff]   ;;  %v792_v8 = vld [vmem:[%s929_s26 + $0x2c] ss:$16 sps:$4 sm:$0xff]  }
  0x13   : > { %487 = vmatpush1.bf16.msra.mxu0 %v788_v5  ;;  %530 = vmatpush1.bf16.msra.mxu1 %v789_v6  ;;  %v794_v9 = vld [vmem:[%s929_s26 + $0x20] ss:$16 sps:$4 sm:$0xff]   ;;  %v795_v10 = vld [vmem:[%s929_s26 + $0x28] ss:$16 sps:$4 sm:$0xff]   ;;  %v796_v11 = vld [vmem:[%s929_s26 + $0x44] ss:$16 sps:$4 sm:$0xff]  }
  0x14   : > { %488 = vmatprep.subr.bf16.mxu0 %v790_v7  ;;  %531 = vmatprep.subr.bf16.mxu1 %v792_v8  ;;  %v798_v12 = vld [vmem:[%s929_s26 + $0x4c] ss:$16 sps:$4 sm:$0xff]   ;;  %v800_v13 = vld [vmem:[%s929_s26 + $0x40] ss:$16 sps:$4 sm:$0xff]   ;;  %v801_v14 = vld [vmem:[%s929_s26 + $0x48] ss:$16 sps:$4 sm:$0xff]  }
  0x15   : > { %v802_v15 = vld [vmem:[%s929_s26 + $0x64] ss:$16 sps:$4 sm:$0xff]   ;;  %v804_v16 = vld [vmem:[%s929_s26 + $0x6c] ss:$16 sps:$4 sm:$0xff]   ;;  %v806_v17 = vld [vmem:[%s929_s26 + $0x60] ss:$16 sps:$4 sm:$0xff]  }
  0x16   : > { %v807_v18 = vld [vmem:[%s929_s26 + $0x68] ss:$16 sps:$4 sm:$0xff]   ;;  %v808_v19 = vld [vmem:[%s929_s26 + $0x84] ss:$16 sps:$4 sm:$0xff]   ;;  %v810_v20 = vld [vmem:[%s929_s26 + $0x8c] ss:$16 sps:$4 sm:$0xff]  }
  0x17   : > { %489 = vmatpush1.bf16.msra.mxu0 %v794_v9  ;;  %532 = vmatpush1.bf16.msra.mxu1 %v795_v10  ;;  %v812_v21 = vld [vmem:[%s929_s26 + $0x80] ss:$16 sps:$4 sm:$0xff]   ;;  %v813_v22 = vld [vmem:[%s929_s26 + $0x88] ss:$16 sps:$4 sm:$0xff]   ;;  %v814_v23 = vld [vmem:[%s929_s26 + $0xa4] ss:$16 sps:$4 sm:$0xff]  }
  0x18   : > { %490 = vmatprep.subr.bf16.mxu0 %v796_v11  ;;  %533 = vmatprep.subr.bf16.mxu1 %v798_v12  ;;  %v816_v24 = vld [vmem:[%s929_s26 + $0xac] ss:$16 sps:$4 sm:$0xff]   ;;  %v818_v25 = vld [vmem:[%s929_s26 + $0xa0] ss:$16 sps:$4 sm:$0xff]   ;;  %v819_v26 = vld [vmem:[%s929_s26 + $0xa8] ss:$16 sps:$4 sm:$0xff]  }
  0x19   : > { %v820_v27 = vld [vmem:[%s929_s26 + $0xc4] ss:$16 sps:$4 sm:$0xff]   ;;  %v822_v28 = vld [vmem:[%s929_s26 + $0xcc] ss:$16 sps:$4 sm:$0xff]   ;;  %v824_v29 = vld [vmem:[%s929_s26 + $0xc0] ss:$16 sps:$4 sm:$0xff]  }
  0x1a   : > { %v825_v30 = vld [vmem:[%s929_s26 + $0xc8] ss:$16 sps:$4 sm:$0xff]   ;;  %v826_v31 = vld [vmem:[%s929_s26 + $0xe4] ss:$16 sps:$4 sm:$0xff]   ;;  %v828_v32 = vld [vmem:[%s929_s26 + $0xec] ss:$16 sps:$4 sm:$0xff]  }
  0x1b   : > { %491 = vmatpush1.bf16.msra.mxu0 %v800_v13  ;;  %534 = vmatpush1.bf16.msra.mxu1 %v801_v14  ;;  %v830_v33 = vld [vmem:[%s929_s26 + $0xe0] ss:$16 sps:$4 sm:$0xff]   ;;  %v831_v34 = vld [vmem:[%s929_s26 + $0xe8] ss:$16 sps:$4 sm:$0xff]  }
  0x1c   : > { %492 = vmatprep.subr.bf16.mxu0 %v802_v15  ;;  %535 = vmatprep.subr.bf16.mxu1 %v804_v16  ;;  %v580_v54 = vld [vmem:[%s261_s6] sm:$0xff]  ;;  %v582_v55 = vld [vmem:[%s261_s6 + $0x10] sm:$0xff]  ;;  %v581_v57 = vld [vmem:[%s261_s6 + $0x8] sm:$0xff] }
  0x1d   : > { %v583_v60 = vld [vmem:[%s261_s6 + $0x18] sm:$0xff]  ;;  %v584_v63 = vld [vmem:[%s261_s6 + $0x20] sm:$0xff]  ;;  %v586_v2 = vld [vmem:[%s261_s6 + $0x30] sm:$0xff] }
  0x1e   : > { %v585_v5 = vld [vmem:[%s261_s6 + $0x28] sm:$0xff]  ;;  %v587_v8 = vld [vmem:[%s261_s6 + $0x38] sm:$0xff] }
  0x1f   : > { %493 = vmatpush1.bf16.msra.mxu0 %v806_v17  ;;  %536 = vmatpush1.bf16.msra.mxu1 %v807_v18 }
  0x20   : > { %494 = vmatprep.subr.bf16.mxu0 %v808_v19  ;;  %537 = vmatprep.subr.bf16.mxu1 %v810_v20 }
  0x23   : > { %495 = vmatpush1.bf16.msra.mxu0 %v812_v21  ;;  %538 = vmatpush1.bf16.msra.mxu1 %v813_v22 }
  0x24   : > { %496 = vmatprep.subr.bf16.mxu0 %v814_v23  ;;  %539 = vmatprep.subr.bf16.mxu1 %v816_v24 }
  0x27   : > { %497 = vmatpush1.bf16.msra.mxu0 %v818_v25  ;;  %540 = vmatpush1.bf16.msra.mxu1 %v819_v26 }
  0x28   : > { %498 = vmatprep.subr.bf16.mxu0 %v820_v27  ;;  %541 = vmatprep.subr.bf16.mxu1 %v822_v28 }
  0x2b   : > { %499 = vmatpush1.bf16.msra.mxu0 %v824_v29  ;;  %542 = vmatpush1.bf16.msra.mxu1 %v825_v30 }
  0x2c   : > { %500 = vmatprep.subr.bf16.mxu0 %v826_v31  ;;  %543 = vmatprep.subr.bf16.mxu1 %v828_v32 }
  0x2f   : > { %501 = vmatpush1.bf16.msra.mxu0 %v830_v33  ;;  %544 = vmatpush1.bf16.msra.mxu1 %v831_v34 }
  0x32   : > { %519 = vmatmul.mubr.bf16.vlgmr.msra.gmra.mrb[0].mxu0 %v832_v35  ;;  %562 = vmatmul.mubr.bf16.vlgmr.msra.gmra.mrb[0].mxu1 %v832_v35 }
  0x88   : > { %v313_v36 = vpop.permute.xlu0 %312 }
  0x8c   : > { %v318_v37 = vpop.permute.xlu0 %317 }
 0x105   : > { %v520_v38 = vpop.f32.mrb[0].mxu0  ;;  %v563_v39 = vpop.f32.mrb[0].mxu1 }
 0x106   : > { %v521_v40 = vadd.f32 %v520_v38, %v313_v36  ;;  %v564_v41 = vadd.f32 %v563_v39, %v313_v36  ;;  %v522_v42 = vpop.f32.mrb[1].mxu0  ;;  %v565_v43 = vpop.f32.mrb[1].mxu1 }
 0x107   : > { %v523_v44 = vadd.f32 %v522_v42, %v313_v36  ;;  %v566_v45 = vadd.f32 %v565_v43, %v313_v36  ;;  %v524_v46 = vpop.f32.mrb[2].mxu0  ;;  %v567_v47 = vpop.f32.mrb[2].mxu1 }
 0x108   : > { %833 = vtanh.f32 %v521_v40  ;;  %v525_v48 = vadd.f32 %v524_v46, %v318_v37  ;;  %v526_v49 = vpop.f32.mrb[3].mxu0  ;;  %v569_v50 = vpop.f32.mrb[3].mxu1  ;;  %v568_v51 = vadd.f32 %v567_v47, %v318_v37 }
 0x109   : > { %835 = vtanh.f32 %v564_v41  ;;  %v527_v52 = vadd.f32 %v526_v49, %v318_v37  ;;  %v570_v53 = vadd.f32 %v569_v50, %v318_v37 }
 0x10a   : > { %837 = vtanh.f32 %v523_v44 }
 0x10b   : > { %839 = vtanh.f32 %v566_v45 }
 0x10c   : > { %841 = vtanh.f32 %v525_v48 }
 0x10d   : > { %843 = vtanh.f32 %v568_v51 }
 0x10e   : > { %845 = vtanh.f32 %v527_v52 }
 0x10f   : > { %847 = vtanh.f32 %v570_v53 }
 0x112   : > { %v834_v56 = vpop.eup %833 }
 0x113   : > { %v836_v58 = vpop.eup %835  ;;  %v588_v59 = vmul.f32 %v834_v56, %v580_v54 }
 0x114   : > { %v838_v61 = vpop.eup %837  ;;  %v590_v62 = vmul.f32 %v836_v58, %v582_v55 }
 0x115   : > { %v840_v0 = vpop.eup %839  ;;  %596 = vst [vmem:[%s271_s9] sm:$0xff] %v588_v59  ;;  %v589_v1 = vmul.f32 %v838_v61, %v581_v57 }
 0x116   : > { %v842_v3 = vpop.eup %841  ;;  %598 = vst [vmem:[%s271_s9 + $0x10] sm:$0xff] %v590_v62  ;;  %v591_v4 = vmul.f32 %v840_v0, %v583_v60 }
 0x117   : > { %v844_v6 = vpop.eup %843  ;;  %597 = vst [vmem:[%s271_s9 + $0x8] sm:$0xff] %v589_v1  ;;  %v592_v7 = vmul.f32 %v842_v3, %v584_v63 }
 0x118   : > { %v846_v9 = vpop.eup %845  ;;  %599 = vst [vmem:[%s271_s9 + $0x18] sm:$0xff] %v591_v4  ;;  %v594_v10 = vmul.f32 %v844_v6, %v586_v2 }
 0x119   : > { %v848_v11 = vpop.eup %847  ;;  %600 = vst [vmem:[%s271_s9 + $0x20] sm:$0xff] %v592_v7  ;;  %v593_v12 = vmul.f32 %v846_v9, %v585_v5 }
 0x11a   : > { %602 = vst [vmem:[%s271_s9 + $0x30] sm:$0xff] %v594_v10  ;;  %v595_v13 = vmul.f32 %v848_v11, %v587_v8 }
 0x11b   : > { %601 = vst [vmem:[%s271_s9 + $0x28] sm:$0xff] %v593_v12 }
 0x11c   : > { %603 = vst [vmem:[%s271_s9 + $0x38] sm:$0xff] %v595_v13 }
 0x11d PF: > { %s14_s17 = sadd.s32 1, %s871_s17   ;;  %s987_s15 = smov %s867_s16 }
 0x11e   : > { %p11_p5 = scmp.ge.s32.totalorder %s14_s17, 4   ;;  %s988_s16 = smov %s990_s18 }
 0x120   :  { %13 = sbr.rel (!%p11_p5) target bundleno = 2 (0x2), region = 69 }

// kernel: taxibj_forward.97
= control target key start
LH: loop header
LB: loop body
LE: loop exit
PB: predicated region body
PF: predicated region fallthrough
CT: control target
= control target key end

     0   :  { %s661_s15 = smov 0   ;;  %s711_s0 = inlined_call_operand.vmem [shape: bf16[2,112,512], index: 0, kind: input, shape index: {}]   ;;  %s712_s1 = inlined_call_operand.vmem [shape: bf16[2,64,512], index: 1, kind: input, shape index: {}]   ;;  %s713_s2 = inlined_call_operand.vmem [shape: bf16[2,16,512], index: 2, kind: input, shape index: {}]   ;;  %s714_s3 = inlined_call_operand.vmem [shape: bf16[2,16,512], index: 3, kind: input, shape index: {}]   ;;  %s715_s4 = inlined_call_operand.vmem [shape: f32[2,16,512], index: 4, kind: output, shape index: {}]  }
   0x1 LB: > { %s548_s16 = sadd.s32 4294967295, %s634_s15   ;;  %p552_p0 = scmp.ge.s32.totalorder %s634_s15, 1  ;;  %s634_s15 = sphi %s661_s15, %s14_s15  }
   0x2   : > { %p194_p1 = scmp.lt.s32.totalorder %s634_s15, 3 }
   0x4   : > { %p195_p2 = pnand %p552_p0, %p194_p1 }
   0x5   : > { %p237_p3 = scmp.lt.s32.totalorder (!%p195_p2), %s548_s16, 1 }
   0x6   : > { %198 = sbr.rel (%p195_p2) target bundleno = 382 (0x17e), region = 36 }
   0xd   : > { %s717_s16 = smov (!%p237_p3, %s548_s16), 1 }
   0xe   : > { %s553_s17 = smul.u32 224, %s717_s16  ;;  %s580_s18 = sshll.u32 %s717_s16, 7 }
   0xf   : > { %s676_s21 = scalar_lea.vmem %s712_s1, %s580_s18  ;;  %s581_s22 = sshll.u32 %s717_s16, 5 }
  0x10   : > { %s494_s25 = scalar_lea.vmem %s711_s0, %s553_s17  ;;  %s685_s28 = scalar_lea.vmem %s713_s2, %s581_s22  ;;  %v566_v0 = vld [vmem:[%s676_s21 + $0x60] sm:$0xff]  ;;  %v567_v1 = vld [vmem:[%s676_s21 + $0x68] sm:$0xff]  ;;  %v568_v34 = vld [vmem:[%s676_s21 + $0x70] sm:$0xff] }
  0x11   : > { %s692_s5 = scalar_lea.vmem %s714_s3, %s581_s22  ;;  %v562_v2 = vld [vmem:[%s494_s25 + $0xc0] sm:$0xff]  ;;  %v563_v3 = vld [vmem:[%s494_s25 + $0xc8] sm:$0xff]  ;;  %v280_v4 = vunpack.c.l.bf16 %v566_v0  ;;  %v281_v5 = vunpack.c.h.bf16 %v566_v0  ;;  %v282_v6 = vunpack.c.l.bf16 %v567_v1  ;;  %v283_v7 = vunpack.c.h.bf16 %v567_v1  ;;  %v564_v24 = vld [vmem:[%s494_s25 + $0xd0] sm:$0xff]  ;;  %s583_s6 = sshll.u32 %s717_s16, 6 }
  0x12   : > { %v296_v8 = vld [vmem:[%s685_s28] sm:$0xff]  ;;  %v268_v9 = vunpack.c.l.bf16 %v562_v2  ;;  %v269_v10 = vunpack.c.h.bf16 %v562_v2  ;;  %v270_v11 = vunpack.c.l.bf16 %v563_v3  ;;  %v271_v12 = vunpack.c.h.bf16 %v563_v3  ;;  %v297_v13 = vld [vmem:[%s685_s28 + $0x8] sm:$0xff]  ;;  %v565_v25 = vld [vmem:[%s494_s25 + $0xd8] sm:$0xff]  ;;  %s263_s9 = scalar_lea.vmem %s715_s4, %s583_s6 }
  0x13   : > { %v316_v14 = vld [vmem:[%s692_s5] sm:$0xff]  ;;  %v317_v15 = vld [vmem:[%s692_s5 + $0x8] sm:$0xff]  ;;  %v300_v16 = vunpack.c.l.bf16 %v296_v8  ;;  %v301_v17 = vunpack.c.h.bf16 %v296_v8  ;;  %v302_v18 = vunpack.c.l.bf16 %v297_v13  ;;  %v303_v19 = vunpack.c.h.bf16 %v297_v13  ;;  %v569_v35 = vld [vmem:[%s676_s21 + $0x78] sm:$0xff] }
  0x14   : > { %v288_v20 = vadd.f32 %v280_v4, %v268_v9  ;;  %v289_v21 = vadd.f32 %v281_v5, %v269_v10  ;;  %v290_v22 = vadd.f32 %v282_v6, %v270_v11  ;;  %v291_v23 = vadd.f32 %v283_v7, %v271_v12  ;;  %v298_v40 = vld [vmem:[%s685_s28 + $0x10] sm:$0xff]  ;;  %v299_v41 = vld [vmem:[%s685_s28 + $0x18] sm:$0xff] }
  0x15   : > { %v320_v26 = vunpack.c.l.bf16 %v316_v14  ;;  %v321_v27 = vunpack.c.h.bf16 %v316_v14  ;;  %v322_v28 = vunpack.c.l.bf16 %v317_v15  ;;  %v323_v29 = vunpack.c.h.bf16 %v317_v15  ;;  %v318_v50 = vld [vmem:[%s692_s5 + $0x10] sm:$0xff]  ;;  %v319_v55 = vld [vmem:[%s692_s5 + $0x18] sm:$0xff] }
  0x16   : > { %v308_v30 = vadd.f32 %v300_v16, %v288_v20  ;;  %v309_v31 = vadd.f32 %v301_v17, %v289_v21  ;;  %v310_v32 = vadd.f32 %v302_v18, %v290_v22  ;;  %v311_v33 = vadd.f32 %v303_v19, %v291_v23 }
  0x17   : > { %v272_v36 = vunpack.c.l.bf16 %v564_v24  ;;  %v273_v37 = vunpack.c.h.bf16 %v564_v24  ;;  %v274_v38 = vunpack.c.l.bf16 %v565_v25  ;;  %v275_v39 = vunpack.c.h.bf16 %v565_v25 }
  0x18   : > { %v328_v42 = vadd.f32 %v320_v26, %v308_v30  ;;  %v329_v43 = vadd.f32 %v321_v27, %v309_v31  ;;  %v330_v44 = vadd.f32 %v322_v28, %v310_v32  ;;  %v331_v45 = vadd.f32 %v323_v29, %v311_v33 }
  0x19   : > { %v284_v46 = vunpack.c.l.bf16 %v568_v34  ;;  %v285_v47 = vunpack.c.h.bf16 %v568_v34  ;;  %v286_v48 = vunpack.c.l.bf16 %v569_v35  ;;  %v287_v49 = vunpack.c.h.bf16 %v569_v35 }
  0x1a   : > { %v336_v51 = vadd.f32 %v329_v43, %v328_v42  ;;  %v304_v52 = vunpack.c.l.bf16 %v298_v40  ;;  %v305_v53 = vunpack.c.h.bf16 %v298_v40  ;;  %v306_v54 = vunpack.c.l.bf16 %v299_v41 }
  0x1b   : > { %v292_v56 = vadd.f32 %v284_v46, %v272_v36  ;;  %v293_v57 = vadd.f32 %v285_v47, %v273_v37  ;;  %v294_v58 = vadd.f32 %v286_v48, %v274_v38  ;;  %v295_v59 = vadd.f32 %v287_v49, %v275_v39 }
  0x1c   : > { %v337_v60 = vadd.f32 %v336_v51, %v330_v44  ;;  %v307_v61 = vunpack.c.h.bf16 %v299_v41  ;;  %v324_v62 = vunpack.c.l.bf16 %v318_v50  ;;  %v325_v63 = vunpack.c.h.bf16 %v318_v50 }
  0x1d   : > { %v312_v0 = vadd.f32 %v304_v52, %v292_v56  ;;  %v313_v1 = vadd.f32 %v305_v53, %v293_v57  ;;  %v314_v2 = vadd.f32 %v306_v54, %v294_v58  ;;  %v326_v3 = vunpack.c.l.bf16 %v319_v55 }
  0x1e   : > { %v338_v4 = vadd.f32 %v337_v60, %v331_v45  ;;  %v315_v5 = vadd.f32 %v307_v61, %v295_v59  ;;  %v327_v6 = vunpack.c.h.bf16 %v319_v55 }
  0x1f   : > { %v332_v7 = vadd.f32 %v324_v62, %v312_v0  ;;  %v333_v8 = vadd.f32 %v325_v63, %v313_v1  ;;  %v334_v9 = vadd.f32 %v326_v3, %v314_v2 }
  0x20   : > { %339 = vadd.xlane.f32.xlu0 %v338_v4  ;;  %v335_v10 = vadd.f32 %v327_v6, %v315_v5 }
  0x21   : > { %v341_v11 = vadd.f32 %v333_v8, %v332_v7 }
  0x23   : > { %v342_v12 = vadd.f32 %v341_v11, %v334_v9 }
  0x25   : > { %v343_v13 = vadd.f32 %v342_v12, %v335_v10 }
  0x27   : > { %344 = vadd.xlane.f32.xlu0 %v343_v13 }
  0xad   : > { %v340_v14 = vpop.xlane.xlu0 %339 }
  0xae   : > { %v347_v15 = vmul.f32 0.001953125, %v340_v14 }
  0xb0   : > { %v349_v16 = vsub.f32 %v328_v42, %v347_v15  ;;  %v350_v17 = vsub.f32 %v329_v43, %v347_v15  ;;  %v351_v18 = vsub.f32 %v330_v44, %v347_v15  ;;  %v352_v19 = vsub.f32 %v331_v45, %v347_v15 }
  0xb2   : > { %v357_v20 = vmul.f32 %v349_v16, %v349_v16  ;;  %v358_v21 = vmul.f32 %v350_v17, %v350_v17  ;;  %v359_v23 = vmul.f32 %v351_v18, %v351_v18  ;;  %v360_v26 = vmul.f32 %v352_v19, %v352_v19 }
  0xb4   : > { %v345_v22 = vpop.xlane.xlu0 %344  ;;  %v365_v24 = vadd.f32 %v358_v21, %v357_v20 }
  0xb5   : > { %v348_v25 = vmul.f32 0.001953125, %v345_v22 }
  0xb6   : > { %v366_v27 = vadd.f32 %v365_v24, %v359_v23 }
  0xb7   : > { %v353_v28 = vsub.f32 %v332_v7, %v348_v25  ;;  %v354_v29 = vsub.f32 %v333_v8, %v348_v25  ;;  %v355_v30 = vsub.f32 %v334_v9, %v348_v25  ;;  %v356_v32 = vsub.f32 %v335_v10, %v348_v25 }
  0xb8   : > { %v367_v31 = vadd.f32 %v366_v27, %v360_v26 }
  0xb9   : > { %v361_v33 = vmul.f32 %v353_v28, %v353_v28  ;;  %v362_v34 = vmul.f32 %v354_v29, %v354_v29  ;;  %v363_v35 = vmul.f32 %v355_v30, %v355_v30  ;;  %v364_v37 = vmul.f32 %v356_v32, %v356_v32 }
  0xba   : > { %368 = vadd.xlane.f32.xlu1 %v367_v31 }
  0xbb   : > { %v370_v36 = vadd.f32 %v362_v34, %v361_v33 }
  0xbd   : > { %v371_v38 = vadd.f32 %v370_v36, %v363_v35 }
  0xbf   : > { %v372_v39 = vadd.f32 %v371_v38, %v364_v37 }
  0xc1   : > { %373 = vadd.xlane.f32.xlu1 %v372_v39 }
 0x147   : > { %v369_v40 = vpop.xlane.xlu1 %368 }
 0x148   : > { %v375_v41 = vmul.f32 0.001953125, %v369_v40 }
 0x14a   : > { %v377_v42 = vadd.f32 1e-05, %v375_v41 }
 0x14c   : > { %592 = vrsqrt.f32 %v377_v42 }
 0x14e   : > { %v374_v43 = vpop.xlane.xlu1 %373 }
 0x14f   : > { %v376_v44 = vmul.f32 0.001953125, %v374_v43 }
 0x151   : > { %v378_v45 = vadd.f32 1e-05, %v376_v44 }
 0x153   : > { %594 = vrsqrt.f32 %v378_v45 }
 0x156   : > { %v593_v46 = vpop.eup %592 }
 0x157   : > { %v381_v47 = vmul.f32 %v593_v46, %v349_v16  ;;  %v382_v48 = vmul.f32 %v593_v46, %v350_v17  ;;  %v383_v49 = vmul.f32 %v593_v46, %v351_v18  ;;  %v384_v50 = vmul.f32 %v593_v46, %v352_v19 }
 0x159   : > { %v570_v51 = vmul.f32 -1.442695, %v381_v47  ;;  %v571_v52 = vmul.f32 -1.442695, %v382_v48  ;;  %v572_v53 = vmul.f32 -1.442695, %v383_v49 }
 0x15a   : > { %v573_v54 = vmul.f32 -1.442695, %v384_v50 }
 0x15b   : > { %596 = vpow2.f32 %v570_v51 }
 0x15c   : > { %598 = vpow2.f32 %v571_v52 }
 0x15d   : > { %v595_v55 = vpop.eup %594  ;;  %600 = vpow2.f32 %v572_v53 }
 0x15e   : > { %602 = vpow2.f32 %v573_v54  ;;  %v385_v56 = vmul.f32 %v595_v55, %v353_v28  ;;  %v386_v57 = vmul.f32 %v595_v55, %v354_v29  ;;  %v387_v58 = vmul.f32 %v595_v55, %v355_v30 }
 0x15f   : > { %v388_v59 = vmul.f32 %v595_v55, %v356_v32 }
 0x160   : > { %v574_v60 = vmul.f32 -1.442695, %v385_v56  ;;  %v575_v61 = vmul.f32 -1.442695, %v386_v57  ;;  %v576_v62 = vmul.f32 -1.442695, %v387_v58 }
 0x161   : > { %v577_v63 = vmul.f32 -1.442695, %v388_v59 }
 0x162   : > { %604 = vpow2.f32 %v574_v60 }
 0x163   : > { %606 = vpow2.f32 %v575_v61 }
 0x164   : > { %608 = vpow2.f32 %v576_v62 }
 0x165   : > { %v597_v0 = vpop.eup %596  ;;  %610 = vpow2.f32 %v577_v63 }
 0x166   : > { %v599_v1 = vpop.eup %598  ;;  %v413_v2 = vadd.f32 1.0, %v597_v0 }
 0x167   : > { %v601_v3 = vpop.eup %600  ;;  %v414_v4 = vadd.f32 1.0, %v599_v1 }
 0x168   : > { %v603_v5 = vpop.eup %602  ;;  %v415_v6 = vadd.f32 1.0, %v601_v3  ;;  %612 = vrcp.f32 %v413_v2 }
 0x169   : > { %v416_v7 = vadd.f32 1.0, %v603_v5  ;;  %614 = vrcp.f32 %v414_v4 }
 0x16a   : > { %616 = vrcp.f32 %v415_v6 }
 0x16b   : > { %618 = vrcp.f32 %v416_v7 }
 0x16c   : > { %v605_v8 = vpop.eup %604 }
 0x16d   : > { %v607_v9 = vpop.eup %606  ;;  %v417_v10 = vadd.f32 1.0, %v605_v8 }
 0x16e   : > { %v609_v11 = vpop.eup %608  ;;  %v418_v12 = vadd.f32 1.0, %v607_v9 }
 0x16f   : > { %v611_v13 = vpop.eup %610  ;;  %v419_v14 = vadd.f32 1.0, %v609_v11  ;;  %620 = vrcp.f32 %v417_v10 }
 0x170   : > { %v420_v15 = vadd.f32 1.0, %v611_v13  ;;  %622 = vrcp.f32 %v418_v12 }
 0x171   : > { %624 = vrcp.f32 %v419_v14 }
 0x172   : > { %v613_v16 = vpop.eup %612  ;;  %626 = vrcp.f32 %v420_v15 }
 0x173   : > { %v615_v17 = vpop.eup %614  ;;  %437 = vst [vmem:[%s263_s9] sm:$0xff] %v613_v16 }
 0x174   : > { %v617_v18 = vpop.eup %616  ;;  %438 = vst [vmem:[%s263_s9 + $0x8] sm:$0xff] %v615_v17 }
 0x175   : > { %v619_v19 = vpop.eup %618  ;;  %439 = vst [vmem:[%s263_s9 + $0x10] sm:$0xff] %v617_v18 }
 0x176   : > { %440 = vst [vmem:[%s263_s9 + $0x18] sm:$0xff] %v619_v19 }
 0x179   : > { %v621_v20 = vpop.eup %620 }
 0x17a   : > { %v623_v21 = vpop.eup %622  ;;  %441 = vst [vmem:[%s263_s9 + $0x20] sm:$0xff] %v621_v20 }
 0x17b   : > { %v625_v22 = vpop.eup %624  ;;  %442 = vst [vmem:[%s263_s9 + $0x28] sm:$0xff] %v623_v21 }
 0x17c   : > { %v627_v23 = vpop.eup %626  ;;  %443 = vst [vmem:[%s263_s9 + $0x30] sm:$0xff] %v625_v22 }
 0x17d   : > { %444 = vst [vmem:[%s263_s9 + $0x38] sm:$0xff] %v627_v23 }
 0x17e PF: > { %s14_s15 = sadd.s32 1, %s634_s15  }
 0x17f   : > { %p11_p4 = scmp.ge.s32.totalorder %s14_s15, 4  }
 0x181   :  { %13 = sbr.rel (!%p11_p4) target bundleno = 1 (0x1), region = 75 }

// kernel: taxibj_forward.99
= control target key start
LH: loop header
LB: loop body
LE: loop exit
PB: predicated region body
PF: predicated region fallthrough
CT: control target
= control target key end

     0   :  { %s2497_s12 = smov 0   ;;  %s2499_s13 = smov 0   ;;  %s2894_s0 = inlined_call_operand.vmem [shape: bf16[112,896], index: 0, kind: input, shape index: {}]   ;;  %s2895_s1 = inlined_call_operand.vmem [shape: f32[112,1], index: 1, kind: input, shape index: {}]   ;;  %s2896_s2 = inlined_call_operand.vmem [shape: bf16[2,896,144], index: 2, kind: input, shape index: {}]   ;;  %s2897_s3 = inlined_call_operand.vmem [shape: bf16[2,112,144], index: 3, kind: output, shape index: {}]  }
   0x1   :  { %s2501_s14 = smov 0  }
   0x2 LB: > { %s25_s15 = sadd.s32 1, %s2470_s13  ;;  %p1879_p0 = scmp.ge.s32.totalorder %s2474_s14, 1  ;;  %s2474_s14 = sphi %s2501_s14, %s13_s14   ;;  %s2470_s13 = sphi %s2499_s13, %s2901_s13   ;;  %s2466_s12 = sphi %s2497_s12, %s2900_s12  }
   0x3   : > { %p27_p1 = scmp.ge.s32.totalorder %s25_s15, 2  ;;  %p158_p2 = scmp.lt.s32.totalorder %s2474_s14, 3 }
   0x5   : > { %s2903_s15 = smov (%p27_p1, %s25_s15), 0  ;;  %p159_p3 = pnand %p1879_p0, %p158_p2 }
   0x6   : > { %p191_p4 = scmp.lt.s32.totalorder (!%p159_p3), %s2466_s12, 1  ;;  %v2312_v0 = vld [vmem:[%s2894_s0 + $0x14] ss:$28 sps:$4 sm:$0xff] (!%p159_p3)   ;;  %v2476_v1 = vmov (!%p159_p3), 0   ;;  %v2315_v2 = vld [vmem:[%s2894_s0 + $0x4] ss:$28 sps:$4 sm:$0xff] (!%p159_p3)  }
   0x7   : > { %162 = sbr.rel (%p159_p3) target bundleno = 417 (0x1a1), region = 32  ;;  %2212 = vset.pattern.permute.xlu0 (!%p159_p3), %v2476_v1  ;;  %2213 = vset.pattern.permute.xlu1 (!%p159_p3), %v2476_v1  ;;  %vm1771_vm0 = vcmask (!%p159_p3), 1043456   ;;  %vm1772_vm1 = vcmask (!%p159_p3), 130052  }
   0x8   : > { %1513 = vmatprep.mubr.bf16.mxu0 (!%p159_p3), %v2312_v0  ;;  %1307 = vmatprep.mubr.bf16.mxu1 (!%p159_p3), %v2315_v2  ;;  %vm2839_vm2 = vmor (!%p159_p3), %vm1772_vm1, %vm1771_vm0 }
   0xe   : > { %s2905_s12 = smov (!%p191_p4, %s2466_s12), 1 }
   0xf   : > { %s2185_s20 = smul.u32 896, %s2905_s12 }
  0x10   : > { %s2186_s7 = smul.u32 112, %s2905_s12 }
  0x11   : > { %s2529_s23 = scalar_lea.vmem %s2896_s2, %s2185_s20 }
  0x12   : > { %v2214_v3 = vld [vmem:[%s2529_s23 + $0x4] ss:$8 sps:$4 sm:$0xff]   ;;  %v2218_v5 = vld [vmem:[%s2529_s23] ss:$8 sps:$4 sm:$0xff]   ;;  %v2220_v7 = vld [vmem:[%s2529_s23 + $0x14] ss:$8 sps:$4 sm:$0xff]   ;;  %s2837_s10 = scalar_lea.vmem %s2897_s3, %s2186_s7 }
  0x13   : > { %v2216_v4 = vld [vmem:[%s2529_s23 + $0x204] ss:$8 sps:$4 sm:$0xff]   ;;  %1275 = vmatprep.subr.bf16.mxu1 %v2214_v3  ;;  %v2219_v6 = vld [vmem:[%s2529_s23 + $0x200] ss:$8 sps:$4 sm:$0xff]   ;;  %v2222_v8 = vld [vmem:[%s2529_s23 + $0x214] ss:$8 sps:$4 sm:$0xff]  }
  0x14   : > { %1481 = vmatprep.subr.bf16.mxu0 %v2216_v4  ;;  %1276 = vmatpush1.bf16.msra.mxu1 %v2218_v5  ;;  %v2224_v9 = vld [vmem:[%s2529_s23 + $0x10] ss:$8 sps:$4 sm:$0xff]   ;;  %v2226_v11 = vld [vmem:[%s2529_s23 + $0x24] ss:$8 sps:$4 sm:$0xff]   ;;  %v2230_v13 = vld [vmem:[%s2529_s23 + $0x20] ss:$8 sps:$4 sm:$0xff]  }
  0x15   : > { %1482 = vmatpush1.bf16.msra.mxu0 %v2219_v6  ;;  %1277 = vmatprep.subr.bf16.mxu1 %v2220_v7  ;;  %v2225_v10 = vld [vmem:[%s2529_s23 + $0x210] ss:$8 sps:$4 sm:$0xff]   ;;  %v2228_v12 = vld [vmem:[%s2529_s23 + $0x224] ss:$8 sps:$4 sm:$0xff]   ;;  %v2231_v14 = vld [vmem:[%s2529_s23 + $0x220] ss:$8 sps:$4 sm:$0xff]  }
  0x16   : > { %1483 = vmatprep.subr.bf16.mxu0 %v2222_v8  ;;  %v2232_v15 = vld [vmem:[%s2529_s23 + $0x34] ss:$8 sps:$4 sm:$0xff]   ;;  %v2236_v17 = vld [vmem:[%s2529_s23 + $0x30] ss:$8 sps:$4 sm:$0xff]   ;;  %v2238_v19 = vld [vmem:[%s2529_s23 + $0x44] ss:$8 sps:$4 sm:$0xff]  }
  0x17   : > { %v2234_v16 = vld [vmem:[%s2529_s23 + $0x234] ss:$8 sps:$4 sm:$0xff]   ;;  %v2237_v18 = vld [vmem:[%s2529_s23 + $0x230] ss:$8 sps:$4 sm:$0xff]   ;;  %v2240_v20 = vld [vmem:[%s2529_s23 + $0x244] ss:$8 sps:$4 sm:$0xff]  }
  0x18   : > { %1278 = vmatpush1.bf16.msra.mxu1 %v2224_v9  ;;  %v2242_v21 = vld [vmem:[%s2529_s23 + $0x40] ss:$8 sps:$4 sm:$0xff]   ;;  %v2244_v23 = vld [vmem:[%s2529_s23 + $0x54] ss:$8 sps:$4 sm:$0xff]   ;;  %v2248_v25 = vld [vmem:[%s2529_s23 + $0x50] ss:$8 sps:$4 sm:$0xff]  }
  0x19   : > { %1484 = vmatpush1.bf16.msra.mxu0 %v2225_v10  ;;  %1279 = vmatprep.subr.bf16.mxu1 %v2226_v11  ;;  %v2243_v22 = vld [vmem:[%s2529_s23 + $0x240] ss:$8 sps:$4 sm:$0xff]   ;;  %v2246_v24 = vld [vmem:[%s2529_s23 + $0x254] ss:$8 sps:$4 sm:$0xff]   ;;  %v2249_v26 = vld [vmem:[%s2529_s23 + $0x250] ss:$8 sps:$4 sm:$0xff]  }
  0x1a   : > { %1485 = vmatprep.subr.bf16.mxu0 %v2228_v12  ;;  %v2250_v27 = vld [vmem:[%s2529_s23 + $0x64] ss:$8 sps:$4 sm:$0xff]   ;;  %v2254_v29 = vld [vmem:[%s2529_s23 + $0x60] ss:$8 sps:$4 sm:$0xff]   ;;  %v2256_v31 = vld [vmem:[%s2529_s23 + $0x74] ss:$8 sps:$4 sm:$0xff]  }
  0x1b   : > { %v2252_v28 = vld [vmem:[%s2529_s23 + $0x264] ss:$8 sps:$4 sm:$0xff]   ;;  %v2255_v30 = vld [vmem:[%s2529_s23 + $0x260] ss:$8 sps:$4 sm:$0xff]   ;;  %v2258_v32 = vld [vmem:[%s2529_s23 + $0x274] ss:$8 sps:$4 sm:$0xff]  }
  0x1c   : > { %1280 = vmatpush1.bf16.msra.mxu1 %v2230_v13  ;;  %v2260_v33 = vld [vmem:[%s2529_s23 + $0x70] ss:$8 sps:$4 sm:$0xff]   ;;  %v2262_v35 = vld [vmem:[%s2529_s23 + $0x84] ss:$8 sps:$4 sm:$0xff]   ;;  %v2266_v37 = vld [vmem:[%s2529_s23 + $0x80] ss:$8 sps:$4 sm:$0xff]  }
  0x1d   : > { %1486 = vmatpush1.bf16.msra.mxu0 %v2231_v14  ;;  %1281 = vmatprep.subr.bf16.mxu1 %v2232_v15  ;;  %v2261_v34 = vld [vmem:[%s2529_s23 + $0x270] ss:$8 sps:$4 sm:$0xff]   ;;  %v2264_v36 = vld [vmem:[%s2529_s23 + $0x284] ss:$8 sps:$4 sm:$0xff]   ;;  %v2267_v38 = vld [vmem:[%s2529_s23 + $0x280] ss:$8 sps:$4 sm:$0xff]  }
  0x1e   : > { %1487 = vmatprep.subr.bf16.mxu0 %v2234_v16  ;;  %v2268_v39 = vld [vmem:[%s2529_s23 + $0x94] ss:$8 sps:$4 sm:$0xff]   ;;  %v2272_v41 = vld [vmem:[%s2529_s23 + $0x90] ss:$8 sps:$4 sm:$0xff]   ;;  %v2274_v43 = vld [vmem:[%s2529_s23 + $0xa4] ss:$8 sps:$4 sm:$0xff]  }
  0x1f   : > { %v2270_v40 = vld [vmem:[%s2529_s23 + $0x294] ss:$8 sps:$4 sm:$0xff]   ;;  %v2273_v42 = vld [vmem:[%s2529_s23 + $0x290] ss:$8 sps:$4 sm:$0xff]   ;;  %v2276_v44 = vld [vmem:[%s2529_s23 + $0x2a4] ss:$8 sps:$4 sm:$0xff]  }
  0x20   : > { %1282 = vmatpush1.bf16.msra.mxu1 %v2236_v17  ;;  %v2278_v45 = vld [vmem:[%s2529_s23 + $0xa0] ss:$8 sps:$4 sm:$0xff]   ;;  %v2280_v47 = vld [vmem:[%s2529_s23 + $0xb4] ss:$8 sps:$4 sm:$0xff]   ;;  %v2284_v49 = vld [vmem:[%s2529_s23 + $0xb0] ss:$8 sps:$4 sm:$0xff]  }
  0x21   : > { %1488 = vmatpush1.bf16.msra.mxu0 %v2237_v18  ;;  %1283 = vmatprep.subr.bf16.mxu1 %v2238_v19  ;;  %v2279_v46 = vld [vmem:[%s2529_s23 + $0x2a0] ss:$8 sps:$4 sm:$0xff]   ;;  %v2282_v48 = vld [vmem:[%s2529_s23 + $0x2b4] ss:$8 sps:$4 sm:$0xff]   ;;  %v2285_v50 = vld [vmem:[%s2529_s23 + $0x2b0] ss:$8 sps:$4 sm:$0xff]  }
  0x22   : > { %1489 = vmatprep.subr.bf16.mxu0 %v2240_v20  ;;  %v2286_v51 = vld [vmem:[%s2529_s23 + $0xc4] ss:$8 sps:$4 sm:$0xff]   ;;  %v2290_v53 = vld [vmem:[%s2529_s23 + $0xc0] ss:$8 sps:$4 sm:$0xff]   ;;  %v2292_v55 = vld [vmem:[%s2529_s23 + $0xd4] ss:$8 sps:$4 sm:$0xff]  }
  0x23   : > { %v2288_v52 = vld [vmem:[%s2529_s23 + $0x2c4] ss:$8 sps:$4 sm:$0xff]   ;;  %v2291_v54 = vld [vmem:[%s2529_s23 + $0x2c0] ss:$8 sps:$4 sm:$0xff]   ;;  %v2294_v56 = vld [vmem:[%s2529_s23 + $0x2d4] ss:$8 sps:$4 sm:$0xff]  }
  0x24   : > { %1284 = vmatpush1.bf16.msra.mxu1 %v2242_v21  ;;  %v2296_v57 = vld [vmem:[%s2529_s23 + $0xd0] ss:$8 sps:$4 sm:$0xff]   ;;  %v2298_v59 = vld [vmem:[%s2529_s23 + $0xe4] ss:$8 sps:$4 sm:$0xff]   ;;  %v2302_v61 = vld [vmem:[%s2529_s23 + $0xe0] ss:$8 sps:$4 sm:$0xff]  }
  0x25   : > { %1490 = vmatpush1.bf16.msra.mxu0 %v2243_v22  ;;  %1285 = vmatprep.subr.bf16.mxu1 %v2244_v23  ;;  %v2297_v58 = vld [vmem:[%s2529_s23 + $0x2d0] ss:$8 sps:$4 sm:$0xff]   ;;  %v2300_v60 = vld [vmem:[%s2529_s23 + $0x2e4] ss:$8 sps:$4 sm:$0xff]   ;;  %v2303_v62 = vld [vmem:[%s2529_s23 + $0x2e0] ss:$8 sps:$4 sm:$0xff]  }
  0x26   : > { %1491 = vmatprep.subr.bf16.mxu0 %v2246_v24  ;;  %v2304_v63 = vld [vmem:[%s2529_s23 + $0xf4] ss:$8 sps:$4 sm:$0xff]   ;;  %v2308_v2 = vld [vmem:[%s2529_s23 + $0xf0] ss:$8 sps:$4 sm:$0xff]   ;;  %v2318_v4 = vld [vmem:[%s2529_s23 + $0x104] ss:$8 sps:$4 sm:$0xff]  }
  0x27   : > { %v2306_v0 = vld [vmem:[%s2529_s23 + $0x2f4] ss:$8 sps:$4 sm:$0xff]   ;;  %v2309_v3 = vld [vmem:[%s2529_s23 + $0x2f0] ss:$8 sps:$4 sm:$0xff]   ;;  %v2330_v6 = vld [vmem:[%s2529_s23 + $0x304] ss:$8 sps:$4 sm:$0xff]  }
  0x28   : > { %1286 = vmatpush1.bf16.msra.mxu1 %v2248_v25  ;;  %v2310_v5 = vld [vmem:[%s2894_s0 + $0x10] ss:$28 sps:$4 sm:$0xff]   ;;  %v2313_v7 = vld [vmem:[%s2894_s0] ss:$28 sps:$4 sm:$0xff]   ;;  %v2327_v16 = vld [vmem:[%s2894_s0 + $0x48] ss:$28 sps:$4 sm:$0xff]  }
  0x29   : > { %1492 = vmatpush1.bf16.msra.mxu0 %v2249_v26  ;;  %1287 = vmatprep.subr.bf16.mxu1 %v2250_v27  ;;  %v2322_v8 = vld [vmem:[%s2894_s0 + $0x4c] ss:$28 sps:$4 sm:$0xff]   ;;  %v2321_v10 = vld [vmem:[%s2529_s23 + $0x114] ss:$8 sps:$4 sm:$0xff]   ;;  %v2319_v14 = vld [vmem:[%s2529_s23 + $0x110] ss:$8 sps:$4 sm:$0xff]  }
  0x2a   : > { %1493 = vmatprep.subr.bf16.mxu0 %v2252_v28  ;;  %v2316_v9 = vld [vmem:[%s2529_s23 + $0x100] ss:$8 sps:$4 sm:$0xff]   ;;  %v2334_v11 = vld [vmem:[%s2894_s0 + $0x3c] ss:$28 sps:$4 sm:$0xff]   ;;  %v2326_v15 = vld [vmem:[%s2529_s23 + $0x124] ss:$8 sps:$4 sm:$0xff]  }
  0x2b   : > { %v2328_v12 = vld [vmem:[%s2529_s23 + $0x300] ss:$8 sps:$4 sm:$0xff]   ;;  %v2345_v13 = vld [vmem:[%s2529_s23 + $0x314] ss:$8 sps:$4 sm:$0xff]   ;;  %v2343_v17 = vld [vmem:[%s2529_s23 + $0x310] ss:$8 sps:$4 sm:$0xff]  }
  0x2c   : > { %1288 = vmatpush1.bf16.msra.mxu1 %v2254_v29  ;;  %v2355_v18 = vld [vmem:[%s2529_s23 + $0x324] ss:$8 sps:$4 sm:$0xff]   ;;  %v2338_v20 = vld [vmem:[%s2894_s0 + $0x38] ss:$28 sps:$4 sm:$0xff]   ;;  %v2324_v21 = vld [vmem:[%s2529_s23 + $0x120] ss:$8 sps:$4 sm:$0xff]  }
  0x2d   : > { %1494 = vmatpush1.bf16.msra.mxu0 %v2255_v30  ;;  %1289 = vmatprep.subr.bf16.mxu1 %v2256_v31  ;;  %v2336_v19 = vld [vmem:[%s2894_s0 + $0x84] ss:$28 sps:$4 sm:$0xff]   ;;  %v2333_v22 = vld [vmem:[%s2529_s23 + $0x134] ss:$8 sps:$4 sm:$0xff]   ;;  %v2331_v26 = vld [vmem:[%s2529_s23 + $0x130] ss:$8 sps:$4 sm:$0xff]  }
  0x2e   : > { %1495 = vmatprep.subr.bf16.mxu0 %v2258_v32  ;;  %v2349_v23 = vld [vmem:[%s2894_s0 + $0x74] ss:$28 sps:$4 sm:$0xff]   ;;  %v2353_v24 = vld [vmem:[%s2529_s23 + $0x320] ss:$8 sps:$4 sm:$0xff]   ;;  %v2341_v27 = vld [vmem:[%s2529_s23 + $0x144] ss:$8 sps:$4 sm:$0xff]  }
  0x2f   : > { %v2366_v25 = vld [vmem:[%s2529_s23 + $0x334] ss:$8 sps:$4 sm:$0xff]   ;;  %v2364_v29 = vld [vmem:[%s2529_s23 + $0x330] ss:$8 sps:$4 sm:$0xff]   ;;  %v2339_v30 = vld [vmem:[%s2529_s23 + $0x140] ss:$8 sps:$4 sm:$0xff]  }
  0x30   : > { %1290 = vmatpush1.bf16.msra.mxu1 %v2260_v33  ;;  %v2342_v28 = vld [vmem:[%s2894_s0 + $0x80] ss:$28 sps:$4 sm:$0xff]   ;;  %v2356_v31 = vld [vmem:[%s2894_s0 + $0x70] ss:$28 sps:$4 sm:$0xff]  }
  0x31   : > { %1496 = vmatpush1.bf16.msra.mxu0 %v2261_v34  ;;  %1291 = vmatprep.subr.bf16.mxu1 %v2262_v35  ;;  %v2348_v32 = vld [vmem:[%s2529_s23 + $0x154] ss:$8 sps:$4 sm:$0xff]   ;;  %v2367_v34 = vld [vmem:[%s2894_s0 + $0xac] ss:$28 sps:$4 sm:$0xff]  }
  0x32   : > { %1497 = vmatprep.subr.bf16.mxu0 %v2264_v36  ;;  %v2351_v33 = vld [vmem:[%s2894_s0 + $0xbc] ss:$28 sps:$4 sm:$0xff]   ;;  %v2381_v35 = vld [vmem:[%s2529_s23 + $0x344] ss:$8 sps:$4 sm:$0xff]   ;;  %v2379_v36 = vld [vmem:[%s2529_s23 + $0x340] ss:$8 sps:$4 sm:$0xff]  }
  0x34   : > { %1292 = vmatpush1.bf16.msra.mxu1 %v2266_v37  ;;  %v2346_v37 = vld [vmem:[%s2529_s23 + $0x150] ss:$8 sps:$4 sm:$0xff]  }
  0x35   : > { %1498 = vmatpush1.bf16.msra.mxu0 %v2267_v38  ;;  %1293 = vmatprep.subr.bf16.mxu1 %v2268_v39  ;;  %v2396_v38 = vld [vmem:[%s2529_s23 + $0x354] ss:$8 sps:$4 sm:$0xff]   ;;  %v2359_v39 = vld [vmem:[%s2529_s23 + $0x164] ss:$8 sps:$4 sm:$0xff]  }
  0x36   : > { %1499 = vmatprep.subr.bf16.mxu0 %v2270_v40  ;;  %v2357_v40 = vld [vmem:[%s2529_s23 + $0x160] ss:$8 sps:$4 sm:$0xff]  }
  0x38   : > { %1294 = vmatpush1.bf16.msra.mxu1 %v2272_v41  ;;  %v2360_v41 = vld [vmem:[%s2894_s0 + $0xb8] ss:$28 sps:$4 sm:$0xff]  }
  0x39   : > { %1500 = vmatpush1.bf16.msra.mxu0 %v2273_v42  ;;  %1295 = vmatprep.subr.bf16.mxu1 %v2274_v43  ;;  %v2371_v42 = vld [vmem:[%s2894_s0 + $0xa8] ss:$28 sps:$4 sm:$0xff]   ;;  %v2363_v43 = vld [vmem:[%s2529_s23 + $0x174] ss:$8 sps:$4 sm:$0xff]  }
  0x3a   : > { %1501 = vmatprep.subr.bf16.mxu0 %v2276_v44  ;;  %v2369_v44 = vld [vmem:[%s2894_s0 + $0xf4] ss:$28 sps:$4 sm:$0xff]  }
  0x3c   : > { %1296 = vmatpush1.bf16.msra.mxu1 %v2278_v45  ;;  %v2382_v45 = vld [vmem:[%s2894_s0 + $0xe4] ss:$28 sps:$4 sm:$0xff]  }
  0x3d   : > { %1502 = vmatpush1.bf16.msra.mxu0 %v2279_v46  ;;  %1297 = vmatprep.subr.bf16.mxu1 %v2280_v47  ;;  %v2394_v46 = vld [vmem:[%s2529_s23 + $0x350] ss:$8 sps:$4 sm:$0xff]   ;;  %v2408_v47 = vld [vmem:[%s2529_s23 + $0x364] ss:$8 sps:$4 sm:$0xff]  }
  0x3e   : > { %1503 = vmatprep.subr.bf16.mxu0 %v2282_v48  ;;  %v2361_v48 = vld [vmem:[%s2529_s23 + $0x170] ss:$8 sps:$4 sm:$0xff]  }
  0x40   : > { %1298 = vmatpush1.bf16.msra.mxu1 %v2284_v49  ;;  %v2374_v49 = vld [vmem:[%s2529_s23 + $0x184] ss:$8 sps:$4 sm:$0xff]  }
  0x41   : > { %1504 = vmatpush1.bf16.msra.mxu0 %v2285_v50  ;;  %1299 = vmatprep.subr.bf16.mxu1 %v2286_v51  ;;  %v2372_v50 = vld [vmem:[%s2529_s23 + $0x180] ss:$8 sps:$4 sm:$0xff]  }
  0x42   : > { %1505 = vmatprep.subr.bf16.mxu0 %v2288_v52  ;;  %v2406_v51 = vld [vmem:[%s2529_s23 + $0x360] ss:$8 sps:$4 sm:$0xff]   ;;  %v2375_v52 = vld [vmem:[%s2894_s0 + $0xf0] ss:$28 sps:$4 sm:$0xff]  }
  0x44   : > { %1300 = vmatpush1.bf16.msra.mxu1 %v2290_v53  ;;  %v2386_v53 = vld [vmem:[%s2894_s0 + $0xe0] ss:$28 sps:$4 sm:$0xff]  }
  0x45   : > { %1506 = vmatpush1.bf16.msra.mxu0 %v2291_v54  ;;  %1301 = vmatprep.subr.bf16.mxu1 %v2292_v55  ;;  %v2384_v54 = vld [vmem:[%s2894_s0 + $0x12c] ss:$28 sps:$4 sm:$0xff]   ;;  %v2378_v55 = vld [vmem:[%s2529_s23 + $0x194] ss:$8 sps:$4 sm:$0xff]  }
  0x46   : > { %1507 = vmatprep.subr.bf16.mxu0 %v2294_v56  ;;  %v2397_v56 = vld [vmem:[%s2894_s0 + $0x11c] ss:$28 sps:$4 sm:$0xff]  }
  0x48   : > { %1302 = vmatpush1.bf16.msra.mxu1 %v2296_v57  ;;  %v2414_v57 = vld [vmem:[%s2529_s23 + $0x374] ss:$8 sps:$4 sm:$0xff]  }
  0x49   : > { %1508 = vmatpush1.bf16.msra.mxu0 %v2297_v58  ;;  %1303 = vmatprep.subr.bf16.mxu1 %v2298_v59  ;;  %v2412_v58 = vld [vmem:[%s2529_s23 + $0x370] ss:$8 sps:$4 sm:$0xff]  }
  0x4a   : > { %1509 = vmatprep.subr.bf16.mxu0 %v2300_v60  ;;  %v2376_v59 = vld [vmem:[%s2529_s23 + $0x190] ss:$8 sps:$4 sm:$0xff]   ;;  %v2389_v60 = vld [vmem:[%s2529_s23 + $0x1a4] ss:$8 sps:$4 sm:$0xff]  }
  0x4c   : > { %1304 = vmatpush1.bf16.msra.mxu1 %v2302_v61  ;;  %v379_v61 = vld [vmem:[%s2895_s1] sm:$0xff] }
  0x4d   : > { %1510 = vmatpush1.bf16.msra.mxu0 %v2303_v62  ;;  %1305 = vmatprep.subr.bf16.mxu1 %v2304_v63  ;;  %v2390_v62 = vld [vmem:[%s2894_s0 + $0x128] ss:$28 sps:$4 sm:$0xff]   ;;  %v2401_v63 = vld [vmem:[%s2894_s0 + $0x118] ss:$28 sps:$4 sm:$0xff]  }
  0x4e   : > { %1511 = vmatprep.subr.bf16.mxu0 %v2306_v0  ;;  %395 = vperm.xlu0 %2212, %v379_v61   ;;  %v381_v0 = vld [vmem:[%s2895_s1 + $0x10] sm:$0xff] }
  0x4f   : > { %405 = vperm.xlu1 %2213, %v381_v0  }
  0x50   : > { %1306 = vmatpush1.bf16.msra.mxu1 %v2308_v2  ;;  %v2387_v2 = vld [vmem:[%s2529_s23 + $0x1a0] ss:$8 sps:$4 sm:$0xff]  }
  0x51   : > { %1512 = vmatpush1.bf16.msra.mxu0 %v2309_v3  ;;  %1378 = vmatprep.subr.bf16.mxu1 %v2318_v4  ;;  %v2399_v3 = vld [vmem:[%s2894_s0 + $0x164] ss:$28 sps:$4 sm:$0xff]   ;;  %v2393_v4 = vld [vmem:[%s2529_s23 + $0x1b4] ss:$8 sps:$4 sm:$0xff]  }
  0x52   : > { %1584 = vmatprep.subr.bf16.mxu0 %v2330_v6  ;;  %v380_v6 = vld [vmem:[%s2895_s1 + $0x8] sm:$0xff] }
  0x53   : > { %1308 = vmatmul.mubr.bf16.vlgmr.msra.gmra.mrb[0].mxu1 %v2313_v7  ;;  %v382_v7 = vld [vmem:[%s2895_s1 + $0x18] sm:$0xff]  ;;  %400 = vperm.xlu0 %2212, %v380_v6  }
  0x54   : > { %1514 = vmatmul.mubr.bf16.vlgmr.msra.gmra.mrb[0].mxu0 %v2310_v5  ;;  %1379 = vmatpush1.bf16.msra.mxu1 %v2316_v9  ;;  %v2415_v5 = vld [vmem:[%s2894_s0 + $0x154] ss:$28 sps:$4 sm:$0xff]   ;;  %v2404_v9 = vld [vmem:[%s2529_s23 + $0x1c4] ss:$8 sps:$4 sm:$0xff]  }
  0x55   : > { %1523 = vmatprep.mubr.bf16.mxu0 %v2322_v8  ;;  %1380 = vmatprep.subr.bf16.mxu1 %v2321_v10  ;;  %v2391_v8 = vld [vmem:[%s2529_s23 + $0x1b0] ss:$8 sps:$4 sm:$0xff]   ;;  %v2405_v10 = vld [vmem:[%s2894_s0 + $0x160] ss:$28 sps:$4 sm:$0xff]  }
  0x56   : > { %1585 = vmatpush1.bf16.msra.mxu0 %v2328_v12  ;;  %1317 = vmatprep.mubr.bf16.mxu1 %v2334_v11  ;;  %v2417_v11 = vld [vmem:[%s2894_s0 + $0x150] ss:$28 sps:$4 sm:$0xff]  }
  0x57   : > { %1586 = vmatprep.subr.bf16.mxu0 %v2345_v13  ;;  %410 = vperm.xlu1 %2213, %v382_v7   ;;  %v384_v12 = vld [vmem:[%s2895_s1 + $0x28] sm:$0xff]  ;;  %v383_v13 = vld [vmem:[%s2895_s1 + $0x20] sm:$0xff] }
  0x58   : > { %1381 = vmatpush1.bf16.msra.mxu1 %v2319_v14  ;;  %v2402_v14 = vld [vmem:[%s2529_s23 + $0x1c0] ss:$8 sps:$4 sm:$0xff]   ;;  %415 = vperm.xlu0 %2212, %v383_v13  }
  0x59   : > { %1382 = vmatprep.subr.bf16.mxu1 %v2326_v15  ;;  %v2411_v15 = vld [vmem:[%s2529_s23 + $0x1d4] ss:$8 sps:$4 sm:$0xff]  }
  0x5a   : > { %1587 = vmatpush1.bf16.msra.mxu0 %v2343_v17  ;;  %v386_v17 = vld [vmem:[%s2895_s1 + $0x38] sm:$0xff] }
  0x5b   : > { %1588 = vmatprep.subr.bf16.mxu0 %v2355_v18  ;;  %1318 = vmatmul.mubr.bf16.gmra.mrb[4].mxu1 %v2338_v20  ;;  %v385_v18 = vld [vmem:[%s2895_s1 + $0x30] sm:$0xff]  ;;  %v2420_v20 = vld [vmem:[%s2529_s23 + $0x1e4] ss:$8 sps:$4 sm:$0xff]  }
  0x5c   : > { %1524 = vmatmul.mubr.bf16.gmra.mrb[4].mxu0 %v2327_v16  ;;  %1383 = vmatpush1.bf16.msra.mxu1 %v2324_v21  ;;  %v2427_v16 = vld [vmem:[%s2894_s0 + $0xc] ss:$28 sps:$4 sm:$0xff]   ;;  %v2421_v21 = vld [vmem:[%s2894_s0 + $0x18] ss:$28 sps:$4 sm:$0xff]  }
  0x5d   : > { %1533 = vmatprep.mubr.bf16.mxu0 %v2336_v19  ;;  %1384 = vmatprep.subr.bf16.mxu1 %v2333_v22  ;;  %v2409_v19 = vld [vmem:[%s2529_s23 + $0x1d0] ss:$8 sps:$4 sm:$0xff]   ;;  %v388_v22 = vld [vmem:[%s2895_s1 + $0x48] sm:$0xff] }
  0x5e   : > { %1327 = vmatprep.mubr.bf16.mxu1 %v2349_v23  ;;  %1589 = vmatpush1.bf16.msra.mxu0 %v2353_v24  ;;  %v387_v23 = vld [vmem:[%s2895_s1 + $0x40] sm:$0xff] }
  0x5f   : > { %1590 = vmatprep.subr.bf16.mxu0 %v2366_v25  ;;  %420 = vperm.xlu1 %2213, %v384_v12   ;;  %v2418_v24 = vld [vmem:[%s2529_s23 + $0x1e0] ss:$8 sps:$4 sm:$0xff]   ;;  %v2424_v25 = vld [vmem:[%s2529_s23 + $0x1f4] ss:$8 sps:$4 sm:$0xff]  }
  0x60   : > { %1385 = vmatpush1.bf16.msra.mxu1 %v2331_v26  ;;  %425 = vperm.xlu0 %2212, %v385_v18   ;;  %v390_v26 = vld [vmem:[%s2895_s1 + $0x58] sm:$0xff] }
  0x61   : > { %1386 = vmatprep.subr.bf16.mxu1 %v2341_v27  ;;  %v389_v27 = vld [vmem:[%s2895_s1 + $0x50] sm:$0xff] }
  0x62   : > { %1591 = vmatpush1.bf16.msra.mxu0 %v2364_v29  ;;  %v2425_v29 = vld [vmem:[%s2894_s0 + $0x8] ss:$28 sps:$4 sm:$0xff]  }
  0x63   : > { %1328 = vmatmul.mubr.bf16.gmra.mrb[8].mxu1 %v2356_v31  ;;  %1592 = vmatprep.subr.bf16.mxu0 %v2381_v35  ;;  %v392_v31 = vld [vmem:[%s2895_s1 + $0x68] sm:$0xff] }
  0x64   : > { %1534 = vmatmul.mubr.bf16.gmra.mrb[8].mxu0 %v2342_v28  ;;  %1387 = vmatpush1.bf16.msra.mxu1 %v2339_v30  ;;  %v2422_v28 = vld [vmem:[%s2529_s23 + $0x1f0] ss:$8 sps:$4 sm:$0xff]   ;;  %v2432_v35 = vld [vmem:[%s2894_s0 + $0x88] ss:$28 sps:$4 sm:$0xff]  }
  0x65   : > { %1543 = vmatprep.mubr.bf16.mxu0 %v2351_v33  ;;  %1388 = vmatprep.subr.bf16.mxu1 %v2348_v32  ;;  %v2428_v30 = vld [vmem:[%s2894_s0 + $0x50] ss:$28 sps:$4 sm:$0xff]   ;;  %v391_v32 = vld [vmem:[%s2895_s1 + $0x60] sm:$0xff] }
  0x66   : > { %1337 = vmatprep.mubr.bf16.mxu1 %v2367_v34  ;;  %1593 = vmatpush1.bf16.msra.mxu0 %v2379_v36  ;;  %v2429_v33 = vld [vmem:[%s2894_s0 + $0x44] ss:$28 sps:$4 sm:$0xff]   ;;  %v2433_v36 = vld [vmem:[%s2894_s0 + $0x7c] ss:$28 sps:$4 sm:$0xff]  }
  0x67   : > { %1594 = vmatprep.subr.bf16.mxu0 %v2396_v38  ;;  %430 = vperm.xlu1 %2213, %v386_v17   ;;  %v2431_v34 = vld [vmem:[%s2894_s0 + $0x40] ss:$28 sps:$4 sm:$0xff]  }
  0x68   : > { %1389 = vmatpush1.bf16.msra.mxu1 %v2346_v37  ;;  %435 = vperm.xlu0 %2212, %v387_v23   ;;  %v2435_v37 = vld [vmem:[%s2894_s0 + $0x78] ss:$28 sps:$4 sm:$0xff]   ;;  %v2436_v38 = vld [vmem:[%s2894_s0 + $0xc0] ss:$28 sps:$4 sm:$0xff]  }
  0x69   : > { %1390 = vmatprep.subr.bf16.mxu1 %v2359_v39  ;;  %v2437_v39 = vld [vmem:[%s2894_s0 + $0xb4] ss:$28 sps:$4 sm:$0xff]  }
  0x6a   : > { %1595 = vmatpush1.bf16.msra.mxu0 %v2394_v46  ;;  %v2447_v46 = vld [vmem:[%s2894_s0 + $0x120] ss:$28 sps:$4 sm:$0xff]  }
  0x6b   : > { %1338 = vmatmul.mubr.bf16.gmra.mrb[12].mxu1 %v2371_v42  ;;  %1596 = vmatprep.subr.bf16.mxu0 %v2408_v47  ;;  %v2441_v42 = vld [vmem:[%s2894_s0 + $0xec] ss:$28 sps:$4 sm:$0xff]  }
  0x6c   : > { %1544 = vmatmul.mubr.bf16.gmra.mrb[12].mxu0 %v2360_v41  ;;  %1391 = vmatpush1.bf16.msra.mxu1 %v2357_v40  ;;  %v2439_v40 = vld [vmem:[%s2894_s0 + $0xb0] ss:$28 sps:$4 sm:$0xff]   ;;  %v2440_v41 = vld [vmem:[%s2894_s0 + $0xf8] ss:$28 sps:$4 sm:$0xff]   ;;  %v2448_v47 = vld [vmem:[%s2894_s0 + $0x168] ss:$28 sps:$4 sm:$0xff]  }
  0x6d   : > { %1553 = vmatprep.mubr.bf16.mxu0 %v2369_v44  ;;  %1392 = vmatprep.subr.bf16.mxu1 %v2363_v43  ;;  %v2443_v43 = vld [vmem:[%s2894_s0 + $0xe8] ss:$28 sps:$4 sm:$0xff]   ;;  %v2444_v44 = vld [vmem:[%s2894_s0 + $0x130] ss:$28 sps:$4 sm:$0xff]  }
  0x6e   : > { %1347 = vmatprep.mubr.bf16.mxu1 %v2382_v45  ;;  %1597 = vmatpush1.bf16.msra.mxu0 %v2406_v51  ;;  %v2445_v45 = vld [vmem:[%s2894_s0 + $0x124] ss:$28 sps:$4 sm:$0xff]  }
  0x6f   : > { %1598 = vmatprep.subr.bf16.mxu0 %v2414_v57  ;;  %440 = vperm.xlu1 %2213, %v388_v22  }
  0x70   : > { %1393 = vmatpush1.bf16.msra.mxu1 %v2361_v48  ;;  %445 = vperm.xlu0 %2212, %v389_v27   ;;  %v2449_v48 = vld [vmem:[%s2894_s0 + $0x15c] ss:$28 sps:$4 sm:$0xff]  }
  0x71   : > { %1394 = vmatprep.subr.bf16.mxu1 %v2374_v49 }
  0x72   : > { %1599 = vmatpush1.bf16.msra.mxu0 %v2412_v58 }
  0x73   : > { %1348 = vmatmul.mubr.bf16.gmra.mrb[16].mxu1 %v2386_v53  ;;  %450 = vperm.xlu1 %2213, %v390_v26  }
  0x74   : > { %1554 = vmatmul.mubr.bf16.gmra.mrb[16].mxu0 %v2375_v52  ;;  %1395 = vmatpush1.bf16.msra.mxu1 %v2372_v50 }
  0x75   : > { %1563 = vmatprep.mubr.bf16.mxu0 %v2384_v54  ;;  %1396 = vmatprep.subr.bf16.mxu1 %v2378_v55 }
  0x76   : > { %1357 = vmatprep.mubr.bf16.mxu1 %v2397_v56  ;;  %455 = vperm.xlu0 %2212, %v391_v32  }
  0x77   : > { %460 = vperm.xlu1 %2213, %v392_v31  }
  0x78   : > { %1397 = vmatpush1.bf16.msra.mxu1 %v2376_v59 }
  0x79   : > { %1398 = vmatprep.subr.bf16.mxu1 %v2389_v60 }
  0x7b   : > { %1358 = vmatmul.mubr.bf16.gmra.mrb[20].mxu1 %v2401_v63 }
  0x7c   : > { %1564 = vmatmul.mubr.bf16.gmra.mrb[20].mxu0 %v2390_v62  ;;  %1399 = vmatpush1.bf16.msra.mxu1 %v2387_v2 }
  0x7d   : > { %1573 = vmatprep.mubr.bf16.mxu0 %v2399_v3  ;;  %1400 = vmatprep.subr.bf16.mxu1 %v2393_v4 }
  0x7e   : > { %1367 = vmatprep.mubr.bf16.mxu1 %v2415_v5 }
  0x80   : > { %1401 = vmatpush1.bf16.msra.mxu1 %v2391_v8 }
  0x81   : > { %1402 = vmatprep.subr.bf16.mxu1 %v2404_v9 }
  0x83   : > { %1368 = vmatmul.mubr.bf16.gmra.mrb[24].mxu1 %v2417_v11 }
  0x84   : > { %1574 = vmatmul.mubr.bf16.gmra.mrb[24].mxu0 %v2405_v10  ;;  %1403 = vmatpush1.bf16.msra.mxu1 %v2402_v14 }
  0x85   : > { %1616 = vmatprep.mubr.bf16.mxu0 %v2476_v1  ;;  %1404 = vmatprep.subr.bf16.mxu1 %v2411_v15 }
  0x86   : > { %1410 = vmatprep.mubr.bf16.mxu1 %v2427_v16 }
  0x88   : > { %1405 = vmatpush1.bf16.msra.mxu1 %v2409_v19 }
  0x89   : > { %1406 = vmatprep.subr.bf16.mxu1 %v2420_v20 }
  0x8c   : > { %1617 = vmatmul.mubr.bf16.vlgmr.msra.gmra.mrb[0].mxu0 %v2421_v21  ;;  %1407 = vmatpush1.bf16.msra.mxu1 %v2418_v24 }
  0x8d   : > { %1626 = vmatprep.mubr.bf16.mxu0 %v2476_v1  ;;  %1408 = vmatprep.subr.bf16.mxu1 %v2424_v25 }
  0x90   : > { %1409 = vmatpush1.bf16.msra.mxu1 %v2422_v28 }
  0x93   : > { %1411 = vmatmul.mubr.bf16.vlgmr.msra.gmra.mrb[0].mxu1 %v2425_v29 }
  0x94   : > { %1627 = vmatmul.mubr.bf16.gmra.mrb[4].mxu0 %v2428_v30  ;;  %1420 = vmatprep.mubr.bf16.mxu1 %v2429_v33 }
  0x95   : > { %1636 = vmatprep.mubr.bf16.mxu0 %v2476_v1 }
  0x9b   : > { %1421 = vmatmul.mubr.bf16.gmra.mrb[4].mxu1 %v2431_v34 }
  0x9c   : > { %1637 = vmatmul.mubr.bf16.gmra.mrb[8].mxu0 %v2432_v35  ;;  %1430 = vmatprep.mubr.bf16.mxu1 %v2433_v36 }
  0x9d   : > { %1646 = vmatprep.mubr.bf16.mxu0 %v2476_v1 }
  0xa3   : > { %1431 = vmatmul.mubr.bf16.gmra.mrb[8].mxu1 %v2435_v37 }
  0xa4   : > { %1647 = vmatmul.mubr.bf16.gmra.mrb[12].mxu0 %v2436_v38  ;;  %1440 = vmatprep.mubr.bf16.mxu1 %v2437_v39 }
  0xa5   : > { %1656 = vmatprep.mubr.bf16.mxu0 %v2476_v1 }
  0xab   : > { %1441 = vmatmul.mubr.bf16.gmra.mrb[12].mxu1 %v2439_v40 }
  0xac   : > { %1657 = vmatmul.mubr.bf16.gmra.mrb[16].mxu0 %v2440_v41  ;;  %1450 = vmatprep.mubr.bf16.mxu1 %v2441_v42 }
  0xad   : > { %1666 = vmatprep.mubr.bf16.mxu0 %v2476_v1 }
  0xb3   : > { %1451 = vmatmul.mubr.bf16.gmra.mrb[16].mxu1 %v2443_v43 }
  0xb4   : > { %1667 = vmatmul.mubr.bf16.gmra.mrb[20].mxu0 %v2444_v44  ;;  %1460 = vmatprep.mubr.bf16.mxu1 %v2445_v45 }
  0xb5   : > { %1676 = vmatprep.mubr.bf16.mxu0 %v2476_v1  ;;  %v2451_v1 = vld [vmem:[%s2894_s0 + $0x158] ss:$28 sps:$4 sm:$0xff]  }
  0xbb   : > { %1461 = vmatmul.mubr.bf16.gmra.mrb[20].mxu1 %v2447_v46 }
  0xbc   : > { %1677 = vmatmul.mubr.bf16.gmra.mrb[24].mxu0 %v2448_v47  ;;  %1470 = vmatprep.mubr.bf16.mxu1 %v2449_v48 }
  0xc3   : > { %1471 = vmatmul.mubr.bf16.gmra.mrb[24].mxu1 %v2451_v1 }
  0xcd   : > { %v396_v51 = vpop.permute.xlu0 %395 }
  0xce   : > { %v406_v55 = vpop.permute.xlu1 %405 }
  0xd2   : > { %v401_v54 = vpop.permute.xlu0 %400 }
  0xd6   : > { %v411_v11 = vpop.permute.xlu1 %410 }
  0xd7   : > { %v416_v31 = vpop.permute.xlu0 %415 }
  0xde   : > { %v421_v30 = vpop.permute.xlu1 %420 }
 0x15f   : > { %v1618_v49 = vpop.f32.mrb[0].mxu0 }
 0x160   : > { %v1620_v50 = vpop.f32.mrb[1].mxu0 }
 0x161   : > { %v1622_v52 = vpop.f32.mrb[2].mxu0 }
 0x162   : > { %v1624_v53 = vpop.f32.mrb[3].mxu0 }
 0x166   : > { %v1412_v56 = vpop.f32.mrb[0].mxu1 }
 0x167   : > { %v1628_v57 = vpop.f32.mrb[4].mxu0  ;;  %v2073_v58 = vadd.f32 %v1412_v56, %v396_v51  ;;  %v1414_v59 = vpop.f32.mrb[1].mxu1 }
 0x168   : > { %v1630_v60 = vpop.f32.mrb[5].mxu0  ;;  %v2075_v61 = vadd.f32 %v1414_v59, %v396_v51  ;;  %v1416_v62 = vpop.f32.mrb[2].mxu1 }
 0x169   : > { %v1632_v63 = vpop.f32.mrb[6].mxu0  ;;  %v2074_v0 = vadd.f32 %v2073_v58, %v1618_v49  ;;  %v2077_v2 = vadd.f32 %v1416_v62, %v401_v54  ;;  %v1418_v3 = vpop.f32.mrb[3].mxu1 }
 0x16a   : > { %v1634_v4 = vpop.f32.mrb[7].mxu0  ;;  %v2076_v5 = vadd.f32 %v2075_v61, %v1620_v50  ;;  %v2079_v6 = vadd.f32 %v1418_v3, %v401_v54  ;;  %v431_v49 = vpop.permute.xlu1 %430 }
 0x16b   : > { %v2078_v8 = vadd.f32 %v2077_v2, %v1622_v52  ;;  %v426_v50 = vpop.permute.xlu0 %425 }
 0x16c   : > { %v2059_v9 = vpack.c.bf16 %v2076_v5, %v2074_v0  ;;  %v2080_v10 = vadd.f32 %v2079_v6, %v1624_v53 }
 0x16e   : > { %1774 = vst.msk [vmem:[%s2837_s10] sm:$0xff] %vm2839_vm2, %v2059_v9  ;;  %v2060_v12 = vpack.c.bf16 %v2080_v10, %v2078_v8  ;;  %v1422_v13 = vpop.f32.mrb[4].mxu1  ;;  %v441_v6 = vpop.permute.xlu1 %440 }
 0x16f   : > { %v1638_v14 = vpop.f32.mrb[8].mxu0  ;;  %v2081_v15 = vadd.f32 %v1422_v13, %v406_v55  ;;  %v1424_v16 = vpop.f32.mrb[5].mxu1 }
 0x170   : > { %v1640_v17 = vpop.f32.mrb[9].mxu0  ;;  %1775 = vst.msk [vmem:[%s2837_s10 + $0x8] sm:$0xff] %vm2839_vm2, %v2060_v12  ;;  %v2083_v18 = vadd.f32 %v1424_v16, %v406_v55  ;;  %v1426_v19 = vpop.f32.mrb[6].mxu1 }
 0x171   : > { %v1642_v20 = vpop.f32.mrb[10].mxu0  ;;  %v2082_v21 = vadd.f32 %v2081_v15, %v1628_v57  ;;  %v2085_v22 = vadd.f32 %v1426_v19, %v411_v11  ;;  %v1428_v23 = vpop.f32.mrb[7].mxu1 }
 0x172   : > { %v1644_v24 = vpop.f32.mrb[11].mxu0  ;;  %v2084_v25 = vadd.f32 %v2083_v18, %v1630_v60  ;;  %v2087_v26 = vadd.f32 %v1428_v23, %v411_v11  ;;  %v436_v8 = vpop.permute.xlu0 %435 }
 0x173   : > { %v2086_v27 = vadd.f32 %v2085_v22, %v1632_v63 }
 0x174   : > { %v2061_v28 = vpack.c.bf16 %v2084_v25, %v2082_v21  ;;  %v2088_v29 = vadd.f32 %v2087_v26, %v1634_v4 }
 0x176   : > { %1776 = vst.msk [vmem:[%s2837_s10 + $0x10] sm:$0xff] %vm2839_vm2, %v2061_v28  ;;  %v2062_v32 = vpack.c.bf16 %v2088_v29, %v2086_v27  ;;  %v1432_v33 = vpop.f32.mrb[8].mxu1  ;;  %v451_v27 = vpop.permute.xlu1 %450 }
 0x177   : > { %v1648_v34 = vpop.f32.mrb[12].mxu0  ;;  %v2089_v35 = vadd.f32 %v1432_v33, %v416_v31  ;;  %v1434_v36 = vpop.f32.mrb[9].mxu1 }
 0x178   : > { %v1650_v37 = vpop.f32.mrb[13].mxu0  ;;  %1777 = vst.msk [vmem:[%s2837_s10 + $0x18] sm:$0xff] %vm2839_vm2, %v2062_v32  ;;  %v2091_v38 = vadd.f32 %v1434_v36, %v416_v31  ;;  %v1436_v39 = vpop.f32.mrb[10].mxu1 }
 0x179   : > { %v1652_v40 = vpop.f32.mrb[14].mxu0  ;;  %v2090_v41 = vadd.f32 %v2089_v35, %v1638_v14  ;;  %v2093_v42 = vadd.f32 %v1436_v39, %v421_v30  ;;  %v1438_v43 = vpop.f32.mrb[11].mxu1 }
 0x17a   : > { %v1654_v44 = vpop.f32.mrb[15].mxu0  ;;  %v2092_v45 = vadd.f32 %v2091_v38, %v1640_v17  ;;  %v2095_v46 = vadd.f32 %v1438_v43, %v421_v30  ;;  %v446_v28 = vpop.permute.xlu0 %445 }
 0x17b   : > { %v2094_v47 = vadd.f32 %v2093_v42, %v1642_v20 }
 0x17c   : > { %v2063_v48 = vpack.c.bf16 %v2092_v45, %v2090_v41  ;;  %v2096_v1 = vadd.f32 %v2095_v46, %v1644_v24 }
 0x17e   : > { %1778 = vst.msk [vmem:[%s2837_s10 + $0x20] sm:$0xff] %vm2839_vm2, %v2063_v48  ;;  %v2064_v51 = vpack.c.bf16 %v2096_v1, %v2094_v47  ;;  %v1442_v52 = vpop.f32.mrb[12].mxu1  ;;  %v456_v47 = vpop.permute.xlu0 %455 }
 0x17f   : > { %v1658_v53 = vpop.f32.mrb[16].mxu0  ;;  %v2097_v54 = vadd.f32 %v1442_v52, %v426_v50  ;;  %v1444_v55 = vpop.f32.mrb[13].mxu1 }
 0x180   : > { %v1660_v56 = vpop.f32.mrb[17].mxu0  ;;  %1779 = vst.msk [vmem:[%s2837_s10 + $0x28] sm:$0xff] %vm2839_vm2, %v2064_v51  ;;  %v2099_v57 = vadd.f32 %v1444_v55, %v426_v50  ;;  %v1446_v58 = vpop.f32.mrb[14].mxu1 }
 0x181   : > { %v1662_v59 = vpop.f32.mrb[18].mxu0  ;;  %v2098_v60 = vadd.f32 %v2097_v54, %v1648_v34  ;;  %v2101_v61 = vadd.f32 %v1446_v58, %v431_v49  ;;  %v1448_v62 = vpop.f32.mrb[15].mxu1 }
 0x182   : > { %v1664_v63 = vpop.f32.mrb[19].mxu0  ;;  %v2100_v0 = vadd.f32 %v2099_v57, %v1650_v37  ;;  %v2103_v2 = vadd.f32 %v1448_v62, %v431_v49  ;;  %v461_v51 = vpop.permute.xlu1 %460 }
 0x183   : > { %v2102_v3 = vadd.f32 %v2101_v61, %v1652_v40 }
 0x184   : > { %v2065_v4 = vpack.c.bf16 %v2100_v0, %v2098_v60  ;;  %v2104_v5 = vadd.f32 %v2103_v2, %v1654_v44 }
 0x186   : > { %1780 = vst.msk [vmem:[%s2837_s10 + $0x30] sm:$0xff] %vm2839_vm2, %v2065_v4  ;;  %v2066_v9 = vpack.c.bf16 %v2104_v5, %v2102_v3  ;;  %v1452_v10 = vpop.f32.mrb[16].mxu1 }
 0x187   : > { %v1668_v11 = vpop.f32.mrb[20].mxu0  ;;  %v2105_v12 = vadd.f32 %v1452_v10, %v436_v8  ;;  %v1454_v13 = vpop.f32.mrb[17].mxu1 }
 0x188   : > { %v1670_v14 = vpop.f32.mrb[21].mxu0  ;;  %1781 = vst.msk [vmem:[%s2837_s10 + $0x38] sm:$0xff] %vm2839_vm2, %v2066_v9  ;;  %v2107_v15 = vadd.f32 %v1454_v13, %v436_v8  ;;  %v1456_v16 = vpop.f32.mrb[18].mxu1 }
 0x189   : > { %v1672_v17 = vpop.f32.mrb[22].mxu0  ;;  %v2106_v18 = vadd.f32 %v2105_v12, %v1658_v53  ;;  %v2109_v19 = vadd.f32 %v1456_v16, %v441_v6  ;;  %v1458_v20 = vpop.f32.mrb[19].mxu1 }
 0x18a   : > { %v1674_v21 = vpop.f32.mrb[23].mxu0  ;;  %v2108_v22 = vadd.f32 %v2107_v15, %v1660_v56  ;;  %v2111_v23 = vadd.f32 %v1458_v20, %v441_v6 }
 0x18b   : > { %v2110_v24 = vadd.f32 %v2109_v19, %v1662_v59 }
 0x18c   : > { %v2067_v25 = vpack.c.bf16 %v2108_v22, %v2106_v18  ;;  %v2112_v26 = vadd.f32 %v2111_v23, %v1664_v63 }
 0x18e   : > { %1782 = vst.msk [vmem:[%s2837_s10 + $0x40] sm:$0xff] %vm2839_vm2, %v2067_v25  ;;  %v2068_v29 = vpack.c.bf16 %v2112_v26, %v2110_v24  ;;  %v1462_v30 = vpop.f32.mrb[20].mxu1 }
 0x18f   : > { %v1678_v31 = vpop.f32.mrb[24].mxu0  ;;  %v2113_v32 = vadd.f32 %v1462_v30, %v446_v28  ;;  %v1464_v33 = vpop.f32.mrb[21].mxu1 }
 0x190   : > { %v1680_v34 = vpop.f32.mrb[25].mxu0  ;;  %1783 = vst.msk [vmem:[%s2837_s10 + $0x48] sm:$0xff] %vm2839_vm2, %v2068_v29  ;;  %v2115_v35 = vadd.f32 %v1464_v33, %v446_v28  ;;  %v1466_v36 = vpop.f32.mrb[22].mxu1 }
 0x191   : > { %v1682_v37 = vpop.f32.mrb[26].mxu0  ;;  %v2114_v38 = vadd.f32 %v2113_v32, %v1668_v11  ;;  %v2117_v39 = vadd.f32 %v1466_v36, %v451_v27  ;;  %v1468_v40 = vpop.f32.mrb[23].mxu1 }
 0x192   : > { %v1684_v41 = vpop.f32.mrb[27].mxu0  ;;  %v2116_v42 = vadd.f32 %v2115_v35, %v1670_v14  ;;  %v2119_v43 = vadd.f32 %v1468_v40, %v451_v27 }
 0x193   : > { %v2118_v44 = vadd.f32 %v2117_v39, %v1672_v17 }
 0x194   : > { %v2069_v45 = vpack.c.bf16 %v2116_v42, %v2114_v38  ;;  %v2120_v46 = vadd.f32 %v2119_v43, %v1674_v21 }
 0x196   : > { %1784 = vst.msk [vmem:[%s2837_s10 + $0x50] sm:$0xff] %vm2839_vm2, %v2069_v45  ;;  %v2070_v48 = vpack.c.bf16 %v2120_v46, %v2118_v44  ;;  %v1472_v1 = vpop.f32.mrb[24].mxu1 }
 0x197   : > { %v2121_v49 = vadd.f32 %v1472_v1, %v456_v47  ;;  %v1474_v50 = vpop.f32.mrb[25].mxu1 }
 0x198   : > { %1785 = vst.msk [vmem:[%s2837_s10 + $0x58] sm:$0xff] %vm2839_vm2, %v2070_v48  ;;  %v2123_v52 = vadd.f32 %v1474_v50, %v456_v47  ;;  %v1476_v53 = vpop.f32.mrb[26].mxu1 }
 0x199   : > { %v2122_v54 = vadd.f32 %v2121_v49, %v1678_v31  ;;  %v2125_v55 = vadd.f32 %v1476_v53, %v461_v51  ;;  %v1478_v56 = vpop.f32.mrb[27].mxu1 }
 0x19a   : > { %v2124_v57 = vadd.f32 %v2123_v52, %v1680_v34  ;;  %v2127_v58 = vadd.f32 %v1478_v56, %v461_v51 }
 0x19b   : > { %v2126_v59 = vadd.f32 %v2125_v55, %v1682_v37 }
 0x19c   : > { %v2071_v60 = vpack.c.bf16 %v2124_v57, %v2122_v54  ;;  %v2128_v61 = vadd.f32 %v2127_v58, %v1684_v41 }
 0x19e   : > { %1786 = vst.msk [vmem:[%s2837_s10 + $0x60] sm:$0xff] %vm2839_vm2, %v2071_v60  ;;  %v2072_v62 = vpack.c.bf16 %v2128_v61, %v2126_v59 }
 0x1a0   : > { %1787 = vst.msk [vmem:[%s2837_s10 + $0x68] sm:$0xff] %vm2839_vm2, %v2072_v62 }
 0x1a1 PF: > { %s13_s14 = sadd.s32 1, %s2474_s14   ;;  %s2900_s12 = smov %s2470_s13 }
 0x1a2   : > { %p10_p5 = scmp.ge.s32.totalorder %s13_s14, 4   ;;  %s2901_s13 = smov %s2903_s15 }
 0x1a4   :  { %12 = sbr.rel (!%p10_p5) target bundleno = 2 (0x2), region = 62 }

// kernel: taxibj_forward.169
= control target key start
LH: loop header
LB: loop body
LE: loop exit
PB: predicated region body
PF: predicated region fallthrough
CT: control target
= control target key end

     0   :  { %s3581_s12 = smov 0   ;;  %s3583_s13 = smov 0   ;;  %s4034_s0 = inlined_call_operand.vmem [shape: bf16[2,2432], index: 0, kind: input, shape index: {}]   ;;  %s4035_s1 = inlined_call_operand.vmem [shape: f32[2,1], index: 1, kind: input, shape index: {}]   ;;  %s4036_s2 = inlined_call_operand.vmem [shape: bf16[2,2432,256], index: 2, kind: input, shape index: {}]   ;;  %s4037_s3 = inlined_call_operand.vmem [shape: f32[2,2,256], index: 3, kind: output, shape index: {}]  }
   0x1   :  { %s3585_s14 = smov 0  }
   0x2 LB: > { %s25_s15 = sadd.s32 1, %s3553_s13  ;;  %p2700_p0 = scmp.ge.s32.totalorder %s3557_s14, 1  ;;  %s3557_s14 = sphi %s3585_s14, %s13_s14   ;;  %s3553_s13 = sphi %s3583_s13, %s4039_s13   ;;  %s3549_s12 = sphi %s3581_s12, %s4038_s12  }
   0x3   : > { %p27_p1 = scmp.ge.s32.totalorder %s25_s15, 2  ;;  %p158_p2 = scmp.lt.s32.totalorder %s3557_s14, 3 }
   0x5   : > { %s4041_s15 = smov (%p27_p1, %s25_s15), 0  ;;  %p159_p3 = pnand %p2700_p0, %p158_p2 }
   0x6   : > { %p191_p4 = scmp.lt.s32.totalorder (!%p159_p3), %s3549_s12, 1  ;;  %v531_v0 = vlaneseq (!%p159_p3)  ;;  %v3559_v1 = vmov (!%p159_p3), 1966171168   ;;  %v3605_v5 = vld [vmem:[%s4034_s0] sm:$0xff] (!%p159_p3)  ;;  %v3610_v6 = vld [vmem:[%s4034_s0 + $0x8] sm:$0xff] (!%p159_p3) }
   0x7   : > { %162 = sbr.rel (%p159_p3) target bundleno = 559 (0x22f), region = 32  ;;  %v529_v2 = vunpack.c.l.s4 (!%p159_p3), %v3559_v1 }
   0x8   : > { %v532_v3 = vshrl.u32 (!%p159_p3), %v531_v0, 7 }
   0x9   : > { %v530_v4 = vunpack.c.0.s8 (!%p159_p3), %v529_v2 }
   0xb   : > { %v3612_v7 = vsub.s32 (!%p159_p3), %v530_v4, %v532_v3 }
   0xd   : > { %v3622_v9 = vrot.slane (!%p159_p3), %v3605_v5, %v3612_v7  ;;  %v3626_v10 = vrot.slane (!%p159_p3), %v3610_v6, %v3612_v7 }
   0xe   : > { %s4043_s12 = smov (!%p191_p4, %s3549_s12), 1 }
   0xf   : > { %s3049_s16 = smul.u32 2432, %s4043_s12  ;;  %v542_v14 = vcombine.high %v3622_v9, %v3622_v9  ;;  %v591_v15 = vcombine.high %v3626_v10, %v3626_v10  ;;  %s3012_s28 = sshll.u32 %s4043_s12, 2 }
  0x10   : > { %s208_s4 = scalar_lea.vmem %s4037_s3, %s3012_s28 }
  0x11   : > { %s3617_s23 = scalar_lea.vmem %s4036_s2, %s3049_s16  ;;  %v3639_v19 = vrot.slane %v542_v14, %v3612_v7  ;;  %v3642_v20 = vrot.slane %v591_v15, %v3612_v7  ;;  %v576_v14 = vcombine.high %v3610_v6, %v3610_v6  ;;  %v3711_v6 = vrot.slane %v3626_v10, %v3612_v7 }
  0x12   : > { %v3077_v8 = vld [vmem:[%s3617_s23 + $0x4] ss:$8 sps:$4 sm:$0xff]   ;;  %v3081_v12 = vld [vmem:[%s3617_s23] ss:$8 sps:$4 sm:$0xff]   ;;  %v3083_v16 = vld [vmem:[%s3617_s23 + $0x14] ss:$8 sps:$4 sm:$0xff]  }
  0x13   : > { %v3079_v11 = vld [vmem:[%s3617_s23 + $0x504] ss:$8 sps:$4 sm:$0xff]   ;;  %2187 = vmatprep.subr.bf16.mxu1 %v3077_v8  ;;  %v3082_v13 = vld [vmem:[%s3617_s23 + $0x500] ss:$8 sps:$4 sm:$0xff]   ;;  %v3085_v17 = vld [vmem:[%s3617_s23 + $0x514] ss:$8 sps:$4 sm:$0xff]   ;;  %2219 = vmatprep.mubr.bf16.mxu1 %v3639_v19  ;;  %v623_v23 = vcombine.high %v3642_v20, %v3642_v20  ;;  %v621_v10 = vcombine.high %v3711_v6, %v3711_v6 }
  0x14   : > { %2392 = vmatprep.subr.bf16.mxu0 %v3079_v11  ;;  %2188 = vmatpush1.bf16.msra.mxu1 %v3081_v12  ;;  %v3087_v18 = vld [vmem:[%s3617_s23 + $0x10] ss:$8 sps:$4 sm:$0xff]   ;;  %v3089_v22 = vld [vmem:[%s3617_s23 + $0x24] ss:$8 sps:$4 sm:$0xff]   ;;  %v3093_v25 = vld [vmem:[%s3617_s23 + $0x20] ss:$8 sps:$4 sm:$0xff]  }
  0x15   : > { %2393 = vmatpush1.bf16.msra.mxu0 %v3082_v13  ;;  %2189 = vmatprep.subr.bf16.mxu1 %v3083_v16  ;;  %v3088_v21 = vld [vmem:[%s3617_s23 + $0x510] ss:$8 sps:$4 sm:$0xff]   ;;  %v3091_v24 = vld [vmem:[%s3617_s23 + $0x524] ss:$8 sps:$4 sm:$0xff]   ;;  %v3094_v26 = vld [vmem:[%s3617_s23 + $0x520] ss:$8 sps:$4 sm:$0xff]  }
  0x16   : > { %2394 = vmatprep.subr.bf16.mxu0 %v3085_v17  ;;  %v3095_v27 = vld [vmem:[%s3617_s23 + $0x34] ss:$8 sps:$4 sm:$0xff]   ;;  %2424 = vmatprep.mubr.bf16.mxu0 %v623_v23  ;;  %v3099_v29 = vld [vmem:[%s3617_s23 + $0x30] ss:$8 sps:$4 sm:$0xff]   ;;  %v3101_v31 = vld [vmem:[%s3617_s23 + $0x44] ss:$8 sps:$4 sm:$0xff]  }
  0x17   : > { %v3097_v28 = vld [vmem:[%s3617_s23 + $0x534] ss:$8 sps:$4 sm:$0xff]   ;;  %v3100_v30 = vld [vmem:[%s3617_s23 + $0x530] ss:$8 sps:$4 sm:$0xff]   ;;  %v3103_v32 = vld [vmem:[%s3617_s23 + $0x544] ss:$8 sps:$4 sm:$0xff]  }
  0x18   : > { %2190 = vmatpush1.bf16.msra.mxu1 %v3087_v18  ;;  %v3105_v33 = vld [vmem:[%s3617_s23 + $0x40] ss:$8 sps:$4 sm:$0xff]   ;;  %v3107_v35 = vld [vmem:[%s3617_s23 + $0x54] ss:$8 sps:$4 sm:$0xff]   ;;  %v3111_v37 = vld [vmem:[%s3617_s23 + $0x50] ss:$8 sps:$4 sm:$0xff]  }
  0x19   : > { %2395 = vmatpush1.bf16.msra.mxu0 %v3088_v21  ;;  %2191 = vmatprep.subr.bf16.mxu1 %v3089_v22  ;;  %v3106_v34 = vld [vmem:[%s3617_s23 + $0x540] ss:$8 sps:$4 sm:$0xff]   ;;  %v3109_v36 = vld [vmem:[%s3617_s23 + $0x554] ss:$8 sps:$4 sm:$0xff]   ;;  %v3112_v38 = vld [vmem:[%s3617_s23 + $0x550] ss:$8 sps:$4 sm:$0xff]   ;;  %v3705_v21 = vrot.slane %v576_v14, %v3612_v7 }
  0x1a   : > { %2396 = vmatprep.subr.bf16.mxu0 %v3091_v24  ;;  %v3113_v39 = vld [vmem:[%s3617_s23 + $0x64] ss:$8 sps:$4 sm:$0xff]   ;;  %v3117_v41 = vld [vmem:[%s3617_s23 + $0x60] ss:$8 sps:$4 sm:$0xff]   ;;  %v3119_v43 = vld [vmem:[%s3617_s23 + $0x74] ss:$8 sps:$4 sm:$0xff]  }
  0x1b   : > { %v3115_v40 = vld [vmem:[%s3617_s23 + $0x564] ss:$8 sps:$4 sm:$0xff]   ;;  %v3118_v42 = vld [vmem:[%s3617_s23 + $0x560] ss:$8 sps:$4 sm:$0xff]   ;;  %v3121_v44 = vld [vmem:[%s3617_s23 + $0x574] ss:$8 sps:$4 sm:$0xff]  }
  0x1c   : > { %2192 = vmatpush1.bf16.msra.mxu1 %v3093_v25  ;;  %v3123_v45 = vld [vmem:[%s3617_s23 + $0x70] ss:$8 sps:$4 sm:$0xff]   ;;  %v3125_v47 = vld [vmem:[%s3617_s23 + $0x84] ss:$8 sps:$4 sm:$0xff]   ;;  %v3129_v49 = vld [vmem:[%s3617_s23 + $0x80] ss:$8 sps:$4 sm:$0xff]  }
  0x1d   : > { %2397 = vmatpush1.bf16.msra.mxu0 %v3094_v26  ;;  %2193 = vmatprep.subr.bf16.mxu1 %v3095_v27  ;;  %v3124_v46 = vld [vmem:[%s3617_s23 + $0x570] ss:$8 sps:$4 sm:$0xff]   ;;  %v3127_v48 = vld [vmem:[%s3617_s23 + $0x584] ss:$8 sps:$4 sm:$0xff]   ;;  %v3130_v50 = vld [vmem:[%s3617_s23 + $0x580] ss:$8 sps:$4 sm:$0xff]   ;;  %v592_v26 = vcombine.high %v3705_v21, %v3705_v21 }
  0x1e   : > { %2398 = vmatprep.subr.bf16.mxu0 %v3097_v28  ;;  %v3131_v51 = vld [vmem:[%s3617_s23 + $0x94] ss:$8 sps:$4 sm:$0xff]   ;;  %v3135_v53 = vld [vmem:[%s3617_s23 + $0x90] ss:$8 sps:$4 sm:$0xff]   ;;  %v3137_v55 = vld [vmem:[%s3617_s23 + $0xa4] ss:$8 sps:$4 sm:$0xff]  }
  0x1f   : > { %v3133_v52 = vld [vmem:[%s3617_s23 + $0x594] ss:$8 sps:$4 sm:$0xff]   ;;  %v3136_v54 = vld [vmem:[%s3617_s23 + $0x590] ss:$8 sps:$4 sm:$0xff]   ;;  %v3139_v56 = vld [vmem:[%s3617_s23 + $0x5a4] ss:$8 sps:$4 sm:$0xff]  }
  0x20   : > { %2194 = vmatpush1.bf16.msra.mxu1 %v3099_v29  ;;  %v3141_v57 = vld [vmem:[%s3617_s23 + $0xa0] ss:$8 sps:$4 sm:$0xff]   ;;  %v3143_v59 = vld [vmem:[%s3617_s23 + $0xb4] ss:$8 sps:$4 sm:$0xff]   ;;  %v3147_v61 = vld [vmem:[%s3617_s23 + $0xb0] ss:$8 sps:$4 sm:$0xff]   ;;  %v3721_v29 = vrot.slane %v3622_v9, %v3612_v7 }
  0x21   : > { %2399 = vmatpush1.bf16.msra.mxu0 %v3100_v30  ;;  %2195 = vmatprep.subr.bf16.mxu1 %v3101_v31  ;;  %v3142_v58 = vld [vmem:[%s3617_s23 + $0x5a0] ss:$8 sps:$4 sm:$0xff]   ;;  %v3145_v60 = vld [vmem:[%s3617_s23 + $0x5b4] ss:$8 sps:$4 sm:$0xff]   ;;  %v3148_v62 = vld [vmem:[%s3617_s23 + $0x5b0] ss:$8 sps:$4 sm:$0xff]  }
  0x22   : > { %2400 = vmatprep.subr.bf16.mxu0 %v3103_v32  ;;  %v3149_v63 = vld [vmem:[%s3617_s23 + $0xc4] ss:$8 sps:$4 sm:$0xff]   ;;  %v3153_v1 = vld [vmem:[%s3617_s23 + $0xc0] ss:$8 sps:$4 sm:$0xff]   ;;  %v3155_v3 = vld [vmem:[%s3617_s23 + $0xd4] ss:$8 sps:$4 sm:$0xff]   ;;  %v574_v32 = vcombine.high %v3639_v19, %v3639_v19 }
  0x23   : > { %v3151_v0 = vld [vmem:[%s3617_s23 + $0x5c4] ss:$8 sps:$4 sm:$0xff]   ;;  %v3154_v2 = vld [vmem:[%s3617_s23 + $0x5c0] ss:$8 sps:$4 sm:$0xff]   ;;  %v3157_v4 = vld [vmem:[%s3617_s23 + $0x5d4] ss:$8 sps:$4 sm:$0xff]  }
  0x24   : > { %2196 = vmatpush1.bf16.msra.mxu1 %v3105_v33  ;;  %v3159_v8 = vld [vmem:[%s3617_s23 + $0xd0] ss:$8 sps:$4 sm:$0xff]   ;;  %v3161_v12 = vld [vmem:[%s3617_s23 + $0xe4] ss:$8 sps:$4 sm:$0xff]   ;;  %v3165_v15 = vld [vmem:[%s3617_s23 + $0xe0] ss:$8 sps:$4 sm:$0xff]   ;;  %v3730_v33 = vrot.slane %v592_v26, %v3612_v7 }
  0x25   : > { %2401 = vmatpush1.bf16.msra.mxu0 %v3106_v34  ;;  %2197 = vmatprep.subr.bf16.mxu1 %v3107_v35  ;;  %v3160_v11 = vld [vmem:[%s3617_s23 + $0x5d0] ss:$8 sps:$4 sm:$0xff]   ;;  %v3163_v13 = vld [vmem:[%s3617_s23 + $0x5e4] ss:$8 sps:$4 sm:$0xff]   ;;  %v3166_v16 = vld [vmem:[%s3617_s23 + $0x5e0] ss:$8 sps:$4 sm:$0xff]  }
  0x26   : > { %2402 = vmatprep.subr.bf16.mxu0 %v3109_v36  ;;  %v3167_v17 = vld [vmem:[%s3617_s23 + $0xf4] ss:$8 sps:$4 sm:$0xff]   ;;  %v3171_v22 = vld [vmem:[%s3617_s23 + $0xf0] ss:$8 sps:$4 sm:$0xff]   ;;  %v3176_v24 = vld [vmem:[%s3617_s23 + $0x104] ss:$8 sps:$4 sm:$0xff]  }
  0x27   : > { %v3169_v18 = vld [vmem:[%s3617_s23 + $0x5f4] ss:$8 sps:$4 sm:$0xff]   ;;  %v3172_v23 = vld [vmem:[%s3617_s23 + $0x5f0] ss:$8 sps:$4 sm:$0xff]   ;;  %v3180_v25 = vld [vmem:[%s3617_s23 + $0x604] ss:$8 sps:$4 sm:$0xff]  }
  0x28   : > { %2198 = vmatpush1.bf16.msra.mxu1 %v3111_v37  ;;  %v3174_v27 = vld [vmem:[%s3617_s23 + $0x100] ss:$8 sps:$4 sm:$0xff]   ;;  %v3183_v30 = vld [vmem:[%s3617_s23 + $0x114] ss:$8 sps:$4 sm:$0xff]   ;;  %v3181_v9 = vld [vmem:[%s3617_s23 + $0x110] ss:$8 sps:$4 sm:$0xff]  }
  0x29   : > { %2403 = vmatpush1.bf16.msra.mxu0 %v3112_v38  ;;  %2199 = vmatprep.subr.bf16.mxu1 %v3113_v39  ;;  %v3178_v28 = vld [vmem:[%s3617_s23 + $0x600] ss:$8 sps:$4 sm:$0xff]   ;;  %v3186_v31 = vld [vmem:[%s3617_s23 + $0x614] ss:$8 sps:$4 sm:$0xff]   ;;  %v3184_v34 = vld [vmem:[%s3617_s23 + $0x610] ss:$8 sps:$4 sm:$0xff]  }
  0x2a   : > { %2404 = vmatprep.subr.bf16.mxu0 %v3115_v40  ;;  %v3189_v35 = vld [vmem:[%s3617_s23 + $0x124] ss:$8 sps:$4 sm:$0xff]   ;;  %v3187_v19 = vld [vmem:[%s3617_s23 + $0x120] ss:$8 sps:$4 sm:$0xff]   ;;  %v3195_v38 = vld [vmem:[%s3617_s23 + $0x134] ss:$8 sps:$4 sm:$0xff]  }
  0x2b   : > { %v3192_v36 = vld [vmem:[%s3617_s23 + $0x624] ss:$8 sps:$4 sm:$0xff]   ;;  %v3190_v37 = vld [vmem:[%s3617_s23 + $0x620] ss:$8 sps:$4 sm:$0xff]   ;;  %v3198_v39 = vld [vmem:[%s3617_s23 + $0x634] ss:$8 sps:$4 sm:$0xff]  }
  0x2c   : > { %2200 = vmatpush1.bf16.msra.mxu1 %v3117_v41  ;;  %v3193_v40 = vld [vmem:[%s3617_s23 + $0x130] ss:$8 sps:$4 sm:$0xff]   ;;  %v3261_v26 = vld [vmem:[%s3617_s23 + $0x1e4] ss:$8 sps:$4 sm:$0xff]  }
  0x2d   : > { %2405 = vmatpush1.bf16.msra.mxu0 %v3118_v42  ;;  %2201 = vmatprep.subr.bf16.mxu1 %v3119_v43  ;;  %v3196_v41 = vld [vmem:[%s3617_s23 + $0x630] ss:$8 sps:$4 sm:$0xff]   ;;  %v3201_v42 = vld [vmem:[%s3617_s23 + $0x144] ss:$8 sps:$4 sm:$0xff]  }
  0x2e   : > { %2406 = vmatprep.subr.bf16.mxu0 %v3121_v44  ;;  %v3204_v43 = vld [vmem:[%s3617_s23 + $0x644] ss:$8 sps:$4 sm:$0xff]   ;;  %v3199_v44 = vld [vmem:[%s3617_s23 + $0x140] ss:$8 sps:$4 sm:$0xff]   ;;  %v3244_v14 = vld [vmem:[%s3617_s23 + $0x6b0] ss:$8 sps:$4 sm:$0xff]  }
  0x30   : > { %2202 = vmatpush1.bf16.msra.mxu1 %v3123_v45  ;;  %v3202_v45 = vld [vmem:[%s3617_s23 + $0x640] ss:$8 sps:$4 sm:$0xff]  }
  0x31   : > { %2407 = vmatpush1.bf16.msra.mxu0 %v3124_v46  ;;  %2203 = vmatprep.subr.bf16.mxu1 %v3125_v47  ;;  %v3207_v46 = vld [vmem:[%s3617_s23 + $0x154] ss:$8 sps:$4 sm:$0xff]  }
  0x32   : > { %2408 = vmatprep.subr.bf16.mxu0 %v3127_v48  ;;  %v3210_v47 = vld [vmem:[%s3617_s23 + $0x654] ss:$8 sps:$4 sm:$0xff]   ;;  %v3205_v48 = vld [vmem:[%s3617_s23 + $0x150] ss:$8 sps:$4 sm:$0xff]  }
  0x34   : > { %2204 = vmatpush1.bf16.msra.mxu1 %v3129_v49  ;;  %v3208_v49 = vld [vmem:[%s3617_s23 + $0x650] ss:$8 sps:$4 sm:$0xff]  }
  0x35   : > { %2409 = vmatpush1.bf16.msra.mxu0 %v3130_v50  ;;  %2205 = vmatprep.subr.bf16.mxu1 %v3131_v51  ;;  %v3213_v50 = vld [vmem:[%s3617_s23 + $0x164] ss:$8 sps:$4 sm:$0xff]  }
  0x36   : > { %2410 = vmatprep.subr.bf16.mxu0 %v3133_v52  ;;  %v3216_v51 = vld [vmem:[%s3617_s23 + $0x664] ss:$8 sps:$4 sm:$0xff]   ;;  %v3211_v52 = vld [vmem:[%s3617_s23 + $0x160] ss:$8 sps:$4 sm:$0xff]  }
  0x38   : > { %2206 = vmatpush1.bf16.msra.mxu1 %v3135_v53  ;;  %v3214_v53 = vld [vmem:[%s3617_s23 + $0x660] ss:$8 sps:$4 sm:$0xff]  }
  0x39   : > { %2411 = vmatpush1.bf16.msra.mxu0 %v3136_v54  ;;  %2207 = vmatprep.subr.bf16.mxu1 %v3137_v55  ;;  %v3219_v54 = vld [vmem:[%s3617_s23 + $0x174] ss:$8 sps:$4 sm:$0xff]  }
  0x3a   : > { %2412 = vmatprep.subr.bf16.mxu0 %v3139_v56  ;;  %v3222_v55 = vld [vmem:[%s3617_s23 + $0x674] ss:$8 sps:$4 sm:$0xff]   ;;  %v3217_v56 = vld [vmem:[%s3617_s23 + $0x170] ss:$8 sps:$4 sm:$0xff]  }
  0x3c   : > { %2208 = vmatpush1.bf16.msra.mxu1 %v3141_v57  ;;  %v3220_v57 = vld [vmem:[%s3617_s23 + $0x670] ss:$8 sps:$4 sm:$0xff]  }
  0x3d   : > { %2413 = vmatpush1.bf16.msra.mxu0 %v3142_v58  ;;  %2209 = vmatprep.subr.bf16.mxu1 %v3143_v59  ;;  %v3225_v58 = vld [vmem:[%s3617_s23 + $0x184] ss:$8 sps:$4 sm:$0xff]  }
  0x3e   : > { %2414 = vmatprep.subr.bf16.mxu0 %v3145_v60  ;;  %v3228_v59 = vld [vmem:[%s3617_s23 + $0x684] ss:$8 sps:$4 sm:$0xff]   ;;  %v3223_v60 = vld [vmem:[%s3617_s23 + $0x180] ss:$8 sps:$4 sm:$0xff]  }
  0x40   : > { %2210 = vmatpush1.bf16.msra.mxu1 %v3147_v61  ;;  %v3226_v61 = vld [vmem:[%s3617_s23 + $0x680] ss:$8 sps:$4 sm:$0xff]  }
  0x41   : > { %2415 = vmatpush1.bf16.msra.mxu0 %v3148_v62  ;;  %2211 = vmatprep.subr.bf16.mxu1 %v3149_v63  ;;  %v3231_v62 = vld [vmem:[%s3617_s23 + $0x194] ss:$8 sps:$4 sm:$0xff]  }
  0x42   : > { %2416 = vmatprep.subr.bf16.mxu0 %v3151_v0  ;;  %v3234_v63 = vld [vmem:[%s3617_s23 + $0x694] ss:$8 sps:$4 sm:$0xff]   ;;  %v3229_v0 = vld [vmem:[%s3617_s23 + $0x190] ss:$8 sps:$4 sm:$0xff]  }
  0x44   : > { %2212 = vmatpush1.bf16.msra.mxu1 %v3153_v1  ;;  %v3232_v1 = vld [vmem:[%s3617_s23 + $0x690] ss:$8 sps:$4 sm:$0xff]  }
  0x45   : > { %2417 = vmatpush1.bf16.msra.mxu0 %v3154_v2  ;;  %2213 = vmatprep.subr.bf16.mxu1 %v3155_v3  ;;  %v3237_v2 = vld [vmem:[%s3617_s23 + $0x1a4] ss:$8 sps:$4 sm:$0xff]  }
  0x46   : > { %2418 = vmatprep.subr.bf16.mxu0 %v3157_v4  ;;  %v3240_v3 = vld [vmem:[%s3617_s23 + $0x6a4] ss:$8 sps:$4 sm:$0xff]   ;;  %v3235_v4 = vld [vmem:[%s3617_s23 + $0x1a0] ss:$8 sps:$4 sm:$0xff]  }
  0x48   : > { %2214 = vmatpush1.bf16.msra.mxu1 %v3159_v8  ;;  %v3238_v8 = vld [vmem:[%s3617_s23 + $0x6a0] ss:$8 sps:$4 sm:$0xff]  }
  0x49   : > { %2419 = vmatpush1.bf16.msra.mxu0 %v3160_v11  ;;  %2215 = vmatprep.subr.bf16.mxu1 %v3161_v12  ;;  %v3243_v11 = vld [vmem:[%s3617_s23 + $0x1b4] ss:$8 sps:$4 sm:$0xff]  }
  0x4a   : > { %2420 = vmatprep.subr.bf16.mxu0 %v3163_v13  ;;  %v3246_v12 = vld [vmem:[%s3617_s23 + $0x6b4] ss:$8 sps:$4 sm:$0xff]   ;;  %v3241_v13 = vld [vmem:[%s3617_s23 + $0x1b0] ss:$8 sps:$4 sm:$0xff]  }
  0x4c   : > { %2216 = vmatpush1.bf16.msra.mxu1 %v3165_v15  ;;  %v3249_v15 = vld [vmem:[%s3617_s23 + $0x1c4] ss:$8 sps:$4 sm:$0xff]  }
  0x4d   : > { %2421 = vmatpush1.bf16.msra.mxu0 %v3166_v16  ;;  %2217 = vmatprep.subr.bf16.mxu1 %v3167_v17  ;;  %v3252_v16 = vld [vmem:[%s3617_s23 + $0x6c4] ss:$8 sps:$4 sm:$0xff]   ;;  %v3247_v17 = vld [vmem:[%s3617_s23 + $0x1c0] ss:$8 sps:$4 sm:$0xff]  }
  0x4e   : > { %2422 = vmatprep.subr.bf16.mxu0 %v3169_v18  ;;  %v3250_v18 = vld [vmem:[%s3617_s23 + $0x6c0] ss:$8 sps:$4 sm:$0xff]  }
  0x50   : > { %2218 = vmatpush1.bf16.msra.mxu1 %v3171_v22  ;;  %v3255_v22 = vld [vmem:[%s3617_s23 + $0x1d4] ss:$8 sps:$4 sm:$0xff]  }
  0x51   : > { %2423 = vmatpush1.bf16.msra.mxu0 %v3172_v23  ;;  %2228 = vmatprep.subr.bf16.mxu1 %v3176_v24  ;;  %v3258_v23 = vld [vmem:[%s3617_s23 + $0x6d4] ss:$8 sps:$4 sm:$0xff]   ;;  %v3253_v24 = vld [vmem:[%s3617_s23 + $0x1d0] ss:$8 sps:$4 sm:$0xff]  }
  0x52   : > { %2433 = vmatprep.subr.bf16.mxu0 %v3180_v25  ;;  %v3256_v25 = vld [vmem:[%s3617_s23 + $0x6d0] ss:$8 sps:$4 sm:$0xff]  }
  0x53   : > { %2220 = vmatmul.mubr.bf16.vlgmr.msra.gmra.mrb[0].mxu1 %v3721_v29 }
  0x54   : > { %2425 = vmatmul.mubr.bf16.vlgmr.msra.gmra.mrb[0].mxu0 %v621_v10  ;;  %2229 = vmatpush1.bf16.msra.mxu1 %v3174_v27  ;;  %v3264_v27 = vld [vmem:[%s3617_s23 + $0x6e4] ss:$8 sps:$4 sm:$0xff]   ;;  %v3259_v10 = vld [vmem:[%s3617_s23 + $0x1e0] ss:$8 sps:$4 sm:$0xff]  }
  0x55   : > { %2434 = vmatpush1.bf16.msra.mxu0 %v3178_v28  ;;  %2230 = vmatprep.subr.bf16.mxu1 %v3183_v30  ;;  %v527_v28 = vcombine.high %v3605_v5, %v3605_v5  ;;  %v3262_v30 = vld [vmem:[%s3617_s23 + $0x6e0] ss:$8 sps:$4 sm:$0xff]   ;;  %v3273_v5 = vld [vmem:[%s3617_s23 + $0x204] ss:$8 sps:$4 sm:$0xff]  }
  0x56   : > { %2435 = vmatprep.subr.bf16.mxu0 %v3186_v31  ;;  %2260 = vmatprep.mubr.bf16.mxu1 %v574_v32  ;;  %v3267_v31 = vld [vmem:[%s3617_s23 + $0x1f4] ss:$8 sps:$4 sm:$0xff]  }
  0x57   : > { %2465 = vmatprep.mubr.bf16.mxu0 %v3730_v33  ;;  %v3270_v32 = vld [vmem:[%s3617_s23 + $0x6f4] ss:$8 sps:$4 sm:$0xff]  }
  0x58   : > { %2231 = vmatpush1.bf16.msra.mxu1 %v3181_v9  ;;  %v3793_v9 = vrot.slane %v527_v28, %v3612_v7  ;;  %v3340_v28 = vld [vmem:[%s3617_s23 + $0x7b0] ss:$8 sps:$4 sm:$0xff]  }
  0x59   : > { %2436 = vmatpush1.bf16.msra.mxu0 %v3184_v34  ;;  %2232 = vmatprep.subr.bf16.mxu1 %v3189_v35  ;;  %v3265_v34 = vld [vmem:[%s3617_s23 + $0x1f0] ss:$8 sps:$4 sm:$0xff]  }
  0x5a   : > { %2437 = vmatprep.subr.bf16.mxu0 %v3192_v36  ;;  %v3268_v35 = vld [vmem:[%s3617_s23 + $0x6f0] ss:$8 sps:$4 sm:$0xff]   ;;  %v3276_v36 = vld [vmem:[%s3617_s23 + $0x704] ss:$8 sps:$4 sm:$0xff]  }
  0x5c   : > { %2233 = vmatpush1.bf16.msra.mxu1 %v3187_v19  ;;  %v543_v19 = vcombine.high %v3793_v9, %v3793_v9 }
  0x5d   : > { %2438 = vmatpush1.bf16.msra.mxu0 %v3190_v37  ;;  %2234 = vmatprep.subr.bf16.mxu1 %v3195_v38  ;;  %v572_v37 = vcombine.high %v3721_v29, %v3721_v29  ;;  %v3271_v38 = vld [vmem:[%s3617_s23 + $0x200] ss:$8 sps:$4 sm:$0xff]   ;;  %v624_v29 = vcombine.high %v3730_v33, %v3730_v33 }
  0x5e   : > { %2439 = vmatprep.subr.bf16.mxu0 %v3198_v39  ;;  %v3274_v39 = vld [vmem:[%s3617_s23 + $0x700] ss:$8 sps:$4 sm:$0xff]  }
  0x5f   : > { %v3283_v33 = vld [vmem:[%s3617_s23 + $0x220] ss:$8 sps:$4 sm:$0xff]  }
  0x60   : > { %2235 = vmatpush1.bf16.msra.mxu1 %v3193_v40  ;;  %v3807_v40 = vrot.slane %v3705_v21, %v3612_v7  ;;  %v3277_v21 = vld [vmem:[%s3617_s23 + $0x210] ss:$8 sps:$4 sm:$0xff]  }
  0x61   : > { %2440 = vmatpush1.bf16.msra.mxu0 %v3196_v41  ;;  %2236 = vmatprep.subr.bf16.mxu1 %v3201_v42  ;;  %v3279_v41 = vld [vmem:[%s3617_s23 + $0x214] ss:$8 sps:$4 sm:$0xff]  }
  0x62   : > { %2441 = vmatprep.subr.bf16.mxu0 %v3204_v43  ;;  %v3282_v42 = vld [vmem:[%s3617_s23 + $0x714] ss:$8 sps:$4 sm:$0xff]   ;;  %v3812_v43 = vrot.slane %v543_v19, %v3612_v7  ;;  %v3357_v19 = vld [vmem:[%s3617_s23 + $0x2e4] ss:$8 sps:$4 sm:$0xff]  }
  0x64   : > { %2237 = vmatpush1.bf16.msra.mxu1 %v3199_v44  ;;  %v3280_v44 = vld [vmem:[%s3617_s23 + $0x710] ss:$8 sps:$4 sm:$0xff]  }
  0x65   : > { %2442 = vmatpush1.bf16.msra.mxu0 %v3202_v45  ;;  %2238 = vmatprep.subr.bf16.mxu1 %v3207_v46  ;;  %v3285_v45 = vld [vmem:[%s3617_s23 + $0x224] ss:$8 sps:$4 sm:$0xff]  }
  0x66   : > { %2443 = vmatprep.subr.bf16.mxu0 %v3210_v47  ;;  %v3288_v46 = vld [vmem:[%s3617_s23 + $0x724] ss:$8 sps:$4 sm:$0xff]   ;;  %v3286_v47 = vld [vmem:[%s3617_s23 + $0x720] ss:$8 sps:$4 sm:$0xff]  }
  0x68   : > { %2239 = vmatpush1.bf16.msra.mxu1 %v3205_v48  ;;  %v3291_v48 = vld [vmem:[%s3617_s23 + $0x234] ss:$8 sps:$4 sm:$0xff]  }
  0x69   : > { %2444 = vmatpush1.bf16.msra.mxu0 %v3208_v49  ;;  %2240 = vmatprep.subr.bf16.mxu1 %v3213_v50  ;;  %v3294_v49 = vld [vmem:[%s3617_s23 + $0x734] ss:$8 sps:$4 sm:$0xff]   ;;  %v3289_v50 = vld [vmem:[%s3617_s23 + $0x230] ss:$8 sps:$4 sm:$0xff]  }
  0x6a   : > { %2445 = vmatprep.subr.bf16.mxu0 %v3216_v51  ;;  %v3292_v51 = vld [vmem:[%s3617_s23 + $0x730] ss:$8 sps:$4 sm:$0xff]  }
  0x6c   : > { %2241 = vmatpush1.bf16.msra.mxu1 %v3211_v52  ;;  %v3297_v52 = vld [vmem:[%s3617_s23 + $0x244] ss:$8 sps:$4 sm:$0xff]  }
  0x6d   : > { %2446 = vmatpush1.bf16.msra.mxu0 %v3214_v53  ;;  %2242 = vmatprep.subr.bf16.mxu1 %v3219_v54  ;;  %v3300_v53 = vld [vmem:[%s3617_s23 + $0x744] ss:$8 sps:$4 sm:$0xff]   ;;  %v3295_v54 = vld [vmem:[%s3617_s23 + $0x240] ss:$8 sps:$4 sm:$0xff]  }
  0x6e   : > { %2447 = vmatprep.subr.bf16.mxu0 %v3222_v55  ;;  %v3298_v55 = vld [vmem:[%s3617_s23 + $0x740] ss:$8 sps:$4 sm:$0xff]  }
  0x70   : > { %2243 = vmatpush1.bf16.msra.mxu1 %v3217_v56  ;;  %v3303_v56 = vld [vmem:[%s3617_s23 + $0x254] ss:$8 sps:$4 sm:$0xff]  }
  0x71   : > { %2448 = vmatpush1.bf16.msra.mxu0 %v3220_v57  ;;  %2244 = vmatprep.subr.bf16.mxu1 %v3225_v58  ;;  %v3306_v57 = vld [vmem:[%s3617_s23 + $0x754] ss:$8 sps:$4 sm:$0xff]   ;;  %v3301_v58 = vld [vmem:[%s3617_s23 + $0x250] ss:$8 sps:$4 sm:$0xff]  }
  0x72   : > { %2449 = vmatprep.subr.bf16.mxu0 %v3228_v59  ;;  %v3304_v59 = vld [vmem:[%s3617_s23 + $0x750] ss:$8 sps:$4 sm:$0xff]  }
  0x74   : > { %2245 = vmatpush1.bf16.msra.mxu1 %v3223_v60  ;;  %v3309_v60 = vld [vmem:[%s3617_s23 + $0x264] ss:$8 sps:$4 sm:$0xff]  }
  0x75   : > { %2450 = vmatpush1.bf16.msra.mxu0 %v3226_v61  ;;  %2246 = vmatprep.subr.bf16.mxu1 %v3231_v62  ;;  %v3312_v61 = vld [vmem:[%s3617_s23 + $0x764] ss:$8 sps:$4 sm:$0xff]   ;;  %v3307_v62 = vld [vmem:[%s3617_s23 + $0x260] ss:$8 sps:$4 sm:$0xff]  }
  0x76   : > { %2451 = vmatprep.subr.bf16.mxu0 %v3234_v63  ;;  %v3310_v63 = vld [vmem:[%s3617_s23 + $0x760] ss:$8 sps:$4 sm:$0xff]  }
  0x78   : > { %2247 = vmatpush1.bf16.msra.mxu1 %v3229_v0  ;;  %v3315_v0 = vld [vmem:[%s3617_s23 + $0x274] ss:$8 sps:$4 sm:$0xff]  }
  0x79   : > { %2452 = vmatpush1.bf16.msra.mxu0 %v3232_v1  ;;  %2248 = vmatprep.subr.bf16.mxu1 %v3237_v2  ;;  %v3318_v1 = vld [vmem:[%s3617_s23 + $0x774] ss:$8 sps:$4 sm:$0xff]   ;;  %v3313_v2 = vld [vmem:[%s3617_s23 + $0x270] ss:$8 sps:$4 sm:$0xff]  }
  0x7a   : > { %2453 = vmatprep.subr.bf16.mxu0 %v3240_v3  ;;  %v3316_v3 = vld [vmem:[%s3617_s23 + $0x770] ss:$8 sps:$4 sm:$0xff]  }
  0x7c   : > { %2249 = vmatpush1.bf16.msra.mxu1 %v3235_v4  ;;  %v3321_v4 = vld [vmem:[%s3617_s23 + $0x284] ss:$8 sps:$4 sm:$0xff]  }
  0x7d   : > { %2454 = vmatpush1.bf16.msra.mxu0 %v3238_v8  ;;  %2250 = vmatprep.subr.bf16.mxu1 %v3243_v11  ;;  %v3324_v8 = vld [vmem:[%s3617_s23 + $0x784] ss:$8 sps:$4 sm:$0xff]   ;;  %v3319_v11 = vld [vmem:[%s3617_s23 + $0x280] ss:$8 sps:$4 sm:$0xff]  }
  0x7e   : > { %2455 = vmatprep.subr.bf16.mxu0 %v3246_v12  ;;  %v3322_v12 = vld [vmem:[%s3617_s23 + $0x780] ss:$8 sps:$4 sm:$0xff]  }
  0x80   : > { %2251 = vmatpush1.bf16.msra.mxu1 %v3241_v13  ;;  %v3327_v13 = vld [vmem:[%s3617_s23 + $0x294] ss:$8 sps:$4 sm:$0xff]  }
  0x81   : > { %2456 = vmatpush1.bf16.msra.mxu0 %v3244_v14  ;;  %2252 = vmatprep.subr.bf16.mxu1 %v3249_v15  ;;  %v3330_v14 = vld [vmem:[%s3617_s23 + $0x794] ss:$8 sps:$4 sm:$0xff]   ;;  %v3560_v15 = vmov 0  }
  0x82   : > { %2457 = vmatprep.subr.bf16.mxu0 %v3252_v16  ;;  %3076 = vset.pattern.permute.xlu0 %v3560_v15  ;;  %v3325_v16 = vld [vmem:[%s3617_s23 + $0x290] ss:$8 sps:$4 sm:$0xff]  }
  0x84   : > { %2253 = vmatpush1.bf16.msra.mxu1 %v3247_v17  ;;  %v3328_v17 = vld [vmem:[%s3617_s23 + $0x790] ss:$8 sps:$4 sm:$0xff]  }
  0x85   : > { %2458 = vmatpush1.bf16.msra.mxu0 %v3250_v18  ;;  %2254 = vmatprep.subr.bf16.mxu1 %v3255_v22  ;;  %v3333_v18 = vld [vmem:[%s3617_s23 + $0x2a4] ss:$8 sps:$4 sm:$0xff]  }
  0x86   : > { %2459 = vmatprep.subr.bf16.mxu0 %v3258_v23  ;;  %v3336_v22 = vld [vmem:[%s3617_s23 + $0x7a4] ss:$8 sps:$4 sm:$0xff]   ;;  %v3331_v23 = vld [vmem:[%s3617_s23 + $0x2a0] ss:$8 sps:$4 sm:$0xff]  }
  0x88   : > { %2255 = vmatpush1.bf16.msra.mxu1 %v3253_v24  ;;  %v3334_v24 = vld [vmem:[%s3617_s23 + $0x7a0] ss:$8 sps:$4 sm:$0xff]  }
  0x89   : > { %2460 = vmatpush1.bf16.msra.mxu0 %v3256_v25  ;;  %2256 = vmatprep.subr.bf16.mxu1 %v3261_v26  ;;  %v3339_v25 = vld [vmem:[%s3617_s23 + $0x2b4] ss:$8 sps:$4 sm:$0xff]  }
  0x8a   : > { %2461 = vmatprep.subr.bf16.mxu0 %v3264_v27  ;;  %v3342_v26 = vld [vmem:[%s3617_s23 + $0x7b4] ss:$8 sps:$4 sm:$0xff]   ;;  %v3337_v27 = vld [vmem:[%s3617_s23 + $0x2b0] ss:$8 sps:$4 sm:$0xff]  }
  0x8c   : > { %2257 = vmatpush1.bf16.msra.mxu1 %v3259_v10  ;;  %v3345_v10 = vld [vmem:[%s3617_s23 + $0x2c4] ss:$8 sps:$4 sm:$0xff]  }
  0x8d   : > { %2462 = vmatpush1.bf16.msra.mxu0 %v3262_v30  ;;  %2258 = vmatprep.subr.bf16.mxu1 %v3267_v31  ;;  %v3348_v30 = vld [vmem:[%s3617_s23 + $0x7c4] ss:$8 sps:$4 sm:$0xff]   ;;  %v3343_v31 = vld [vmem:[%s3617_s23 + $0x2c0] ss:$8 sps:$4 sm:$0xff]  }
  0x8e   : > { %2463 = vmatprep.subr.bf16.mxu0 %v3270_v32  ;;  %v3346_v32 = vld [vmem:[%s3617_s23 + $0x7c0] ss:$8 sps:$4 sm:$0xff]  }
  0x90   : > { %2259 = vmatpush1.bf16.msra.mxu1 %v3265_v34  ;;  %v3351_v34 = vld [vmem:[%s3617_s23 + $0x2d4] ss:$8 sps:$4 sm:$0xff]  }
  0x91   : > { %2464 = vmatpush1.bf16.msra.mxu0 %v3268_v35  ;;  %2269 = vmatprep.subr.bf16.mxu1 %v3273_v5  ;;  %v3354_v35 = vld [vmem:[%s3617_s23 + $0x7d4] ss:$8 sps:$4 sm:$0xff]   ;;  %v3349_v5 = vld [vmem:[%s3617_s23 + $0x2d0] ss:$8 sps:$4 sm:$0xff]  }
  0x92   : > { %2474 = vmatprep.subr.bf16.mxu0 %v3276_v36  ;;  %v3352_v36 = vld [vmem:[%s3617_s23 + $0x7d0] ss:$8 sps:$4 sm:$0xff]  }
  0x93   : > { %2261 = vmatmul.mubr.bf16.vlgmr.msra.gmra.mrb[0].mxu1 %v572_v37  ;;  %v3360_v37 = vld [vmem:[%s3617_s23 + $0x7e4] ss:$8 sps:$4 sm:$0xff]  }
  0x94   : > { %2466 = vmatmul.mubr.bf16.vlgmr.msra.gmra.mrb[0].mxu0 %v3807_v40  ;;  %2270 = vmatpush1.bf16.msra.mxu1 %v3271_v38  ;;  %v3355_v38 = vld [vmem:[%s3617_s23 + $0x2e0] ss:$8 sps:$4 sm:$0xff]  }
  0x95   : > { %2475 = vmatpush1.bf16.msra.mxu0 %v3274_v39  ;;  %2271 = vmatprep.subr.bf16.mxu1 %v3279_v41  ;;  %v3358_v39 = vld [vmem:[%s3617_s23 + $0x7e0] ss:$8 sps:$4 sm:$0xff]   ;;  %v3363_v41 = vld [vmem:[%s3617_s23 + $0x2f4] ss:$8 sps:$4 sm:$0xff]  }
  0x96   : > { %2476 = vmatprep.subr.bf16.mxu0 %v3282_v42  ;;  %2301 = vmatprep.mubr.bf16.mxu1 %v3812_v43  ;;  %v3366_v42 = vld [vmem:[%s3617_s23 + $0x7f4] ss:$8 sps:$4 sm:$0xff]  }
  0x97   : > { %2506 = vmatprep.mubr.bf16.mxu0 %v624_v29  ;;  %v3361_v29 = vld [vmem:[%s3617_s23 + $0x2f0] ss:$8 sps:$4 sm:$0xff]  }
  0x98   : > { %2272 = vmatpush1.bf16.msra.mxu1 %v3277_v21  ;;  %v3879_v21 = vld.sshfl [vmem:[%s4034_s0 + $0x10] sm:$0x13 pattern:$0x75316420] }
  0x99   : > { %2477 = vmatpush1.bf16.msra.mxu0 %v3280_v44  ;;  %2273 = vmatprep.subr.bf16.mxu1 %v3285_v45  ;;  %v3364_v44 = vld [vmem:[%s3617_s23 + $0x7f0] ss:$8 sps:$4 sm:$0xff]   ;;  %v3369_v45 = vld [vmem:[%s3617_s23 + $0x304] ss:$8 sps:$4 sm:$0xff]  }
  0x9a   : > { %2478 = vmatprep.subr.bf16.mxu0 %v3288_v46  ;;  %v3372_v46 = vld [vmem:[%s3617_s23 + $0x804] ss:$8 sps:$4 sm:$0xff]  }
  0x9c   : > { %2274 = vmatpush1.bf16.msra.mxu1 %v3283_v33  ;;  %v632_v33 = vcombine.high %v3879_v21, %v3879_v21 }
  0x9d   : > { %2479 = vmatpush1.bf16.msra.mxu0 %v3286_v47  ;;  %2275 = vmatprep.subr.bf16.mxu1 %v3291_v48  ;;  %v3367_v47 = vld [vmem:[%s3617_s23 + $0x300] ss:$8 sps:$4 sm:$0xff]   ;;  %v3889_v48 = vrot.slane %v3793_v9, %v3612_v7 }
  0x9e   : > { %2480 = vmatprep.subr.bf16.mxu0 %v3294_v49  ;;  %v622_v49 = vcombine.high %v3807_v40, %v3807_v40  ;;  %v646_v9 = vrot.slane %v632_v33, %v3612_v7  ;;  %v3373_v40 = vld [vmem:[%s3617_s23 + $0x310] ss:$8 sps:$4 sm:$0xff]  }
  0x9f   : > { %v3448_v33 = vld [vmem:[%s3617_s23 + $0x8d0] ss:$8 sps:$4 sm:$0xff]  }
  0xa0   : > { %2276 = vmatpush1.bf16.msra.mxu1 %v3289_v50  ;;  %v3370_v50 = vld [vmem:[%s3617_s23 + $0x800] ss:$8 sps:$4 sm:$0xff]  }
  0xa1   : > { %2481 = vmatpush1.bf16.msra.mxu0 %v3292_v51  ;;  %2277 = vmatprep.subr.bf16.mxu1 %v3297_v52  ;;  %v3375_v51 = vld [vmem:[%s3617_s23 + $0x314] ss:$8 sps:$4 sm:$0xff]  }
  0xa2   : > { %2482 = vmatprep.subr.bf16.mxu0 %v3300_v53  ;;  %v3378_v52 = vld [vmem:[%s3617_s23 + $0x814] ss:$8 sps:$4 sm:$0xff]   ;;  %v575_v53 = vcombine.high %v3812_v43, %v3812_v43  ;;  %v3379_v43 = vld [vmem:[%s3617_s23 + $0x320] ss:$8 sps:$4 sm:$0xff]  }
  0xa4   : > { %2278 = vmatpush1.bf16.msra.mxu1 %v3295_v54  ;;  %v3376_v54 = vld [vmem:[%s3617_s23 + $0x810] ss:$8 sps:$4 sm:$0xff]  }
  0xa5   : > { %2483 = vmatpush1.bf16.msra.mxu0 %v3298_v55  ;;  %2279 = vmatprep.subr.bf16.mxu1 %v3303_v56  ;;  %v3381_v55 = vld [vmem:[%s3617_s23 + $0x324] ss:$8 sps:$4 sm:$0xff]  }
  0xa6   : > { %2484 = vmatprep.subr.bf16.mxu0 %v3306_v57  ;;  %v3384_v56 = vld [vmem:[%s3617_s23 + $0x824] ss:$8 sps:$4 sm:$0xff]   ;;  %v3382_v57 = vld [vmem:[%s3617_s23 + $0x820] ss:$8 sps:$4 sm:$0xff]  }
  0xa8   : > { %2280 = vmatpush1.bf16.msra.mxu1 %v3301_v58  ;;  %v3387_v58 = vld [vmem:[%s3617_s23 + $0x334] ss:$8 sps:$4 sm:$0xff]  }
  0xa9   : > { %2485 = vmatpush1.bf16.msra.mxu0 %v3304_v59  ;;  %2281 = vmatprep.subr.bf16.mxu1 %v3309_v60  ;;  %v3390_v59 = vld [vmem:[%s3617_s23 + $0x834] ss:$8 sps:$4 sm:$0xff]   ;;  %v518_v60 = vld [vmem:[%s4035_s1] sm:$0x3] }
  0xaa   : > { %2486 = vmatprep.subr.bf16.mxu0 %v3312_v61  ;;  %v3385_v61 = vld [vmem:[%s3617_s23 + $0x330] ss:$8 sps:$4 sm:$0xff]   ;;  %521 = vperm.xlu0 %3076, %v518_v60   ;;  %v3474_v60 = vld [vmem:[%s3617_s23 + $0x914] ss:$8 sps:$4 sm:$0xff]  }
  0xac   : > { %2282 = vmatpush1.bf16.msra.mxu1 %v3307_v62  ;;  %v3388_v62 = vld [vmem:[%s3617_s23 + $0x830] ss:$8 sps:$4 sm:$0xff]  }
  0xad   : > { %2487 = vmatpush1.bf16.msra.mxu0 %v3310_v63  ;;  %2283 = vmatprep.subr.bf16.mxu1 %v3315_v0  ;;  %v3393_v63 = vld [vmem:[%s3617_s23 + $0x344] ss:$8 sps:$4 sm:$0xff]  }
  0xae   : > { %2488 = vmatprep.subr.bf16.mxu0 %v3318_v1  ;;  %v3396_v0 = vld [vmem:[%s3617_s23 + $0x844] ss:$8 sps:$4 sm:$0xff]   ;;  %v3391_v1 = vld [vmem:[%s3617_s23 + $0x340] ss:$8 sps:$4 sm:$0xff]  }
  0xb0   : > { %2284 = vmatpush1.bf16.msra.mxu1 %v3313_v2  ;;  %v3394_v2 = vld [vmem:[%s3617_s23 + $0x840] ss:$8 sps:$4 sm:$0xff]  }
  0xb1   : > { %2489 = vmatpush1.bf16.msra.mxu0 %v3316_v3  ;;  %2285 = vmatprep.subr.bf16.mxu1 %v3321_v4  ;;  %v3399_v3 = vld [vmem:[%s3617_s23 + $0x354] ss:$8 sps:$4 sm:$0xff]  }
  0xb2   : > { %2490 = vmatprep.subr.bf16.mxu0 %v3324_v8  ;;  %v3402_v4 = vld [vmem:[%s3617_s23 + $0x854] ss:$8 sps:$4 sm:$0xff]   ;;  %v3397_v8 = vld [vmem:[%s3617_s23 + $0x350] ss:$8 sps:$4 sm:$0xff]  }
  0xb4   : > { %2286 = vmatpush1.bf16.msra.mxu1 %v3319_v11  ;;  %v3400_v11 = vld [vmem:[%s3617_s23 + $0x850] ss:$8 sps:$4 sm:$0xff]  }
  0xb5   : > { %2491 = vmatpush1.bf16.msra.mxu0 %v3322_v12  ;;  %2287 = vmatprep.subr.bf16.mxu1 %v3327_v13  ;;  %v3405_v12 = vld [vmem:[%s3617_s23 + $0x364] ss:$8 sps:$4 sm:$0xff]  }
  0xb6   : > { %2492 = vmatprep.subr.bf16.mxu0 %v3330_v14  ;;  %v3408_v13 = vld [vmem:[%s3617_s23 + $0x864] ss:$8 sps:$4 sm:$0xff]   ;;  %v3403_v14 = vld [vmem:[%s3617_s23 + $0x360] ss:$8 sps:$4 sm:$0xff]  }
  0xb8   : > { %2288 = vmatpush1.bf16.msra.mxu1 %v3325_v16  ;;  %v3406_v16 = vld [vmem:[%s3617_s23 + $0x860] ss:$8 sps:$4 sm:$0xff]  }
  0xb9   : > { %2493 = vmatpush1.bf16.msra.mxu0 %v3328_v17  ;;  %2289 = vmatprep.subr.bf16.mxu1 %v3333_v18  ;;  %v3411_v17 = vld [vmem:[%s3617_s23 + $0x374] ss:$8 sps:$4 sm:$0xff]  }
  0xba   : > { %2494 = vmatprep.subr.bf16.mxu0 %v3336_v22  ;;  %v3414_v18 = vld [vmem:[%s3617_s23 + $0x874] ss:$8 sps:$4 sm:$0xff]   ;;  %v3409_v22 = vld [vmem:[%s3617_s23 + $0x370] ss:$8 sps:$4 sm:$0xff]  }
  0xbc   : > { %2290 = vmatpush1.bf16.msra.mxu1 %v3331_v23  ;;  %v3412_v23 = vld [vmem:[%s3617_s23 + $0x870] ss:$8 sps:$4 sm:$0xff]  }
  0xbd   : > { %2495 = vmatpush1.bf16.msra.mxu0 %v3334_v24  ;;  %2291 = vmatprep.subr.bf16.mxu1 %v3339_v25  ;;  %v3417_v24 = vld [vmem:[%s3617_s23 + $0x384] ss:$8 sps:$4 sm:$0xff]  }
  0xbe   : > { %2496 = vmatprep.subr.bf16.mxu0 %v3342_v26  ;;  %v3420_v25 = vld [vmem:[%s3617_s23 + $0x884] ss:$8 sps:$4 sm:$0xff]   ;;  %v3415_v26 = vld [vmem:[%s3617_s23 + $0x380] ss:$8 sps:$4 sm:$0xff]  }
  0xc0   : > { %2292 = vmatpush1.bf16.msra.mxu1 %v3337_v27  ;;  %v3418_v27 = vld [vmem:[%s3617_s23 + $0x880] ss:$8 sps:$4 sm:$0xff]  }
  0xc1   : > { %2497 = vmatpush1.bf16.msra.mxu0 %v3340_v28  ;;  %2293 = vmatprep.subr.bf16.mxu1 %v3345_v10  ;;  %v3423_v28 = vld [vmem:[%s3617_s23 + $0x394] ss:$8 sps:$4 sm:$0xff]  }
  0xc2   : > { %2498 = vmatprep.subr.bf16.mxu0 %v3348_v30  ;;  %v3426_v10 = vld [vmem:[%s3617_s23 + $0x894] ss:$8 sps:$4 sm:$0xff]   ;;  %v3421_v30 = vld [vmem:[%s3617_s23 + $0x390] ss:$8 sps:$4 sm:$0xff]  }
  0xc4   : > { %2294 = vmatpush1.bf16.msra.mxu1 %v3343_v31  ;;  %v3424_v31 = vld [vmem:[%s3617_s23 + $0x890] ss:$8 sps:$4 sm:$0xff]  }
  0xc5   : > { %2499 = vmatpush1.bf16.msra.mxu0 %v3346_v32  ;;  %2295 = vmatprep.subr.bf16.mxu1 %v3351_v34  ;;  %v3429_v32 = vld [vmem:[%s3617_s23 + $0x3a4] ss:$8 sps:$4 sm:$0xff]  }
  0xc6   : > { %2500 = vmatprep.subr.bf16.mxu0 %v3354_v35  ;;  %v3432_v34 = vld [vmem:[%s3617_s23 + $0x8a4] ss:$8 sps:$4 sm:$0xff]   ;;  %v3427_v35 = vld [vmem:[%s3617_s23 + $0x3a0] ss:$8 sps:$4 sm:$0xff]  }
  0xc8   : > { %2296 = vmatpush1.bf16.msra.mxu1 %v3349_v5  ;;  %v3430_v5 = vld [vmem:[%s3617_s23 + $0x8a0] ss:$8 sps:$4 sm:$0xff]  }
  0xc9   : > { %2501 = vmatpush1.bf16.msra.mxu0 %v3352_v36  ;;  %2297 = vmatprep.subr.bf16.mxu1 %v3357_v19  ;;  %v3435_v36 = vld [vmem:[%s3617_s23 + $0x3b4] ss:$8 sps:$4 sm:$0xff]  }
  0xca   : > { %2502 = vmatprep.subr.bf16.mxu0 %v3360_v37  ;;  %v3438_v19 = vld [vmem:[%s3617_s23 + $0x8b4] ss:$8 sps:$4 sm:$0xff]   ;;  %v3433_v37 = vld [vmem:[%s3617_s23 + $0x3b0] ss:$8 sps:$4 sm:$0xff]  }
  0xcc   : > { %2298 = vmatpush1.bf16.msra.mxu1 %v3355_v38  ;;  %v3436_v38 = vld [vmem:[%s3617_s23 + $0x8b0] ss:$8 sps:$4 sm:$0xff]  }
  0xcd   : > { %2503 = vmatpush1.bf16.msra.mxu0 %v3358_v39  ;;  %2299 = vmatprep.subr.bf16.mxu1 %v3363_v41  ;;  %v3441_v39 = vld [vmem:[%s3617_s23 + $0x3c4] ss:$8 sps:$4 sm:$0xff]  }
  0xce   : > { %2504 = vmatprep.subr.bf16.mxu0 %v3366_v42  ;;  %v3444_v41 = vld [vmem:[%s3617_s23 + $0x8c4] ss:$8 sps:$4 sm:$0xff]   ;;  %v3439_v42 = vld [vmem:[%s3617_s23 + $0x3c0] ss:$8 sps:$4 sm:$0xff]  }
  0xd0   : > { %2300 = vmatpush1.bf16.msra.mxu1 %v3361_v29  ;;  %v3442_v29 = vld [vmem:[%s3617_s23 + $0x8c0] ss:$8 sps:$4 sm:$0xff]  }
  0xd1   : > { %2505 = vmatpush1.bf16.msra.mxu0 %v3364_v44  ;;  %2310 = vmatprep.subr.bf16.mxu1 %v3369_v45  ;;  %v3447_v44 = vld [vmem:[%s3617_s23 + $0x3d4] ss:$8 sps:$4 sm:$0xff]  }
  0xd2   : > { %2515 = vmatprep.subr.bf16.mxu0 %v3372_v46  ;;  %v3450_v45 = vld [vmem:[%s3617_s23 + $0x8d4] ss:$8 sps:$4 sm:$0xff]   ;;  %v3445_v46 = vld [vmem:[%s3617_s23 + $0x3d0] ss:$8 sps:$4 sm:$0xff]  }
  0xd3   : > { %2302 = vmatmul.mubr.bf16.vlgmr.msra.gmra.mrb[0].mxu1 %v3889_v48 }
  0xd4   : > { %2507 = vmatmul.mubr.bf16.vlgmr.msra.gmra.mrb[0].mxu0 %v622_v49  ;;  %2311 = vmatpush1.bf16.msra.mxu1 %v3367_v47  ;;  %v3453_v47 = vld [vmem:[%s3617_s23 + $0x3e4] ss:$8 sps:$4 sm:$0xff]  }
  0xd5   : > { %2516 = vmatpush1.bf16.msra.mxu0 %v3370_v50  ;;  %2312 = vmatprep.subr.bf16.mxu1 %v3375_v51  ;;  %v3456_v49 = vld [vmem:[%s3617_s23 + $0x8e4] ss:$8 sps:$4 sm:$0xff]   ;;  %v3451_v50 = vld [vmem:[%s3617_s23 + $0x3e0] ss:$8 sps:$4 sm:$0xff]  }
  0xd6   : > { %2517 = vmatprep.subr.bf16.mxu0 %v3378_v52  ;;  %2342 = vmatprep.mubr.bf16.mxu1 %v575_v53  ;;  %v3454_v51 = vld [vmem:[%s3617_s23 + $0x8e0] ss:$8 sps:$4 sm:$0xff]   ;;  %v3459_v52 = vld [vmem:[%s3617_s23 + $0x3f4] ss:$8 sps:$4 sm:$0xff]  }
  0xd7   : > { %2547 = vmatprep.mubr.bf16.mxu0 %v646_v9  ;;  %v3462_v53 = vld [vmem:[%s3617_s23 + $0x8f4] ss:$8 sps:$4 sm:$0xff]   ;;  %v3457_v9 = vld [vmem:[%s3617_s23 + $0x3f0] ss:$8 sps:$4 sm:$0xff]  }
  0xd8   : > { %2313 = vmatpush1.bf16.msra.mxu1 %v3373_v40  ;;  %v3460_v40 = vld [vmem:[%s3617_s23 + $0x8f0] ss:$8 sps:$4 sm:$0xff]  }
  0xd9   : > { %2518 = vmatpush1.bf16.msra.mxu0 %v3376_v54  ;;  %2314 = vmatprep.subr.bf16.mxu1 %v3381_v55  ;;  %v3465_v54 = vld [vmem:[%s3617_s23 + $0x404] ss:$8 sps:$4 sm:$0xff]  }
  0xda   : > { %2519 = vmatprep.subr.bf16.mxu0 %v3384_v56  ;;  %v3468_v55 = vld [vmem:[%s3617_s23 + $0x904] ss:$8 sps:$4 sm:$0xff]   ;;  %v573_v56 = vcombine.high %v3889_v48, %v3889_v48 }
  0xdb   : > { %v3477_v48 = vld [vmem:[%s3617_s23 + $0x424] ss:$8 sps:$4 sm:$0xff]  }
  0xdc   : > { %2315 = vmatpush1.bf16.msra.mxu1 %v3379_v43  ;;  %v3967_v43 = vrot.slane %v3879_v21, %v3612_v7  ;;  %v3469_v7 = vld [vmem:[%s3617_s23 + $0x410] ss:$8 sps:$4 sm:$0xff]  }
  0xdd   : > { %2520 = vmatpush1.bf16.msra.mxu0 %v3382_v57  ;;  %2316 = vmatprep.subr.bf16.mxu1 %v3387_v58  ;;  %v3463_v57 = vld [vmem:[%s3617_s23 + $0x400] ss:$8 sps:$4 sm:$0xff]   ;;  %v3472_v21 = vld [vmem:[%s3617_s23 + $0x910] ss:$8 sps:$4 sm:$0xff]  }
  0xde   : > { %2521 = vmatprep.subr.bf16.mxu0 %v3390_v59  ;;  %v3466_v58 = vld [vmem:[%s3617_s23 + $0x900] ss:$8 sps:$4 sm:$0xff]   ;;  %v3471_v59 = vld [vmem:[%s3617_s23 + $0x414] ss:$8 sps:$4 sm:$0xff]  }
  0xe0   : > { %2317 = vmatpush1.bf16.msra.mxu1 %v3385_v61  ;;  %v3480_v61 = vld [vmem:[%s3617_s23 + $0x924] ss:$8 sps:$4 sm:$0xff]  }
  0xe1   : > { %2522 = vmatpush1.bf16.msra.mxu0 %v3388_v62  ;;  %2318 = vmatprep.subr.bf16.mxu1 %v3393_v63  ;;  %v3475_v62 = vld [vmem:[%s3617_s23 + $0x420] ss:$8 sps:$4 sm:$0xff]  }
  0xe2   : > { %2523 = vmatprep.subr.bf16.mxu0 %v3396_v0  ;;  %v3478_v63 = vld [vmem:[%s3617_s23 + $0x920] ss:$8 sps:$4 sm:$0xff]   ;;  %v3483_v0 = vld [vmem:[%s3617_s23 + $0x434] ss:$8 sps:$4 sm:$0xff]  }
  0xe4   : > { %2319 = vmatpush1.bf16.msra.mxu1 %v3391_v1  ;;  %v3486_v1 = vld [vmem:[%s3617_s23 + $0x934] ss:$8 sps:$4 sm:$0xff]  }
  0xe5   : > { %2524 = vmatpush1.bf16.msra.mxu0 %v3394_v2  ;;  %2320 = vmatprep.subr.bf16.mxu1 %v3399_v3  ;;  %v3481_v2 = vld [vmem:[%s3617_s23 + $0x430] ss:$8 sps:$4 sm:$0xff]   ;;  %v3492_v3 = vld [vmem:[%s3617_s23 + $0x944] ss:$8 sps:$4 sm:$0xff]  }
  0xe6   : > { %2525 = vmatprep.subr.bf16.mxu0 %v3402_v4  ;;  %v3487_v4 = vld [vmem:[%s3617_s23 + $0x440] ss:$8 sps:$4 sm:$0xff]  }
  0xe8   : > { %2321 = vmatpush1.bf16.msra.mxu1 %v3397_v8  ;;  %v3490_v8 = vld [vmem:[%s3617_s23 + $0x940] ss:$8 sps:$4 sm:$0xff]  }
  0xe9   : > { %2526 = vmatpush1.bf16.msra.mxu0 %v3400_v11  ;;  %2322 = vmatprep.subr.bf16.mxu1 %v3405_v12  ;;  %v3495_v11 = vld [vmem:[%s3617_s23 + $0x454] ss:$8 sps:$4 sm:$0xff]  }
  0xea   : > { %2527 = vmatprep.subr.bf16.mxu0 %v3408_v13  ;;  %v3498_v12 = vld [vmem:[%s3617_s23 + $0x954] ss:$8 sps:$4 sm:$0xff]   ;;  %v3493_v13 = vld [vmem:[%s3617_s23 + $0x450] ss:$8 sps:$4 sm:$0xff]  }
  0xec   : > { %2323 = vmatpush1.bf16.msra.mxu1 %v3403_v14  ;;  %v3496_v14 = vld [vmem:[%s3617_s23 + $0x950] ss:$8 sps:$4 sm:$0xff]  }
  0xed   : > { %2528 = vmatpush1.bf16.msra.mxu0 %v3406_v16  ;;  %2324 = vmatprep.subr.bf16.mxu1 %v3411_v17  ;;  %v3501_v16 = vld [vmem:[%s3617_s23 + $0x464] ss:$8 sps:$4 sm:$0xff]  }
  0xee   : > { %2529 = vmatprep.subr.bf16.mxu0 %v3414_v18  ;;  %v3504_v17 = vld [vmem:[%s3617_s23 + $0x964] ss:$8 sps:$4 sm:$0xff]   ;;  %v3499_v18 = vld [vmem:[%s3617_s23 + $0x460] ss:$8 sps:$4 sm:$0xff]  }
  0xf0   : > { %2325 = vmatpush1.bf16.msra.mxu1 %v3409_v22  ;;  %v3502_v22 = vld [vmem:[%s3617_s23 + $0x960] ss:$8 sps:$4 sm:$0xff]  }
  0xf1   : > { %2530 = vmatpush1.bf16.msra.mxu0 %v3412_v23  ;;  %2326 = vmatprep.subr.bf16.mxu1 %v3417_v24  ;;  %v3507_v23 = vld [vmem:[%s3617_s23 + $0x474] ss:$8 sps:$4 sm:$0xff]  }
  0xf2   : > { %2531 = vmatprep.subr.bf16.mxu0 %v3420_v25  ;;  %v3510_v24 = vld [vmem:[%s3617_s23 + $0x974] ss:$8 sps:$4 sm:$0xff]   ;;  %v3505_v25 = vld [vmem:[%s3617_s23 + $0x470] ss:$8 sps:$4 sm:$0xff]  }
  0xf4   : > { %2327 = vmatpush1.bf16.msra.mxu1 %v3415_v26  ;;  %v3508_v26 = vld [vmem:[%s3617_s23 + $0x970] ss:$8 sps:$4 sm:$0xff]  }
  0xf5   : > { %2532 = vmatpush1.bf16.msra.mxu0 %v3418_v27  ;;  %2328 = vmatprep.subr.bf16.mxu1 %v3423_v28  ;;  %v3513_v27 = vld [vmem:[%s3617_s23 + $0x484] ss:$8 sps:$4 sm:$0xff]   ;;  %v647_v28 = vcombine.high %v3967_v43, %v3967_v43 }
  0xf6   : > { %2533 = vmatprep.subr.bf16.mxu0 %v3426_v10  ;;  %v3511_v10 = vld [vmem:[%s3617_s23 + $0x480] ss:$8 sps:$4 sm:$0xff]  }
  0xf8   : > { %2329 = vmatpush1.bf16.msra.mxu1 %v3421_v30  ;;  %v3516_v30 = vld [vmem:[%s3617_s23 + $0x494] ss:$8 sps:$4 sm:$0xff]  }
  0xf9   : > { %2534 = vmatpush1.bf16.msra.mxu0 %v3424_v31  ;;  %2330 = vmatprep.subr.bf16.mxu1 %v3429_v32  ;;  %v3514_v31 = vld [vmem:[%s3617_s23 + $0x490] ss:$8 sps:$4 sm:$0xff]   ;;  %v3519_v32 = vld [vmem:[%s3617_s23 + $0x4a4] ss:$8 sps:$4 sm:$0xff]  }
  0xfa   : > { %2535 = vmatprep.subr.bf16.mxu0 %v3432_v34  ;;  %v3517_v34 = vld [vmem:[%s3617_s23 + $0x4a0] ss:$8 sps:$4 sm:$0xff]  }
  0xfc   : > { %2331 = vmatpush1.bf16.msra.mxu1 %v3427_v35  ;;  %v3522_v35 = vld [vmem:[%s3617_s23 + $0x4b4] ss:$8 sps:$4 sm:$0xff]  }
  0xfd   : > { %2536 = vmatpush1.bf16.msra.mxu0 %v3430_v5  ;;  %2332 = vmatprep.subr.bf16.mxu1 %v3435_v36  ;;  %v3520_v5 = vld [vmem:[%s3617_s23 + $0x4b0] ss:$8 sps:$4 sm:$0xff]   ;;  %v3525_v36 = vld [vmem:[%s3617_s23 + $0x4c4] ss:$8 sps:$4 sm:$0xff]  }
  0xfe   : > { %2537 = vmatprep.subr.bf16.mxu0 %v3438_v19  ;;  %v3523_v19 = vld [vmem:[%s3617_s23 + $0x4c0] ss:$8 sps:$4 sm:$0xff]  }
 0x100   : > { %2333 = vmatpush1.bf16.msra.mxu1 %v3433_v37  ;;  %v3528_v37 = vld [vmem:[%s3617_s23 + $0x4d4] ss:$8 sps:$4 sm:$0xff]  }
 0x101   : > { %2538 = vmatpush1.bf16.msra.mxu0 %v3436_v38  ;;  %2334 = vmatprep.subr.bf16.mxu1 %v3441_v39  ;;  %v3526_v38 = vld [vmem:[%s3617_s23 + $0x4d0] ss:$8 sps:$4 sm:$0xff]   ;;  %v3531_v39 = vld [vmem:[%s3617_s23 + $0x4e4] ss:$8 sps:$4 sm:$0xff]  }
 0x102   : > { %2539 = vmatprep.subr.bf16.mxu0 %v3444_v41  ;;  %v3529_v41 = vld [vmem:[%s3617_s23 + $0x4e0] ss:$8 sps:$4 sm:$0xff]  }
 0x104   : > { %2335 = vmatpush1.bf16.msra.mxu1 %v3439_v42  ;;  %v3534_v42 = vld [vmem:[%s3617_s23 + $0x4f4] ss:$8 sps:$4 sm:$0xff]  }
 0x105   : > { %2540 = vmatpush1.bf16.msra.mxu0 %v3442_v29  ;;  %2336 = vmatprep.subr.bf16.mxu1 %v3447_v44  ;;  %v3532_v29 = vld [vmem:[%s3617_s23 + $0x4f0] ss:$8 sps:$4 sm:$0xff]  }
 0x106   : > { %2541 = vmatprep.subr.bf16.mxu0 %v3450_v45 }
 0x108   : > { %2337 = vmatpush1.bf16.msra.mxu1 %v3445_v46 }
 0x109   : > { %2542 = vmatpush1.bf16.msra.mxu0 %v3448_v33  ;;  %2338 = vmatprep.subr.bf16.mxu1 %v3453_v47 }
 0x10a   : > { %2543 = vmatprep.subr.bf16.mxu0 %v3456_v49 }
 0x10c   : > { %2339 = vmatpush1.bf16.msra.mxu1 %v3451_v50 }
 0x10d   : > { %2544 = vmatpush1.bf16.msra.mxu0 %v3454_v51  ;;  %2340 = vmatprep.subr.bf16.mxu1 %v3459_v52 }
 0x10e   : > { %2545 = vmatprep.subr.bf16.mxu0 %v3462_v53 }
 0x110   : > { %2341 = vmatpush1.bf16.msra.mxu1 %v3457_v9 }
 0x111   : > { %2546 = vmatpush1.bf16.msra.mxu0 %v3460_v40  ;;  %2351 = vmatprep.subr.bf16.mxu1 %v3465_v54 }
 0x112   : > { %2556 = vmatprep.subr.bf16.mxu0 %v3468_v55 }
 0x113   : > { %2343 = vmatmul.mubr.bf16.vlgmr.msra.gmra.mrb[0].mxu1 %v573_v56 }
 0x114   : > { %2548 = vmatmul.mubr.bf16.vlgmr.msra.gmra.mrb[0].mxu0 %v3967_v43  ;;  %2352 = vmatpush1.bf16.msra.mxu1 %v3463_v57 }
 0x115   : > { %2557 = vmatpush1.bf16.msra.mxu0 %v3466_v58  ;;  %2353 = vmatprep.subr.bf16.mxu1 %v3471_v59 }
 0x116   : > { %2558 = vmatprep.subr.bf16.mxu0 %v3474_v60  ;;  %2588 = vmatprep.mubr.bf16.mxu0 %v3560_v15  ;;  %v3484_v15 = vld [vmem:[%s3617_s23 + $0x930] ss:$8 sps:$4 sm:$0xff]  }
 0x117   : > { %2383 = vmatprep.mubr.bf16.mxu1 %v3642_v20  ;;  %v3489_v20 = vld [vmem:[%s3617_s23 + $0x444] ss:$8 sps:$4 sm:$0xff]  }
 0x118   : > { %2354 = vmatpush1.bf16.msra.mxu1 %v3469_v7 }
 0x119   : > { %2559 = vmatpush1.bf16.msra.mxu0 %v3472_v21  ;;  %2355 = vmatprep.subr.bf16.mxu1 %v3477_v48 }
 0x11a   : > { %2560 = vmatprep.subr.bf16.mxu0 %v3480_v61 }
 0x11c   : > { %2356 = vmatpush1.bf16.msra.mxu1 %v3475_v62 }
 0x11d   : > { %2561 = vmatpush1.bf16.msra.mxu0 %v3478_v63  ;;  %2357 = vmatprep.subr.bf16.mxu1 %v3483_v0 }
 0x11e   : > { %2562 = vmatprep.subr.bf16.mxu0 %v3486_v1 }
 0x120   : > { %2358 = vmatpush1.bf16.msra.mxu1 %v3481_v2 }
 0x121   : > { %2563 = vmatpush1.bf16.msra.mxu0 %v3484_v15  ;;  %2359 = vmatprep.subr.bf16.mxu1 %v3489_v20 }
 0x122   : > { %2564 = vmatprep.subr.bf16.mxu0 %v3492_v3 }
 0x124   : > { %2360 = vmatpush1.bf16.msra.mxu1 %v3487_v4 }
 0x125   : > { %2565 = vmatpush1.bf16.msra.mxu0 %v3490_v8  ;;  %2361 = vmatprep.subr.bf16.mxu1 %v3495_v11 }
 0x126   : > { %2566 = vmatprep.subr.bf16.mxu0 %v3498_v12 }
 0x128   : > { %2362 = vmatpush1.bf16.msra.mxu1 %v3493_v13 }
 0x129   : > { %2567 = vmatpush1.bf16.msra.mxu0 %v3496_v14  ;;  %2363 = vmatprep.subr.bf16.mxu1 %v3501_v16  ;;  %v522_v47 = vpop.permute.xlu0 %521 }
 0x12a   : > { %2568 = vmatprep.subr.bf16.mxu0 %v3504_v17 }
 0x12c   : > { %2364 = vmatpush1.bf16.msra.mxu1 %v3499_v18 }
 0x12d   : > { %2569 = vmatpush1.bf16.msra.mxu0 %v3502_v22  ;;  %2365 = vmatprep.subr.bf16.mxu1 %v3507_v23 }
 0x12e   : > { %2570 = vmatprep.subr.bf16.mxu0 %v3510_v24 }
 0x130   : > { %2366 = vmatpush1.bf16.msra.mxu1 %v3505_v25 }
 0x131   : > { %2571 = vmatpush1.bf16.msra.mxu0 %v3508_v26  ;;  %2367 = vmatprep.subr.bf16.mxu1 %v3513_v27 }
 0x134   : > { %2589 = vmatmul.mubr.bf16.vlgmr.msra.gmra.mrb[0].mxu0 %v647_v28  ;;  %2368 = vmatpush1.bf16.msra.mxu1 %v3511_v10 }
 0x135   : > { %2369 = vmatprep.subr.bf16.mxu1 %v3516_v30 }
 0x138   : > { %2370 = vmatpush1.bf16.msra.mxu1 %v3514_v31 }
 0x139   : > { %2371 = vmatprep.subr.bf16.mxu1 %v3519_v32 }
 0x13c   : > { %2372 = vmatpush1.bf16.msra.mxu1 %v3517_v34 }
 0x13d   : > { %2373 = vmatprep.subr.bf16.mxu1 %v3522_v35 }
 0x140   : > { %2374 = vmatpush1.bf16.msra.mxu1 %v3520_v5 }
 0x141   : > { %2375 = vmatprep.subr.bf16.mxu1 %v3525_v36 }
 0x144   : > { %2376 = vmatpush1.bf16.msra.mxu1 %v3523_v19 }
 0x145   : > { %2377 = vmatprep.subr.bf16.mxu1 %v3528_v37 }
 0x148   : > { %2378 = vmatpush1.bf16.msra.mxu1 %v3526_v38 }
 0x149   : > { %2379 = vmatprep.subr.bf16.mxu1 %v3531_v39 }
 0x14c   : > { %2380 = vmatpush1.bf16.msra.mxu1 %v3529_v41 }
 0x14d   : > { %2381 = vmatprep.subr.bf16.mxu1 %v3534_v42 }
 0x150   : > { %2382 = vmatpush1.bf16.msra.mxu1 %v3532_v29 }
 0x153   : > { %2384 = vmatmul.mubr.bf16.vlgmr.msra.gmra.mrb[0].mxu1 %v3711_v6 }
 0x207   : > { %v2590_v44 = vpop.f32.mrb[0].mxu0 }
 0x208   : > { %v2592_v45 = vpop.f32.mrb[1].mxu0 }
 0x209   : > { %v2594_v46 = vpop.f32.mrb[2].mxu0 }
 0x20a   : > { %v2595_v33 = vpop.f32.mrb[3].mxu0 }
 0x226   : > { %v2385_v49 = vpop.f32.mrb[0].mxu1 }
 0x227   : > { %v3013_v50 = vadd.f32 %v2385_v49, %v522_v47  ;;  %v2387_v51 = vpop.f32.mrb[1].mxu1 }
 0x228   : > { %v3015_v52 = vadd.f32 %v2387_v51, %v522_v47  ;;  %v2389_v53 = vpop.f32.mrb[2].mxu1 }
 0x229   : > { %v3014_v9 = vadd.f32 %v3013_v50, %v2590_v44  ;;  %v2390_v40 = vpop.f32.mrb[3].mxu1 }
 0x22a   : > { %v3016_v54 = vadd.f32 %v3015_v52, %v2592_v45 }
 0x22c   : > { %v2599_v55 = vcombine.low %v3014_v9, %v3016_v54 }
 0x22e   : > { %3009 = vst.sshfl [vmem:[%s208_s4] sm:$0x33 pattern:$0x76325410] %v2599_v55 }
 0x22f PF: > { %s13_s14 = sadd.s32 1, %s3557_s14   ;;  %s4038_s12 = smov %s3553_s13 }
 0x230   : > { %p10_p5 = scmp.ge.s32.totalorder %s13_s14, 4   ;;  %s4039_s13 = smov %s4041_s15 }
 0x232   :  { %12 = sbr.rel (!%p10_p5) target bundleno = 2 (0x2), region = 62 }

</bundles_post_ra>
